<compile_context>
chip_gen: v7x
topology: tpu7x:2x2x1
jax: 0.10.0
libtpu: 0.0.40
codegen_flags: <defaults>
</compile_context>

<pallas_src>
import math
import functools

import jax
import jax.numpy as jnp
from jax.experimental import pallas as pl
from jax.experimental.pallas import tpu as pltpu


# ----------------------------------------------------------------------------
# Kernel 1: tiled matmul  y = x @ W_eff   (LoRA already folded into W_eff)
# ----------------------------------------------------------------------------
def _matmul_kernel(x_ref, w_ref, o_ref, acc_ref):
    @pl.when(pl.program_id(2) == 0)
    def _init():
        acc_ref[...] = jnp.zeros_like(acc_ref[...])

    acc_ref[...] += jnp.dot(x_ref[...], w_ref[...],
                            preferred_element_type=jnp.float32)

    @pl.when(pl.program_id(2) == pl.num_programs(2) - 1)
    def _store():
        o_ref[...] = acc_ref[...].astype(o_ref.dtype)


def _pick_tile(dim, candidates):
    for c in candidates:
        if c <= dim and dim % c == 0:
            return c
    return dim  # a full-extent block is always legal


def linear_pallas(x2d, w_eff, *, tile_m=None, tile_n=None, tile_k=None):
    """y = x2d @ w_eff with x2d: (M, K), w_eff: (K, N) (no transpose in-kernel)."""
    M, K = x2d.shape
    Kw, N = w_eff.shape
    assert K == Kw
    tm = tile_m or _pick_tile(M, (512, 256, 128))
    tn = tile_n or _pick_tile(N, (256, 128))
    tk = tile_k or _pick_tile(K, (512, 256, 128))
    grid = (M // tm, N // tn, K // tk)

    # VMEM budget: double-buffered in/out tiles + f32 accumulator, with headroom,
    # capped comfortably under v7x's 64 MiB physical VMEM.
    tile_bytes = 4 * (2 * tm * tk + 2 * tk * tn + 2 * tm * tn + tm * tn)
    vmem_limit = int(min(48 * 1024 * 1024, max(16 * 1024 * 1024, 4 * tile_bytes)))

    return pl.pallas_call(
        _matmul_kernel,
        out_shape=jax.ShapeDtypeStruct((M, N), x2d.dtype),
        grid_spec=pltpu.PrefetchScalarGridSpec(
            num_scalar_prefetch=0,
            grid=grid,
            in_specs=[
                pl.BlockSpec((tm, tk), lambda i, j, k: (i, k)),
                pl.BlockSpec((tk, tn), lambda i, j, k: (k, j)),
            ],
            out_specs=pl.BlockSpec((tm, tn), lambda i, j, k: (i, j)),
            scratch_shapes=[pltpu.VMEM((tm, tn), jnp.float32)],
        ),
        compiler_params=pltpu.CompilerParams(
            dimension_semantics=("parallel", "parallel", "arbitrary"),
            vmem_limit_bytes=vmem_limit,
        ),
    )(x2d, w_eff)


# ----------------------------------------------------------------------------
# Kernel 2: causal flash attention, fed directly from the fused qkv projection.
# qkv3 layout: (B, S, 3*d_model) where last dim = [q | k | v], each d_model wide
# and internally [head0 | head1 | ...] (head_dim each) -- same as the reference
# reshape (B, S, 3, H, hd).
# Output: (B, S, d_model) in concatenated-head order (lane-dense writeback).
# ----------------------------------------------------------------------------
def _flash_attn_kernel(q_ref, k_ref, v_ref, o_ref, m_scr, l_scr, acc_scr, *,
                       n_heads, head_dim, scale, block_q, block_k):
    qi = pl.program_id(1)
    ki = pl.program_id(2)

    @pl.when(ki == 0)
    def _init():
        m_scr[...] = jnp.full_like(m_scr[...], -jnp.inf)
        l_scr[...] = jnp.zeros_like(l_scr[...])
        acc_scr[...] = jnp.zeros_like(acc_scr[...])

    @pl.when(ki <= qi)  # causal early-exit: kv blocks above the diagonal skipped
    def _compute():
        # global-position causal mask for this (q-block, kv-block) pair
        row = qi * block_q + jax.lax.broadcasted_iota(
            jnp.int32, (block_q, block_k), 0)
        col = ki * block_k + jax.lax.broadcasted_iota(
            jnp.int32, (block_q, block_k), 1)
        causal = row >= col

        for h in range(n_heads):
            lo = h * head_dim
            q_h = q_ref[0, :, lo:lo + head_dim].astype(jnp.bfloat16)
            k_h = k_ref[0, :, lo:lo + head_dim].astype(jnp.bfloat16)
            v_h = v_ref[0, :, lo:lo + head_dim].astype(jnp.bfloat16)

            # contract q/k on their shared last (head_dim) axis -- no k.T relayout
            s = jax.lax.dot_general(
                q_h, k_h, (((1,), (1,)), ((), ())),
                preferred_element_type=jnp.float32) * scale
            s = jnp.where(causal, s, -jnp.inf)

            m_prev = m_scr[h]                                   # (block_q, 1)
            m_new = jnp.maximum(m_prev, jnp.max(s, axis=-1, keepdims=True))
            a = jnp.exp(m_prev - m_new)
            p = jnp.exp(s - m_new)                              # f32 softmax math
            l_scr[h] = a * l_scr[h] + jnp.sum(p, axis=-1, keepdims=True)
            acc_scr[h] = a * acc_scr[h] + jax.lax.dot_general(
                p.astype(jnp.bfloat16), v_h, (((1,), (0,)), ((), ())),
                preferred_element_type=jnp.float32)
            m_scr[h] = m_new

    @pl.when(ki == qi)  # last contributing kv block for this q block
    def _finalize():
        for h in range(n_heads):
            inv_l = pl.reciprocal(l_scr[h], approx=True)        # EUP vrcp
            o_ref[0, :, h * head_dim:(h + 1) * head_dim] = \
                (acc_scr[h] * inv_l).astype(o_ref.dtype)


def flash_attention_fused(qkv3, *, n_heads, head_dim, scale, block=128):
    B, S, three_d = qkv3.shape
    d_model = n_heads * head_dim
    assert three_d == 3 * d_model
    blk = min(block, S)
    assert S % blk == 0
    n_blk = S // blk

    q_spec = pl.BlockSpec((1, blk, d_model), lambda b, qi, ki: (b, qi, 0))
    k_spec = pl.BlockSpec((1, blk, d_model), lambda b, qi, ki: (b, ki, 1))
    v_spec = pl.BlockSpec((1, blk, d_model), lambda b, qi, ki: (b, ki, 2))
    o_spec = pl.BlockSpec((1, blk, d_model), lambda b, qi, ki: (b, qi, 0))

    kernel = functools.partial(_flash_attn_kernel, n_heads=n_heads,
                               head_dim=head_dim, scale=scale,
                               block_q=blk, block_k=blk)
    return pl.pallas_call(
        kernel,
        out_shape=jax.ShapeDtypeStruct((B, S, d_model), qkv3.dtype),
        grid_spec=pltpu.PrefetchScalarGridSpec(
            num_scalar_prefetch=0,
            grid=(B, n_blk, n_blk),
            in_specs=[q_spec, k_spec, v_spec],
            out_specs=o_spec,
            scratch_shapes=[
                pltpu.VMEM((n_heads, blk, 1), jnp.float32),         # running max
                pltpu.VMEM((n_heads, blk, 1), jnp.float32),         # running sum
                pltpu.VMEM((n_heads, blk, head_dim), jnp.float32),  # acc
            ],
        ),
        compiler_params=pltpu.CompilerParams(
            dimension_semantics=("parallel", "parallel", "arbitrary"),
        ),
    )(qkv3, qkv3, qkv3)


# ----------------------------------------------------------------------------
# SelfAttention module (parameter init + forward glue)
# ----------------------------------------------------------------------------
def init_self_attention_params(key, d_model, n_heads, lora_rank=32):
    k1, k2, k3, k4 = jax.random.split(key, 4)
    bound = 1.0 / math.sqrt(d_model)
    return {
        "qkv_w": jax.random.uniform(k1, (3 * d_model, d_model), jnp.float32,
                                    -bound, bound),
        "qkv_A": jax.random.normal(k2, (d_model, lora_rank), jnp.float32),
        "qkv_B": jnp.zeros((lora_rank, 3 * d_model), jnp.float32),
        "out_w": jax.random.uniform(k3, (d_model, d_model), jnp.float32,
                                    -bound, bound),
        "out_A": jax.random.normal(k4, (d_model, lora_rank), jnp.float32),
        "out_B": jnp.zeros((lora_rank, d_model), jnp.float32),
    }


def self_attention_forward(params, x, causal_mask, alibi_bias, *, n_heads,
                           alpha=1.0):
    # causal_mask / alibi_bias are accepted but unused, matching the reference
    # forward (it only uses flash_attn's internal causal mask).
    B, S, d_model = x.shape
    head_dim = d_model // n_heads
    scale = 1.0 / math.sqrt(head_dim)

    # Fold LoRA into base weights (inference): W_eff = W^T + alpha * (A @ B).
    qkv_w_eff = params["qkv_w"].T + alpha * (params["qkv_A"] @ params["qkv_B"])
    out_w_eff = params["out_w"].T + alpha * (params["out_A"] @ params["out_B"])

    x2d = x.reshape(B * S, d_model)
    qkv = linear_pallas(x2d, qkv_w_eff)            # (B*S, 3*d_model)
    qkv = qkv.reshape(B, S, 3 * d_model)           # free reshape, no transpose

    # Attention reads q/k/v slices straight out of the qkv tensor via BlockSpec
    # index maps and writes the concatenated-head (B, S, d_model) layout.
    attn = flash_attention_fused(qkv, n_heads=n_heads, head_dim=head_dim,
                                 scale=scale)

    out = linear_pallas(attn.reshape(B * S, d_model), out_w_eff)
    # TODO(synk): training-mode dropout (attn/resid) not implemented (eval: identity).
    return out.reshape(B, S, d_model)


# ----------------------------------------------------------------------------
# Pure-JAX reference (un-folded LoRA, f32 attention) for validation.
# ----------------------------------------------------------------------------
def _reference_forward(params, x, *, n_heads, alpha=1.0):
    B, S, d_model = x.shape
    hd = d_model // n_heads

    def lora(x2, w, a, b):
        return x2 @ w.T + alpha * ((x2 @ a) @ b)

    qkv = lora(x.reshape(B * S, d_model),
               params["qkv_w"], params["qkv_A"], params["qkv_B"])
    qkv = qkv.reshape(B, S, 3, n_heads, hd).transpose(2, 0, 3, 1, 4)
    q, k, v = qkv[0], qkv[1], qkv[2]                      # (B, H, S, hd)
    s = jnp.einsum("bhqd,bhkd->bhqk", q, k) / math.sqrt(hd)
    mask = jnp.tril(jnp.ones((S, S), bool))
    s = jnp.where(mask, s, -jnp.inf)
    p = jax.nn.softmax(s, axis=-1)
    o = jnp.einsum("bhqk,bhkd->bhqd", p, v)
    o = o.transpose(0, 2, 1, 3).reshape(B * S, d_model)
    out = lora(o, params["out_w"], params["out_A"], params["out_B"])
    return out.reshape(B, S, d_model)


if __name__ == "__main__":
    B, S, d_model, n_heads, lora_rank = 2, 256, 128, 4, 32

    key = jax.random.PRNGKey(0)
    k_param, k_x, k_b1, k_b2 = jax.random.split(key, 4)
    params = init_self_attention_params(k_param, d_model, n_heads, lora_rank)
    # Small non-zero LoRA B matrices so the LoRA fold is actually exercised.
    params["qkv_B"] = 0.01 * jax.random.normal(k_b1, (lora_rank, 3 * d_model),
                                               jnp.float32)
    params["out_B"] = 0.01 * jax.random.normal(k_b2, (lora_rank, d_model),
                                               jnp.float32)

    x = jax.random.normal(k_x, (B, S, d_model), jnp.float32)
    causal_mask = jnp.tril(jnp.ones((S, S), jnp.bool_))     # unused (reference ignores it)
    alibi_bias = jnp.zeros((n_heads, S, S), jnp.float32)    # unused (reference ignores it)

    fwd = jax.jit(functools.partial(self_attention_forward, n_heads=n_heads))
    out = fwd(params, x, causal_mask, alibi_bias)
    jax.block_until_ready(out)
    assert out.shape == (B, S, d_model)

    # Validate against the pure-JAX reference (kernel uses bf16 attention
    # operands like the reference's autocast, hence the loose tolerance).
    ref = _reference_forward(params, x, n_heads=n_heads)
    max_err = float(jnp.max(jnp.abs(out - ref)))
    assert max_err < 5e-2, f"max abs err {max_err}"
    print("KERNEL_OK")
</pallas_src>

<mosaic_0001>
module attributes {stable_mosaic.version = 11 : i64} {
  func.func @_matmul_kernel(%arg0: i32, %arg1: i32, %arg2: i32, %arg3: memref<512x128xf32, #tpu.memory_space<vmem>>, %arg4: memref<128x128xf32, #tpu.memory_space<vmem>>, %arg5: memref<512x128xf32, #tpu.memory_space<vmem>>, %arg6: memref<512x128xf32, #tpu.memory_space<vmem>>) attributes {dimension_semantics = [#tpu.dimension_semantics<parallel>, #tpu.dimension_semantics<parallel>, #tpu.dimension_semantics<arbitrary>], iteration_bounds = array<i64: 1, 3, 1>, scalar_prefetch = 0 : i64, scratch_operands = 1 : i64, tpu.core_type = #tpu.core_type<tc>, window_params = [{transform_indices = @transform_0, window_bounds = array<i64: 512, 128>}, {transform_indices = @transform_1, window_bounds = array<i64: 128, 128>}, {transform_indices = @transform_2, window_bounds = array<i64: 512, 128>}]} {
    %c0_i32 = arith.constant 0 : i32
    %0 = arith.cmpi eq, %arg2, %c0_i32 : i32
    %1 = arith.extui %0 : i1 to i32
    %c0_i32_0 = arith.constant 0 : i32
    %2 = arith.cmpi ne, %1, %c0_i32_0 : i32
    scf.if %2 {
      %cst_10 = arith.constant 0.000000e+00 : f32
      %12 = vector.broadcast %cst_10 : f32 to vector<512x128xf32>
      %c0_11 = arith.constant 0 : index
      %c0_12 = arith.constant 0 : index
      %13 = vector.load %arg6[%c0_11, %c0_12] : memref<512x128xf32, #tpu.memory_space<vmem>>, vector<512x128xf32>
      tpu.vector_store %arg6[%c0_11, %c0_12], %12 {strides = array<i32>} : memref<512x128xf32, #tpu.memory_space<vmem>>, vector<512x128xf32>,
    } else {
    }
    %c0 = arith.constant 0 : index
    %c0_1 = arith.constant 0 : index
    %3 = vector.load %arg6[%c0, %c0_1] : memref<512x128xf32, #tpu.memory_space<vmem>>, vector<512x128xf32>
    %c0_2 = arith.constant 0 : index
    %c0_3 = arith.constant 0 : index
    %4 = vector.load %arg3[%c0_2, %c0_3] : memref<512x128xf32, #tpu.memory_space<vmem>>, vector<512x128xf32>
    %c0_4 = arith.constant 0 : index
    %c0_5 = arith.constant 0 : index
    %5 = vector.load %arg4[%c0_4, %c0_5] : memref<128x128xf32, #tpu.memory_space<vmem>>, vector<128x128xf32>
    %cst = arith.constant dense<0.000000e+00> : vector<512x128xf32>
    %6 = tpu.matmul %4, %5, %cst {dimension_numbers = #tpu.dot_dimension_numbers<[1], [0], [0], [1], [0, 0, 1, 1], [], []>} : vector<512x128xf32>, vector<128x128xf32>, vector<512x128xf32> -> vector<512x128xf32>
    %7 = arith.addf %3, %6 : vector<512x128xf32>
    %c0_6 = arith.constant 0 : index
    %c0_7 = arith.constant 0 : index
    %8 = vector.load %arg6[%c0_6, %c0_7] : memref<512x128xf32, #tpu.memory_space<vmem>>, vector<512x128xf32>
    tpu.vector_store %arg6[%c0_6, %c0_7], %7 {strides = array<i32>} : memref<512x128xf32, #tpu.memory_space<vmem>>, vector<512x128xf32>,
    %c0_i32_8 = arith.constant 0 : i32
    %9 = arith.cmpi eq, %arg2, %c0_i32_8 : i32
    %10 = arith.extui %9 : i1 to i32
    %c0_i32_9 = arith.constant 0 : i32
    %11 = arith.cmpi ne, %10, %c0_i32_9 : i32
    scf.if %11 {
      %c0_10 = arith.constant 0 : index
      %c0_11 = arith.constant 0 : index
      %12 = vector.load %arg6[%c0_10, %c0_11] : memref<512x128xf32, #tpu.memory_space<vmem>>, vector<512x128xf32>
      %c0_12 = arith.constant 0 : index
      %c0_13 = arith.constant 0 : index
      %13 = vector.load %arg5[%c0_12, %c0_13] : memref<512x128xf32, #tpu.memory_space<vmem>>, vector<512x128xf32>
      tpu.vector_store %arg5[%c0_12, %c0_13], %12 {strides = array<i32>} : memref<512x128xf32, #tpu.memory_space<vmem>>, vector<512x128xf32>,
    } else {
    }
    return
  }
  func.func @transform_0(%arg0: i32, %arg1: i32, %arg2: i32) -> (i32, i32) {
    %c0_i32 = arith.constant 0 : i32
    return %arg0, %arg2 : i32, i32
  }
  func.func @transform_1(%arg0: i32, %arg1: i32, %arg2: i32) -> (i32, i32) {
    %c0_i32 = arith.constant 0 : i32
    return %arg2, %arg1 : i32, i32
  }
  func.func @transform_2(%arg0: i32, %arg1: i32, %arg2: i32) -> (i32, i32) {
    %c0_i32 = arith.constant 0 : i32
    return %arg0, %arg1 : i32, i32
  }
}

module attributes {stable_mosaic.version = 11 : i64} {
  func.func @_flash_attn_kernel(%arg0: i32, %arg1: i32, %arg2: i32, %arg3: memref<1x128x128xf32, #tpu.memory_space<vmem>>, %arg4: memref<1x128x128xf32, #tpu.memory_space<vmem>>, %arg5: memref<1x128x128xf32, #tpu.memory_space<vmem>>, %arg6: memref<1x128x128xf32, #tpu.memory_space<vmem>>, %arg7: memref<4x128x1xf32, #tpu.memory_space<vmem>>, %arg8: memref<4x128x1xf32, #tpu.memory_space<vmem>>, %arg9: memref<4x128x32xf32, #tpu.memory_space<vmem>>) attributes {dimension_semantics = [#tpu.dimension_semantics<parallel>, #tpu.dimension_semantics<parallel>, #tpu.dimension_semantics<arbitrary>], iteration_bounds = array<i64: 2, 2, 2>, scalar_prefetch = 0 : i64, scratch_operands = 3 : i64, tpu.core_type = #tpu.core_type<tc>, window_params = [{transform_indices = @transform_0, window_bounds = array<i64: 1, 128, 128>}, {transform_indices = @transform_1, window_bounds = array<i64: 1, 128, 128>}, {transform_indices = @transform_2, window_bounds = array<i64: 1, 128, 128>}, {transform_indices = @transform_3, window_bounds = array<i64: 1, 128, 128>}]} {
    %c0_i32 = arith.constant 0 : i32
    %0 = arith.cmpi eq, %arg2, %c0_i32 : i32
    %1 = arith.extui %0 : i1 to i32
    %c0_i32_0 = arith.constant 0 : i32
    %2 = arith.cmpi ne, %1, %c0_i32_0 : i32
    scf.if %2 {
      %cst = arith.constant 0xFF800000 : f32
      %9 = vector.broadcast %cst : f32 to vector<4x128x1xf32>
      %c0 = arith.constant 0 : index
      %c0_3 = arith.constant 0 : index
      %c0_4 = arith.constant 0 : index
      %10 = vector.load %arg7[%c0, %c0_3, %c0_4] : memref<4x128x1xf32, #tpu.memory_space<vmem>>, vector<4x128x1xf32>
      tpu.vector_store %arg7[%c0, %c0_3, %c0_4], %9 {strides = array<i32>} : memref<4x128x1xf32, #tpu.memory_space<vmem>>, vector<4x128x1xf32>,
      %cst_5 = arith.constant 0.000000e+00 : f32
      %11 = vector.broadcast %cst_5 : f32 to vector<4x128x1xf32>
      %c0_6 = arith.constant 0 : index
      %c0_7 = arith.constant 0 : index
      %c0_8 = arith.constant 0 : index
      %12 = vector.load %arg8[%c0_6, %c0_7, %c0_8] : memref<4x128x1xf32, #tpu.memory_space<vmem>>, vector<4x128x1xf32>
      tpu.vector_store %arg8[%c0_6, %c0_7, %c0_8], %11 {strides = array<i32>} : memref<4x128x1xf32, #tpu.memory_space<vmem>>, vector<4x128x1xf32>,
      %cst_9 = arith.constant 0.000000e+00 : f32
      %13 = vector.broadcast %cst_9 : f32 to vector<4x128x32xf32>
      %c0_10 = arith.constant 0 : index
      %c0_11 = arith.constant 0 : index
      %c0_12 = arith.constant 0 : index
      %14 = vector.load %arg9[%c0_10, %c0_11, %c0_12] : memref<4x128x32xf32, #tpu.memory_space<vmem>>, vector<4x128x32xf32>
      tpu.vector_store %arg9[%c0_10, %c0_11, %c0_12], %13 {strides = array<i32>} : memref<4x128x32xf32, #tpu.memory_space<vmem>>, vector<4x128x32xf32>,
    } else {
    }
    %3 = arith.cmpi sle, %arg2, %arg1 : i32
    %4 = arith.extui %3 : i1 to i32
    %c0_i32_1 = arith.constant 0 : i32
    %5 = arith.cmpi ne, %4, %c0_i32_1 : i32
    scf.if %5 {
      %c128_i32 = arith.constant 128 : i32
      %9 = arith.muli %arg1, %c128_i32 : i32
      %10 = tpu.iota {dimensions = array<i32: 0>} : vector<128x128xi32>
      %11 = vector.broadcast %9 : i32 to vector<128x128xi32>
      %12 = arith.addi %11, %10 : vector<128x128xi32>
      %c128_i32_3 = arith.constant 128 : i32
      %13 = arith.muli %arg2, %c128_i32_3 : i32
      %14 = tpu.iota {dimensions = array<i32: 1>} : vector<128x128xi32>
      %15 = vector.broadcast %13 : i32 to vector<128x128xi32>
      %16 = arith.addi %15, %14 : vector<128x128xi32>
      %17 = arith.cmpi sge, %12, %16 : vector<128x128xi32>
      %c0 = arith.constant 0 : index
      %c0_4 = arith.constant 0 : index
      %c0_5 = arith.constant 0 : index
      %18 = vector.load %arg3[%c0, %c0_4, %c0_5] : memref<1x128x128xf32, #tpu.memory_space<vmem>>, vector<1x128x32xf32>
      %19 = vector.shape_cast %18 : vector<1x128x32xf32> to vector<128x32xf32>
      %20 = arith.truncf %19 : vector<128x32xf32> to vector<128x32xbf16>
      %c0_6 = arith.constant 0 : index
      %c0_7 = arith.constant 0 : index
      %c0_8 = arith.constant 0 : index
      %21 = vector.load %arg4[%c0_6, %c0_7, %c0_8] : memref<1x128x128xf32, #tpu.memory_space<vmem>>, vector<1x128x32xf32>
      %22 = vector.shape_cast %21 : vector<1x128x32xf32> to vector<128x32xf32>
      %23 = arith.truncf %22 : vector<128x32xf32> to vector<128x32xbf16>
      %c0_9 = arith.constant 0 : index
      %c0_10 = arith.constant 0 : index
      %c0_11 = arith.constant 0 : index
      %24 = vector.load %arg5[%c0_9, %c0_10, %c0_11] : memref<1x128x128xf32, #tpu.memory_space<vmem>>, vector<1x128x32xf32>
      %25 = vector.shape_cast %24 : vector<1x128x32xf32> to vector<128x32xf32>
      %26 = arith.truncf %25 : vector<128x32xf32> to vector<128x32xbf16>
      %cst = arith.constant dense<0.000000e+00> : vector<128x128xf32>
      %27 = tpu.matmul %20, %23, %cst {dimension_numbers = #tpu.dot_dimension_numbers<[1], [1], [0], [0], [0, 0, 1, 0], [], []>} : vector<128x32xbf16>, vector<128x32xbf16>, vector<128x128xf32> -> vector<128x128xf32>
      %cst_12 = arith.constant 0.176776692 : f32
      %28 = vector.broadcast %cst_12 : f32 to vector<128x128xf32>
      %29 = arith.mulf %27, %28 : vector<128x128xf32>
      %cst_13 = arith.constant 0xFF800000 : f32
      %30 = vector.broadcast %cst_13 : f32 to vector<128x128xf32>
      %31 = arith.select %17, %29, %30 : vector<128x128xi1>, vector<128x128xf32>
      %c0_14 = arith.constant 0 : index
      %c0_15 = arith.constant 0 : index
      %c0_16 = arith.constant 0 : index
      %32 = vector.load %arg7[%c0_14, %c0_15, %c0_16] : memref<4x128x1xf32, #tpu.memory_space<vmem>>, vector<1x128x1xf32>
      %33 = vector.shape_cast %32 : vector<1x128x1xf32> to vector<128x1xf32>
      %cst_17 = arith.constant dense<0xFF800000> : vector<128xf32>
      %34 = vector.multi_reduction <maximumf>, %31, %cst_17 [1] : vector<128x128xf32> to vector<128xf32>
      %35 = vector.shape_cast %34 : vector<128xf32> to vector<128x1xf32>
      %36 = arith.maximumf %33, %35 : vector<128x1xf32>
      %37 = arith.subf %33, %36 : vector<128x1xf32>
      %38 = math.exp %37 : vector<128x1xf32>
      %39 = vector.broadcast %36 : vector<128x1xf32> to vector<128x128xf32>
      %40 = arith.subf %31, %39 : vector<128x128xf32>
      %41 = math.exp %40 : vector<128x128xf32>
      %c0_18 = arith.constant 0 : index
      %c0_19 = arith.constant 0 : index
      %c0_20 = arith.constant 0 : index
      %42 = vector.load %arg8[%c0_18, %c0_19, %c0_20] : memref<4x128x1xf32, #tpu.memory_space<vmem>>, vector<1x128x1xf32>
      %43 = vector.shape_cast %42 : vector<1x128x1xf32> to vector<128x1xf32>
      %44 = arith.mulf %38, %43 : vector<128x1xf32>
      %cst_21 = arith.constant dense<0.000000e+00> : vector<128xf32>
      %45 = vector.multi_reduction <add>, %41, %cst_21 [1] : vector<128x128xf32> to vector<128xf32>
      %46 = vector.shape_cast %45 : vector<128xf32> to vector<128x1xf32>
      %47 = arith.addf %44, %46 : vector<128x1xf32>
      %c0_22 = arith.constant 0 : index
      %c0_23 = arith.constant 0 : index
      %c0_24 = arith.constant 0 : index
      %48 = vector.load %arg8[%c0_22, %c0_23, %c0_24] : memref<4x128x1xf32, #tpu.memory_space<vmem>>, vector<1x128x1xf32>
      %49 = vector.shape_cast %48 : vector<1x128x1xf32> to vector<128x1xf32>
      %50 = vector.shape_cast %47 : vector<128x1xf32> to vector<1x128x1xf32>
      tpu.vector_store %arg8[%c0_22, %c0_23, %c0_24], %50 {strides = array<i32>} : memref<4x128x1xf32, #tpu.memory_space<vmem>>, vector<1x128x1xf32>,
      %c0_25 = arith.constant 0 : index
      %c0_26 = arith.constant 0 : index
      %c0_27 = arith.constant 0 : index
      %51 = vector.load %arg9[%c0_25, %c0_26, %c0_27] : memref<4x128x32xf32, #tpu.memory_space<vmem>>, vector<1x128x32xf32>
      %52 = vector.shape_cast %51 : vector<1x128x32xf32> to vector<128x32xf32>
      %53 = vector.broadcast %38 : vector<128x1xf32> to vector<128x32xf32>
      %54 = arith.mulf %53, %52 : vector<128x32xf32>
      %55 = arith.truncf %41 : vector<128x128xf32> to vector<128x128xbf16>
      %cst_28 = arith.constant dense<0.000000e+00> : vector<128x32xf32>
      %56 = tpu.matmul %55, %26, %cst_28 {dimension_numbers = #tpu.dot_dimension_numbers<[1], [0], [0], [1], [0, 0, 1, 1], [], []>} : vector<128x128xbf16>, vector<128x32xbf16>, vector<128x32xf32> -> vector<128x32xf32>
      %57 = arith.addf %54, %56 : vector<128x32xf32>
      %c0_29 = arith.constant 0 : index
      %c0_30 = arith.constant 0 : index
      %c0_31 = arith.constant 0 : index
      %58 = vector.load %arg9[%c0_29, %c0_30, %c0_31] : memref<4x128x32xf32, #tpu.memory_space<vmem>>, vector<1x128x32xf32>
      %59 = vector.shape_cast %58 : vector<1x128x32xf32> to vector<128x32xf32>
      %60 = vector.shape_cast %57 : vector<128x32xf32> to vector<1x128x32xf32>
      tpu.vector_store %arg9[%c0_29, %c0_30, %c0_31], %60 {strides = array<i32>} : memref<4x128x32xf32, #tpu.memory_space<vmem>>, vector<1x128x32xf32>,
      %c0_32 = arith.constant 0 : index
      %c0_33 = arith.constant 0 : index
      %c0_34 = arith.constant 0 : index
      %61 = vector.load %arg7[%c0_32, %c0_33, %c0_34] : memref<4x128x1xf32, #tpu.memory_space<vmem>>, vector<1x128x1xf32>
      %62 = vector.shape_cast %61 : vector<1x128x1xf32> to vector<128x1xf32>
      %63 = vector.shape_cast %36 : vector<128x1xf32> to vector<1x128x1xf32>
      tpu.vector_store %arg7[%c0_32, %c0_33, %c0_34], %63 {strides = array<i32>} : memref<4x128x1xf32, #tpu.memory_space<vmem>>, vector<1x128x1xf32>,
      %c0_35 = arith.constant 0 : index
      %c0_36 = arith.constant 0 : index
      %c32 = arith.constant 32 : index
      %64 = vector.load %arg3[%c0_35, %c0_36, %c32] : memref<1x128x128xf32, #tpu.memory_space<vmem>>, vector<1x128x32xf32>
      %65 = vector.shape_cast %64 : vector<1x128x32xf32> to vector<128x32xf32>
      %66 = arith.truncf %65 : vector<128x32xf32> to vector<128x32xbf16>
      %c0_37 = arith.constant 0 : index
      %c0_38 = arith.constant 0 : index
      %c32_39 = arith.constant 32 : index
      %67 = vector.load %arg4[%c0_37, %c0_38, %c32_39] : memref<1x128x128xf32, #tpu.memory_space<vmem>>, vector<1x128x32xf32>
      %68 = vector.shape_cast %67 : vector<1x128x32xf32> to vector<128x32xf32>
      %69 = arith.truncf %68 : vector<128x32xf32> to vector<128x32xbf16>
      %c0_40 = arith.constant 0 : index
      %c0_41 = arith.constant 0 : index
      %c32_42 = arith.constant 32 : index
      %70 = vector.load %arg5[%c0_40, %c0_41, %c32_42] : memref<1x128x128xf32, #tpu.memory_space<vmem>>, vector<1x128x32xf32>
      %71 = vector.shape_cast %70 : vector<1x128x32xf32> to vector<128x32xf32>
      %72 = arith.truncf %71 : vector<128x32xf32> to vector<128x32xbf16>
      %cst_43 = arith.constant dense<0.000000e+00> : vector<128x128xf32>
      %73 = tpu.matmul %66, %69, %cst_43 {dimension_numbers = #tpu.dot_dimension_numbers<[1], [1], [0], [0], [0, 0, 1, 0], [], []>} : vector<128x32xbf16>, vector<128x32xbf16>, vector<128x128xf32> -> vector<128x128xf32>
      %cst_44 = arith.constant 0.176776692 : f32
      %74 = vector.broadcast %cst_44 : f32 to vector<128x128xf32>
      %75 = arith.mulf %73, %74 : vector<128x128xf32>
      %cst_45 = arith.constant 0xFF800000 : f32
      %76 = vector.broadcast %cst_45 : f32 to vector<128x128xf32>
      %77 = arith.select %17, %75, %76 : vector<128x128xi1>, vector<128x128xf32>
      %c1 = arith.constant 1 : index
      %c0_46 = arith.constant 0 : index
      %c0_47 = arith.constant 0 : index
      %78 = vector.load %arg7[%c1, %c0_46, %c0_47] : memref<4x128x1xf32, #tpu.memory_space<vmem>>, vector<1x128x1xf32>
      %79 = vector.shape_cast %78 : vector<1x128x1xf32> to vector<128x1xf32>
      %cst_48 = arith.constant dense<0xFF800000> : vector<128xf32>
      %80 = vector.multi_reduction <maximumf>, %77, %cst_48 [1] : vector<128x128xf32> to vector<128xf32>
      %81 = vector.shape_cast %80 : vector<128xf32> to vector<128x1xf32>
      %82 = arith.maximumf %79, %81 : vector<128x1xf32>
      %83 = arith.subf %79, %82 : vector<128x1xf32>
      %84 = math.exp %83 : vector<128x1xf32>
      %85 = vector.broadcast %82 : vector<128x1xf32> to vector<128x128xf32>
      %86 = arith.subf %77, %85 : vector<128x128xf32>
      %87 = math.exp %86 : vector<128x128xf32>
      %c1_49 = arith.constant 1 : index
      %c0_50 = arith.constant 0 : index
      %c0_51 = arith.constant 0 : index
      %88 = vector.load %arg8[%c1_49, %c0_50, %c0_51] : memref<4x128x1xf32, #tpu.memory_space<vmem>>, vector<1x128x1xf32>
      %89 = vector.shape_cast %88 : vector<1x128x1xf32> to vector<128x1xf32>
      %90 = arith.mulf %84, %89 : vector<128x1xf32>
      %cst_52 = arith.constant dense<0.000000e+00> : vector<128xf32>
      %91 = vector.multi_reduction <add>, %87, %cst_52 [1] : vector<128x128xf32> to vector<128xf32>
      %92 = vector.shape_cast %91 : vector<128xf32> to vector<128x1xf32>
      %93 = arith.addf %90, %92 : vector<128x1xf32>
      %c1_53 = arith.constant 1 : index
      %c0_54 = arith.constant 0 : index
      %c0_55 = arith.constant 0 : index
      %94 = vector.load %arg8[%c1_53, %c0_54, %c0_55] : memref<4x128x1xf32, #tpu.memory_space<vmem>>, vector<1x128x1xf32>
      %95 = vector.shape_cast %94 : vector<1x128x1xf32> to vector<128x1xf32>
      %96 = vector.shape_cast %93 : vector<128x1xf32> to vector<1x128x1xf32>
      tpu.vector_store %arg8[%c1_53, %c0_54, %c0_55], %96 {strides = array<i32>} : memref<4x128x1xf32, #tpu.memory_space<vmem>>, vector<1x128x1xf32>,
      %c1_56 = arith.constant 1 : index
      %c0_57 = arith.constant 0 : index
      %c0_58 = arith.constant 0 : index
      %97 = vector.load %arg9[%c1_56, %c0_57, %c0_58] : memref<4x128x32xf32, #tpu.memory_space<vmem>>, vector<1x128x32xf32>
      %98 = vector.shape_cast %97 : vector<1x128x32xf32> to vector<128x32xf32>
      %99 = vector.broadcast %84 : vector<128x1xf32> to vector<128x32xf32>
      %100 = arith.mulf %99, %98 : vector<128x32xf32>
      %101 = arith.truncf %87 : vector<128x128xf32> to vector<128x128xbf16>
      %cst_59 = arith.constant dense<0.000000e+00> : vector<128x32xf32>
      %102 = tpu.matmul %101, %72, %cst_59 {dimension_numbers = #tpu.dot_dimension_numbers<[1], [0], [0], [1], [0, 0, 1, 1], [], []>} : vector<128x128xbf16>, vector<128x32xbf16>, vector<128x32xf32> -> vector<128x32xf32>
      %103 = arith.addf %100, %102 : vector<128x32xf32>
      %c1_60 = arith.constant 1 : index
      %c0_61 = arith.constant 0 : index
      %c0_62 = arith.constant 0 : index
      %104 = vector.load %arg9[%c1_60, %c0_61, %c0_62] : memref<4x128x32xf32, #tpu.memory_space<vmem>>, vector<1x128x32xf32>
      %105 = vector.shape_cast %104 : vector<1x128x32xf32> to vector<128x32xf32>
      %106 = vector.shape_cast %103 : vector<128x32xf32> to vector<1x128x32xf32>
      tpu.vector_store %arg9[%c1_60, %c0_61, %c0_62], %106 {strides = array<i32>} : memref<4x128x32xf32, #tpu.memory_space<vmem>>, vector<1x128x32xf32>,
      %c1_63 = arith.constant 1 : index
      %c0_64 = arith.constant 0 : index
      %c0_65 = arith.constant 0 : index
      %107 = vector.load %arg7[%c1_63, %c0_64, %c0_65] : memref<4x128x1xf32, #tpu.memory_space<vmem>>, vector<1x128x1xf32>
      %108 = vector.shape_cast %107 : vector<1x128x1xf32> to vector<128x1xf32>
      %109 = vector.shape_cast %82 : vector<128x1xf32> to vector<1x128x1xf32>
      tpu.vector_store %arg7[%c1_63, %c0_64, %c0_65], %109 {strides = array<i32>} : memref<4x128x1xf32, #tpu.memory_space<vmem>>, vector<1x128x1xf32>,
      %c0_66 = arith.constant 0 : index
      %c0_67 = arith.constant 0 : index
      %c64 = arith.constant 64 : index
      %110 = vector.load %arg3[%c0_66, %c0_67, %c64] : memref<1x128x128xf32, #tpu.memory_space<vmem>>, vector<1x128x32xf32>
      %111 = vector.shape_cast %110 : vector<1x128x32xf32> to vector<128x32xf32>
      %112 = arith.truncf %111 : vector<128x32xf32> to vector<128x32xbf16>
      %c0_68 = arith.constant 0 : index
      %c0_69 = arith.constant 0 : index
      %c64_70 = arith.constant 64 : index
      %113 = vector.load %arg4[%c0_68, %c0_69, %c64_70] : memref<1x128x128xf32, #tpu.memory_space<vmem>>, vector<1x128x32xf32>
      %114 = vector.shape_cast %113 : vector<1x128x32xf32> to vector<128x32xf32>
      %115 = arith.truncf %114 : vector<128x32xf32> to vector<128x32xbf16>
      %c0_71 = arith.constant 0 : index
      %c0_72 = arith.constant 0 : index
      %c64_73 = arith.constant 64 : index
      %116 = vector.load %arg5[%c0_71, %c0_72, %c64_73] : memref<1x128x128xf32, #tpu.memory_space<vmem>>, vector<1x128x32xf32>
      %117 = vector.shape_cast %116 : vector<1x128x32xf32> to vector<128x32xf32>
      %118 = arith.truncf %117 : vector<128x32xf32> to vector<128x32xbf16>
      %cst_74 = arith.constant dense<0.000000e+00> : vector<128x128xf32>
      %119 = tpu.matmul %112, %115, %cst_74 {dimension_numbers = #tpu.dot_dimension_numbers<[1], [1], [0], [0], [0, 0, 1, 0], [], []>} : vector<128x32xbf16>, vector<128x32xbf16>, vector<128x128xf32> -> vector<128x128xf32>
      %cst_75 = arith.constant 0.176776692 : f32
      %120 = vector.broadcast %cst_75 : f32 to vector<128x128xf32>
      %121 = arith.mulf %119, %120 : vector<128x128xf32>
      %cst_76 = arith.constant 0xFF800000 : f32
      %122 = vector.broadcast %cst_76 : f32 to vector<128x128xf32>
      %123 = arith.select %17, %121, %122 : vector<128x128xi1>, vector<128x128xf32>
      %c2 = arith.constant 2 : index
      %c0_77 = arith.constant 0 : index
      %c0_78 = arith.constant 0 : index
      %124 = vector.load %arg7[%c2, %c0_77, %c0_78] : memref<4x128x1xf32, #tpu.memory_space<vmem>>, vector<1x128x1xf32>
      %125 = vector.shape_cast %124 : vector<1x128x1xf32> to vector<128x1xf32>
      %cst_79 = arith.constant dense<0xFF800000> : vector<128xf32>
      %126 = vector.multi_reduction <maximumf>, %123, %cst_79 [1] : vector<128x128xf32> to vector<128xf32>
      %127 = vector.shape_cast %126 : vector<128xf32> to vector<128x1xf32>
      %128 = arith.maximumf %125, %127 : vector<128x1xf32>
      %129 = arith.subf %125, %128 : vector<128x1xf32>
      %130 = math.exp %129 : vector<128x1xf32>
      %131 = vector.broadcast %128 : vector<128x1xf32> to vector<128x128xf32>
      %132 = arith.subf %123, %131 : vector<128x128xf32>
      %133 = math.exp %132 : vector<128x128xf32>
      %c2_80 = arith.constant 2 : index
      %c0_81 = arith.constant 0 : index
      %c0_82 = arith.constant 0 : index
      %134 = vector.load %arg8[%c2_80, %c0_81, %c0_82] : memref<4x128x1xf32, #tpu.memory_space<vmem>>, vector<1x128x1xf32>
      %135 = vector.shape_cast %134 : vector<1x128x1xf32> to vector<128x1xf32>
      %136 = arith.mulf %130, %135 : vector<128x1xf32>
      %cst_83 = arith.constant dense<0.000000e+00> : vector<128xf32>
      %137 = vector.multi_reduction <add>, %133, %cst_83 [1] : vector<128x128xf32> to vector<128xf32>
      %138 = vector.shape_cast %137 : vector<128xf32> to vector<128x1xf32>
      %139 = arith.addf %136, %138 : vector<128x1xf32>
      %c2_84 = arith.constant 2 : index
      %c0_85 = arith.constant 0 : index
      %c0_86 = arith.constant 0 : index
      %140 = vector.load %arg8[%c2_84, %c0_85, %c0_86] : memref<4x128x1xf32, #tpu.memory_space<vmem>>, vector<1x128x1xf32>
      %141 = vector.shape_cast %140 : vector<1x128x1xf32> to vector<128x1xf32>
      %142 = vector.shape_cast %139 : vector<128x1xf32> to vector<1x128x1xf32>
      tpu.vector_store %arg8[%c2_84, %c0_85, %c0_86], %142 {strides = array<i32>} : memref<4x128x1xf32, #tpu.memory_space<vmem>>, vector<1x128x1xf32>,
      %c2_87 = arith.constant 2 : index
      %c0_88 = arith.constant 0 : index
      %c0_89 = arith.constant 0 : index
      %143 = vector.load %arg9[%c2_87, %c0_88, %c0_89] : memref<4x128x32xf32, #tpu.memory_space<vmem>>, vector<1x128x32xf32>
      %144 = vector.shape_cast %143 : vector<1x128x32xf32> to vector<128x32xf32>
      %145 = vector.broadcast %130 : vector<128x1xf32> to vector<128x32xf32>
      %146 = arith.mulf %145, %144 : vector<128x32xf32>
      %147 = arith.truncf %133 : vector<128x128xf32> to vector<128x128xbf16>
      %cst_90 = arith.constant dense<0.000000e+00> : vector<128x32xf32>
      %148 = tpu.matmul %147, %118, %cst_90 {dimension_numbers = #tpu.dot_dimension_numbers<[1], [0], [0], [1], [0, 0, 1, 1], [], []>} : vector<128x128xbf16>, vector<128x32xbf16>, vector<128x32xf32> -> vector<128x32xf32>
      %149 = arith.addf %146, %148 : vector<128x32xf32>
      %c2_91 = arith.constant 2 : index
      %c0_92 = arith.constant 0 : index
      %c0_93 = arith.constant 0 : index
      %150 = vector.load %arg9[%c2_91, %c0_92, %c0_93] : memref<4x128x32xf32, #tpu.memory_space<vmem>>, vector<1x128x32xf32>
      %151 = vector.shape_cast %150 : vector<1x128x32xf32> to vector<128x32xf32>
      %152 = vector.shape_cast %149 : vector<128x32xf32> to vector<1x128x32xf32>
      tpu.vector_store %arg9[%c2_91, %c0_92, %c0_93], %152 {strides = array<i32>} : memref<4x128x32xf32, #tpu.memory_space<vmem>>, vector<1x128x32xf32>,
      %c2_94 = arith.constant 2 : index
      %c0_95 = arith.constant 0 : index
      %c0_96 = arith.constant 0 : index
      %153 = vector.load %arg7[%c2_94, %c0_95, %c0_96] : memref<4x128x1xf32, #tpu.memory_space<vmem>>, vector<1x128x1xf32>
      %154 = vector.shape_cast %153 : vector<1x128x1xf32> to vector<128x1xf32>
      %155 = vector.shape_cast %128 : vector<128x1xf32> to vector<1x128x1xf32>
      tpu.vector_store %arg7[%c2_94, %c0_95, %c0_96], %155 {strides = array<i32>} : memref<4x128x1xf32, #tpu.memory_space<vmem>>, vector<1x128x1xf32>,
      %c0_97 = arith.constant 0 : index
      %c0_98 = arith.constant 0 : index
      %c96 = arith.constant 96 : index
      %156 = vector.load %arg3[%c0_97, %c0_98, %c96] : memref<1x128x128xf32, #tpu.memory_space<vmem>>, vector<1x128x32xf32>
      %157 = vector.shape_cast %156 : vector<1x128x32xf32> to vector<128x32xf32>
      %158 = arith.truncf %157 : vector<128x32xf32> to vector<128x32xbf16>
      %c0_99 = arith.constant 0 : index
      %c0_100 = arith.constant 0 : index
      %c96_101 = arith.constant 96 : index
      %159 = vector.load %arg4[%c0_99, %c0_100, %c96_101] : memref<1x128x128xf32, #tpu.memory_space<vmem>>, vector<1x128x32xf32>
      %160 = vector.shape_cast %159 : vector<1x128x32xf32> to vector<128x32xf32>
      %161 = arith.truncf %160 : vector<128x32xf32> to vector<128x32xbf16>
      %c0_102 = arith.constant 0 : index
      %c0_103 = arith.constant 0 : index
      %c96_104 = arith.constant 96 : index
      %162 = vector.load %arg5[%c0_102, %c0_103, %c96_104] : memref<1x128x128xf32, #tpu.memory_space<vmem>>, vector<1x128x32xf32>
      %163 = vector.shape_cast %162 : vector<1x128x32xf32> to vector<128x32xf32>
      %164 = arith.truncf %163 : vector<128x32xf32> to vector<128x32xbf16>
      %cst_105 = arith.constant dense<0.000000e+00> : vector<128x128xf32>
      %165 = tpu.matmul %158, %161, %cst_105 {dimension_numbers = #tpu.dot_dimension_numbers<[1], [1], [0], [0], [0, 0, 1, 0], [], []>} : vector<128x32xbf16>, vector<128x32xbf16>, vector<128x128xf32> -> vector<128x128xf32>
      %cst_106 = arith.constant 0.176776692 : f32
      %166 = vector.broadcast %cst_106 : f32 to vector<128x128xf32>
      %167 = arith.mulf %165, %166 : vector<128x128xf32>
      %cst_107 = arith.constant 0xFF800000 : f32
      %168 = vector.broadcast %cst_107 : f32 to vector<128x128xf32>
      %169 = arith.select %17, %167, %168 : vector<128x128xi1>, vector<128x128xf32>
      %c3 = arith.constant 3 : index
      %c0_108 = arith.constant 0 : index
      %c0_109 = arith.constant 0 : index
      %170 = vector.load %arg7[%c3, %c0_108, %c0_109] : memref<4x128x1xf32, #tpu.memory_space<vmem>>, vector<1x128x1xf32>
      %171 = vector.shape_cast %170 : vector<1x128x1xf32> to vector<128x1xf32>
      %cst_110 = arith.constant dense<0xFF800000> : vector<128xf32>
      %172 = vector.multi_reduction <maximumf>, %169, %cst_110 [1] : vector<128x128xf32> to vector<128xf32>
      %173 = vector.shape_cast %172 : vector<128xf32> to vector<128x1xf32>
      %174 = arith.maximumf %171, %173 : vector<128x1xf32>
      %175 = arith.subf %171, %174 : vector<128x1xf32>
      %176 = math.exp %175 : vector<128x1xf32>
      %177 = vector.broadcast %174 : vector<128x1xf32> to vector<128x128xf32>
      %178 = arith.subf %169, %177 : vector<128x128xf32>
      %179 = math.exp %178 : vector<128x128xf32>
      %c3_111 = arith.constant 3 : index
      %c0_112 = arith.constant 0 : index
      %c0_113 = arith.constant 0 : index
      %180 = vector.load %arg8[%c3_111, %c0_112, %c0_113] : memref<4x128x1xf32, #tpu.memory_space<vmem>>, vector<1x128x1xf32>
      %181 = vector.shape_cast %180 : vector<1x128x1xf32> to vector<128x1xf32>
      %182 = arith.mulf %176, %181 : vector<128x1xf32>
      %cst_114 = arith.constant dense<0.000000e+00> : vector<128xf32>
      %183 = vector.multi_reduction <add>, %179, %cst_114 [1] : vector<128x128xf32> to vector<128xf32>
      %184 = vector.shape_cast %183 : vector<128xf32> to vector<128x1xf32>
      %185 = arith.addf %182, %184 : vector<128x1xf32>
      %c3_115 = arith.constant 3 : index
      %c0_116 = arith.constant 0 : index
      %c0_117 = arith.constant 0 : index
      %186 = vector.load %arg8[%c3_115, %c0_116, %c0_117] : memref<4x128x1xf32, #tpu.memory_space<vmem>>, vector<1x128x1xf32>
      %187 = vector.shape_cast %186 : vector<1x128x1xf32> to vector<128x1xf32>
      %188 = vector.shape_cast %185 : vector<128x1xf32> to vector<1x128x1xf32>
      tpu.vector_store %arg8[%c3_115, %c0_116, %c0_117], %188 {strides = array<i32>} : memref<4x128x1xf32, #tpu.memory_space<vmem>>, vector<1x128x1xf32>,
      %c3_118 = arith.constant 3 : index
      %c0_119 = arith.constant 0 : index
      %c0_120 = arith.constant 0 : index
      %189 = vector.load %arg9[%c3_118, %c0_119, %c0_120] : memref<4x128x32xf32, #tpu.memory_space<vmem>>, vector<1x128x32xf32>
      %190 = vector.shape_cast %189 : vector<1x128x32xf32> to vector<128x32xf32>
      %191 = vector.broadcast %176 : vector<128x1xf32> to vector<128x32xf32>
      %192 = arith.mulf %191, %190 : vector<128x32xf32>
      %193 = arith.truncf %179 : vector<128x128xf32> to vector<128x128xbf16>
      %cst_121 = arith.constant dense<0.000000e+00> : vector<128x32xf32>
      %194 = tpu.matmul %193, %164, %cst_121 {dimension_numbers = #tpu.dot_dimension_numbers<[1], [0], [0], [1], [0, 0, 1, 1], [], []>} : vector<128x128xbf16>, vector<128x32xbf16>, vector<128x32xf32> -> vector<128x32xf32>
      %195 = arith.addf %192, %194 : vector<128x32xf32>
      %c3_122 = arith.constant 3 : index
      %c0_123 = arith.constant 0 : index
      %c0_124 = arith.constant 0 : index
      %196 = vector.load %arg9[%c3_122, %c0_123, %c0_124] : memref<4x128x32xf32, #tpu.memory_space<vmem>>, vector<1x128x32xf32>
      %197 = vector.shape_cast %196 : vector<1x128x32xf32> to vector<128x32xf32>
      %198 = vector.shape_cast %195 : vector<128x32xf32> to vector<1x128x32xf32>
      tpu.vector_store %arg9[%c3_122, %c0_123, %c0_124], %198 {strides = array<i32>} : memref<4x128x32xf32, #tpu.memory_space<vmem>>, vector<1x128x32xf32>,
      %c3_125 = arith.constant 3 : index
      %c0_126 = arith.constant 0 : index
      %c0_127 = arith.constant 0 : index
      %199 = vector.load %arg7[%c3_125, %c0_126, %c0_127] : memref<4x128x1xf32, #tpu.memory_space<vmem>>, vector<1x128x1xf32>
      %200 = vector.shape_cast %199 : vector<1x128x1xf32> to vector<128x1xf32>
      %201 = vector.shape_cast %174 : vector<128x1xf32> to vector<1x128x1xf32>
      tpu.vector_store %arg7[%c3_125, %c0_126, %c0_127], %201 {strides = array<i32>} : memref<4x128x1xf32, #tpu.memory_space<vmem>>, vector<1x128x1xf32>,
    } else {
    }
    %6 = arith.cmpi eq, %arg2, %arg1 : i32
    %7 = arith.extui %6 : i1 to i32
    %c0_i32_2 = arith.constant 0 : i32
    %8 = arith.cmpi ne, %7, %c0_i32_2 : i32
    scf.if %8 {
      %c0 = arith.constant 0 : index
      %c0_3 = arith.constant 0 : index
      %c0_4 = arith.constant 0 : index
      %9 = vector.load %arg8[%c0, %c0_3, %c0_4] : memref<4x128x1xf32, #tpu.memory_space<vmem>>, vector<1x128x1xf32>
      %10 = vector.shape_cast %9 : vector<1x128x1xf32> to vector<128x1xf32>
      %11 = tpu.reciprocal %10 {approx = true} : vector<128x1xf32> -> vector<128x1xf32>
      %c0_5 = arith.constant 0 : index
      %c0_6 = arith.constant 0 : index
      %c0_7 = arith.constant 0 : index
      %12 = vector.load %arg9[%c0_5, %c0_6, %c0_7] : memref<4x128x32xf32, #tpu.memory_space<vmem>>, vector<1x128x32xf32>
      %13 = vector.shape_cast %12 : vector<1x128x32xf32> to vector<128x32xf32>
      %14 = vector.broadcast %11 : vector<128x1xf32> to vector<128x32xf32>
      %15 = arith.mulf %13, %14 : vector<128x32xf32>
      %c0_8 = arith.constant 0 : index
      %c0_9 = arith.constant 0 : index
      %c0_10 = arith.constant 0 : index
      %16 = vector.load %arg6[%c0_8, %c0_9, %c0_10] : memref<1x128x128xf32, #tpu.memory_space<vmem>>, vector<1x128x32xf32>
      %17 = vector.shape_cast %16 : vector<1x128x32xf32> to vector<128x32xf32>
      %18 = vector.shape_cast %15 : vector<128x32xf32> to vector<1x128x32xf32>
      tpu.vector_store %arg6[%c0_8, %c0_9, %c0_10], %18 {strides = array<i32>} : memref<1x128x128xf32, #tpu.memory_space<vmem>>, vector<1x128x32xf32>,
      %c1 = arith.constant 1 : index
      %c0_11 = arith.constant 0 : index
      %c0_12 = arith.constant 0 : index
      %19 = vector.load %arg8[%c1, %c0_11, %c0_12] : memref<4x128x1xf32, #tpu.memory_space<vmem>>, vector<1x128x1xf32>
      %20 = vector.shape_cast %19 : vector<1x128x1xf32> to vector<128x1xf32>
      %21 = tpu.reciprocal %20 {approx = true} : vector<128x1xf32> -> vector<128x1xf32>
      %c1_13 = arith.constant 1 : index
      %c0_14 = arith.constant 0 : index
      %c0_15 = arith.constant 0 : index
      %22 = vector.load %arg9[%c1_13, %c0_14, %c0_15] : memref<4x128x32xf32, #tpu.memory_space<vmem>>, vector<1x128x32xf32>
      %23 = vector.shape_cast %22 : vector<1x128x32xf32> to vector<128x32xf32>
      %24 = vector.broadcast %21 : vector<128x1xf32> to vector<128x32xf32>
      %25 = arith.mulf %23, %24 : vector<128x32xf32>
      %c0_16 = arith.constant 0 : index
      %c0_17 = arith.constant 0 : index
      %c32 = arith.constant 32 : index
      %26 = vector.load %arg6[%c0_16, %c0_17, %c32] : memref<1x128x128xf32, #tpu.memory_space<vmem>>, vector<1x128x32xf32>
      %27 = vector.shape_cast %26 : vector<1x128x32xf32> to vector<128x32xf32>
      %28 = vector.shape_cast %25 : vector<128x32xf32> to vector<1x128x32xf32>
      tpu.vector_store %arg6[%c0_16, %c0_17, %c32], %28 {strides = array<i32>} : memref<1x128x128xf32, #tpu.memory_space<vmem>>, vector<1x128x32xf32>,
      %c2 = arith.constant 2 : index
      %c0_18 = arith.constant 0 : index
      %c0_19 = arith.constant 0 : index
      %29 = vector.load %arg8[%c2, %c0_18, %c0_19] : memref<4x128x1xf32, #tpu.memory_space<vmem>>, vector<1x128x1xf32>
      %30 = vector.shape_cast %29 : vector<1x128x1xf32> to vector<128x1xf32>
      %31 = tpu.reciprocal %30 {approx = true} : vector<128x1xf32> -> vector<128x1xf32>
      %c2_20 = arith.constant 2 : index
      %c0_21 = arith.constant 0 : index
      %c0_22 = arith.constant 0 : index
      %32 = vector.load %arg9[%c2_20, %c0_21, %c0_22] : memref<4x128x32xf32, #tpu.memory_space<vmem>>, vector<1x128x32xf32>
      %33 = vector.shape_cast %32 : vector<1x128x32xf32> to vector<128x32xf32>
      %34 = vector.broadcast %31 : vector<128x1xf32> to vector<128x32xf32>
      %35 = arith.mulf %33, %34 : vector<128x32xf32>
      %c0_23 = arith.constant 0 : index
      %c0_24 = arith.constant 0 : index
      %c64 = arith.constant 64 : index
      %36 = vector.load %arg6[%c0_23, %c0_24, %c64] : memref<1x128x128xf32, #tpu.memory_space<vmem>>, vector<1x128x32xf32>
      %37 = vector.shape_cast %36 : vector<1x128x32xf32> to vector<128x32xf32>
      %38 = vector.shape_cast %35 : vector<128x32xf32> to vector<1x128x32xf32>
      tpu.vector_store %arg6[%c0_23, %c0_24, %c64], %38 {strides = array<i32>} : memref<1x128x128xf32, #tpu.memory_space<vmem>>, vector<1x128x32xf32>,
      %c3 = arith.constant 3 : index
      %c0_25 = arith.constant 0 : index
      %c0_26 = arith.constant 0 : index
      %39 = vector.load %arg8[%c3, %c0_25, %c0_26] : memref<4x128x1xf32, #tpu.memory_space<vmem>>, vector<1x128x1xf32>
      %40 = vector.shape_cast %39 : vector<1x128x1xf32> to vector<128x1xf32>
      %41 = tpu.reciprocal %40 {approx = true} : vector<128x1xf32> -> vector<128x1xf32>
      %c3_27 = arith.constant 3 : index
      %c0_28 = arith.constant 0 : index
      %c0_29 = arith.constant 0 : index
      %42 = vector.load %arg9[%c3_27, %c0_28, %c0_29] : memref<4x128x32xf32, #tpu.memory_space<vmem>>, vector<1x128x32xf32>
      %43 = vector.shape_cast %42 : vector<1x128x32xf32> to vector<128x32xf32>
      %44 = vector.broadcast %41 : vector<128x1xf32> to vector<128x32xf32>
      %45 = arith.mulf %43, %44 : vector<128x32xf32>
      %c0_30 = arith.constant 0 : index
      %c0_31 = arith.constant 0 : index
      %c96 = arith.constant 96 : index
      %46 = vector.load %arg6[%c0_30, %c0_31, %c96] : memref<1x128x128xf32, #tpu.memory_space<vmem>>, vector<1x128x32xf32>
      %47 = vector.shape_cast %46 : vector<1x128x32xf32> to vector<128x32xf32>
      %48 = vector.shape_cast %45 : vector<128x32xf32> to vector<1x128x32xf32>
      tpu.vector_store %arg6[%c0_30, %c0_31, %c96], %48 {strides = array<i32>} : memref<1x128x128xf32, #tpu.memory_space<vmem>>, vector<1x128x32xf32>,
    } else {
    }
    return
  }
  func.func @transform_0(%arg0: i32, %arg1: i32, %arg2: i32) -> (i32, i32, i32) {
    %c0_i32 = arith.constant 0 : i32
    %c0_i32_0 = arith.constant 0 : i32
    return %arg0, %arg1, %c0_i32 : i32, i32, i32
  }
  func.func @transform_1(%arg0: i32, %arg1: i32, %arg2: i32) -> (i32, i32, i32) {
    %c1_i32 = arith.constant 1 : i32
    %c0_i32 = arith.constant 0 : i32
    return %arg0, %arg2, %c1_i32 : i32, i32, i32
  }
  func.func @transform_2(%arg0: i32, %arg1: i32, %arg2: i32) -> (i32, i32, i32) {
    %c2_i32 = arith.constant 2 : i32
    %c0_i32 = arith.constant 0 : i32
    return %arg0, %arg2, %c2_i32 : i32, i32, i32
  }
  func.func @transform_3(%arg0: i32, %arg1: i32, %arg2: i32) -> (i32, i32, i32) {
    %c0_i32 = arith.constant 0 : i32
    %c0_i32_0 = arith.constant 0 : i32
    return %arg0, %arg1, %c0_i32 : i32, i32, i32
  }
}

module attributes {stable_mosaic.version = 11 : i64} {
  func.func @_matmul_kernel(%arg0: i32, %arg1: i32, %arg2: i32, %arg3: memref<512x128xf32, #tpu.memory_space<vmem>>, %arg4: memref<128x128xf32, #tpu.memory_space<vmem>>, %arg5: memref<512x128xf32, #tpu.memory_space<vmem>>, %arg6: memref<512x128xf32, #tpu.memory_space<vmem>>) attributes {dimension_semantics = [#tpu.dimension_semantics<parallel>, #tpu.dimension_semantics<parallel>, #tpu.dimension_semantics<arbitrary>], iteration_bounds = array<i64: 1, 1, 1>, scalar_prefetch = 0 : i64, scratch_operands = 1 : i64, tpu.core_type = #tpu.core_type<tc>, window_params = [{transform_indices = @transform_0, window_bounds = array<i64: 512, 128>}, {transform_indices = @transform_1, window_bounds = array<i64: 128, 128>}, {transform_indices = @transform_2, window_bounds = array<i64: 512, 128>}]} {
    %c0_i32 = arith.constant 0 : i32
    %0 = arith.cmpi eq, %arg2, %c0_i32 : i32
    %1 = arith.extui %0 : i1 to i32
    %c0_i32_0 = arith.constant 0 : i32
    %2 = arith.cmpi ne, %1, %c0_i32_0 : i32
    scf.if %2 {
      %cst_10 = arith.constant 0.000000e+00 : f32
      %12 = vector.broadcast %cst_10 : f32 to vector<512x128xf32>
      %c0_11 = arith.constant 0 : index
      %c0_12 = arith.constant 0 : index
      %13 = vector.load %arg6[%c0_11, %c0_12] : memref<512x128xf32, #tpu.memory_space<vmem>>, vector<512x128xf32>
      tpu.vector_store %arg6[%c0_11, %c0_12], %12 {strides = array<i32>} : memref<512x128xf32, #tpu.memory_space<vmem>>, vector<512x128xf32>,
    } else {
    }
    %c0 = arith.constant 0 : index
    %c0_1 = arith.constant 0 : index
    %3 = vector.load %arg6[%c0, %c0_1] : memref<512x128xf32, #tpu.memory_space<vmem>>, vector<512x128xf32>
    %c0_2 = arith.constant 0 : index
    %c0_3 = arith.constant 0 : index
    %4 = vector.load %arg3[%c0_2, %c0_3] : memref<512x128xf32, #tpu.memory_space<vmem>>, vector<512x128xf32>
    %c0_4 = arith.constant 0 : index
    %c0_5 = arith.constant 0 : index
    %5 = vector.load %arg4[%c0_4, %c0_5] : memref<128x128xf32, #tpu.memory_space<vmem>>, vector<128x128xf32>
    %cst = arith.constant dense<0.000000e+00> : vector<512x128xf32>
    %6 = tpu.matmul %4, %5, %cst {dimension_numbers = #tpu.dot_dimension_numbers<[1], [0], [0], [1], [0, 0, 1, 1], [], []>} : vector<512x128xf32>, vector<128x128xf32>, vector<512x128xf32> -> vector<512x128xf32>
    %7 = arith.addf %3, %6 : vector<512x128xf32>
    %c0_6 = arith.constant 0 : index
    %c0_7 = arith.constant 0 : index
    %8 = vector.load %arg6[%c0_6, %c0_7] : memref<512x128xf32, #tpu.memory_space<vmem>>, vector<512x128xf32>
    tpu.vector_store %arg6[%c0_6, %c0_7], %7 {strides = array<i32>} : memref<512x128xf32, #tpu.memory_space<vmem>>, vector<512x128xf32>,
    %c0_i32_8 = arith.constant 0 : i32
    %9 = arith.cmpi eq, %arg2, %c0_i32_8 : i32
    %10 = arith.extui %9 : i1 to i32
    %c0_i32_9 = arith.constant 0 : i32
    %11 = arith.cmpi ne, %10, %c0_i32_9 : i32
    scf.if %11 {
      %c0_10 = arith.constant 0 : index
      %c0_11 = arith.constant 0 : index
      %12 = vector.load %arg6[%c0_10, %c0_11] : memref<512x128xf32, #tpu.memory_space<vmem>>, vector<512x128xf32>
      %c0_12 = arith.constant 0 : index
      %c0_13 = arith.constant 0 : index
      %13 = vector.load %arg5[%c0_12, %c0_13] : memref<512x128xf32, #tpu.memory_space<vmem>>, vector<512x128xf32>
      tpu.vector_store %arg5[%c0_12, %c0_13], %12 {strides = array<i32>} : memref<512x128xf32, #tpu.memory_space<vmem>>, vector<512x128xf32>,
    } else {
    }
    return
  }
  func.func @transform_0(%arg0: i32, %arg1: i32, %arg2: i32) -> (i32, i32) {
    %c0_i32 = arith.constant 0 : i32
    return %arg0, %arg2 : i32, i32
  }
  func.func @transform_1(%arg0: i32, %arg1: i32, %arg2: i32) -> (i32, i32) {
    %c0_i32 = arith.constant 0 : i32
    return %arg2, %arg1 : i32, i32
  }
  func.func @transform_2(%arg0: i32, %arg1: i32, %arg2: i32) -> (i32, i32) {
    %c0_i32 = arith.constant 0 : i32
    return %arg0, %arg1 : i32, i32
  }
}

</mosaic_0001>

<bundles_post_ra>
// kernel: self_attention_forward.3
= control target key start
LH: loop header
LB: loop body
LE: loop exit
PB: predicated region body
PF: predicated region fallthrough
CT: control target
= control target key end

     0   :  { %s1900_s9 = smov 0   ;;  %s1902_s10 = smov 0   ;;  %s2400_s0 = inlined_call_operand.vmem [shape: f32[512,128], index: 0, kind: input, shape index: {}]   ;;  %s2401_s1 = inlined_call_operand.vmem [shape: f32[128,384], index: 1, kind: input, shape index: {}]   ;;  %s2402_s2 = inlined_call_operand.vmem [shape: f32[512,384], index: 2, kind: output, shape index: {}]  }
   0x1   :  { %s1904_s11 = smov 0   ;;  %s1906_s12 = smov 0  }
   0x2   :  { %s1908_s13 = smov 0  }
   0x3 LB: > { %s27_s14 = sadd.s32 1, %s1879_s12  ;;  %s1535_s15 = sadd.s32 4294967295, %s1883_s13   ;;  %s1883_s13 = sphi %s1908_s13, %s12_s13   ;;  %s1879_s12 = sphi %s1906_s12, %s2407_s12   ;;  %s1875_s11 = sphi %s1904_s11, %s2406_s11   ;;  %s1871_s10 = sphi %s1902_s10, %s2405_s10   ;;  %s1867_s9 = sphi %s1900_s9, %s2404_s9  }
   0x4   : > { %p29_p0 = scmp.ge.s32.totalorder %s27_s14, 3  ;;  %p75_p1 = scmp.ne.s32.totalorder %s1871_s10, %s1867_s9 }
   0x5   : > { %p76_p2 = scmp.eq.s32.totalorder %s1883_s13, 0  ;;  %p107_p4 = scmp.eq.s32.totalorder %s1535_s15, 2 }
   0x6   : > { %s2409_s14 = smov (%p29_p0, %s27_s14), 0  ;;  %s68_s17 = sadd.s32 1, %s1871_s10 }
   0x7   : > { %p77_p3 = por %p76_p2, %p75_p1  ;;  %s64_s16 = ssub.s32 %s1879_s12, %s2409_s14 }
   0x8   : > { %p66_p5 = scmp.eq.s32.totalorder %s64_s16, 0  ;;  %p1935_p6 = por %p107_p4, %p75_p1 }
   0x9   : > { %p1539_p7 = scmp.ge.s32.totalorder %s1883_s13, 3 }
   0xa   : > { %s1940_s19 = scalar_select %p66_p5, %s1871_s10, %s68_s17  }
   0xb   : > { %141 = sbr.rel (%p1539_p7) target bundleno = 30 (0x1e), region = 20 }
  0x12   : > { %144 = sbr.rel (!%p77_p3) target bundleno = 30 (0x1e), region = 24  ;;  %s146_s20 = sand.u32 (%p77_p3), 1, %s1871_s10  }
  0x13   : > { %s1541_s21 = sshll.u32 (%p77_p3), %s1879_s12, 3  ;;  %s1540_s22 = sshll.u32 (%p77_p3), %s146_s20, 7 }
  0x14   : > { %s1948_s25 = scalar_lea.vmem (%p77_p3), %s2401_s1, %s1541_s21  ;;  %s148_s26 = scalar_lea.vmem (%p77_p3), [#allocation3], %s1540_s22 }
  0x15   : > { %v211_v0 = vld [vmem:[%s1948_s25] sm:$0xff] (%p77_p3)  ;;  %v213_v1 = vld [vmem:[%s1948_s25 + $0x18] sm:$0xff] (%p77_p3)  ;;  %v215_v2 = vld [vmem:[%s1948_s25 + $0x30] sm:$0xff] (%p77_p3) }
  0x16   : > { %212 = vst [vmem:[%s148_s26] sm:$0xff] (%p77_p3), %v211_v0  ;;  %214 = vst [vmem:[%s148_s26 + $0x8] sm:$0xff] (%p77_p3), %v213_v1  ;;  %v217_v3 = vld [vmem:[%s1948_s25 + $0x48] sm:$0xff] (%p77_p3)  ;;  %v219_v4 = vld [vmem:[%s1948_s25 + $0x60] sm:$0xff] (%p77_p3) }
  0x17   : > { %216 = vst [vmem:[%s148_s26 + $0x10] sm:$0xff] (%p77_p3), %v215_v2  ;;  %v221_v5 = vld [vmem:[%s1948_s25 + $0x78] sm:$0xff] (%p77_p3)  ;;  %218 = vst [vmem:[%s148_s26 + $0x18] sm:$0xff] (%p77_p3), %v217_v3  ;;  %v223_v6 = vld [vmem:[%s1948_s25 + $0x90] sm:$0xff] (%p77_p3) }
  0x18   : > { %220 = vst [vmem:[%s148_s26 + $0x20] sm:$0xff] (%p77_p3), %v219_v4  ;;  %222 = vst [vmem:[%s148_s26 + $0x28] sm:$0xff] (%p77_p3), %v221_v5  ;;  %v225_v7 = vld [vmem:[%s1948_s25 + $0xa8] sm:$0xff] (%p77_p3)  ;;  %v227_v8 = vld [vmem:[%s1948_s25 + $0xc0] sm:$0xff] (%p77_p3) }
  0x19   : > { %224 = vst [vmem:[%s148_s26 + $0x30] sm:$0xff] %v223_v6  ;;  %226 = vst [vmem:[%s148_s26 + $0x38] sm:$0xff] %v225_v7  ;;  %v229_v9 = vld [vmem:[%s1948_s25 + $0xd8] sm:$0xff]  ;;  %v231_v10 = vld [vmem:[%s1948_s25 + $0xf0] sm:$0xff] }
  0x1a   : > { %228 = vst [vmem:[%s148_s26 + $0x40] sm:$0xff] %v227_v8  ;;  %v233_v11 = vld [vmem:[%s1948_s25 + $0x108] sm:$0xff]  ;;  %230 = vst [vmem:[%s148_s26 + $0x48] sm:$0xff] %v229_v9  ;;  %v235_v12 = vld [vmem:[%s1948_s25 + $0x120] sm:$0xff] }
  0x1b   : > { %232 = vst [vmem:[%s148_s26 + $0x50] sm:$0xff] %v231_v10  ;;  %234 = vst [vmem:[%s148_s26 + $0x58] sm:$0xff] %v233_v11  ;;  %v237_v13 = vld [vmem:[%s1948_s25 + $0x138] sm:$0xff]  ;;  %v239_v14 = vld [vmem:[%s1948_s25 + $0x150] sm:$0xff] }
  0x1c   : > { %236 = vst [vmem:[%s148_s26 + $0x60] sm:$0xff] %v235_v12  ;;  %238 = vst [vmem:[%s148_s26 + $0x68] sm:$0xff] %v237_v13  ;;  %v241_v15 = vld [vmem:[%s1948_s25 + $0x168] sm:$0xff] }
  0x1d   : > { %240 = vst [vmem:[%s148_s26 + $0x70] sm:$0xff] %v239_v14  ;;  %242 = vst [vmem:[%s148_s26 + $0x78] sm:$0xff] %v241_v15 }
  0x1e PF: > { %p1542_p8 = scmp.ge.s32.totalorder %s1883_s13, 1  ;;  %p247_p9 = scmp.lt.s32.totalorder %s1883_s13, 4 }
  0x20   : > { %p248_p10 = pnand %p1542_p8, %p247_p9 }
  0x21   : > { %s254_s27 = sand.u32 (!%p248_p10), 1, %s1867_s9   ;;  %v425_v16 = vld [vmem:[%s2400_s0] sm:$0xff] (!%p248_p10)  ;;  %v426_v42 = vld [vmem:[%s2400_s0 + $0x8] sm:$0xff] (!%p248_p10)  ;;  %v427_v44 = vld [vmem:[%s2400_s0 + $0x10] sm:$0xff] (!%p248_p10) }
  0x22   : > { %251 = sbr.rel (%p248_p10) target bundleno = 357 (0x165), region = 62  ;;  %v457_v17 = vld [vmem:[%s2400_s0 + $0x100] sm:$0xff] (!%p248_p10)  ;;  %s1543_s4 = sshll.u32 (!%p248_p10), %s254_s27, 7  ;;  %1661 = vmatprep.mubr.f32.mxu0 (!%p248_p10), %v425_v16  ;;  %v458_v43 = vld [vmem:[%s2400_s0 + $0x108] sm:$0xff] (!%p248_p10)  ;;  %v459_v45 = vld [vmem:[%s2400_s0 + $0x110] sm:$0xff] (!%p248_p10) }
  0x23   : > { %1709 = vmatprep.mubr.f32.mxu1 (!%p248_p10), %v457_v17  ;;  %s1977_s5 = scalar_lea.vmem (!%p248_p10), [#allocation3], %s1543_s4  ;;  %v428_v46 = vld [vmem:[%s2400_s0 + $0x18] sm:$0xff] (!%p248_p10)  ;;  %v429_v48 = vld [vmem:[%s2400_s0 + $0x20] sm:$0xff] (!%p248_p10)  ;;  %v430_v50 = vld [vmem:[%s2400_s0 + $0x28] sm:$0xff] (!%p248_p10)  ;;  %s1544_s24 = sshll.u32 (!%p248_p10), %s254_s27, 9 }
  0x24   : > { %v489_v18 = vld [vmem:[%s1977_s5] sm:$0xff] (!%p248_p10)  ;;  %v490_v19 = vld [vmem:[%s1977_s5 + $0x8] sm:$0xff] (!%p248_p10)  ;;  %v491_v20 = vld [vmem:[%s1977_s5 + $0x10] sm:$0xff] (!%p248_p10)  ;;  %s2183_s25 = scalar_lea.vmem (!%p248_p10), [#allocation4], %s1544_s24 }
  0x25   : > { %v1757_v21 = vpack.c.bf16 (!%p248_p10), %v490_v19, %v489_v18  ;;  %v492_v22 = vld [vmem:[%s1977_s5 + $0x18] sm:$0xff] (!%p248_p10)  ;;  %v493_v24 = vld [vmem:[%s1977_s5 + $0x20] sm:$0xff] (!%p248_p10)  ;;  %v494_v25 = vld [vmem:[%s1977_s5 + $0x28] sm:$0xff] (!%p248_p10) }
  0x26   : > { %v1761_v23 = vpack.c.bf16 (!%p248_p10), %v492_v22, %v491_v20  ;;  %v1765_v26 = vpack.c.bf16 (!%p248_p10), %v494_v25, %v493_v24  ;;  %v495_v27 = vld [vmem:[%s1977_s5 + $0x30] sm:$0xff] (!%p248_p10)  ;;  %v496_v28 = vld [vmem:[%s1977_s5 + $0x38] sm:$0xff] (!%p248_p10)  ;;  %v497_v30 = vld [vmem:[%s1977_s5 + $0x40] sm:$0xff] (!%p248_p10) }
  0x27   : > { %1758 = vmatprep.subr.bf16.mxu0 (!%p248_p10), %v1757_v21  ;;  %1789 = vmatprep.subr.bf16.mxu1 (!%p248_p10), %v1757_v21  ;;  %v1769_v29 = vpack.c.bf16 (!%p248_p10), %v496_v28, %v495_v27  ;;  %v498_v31 = vld [vmem:[%s1977_s5 + $0x48] sm:$0xff] (!%p248_p10)  ;;  %v499_v33 = vld [vmem:[%s1977_s5 + $0x50] sm:$0xff] (!%p248_p10)  ;;  %v500_v34 = vld [vmem:[%s1977_s5 + $0x58] sm:$0xff] (!%p248_p10) }
  0x28   : > { %1760 = vmatpush3.bf16.msra.mxu0 (!%p248_p10), %v1757_v21  ;;  %1797 = vmatpush3.bf16.msra.mxu1 (!%p248_p10), %v1757_v21  ;;  %v1773_v32 = vpack.c.bf16 (!%p248_p10), %v498_v31, %v497_v30  ;;  %v1777_v35 = vpack.c.bf16 (!%p248_p10), %v500_v34, %v499_v33  ;;  %v501_v36 = vld [vmem:[%s1977_s5 + $0x60] sm:$0xff] (!%p248_p10)  ;;  %v502_v37 = vld [vmem:[%s1977_s5 + $0x68] sm:$0xff] (!%p248_p10)  ;;  %v503_v39 = vld [vmem:[%s1977_s5 + $0x70] sm:$0xff] (!%p248_p10) }
  0x29   : > { %1762 = vmatprep.subr.bf16.mxu0 %v1761_v23  ;;  %1790 = vmatprep.subr.bf16.mxu1 %v1761_v23  ;;  %v1781_v38 = vpack.c.bf16 %v502_v37, %v501_v36  ;;  %v504_v40 = vld [vmem:[%s1977_s5 + $0x78] sm:$0xff]  ;;  %v461_v49 = vld [vmem:[%s2400_s0 + $0x120] sm:$0xff]  ;;  %v462_v51 = vld [vmem:[%s2400_s0 + $0x128] sm:$0xff]  ;;  %s1546_s9 = sshll.u32 (%p1935_p6), %s1875_s11, 3 }
  0x2a   : > { %v1785_v41 = vpack.c.bf16 %v504_v40, %v503_v39  ;;  %v460_v47 = vld [vmem:[%s2400_s0 + $0x118] sm:$0xff]  ;;  %v431_v52 = vld [vmem:[%s2400_s0 + $0x30] sm:$0xff]  ;;  %v433_v56 = vld [vmem:[%s2400_s0 + $0x40] sm:$0xff]  ;;  %s2258_s28 = scalar_lea.vmem (%p1935_p6), %s2402_s2, %s1546_s9 }
  0x2b   : > { %v463_v53 = vld [vmem:[%s2400_s0 + $0x130] sm:$0xff]  ;;  %v432_v54 = vld [vmem:[%s2400_s0 + $0x38] sm:$0xff]  ;;  %v465_v57 = vld [vmem:[%s2400_s0 + $0x140] sm:$0xff] }
  0x2c   : > { %1764 = vmatpush3.bf16.msra.mxu0 %v1761_v23  ;;  %1798 = vmatpush3.bf16.msra.mxu1 %v1761_v23  ;;  %v464_v55 = vld [vmem:[%s2400_s0 + $0x138] sm:$0xff]  ;;  %v434_v58 = vld [vmem:[%s2400_s0 + $0x48] sm:$0xff]  ;;  %v435_v60 = vld [vmem:[%s2400_s0 + $0x50] sm:$0xff] }
  0x2d   : > { %1766 = vmatprep.subr.bf16.mxu0 %v1765_v26  ;;  %1791 = vmatprep.subr.bf16.mxu1 %v1765_v26  ;;  %v466_v59 = vld [vmem:[%s2400_s0 + $0x148] sm:$0xff]  ;;  %v467_v61 = vld [vmem:[%s2400_s0 + $0x150] sm:$0xff]  ;;  %v436_v62 = vld [vmem:[%s2400_s0 + $0x58] sm:$0xff] }
  0x2e   : > { %v468_v63 = vld [vmem:[%s2400_s0 + $0x158] sm:$0xff]  ;;  %v437_v0 = vld [vmem:[%s2400_s0 + $0x60] sm:$0xff]  ;;  %v438_v2 = vld [vmem:[%s2400_s0 + $0x68] sm:$0xff] }
  0x2f   : > { %v469_v1 = vld [vmem:[%s2400_s0 + $0x160] sm:$0xff]  ;;  %v470_v3 = vld [vmem:[%s2400_s0 + $0x168] sm:$0xff]  ;;  %v439_v4 = vld [vmem:[%s2400_s0 + $0x70] sm:$0xff] }
  0x30   : > { %1768 = vmatpush3.bf16.msra.mxu0 %v1765_v26  ;;  %1799 = vmatpush3.bf16.msra.mxu1 %v1765_v26  ;;  %v471_v5 = vld [vmem:[%s2400_s0 + $0x170] sm:$0xff]  ;;  %v440_v6 = vld [vmem:[%s2400_s0 + $0x78] sm:$0xff]  ;;  %v441_v8 = vld [vmem:[%s2400_s0 + $0x80] sm:$0xff] }
  0x31   : > { %1770 = vmatprep.subr.bf16.mxu0 %v1769_v29  ;;  %1792 = vmatprep.subr.bf16.mxu1 %v1769_v29  ;;  %v472_v7 = vld [vmem:[%s2400_s0 + $0x178] sm:$0xff]  ;;  %v473_v9 = vld [vmem:[%s2400_s0 + $0x180] sm:$0xff]  ;;  %v442_v10 = vld [vmem:[%s2400_s0 + $0x88] sm:$0xff] }
  0x32   : > { %v474_v11 = vld [vmem:[%s2400_s0 + $0x188] sm:$0xff]  ;;  %v443_v12 = vld [vmem:[%s2400_s0 + $0x90] sm:$0xff]  ;;  %v444_v14 = vld [vmem:[%s2400_s0 + $0x98] sm:$0xff] }
  0x33   : > { %v475_v13 = vld [vmem:[%s2400_s0 + $0x190] sm:$0xff]  ;;  %v476_v15 = vld [vmem:[%s2400_s0 + $0x198] sm:$0xff]  ;;  %v445_v16 = vld [vmem:[%s2400_s0 + $0xa0] sm:$0xff] }
  0x34   : > { %1772 = vmatpush3.bf16.msra.mxu0 %v1769_v29  ;;  %1800 = vmatpush3.bf16.msra.mxu1 %v1769_v29  ;;  %v477_v17 = vld [vmem:[%s2400_s0 + $0x1a0] sm:$0xff]  ;;  %v446_v18 = vld [vmem:[%s2400_s0 + $0xa8] sm:$0xff]  ;;  %v447_v20 = vld [vmem:[%s2400_s0 + $0xb0] sm:$0xff] }
  0x35   : > { %1774 = vmatprep.subr.bf16.mxu0 %v1773_v32  ;;  %1793 = vmatprep.subr.bf16.mxu1 %v1773_v32  ;;  %v478_v19 = vld [vmem:[%s2400_s0 + $0x1a8] sm:$0xff]  ;;  %v479_v21 = vld [vmem:[%s2400_s0 + $0x1b0] sm:$0xff]  ;;  %v448_v22 = vld [vmem:[%s2400_s0 + $0xb8] sm:$0xff] }
  0x36   : > { %v480_v23 = vld [vmem:[%s2400_s0 + $0x1b8] sm:$0xff]  ;;  %v449_v24 = vld [vmem:[%s2400_s0 + $0xc0] sm:$0xff]  ;;  %v450_v26 = vld [vmem:[%s2400_s0 + $0xc8] sm:$0xff] }
  0x37   : > { %v481_v25 = vld [vmem:[%s2400_s0 + $0x1c0] sm:$0xff]  ;;  %v482_v27 = vld [vmem:[%s2400_s0 + $0x1c8] sm:$0xff]  ;;  %v451_v28 = vld [vmem:[%s2400_s0 + $0xd0] sm:$0xff] }
  0x38   : > { %1776 = vmatpush3.bf16.msra.mxu0 %v1773_v32  ;;  %1801 = vmatpush3.bf16.msra.mxu1 %v1773_v32  ;;  %v483_v29 = vld [vmem:[%s2400_s0 + $0x1d0] sm:$0xff]  ;;  %v452_v30 = vld [vmem:[%s2400_s0 + $0xd8] sm:$0xff]  ;;  %v453_v32 = vld [vmem:[%s2400_s0 + $0xe0] sm:$0xff] }
  0x39   : > { %1778 = vmatprep.subr.bf16.mxu0 %v1777_v35  ;;  %1794 = vmatprep.subr.bf16.mxu1 %v1777_v35  ;;  %v484_v31 = vld [vmem:[%s2400_s0 + $0x1d8] sm:$0xff]  ;;  %v485_v33 = vld [vmem:[%s2400_s0 + $0x1e0] sm:$0xff]  ;;  %v454_v34 = vld [vmem:[%s2400_s0 + $0xe8] sm:$0xff] }
  0x3a   : > { %v455_v36 = vld [vmem:[%s2400_s0 + $0xf0] sm:$0xff]  ;;  %v488_v39 = vld [vmem:[%s2400_s0 + $0x1f8] sm:$0xff] }
  0x3b   : > { %v487_v37 = vld [vmem:[%s2400_s0 + $0x1f0] sm:$0xff] }
  0x3c   : > { %1780 = vmatpush3.bf16.msra.mxu0 %v1777_v35  ;;  %1802 = vmatpush3.bf16.msra.mxu1 %v1777_v35  ;;  %v486_v35 = vld [vmem:[%s2400_s0 + $0x1e8] sm:$0xff] }
  0x3d   : > { %1782 = vmatprep.subr.bf16.mxu0 %v1781_v38  ;;  %1795 = vmatprep.subr.bf16.mxu1 %v1781_v38 }
  0x40   : > { %1784 = vmatpush3.bf16.msra.mxu0 %v1781_v38  ;;  %1803 = vmatpush3.bf16.msra.mxu1 %v1781_v38  ;;  %v456_v38 = vld [vmem:[%s2400_s0 + $0xf8] sm:$0xff] }
  0x41   : > { %1786 = vmatprep.subr.bf16.mxu0 %v1785_v41  ;;  %1796 = vmatprep.subr.bf16.mxu1 %v1785_v41 }
  0x44   : > { %1788 = vmatpush3.bf16.msra.mxu0 %v1785_v41  ;;  %1804 = vmatpush3.bf16.msra.mxu1 %v1785_v41 }
  0x47   : > { %1662 = vmatmul.mubr.f32.vlgmr.msra.gmra.mrb[0].mxu0 %v426_v42  ;;  %1710 = vmatmul.mubr.f32.vlgmr.msra.gmra.mrb[0].mxu1 %v458_v43 }
  0x48   : > { %1664 = vmatprep.mubr.f32.mxu0 %v427_v44  ;;  %1712 = vmatprep.mubr.f32.mxu1 %v459_v45 }
  0x4b   : > { %1665 = vmatmul.mubr.f32.gmra.mrb[2].mxu0 %v428_v46  ;;  %1713 = vmatmul.mubr.f32.gmra.mrb[2].mxu1 %v460_v47 }
  0x4c   : > { %1667 = vmatprep.mubr.f32.mxu0 %v429_v48  ;;  %1715 = vmatprep.mubr.f32.mxu1 %v461_v49 }
  0x4f   : > { %1668 = vmatmul.mubr.f32.gmra.mrb[4].mxu0 %v430_v50  ;;  %1716 = vmatmul.mubr.f32.gmra.mrb[4].mxu1 %v462_v51 }
  0x50   : > { %1670 = vmatprep.mubr.f32.mxu0 %v431_v52  ;;  %1718 = vmatprep.mubr.f32.mxu1 %v463_v53 }
  0x53   : > { %1671 = vmatmul.mubr.f32.gmra.mrb[6].mxu0 %v432_v54  ;;  %1719 = vmatmul.mubr.f32.gmra.mrb[6].mxu1 %v464_v55 }
  0x54   : > { %1673 = vmatprep.mubr.f32.mxu0 %v433_v56  ;;  %1721 = vmatprep.mubr.f32.mxu1 %v465_v57 }
  0x57   : > { %1674 = vmatmul.mubr.f32.gmra.mrb[8].mxu0 %v434_v58  ;;  %1722 = vmatmul.mubr.f32.gmra.mrb[8].mxu1 %v466_v59 }
  0x58   : > { %1676 = vmatprep.mubr.f32.mxu0 %v435_v60  ;;  %1724 = vmatprep.mubr.f32.mxu1 %v467_v61 }
  0x5b   : > { %1677 = vmatmul.mubr.f32.gmra.mrb[10].mxu0 %v436_v62  ;;  %1725 = vmatmul.mubr.f32.gmra.mrb[10].mxu1 %v468_v63 }
  0x5c   : > { %1679 = vmatprep.mubr.f32.mxu0 %v437_v0  ;;  %1727 = vmatprep.mubr.f32.mxu1 %v469_v1 }
  0x5f   : > { %1680 = vmatmul.mubr.f32.gmra.mrb[12].mxu0 %v438_v2  ;;  %1728 = vmatmul.mubr.f32.gmra.mrb[12].mxu1 %v470_v3 }
  0x60   : > { %1682 = vmatprep.mubr.f32.mxu0 %v439_v4  ;;  %1730 = vmatprep.mubr.f32.mxu1 %v471_v5 }
  0x63   : > { %1683 = vmatmul.mubr.f32.gmra.mrb[14].mxu0 %v440_v6  ;;  %1731 = vmatmul.mubr.f32.gmra.mrb[14].mxu1 %v472_v7 }
  0x64   : > { %1685 = vmatprep.mubr.f32.mxu0 %v441_v8  ;;  %1733 = vmatprep.mubr.f32.mxu1 %v473_v9 }
  0x67   : > { %1686 = vmatmul.mubr.f32.gmra.mrb[16].mxu0 %v442_v10  ;;  %1734 = vmatmul.mubr.f32.gmra.mrb[16].mxu1 %v474_v11 }
  0x68   : > { %1688 = vmatprep.mubr.f32.mxu0 %v443_v12  ;;  %1736 = vmatprep.mubr.f32.mxu1 %v475_v13 }
  0x6b   : > { %1689 = vmatmul.mubr.f32.gmra.mrb[18].mxu0 %v444_v14  ;;  %1737 = vmatmul.mubr.f32.gmra.mrb[18].mxu1 %v476_v15 }
  0x6c   : > { %1691 = vmatprep.mubr.f32.mxu0 %v445_v16  ;;  %1739 = vmatprep.mubr.f32.mxu1 %v477_v17 }
  0x6f   : > { %1692 = vmatmul.mubr.f32.gmra.mrb[20].mxu0 %v446_v18  ;;  %1740 = vmatmul.mubr.f32.gmra.mrb[20].mxu1 %v478_v19 }
  0x70   : > { %1694 = vmatprep.mubr.f32.mxu0 %v447_v20  ;;  %1742 = vmatprep.mubr.f32.mxu1 %v479_v21 }
  0x73   : > { %1695 = vmatmul.mubr.f32.gmra.mrb[22].mxu0 %v448_v22  ;;  %1743 = vmatmul.mubr.f32.gmra.mrb[22].mxu1 %v480_v23 }
  0x74   : > { %1697 = vmatprep.mubr.f32.mxu0 %v449_v24  ;;  %1745 = vmatprep.mubr.f32.mxu1 %v481_v25 }
  0x77   : > { %1698 = vmatmul.mubr.f32.gmra.mrb[24].mxu0 %v450_v26  ;;  %1746 = vmatmul.mubr.f32.gmra.mrb[24].mxu1 %v482_v27 }
  0x78   : > { %1700 = vmatprep.mubr.f32.mxu0 %v451_v28  ;;  %1748 = vmatprep.mubr.f32.mxu1 %v483_v29 }
  0x7b   : > { %1701 = vmatmul.mubr.f32.gmra.mrb[26].mxu0 %v452_v30  ;;  %1749 = vmatmul.mubr.f32.gmra.mrb[26].mxu1 %v484_v31 }
  0x7c   : > { %1703 = vmatprep.mubr.f32.mxu0 %v453_v32  ;;  %1751 = vmatprep.mubr.f32.mxu1 %v485_v33 }
  0x7f   : > { %1704 = vmatmul.mubr.f32.gmra.mrb[28].mxu0 %v454_v34  ;;  %1752 = vmatmul.mubr.f32.gmra.mrb[28].mxu1 %v486_v35 }
  0x80   : > { %1706 = vmatprep.mubr.f32.mxu0 %v455_v36  ;;  %1754 = vmatprep.mubr.f32.mxu1 %v487_v37 }
  0x83   : > { %1707 = vmatmul.mubr.f32.gmra.mrb[30].mxu0 %v456_v38  ;;  %1755 = vmatmul.mubr.f32.gmra.mrb[30].mxu1 %v488_v39 }
 0x11a   : > { %v1663_v40 = vpop.f32.mrb[0].mxu0  ;;  %v1711_v41 = vpop.f32.mrb[0].mxu1 }
 0x11b   : > { %1086 = vst [vmem:[%s2183_s25 + $0x8] sm:$0xff] %v1663_v40  ;;  %1118 = vst [vmem:[%s2183_s25 + $0x108] sm:$0xff] %v1711_v41  ;;  %v571_v42 = vpop.f32.mrb[1].mxu0  ;;  %v731_v43 = vpop.f32.mrb[1].mxu1 }
 0x11c   : > { %1085 = vst [vmem:[%s2183_s25] sm:$0xff] %v571_v42  ;;  %1117 = vst [vmem:[%s2183_s25 + $0x100] sm:$0xff] %v731_v43 }
 0x11e   : > { %v1666_v44 = vpop.f32.mrb[2].mxu0  ;;  %v1714_v45 = vpop.f32.mrb[2].mxu1 }
 0x11f   : > { %1088 = vst [vmem:[%s2183_s25 + $0x18] sm:$0xff] %v1666_v44  ;;  %1120 = vst [vmem:[%s2183_s25 + $0x118] sm:$0xff] %v1714_v45  ;;  %v581_v46 = vpop.f32.mrb[3].mxu0  ;;  %v741_v47 = vpop.f32.mrb[3].mxu1 }
 0x120   : > { %1087 = vst [vmem:[%s2183_s25 + $0x10] sm:$0xff] %v581_v46  ;;  %1119 = vst [vmem:[%s2183_s25 + $0x110] sm:$0xff] %v741_v47 }
 0x122   : > { %v1669_v48 = vpop.f32.mrb[4].mxu0  ;;  %v1717_v49 = vpop.f32.mrb[4].mxu1  ;;  %v1316_v41 = vld [vmem:[%s2183_s25 + $0x8] sm:$0xff] (%p1935_p6) }
 0x123   : > { %1090 = vst [vmem:[%s2183_s25 + $0x28] sm:$0xff] %v1669_v48  ;;  %1122 = vst [vmem:[%s2183_s25 + $0x128] sm:$0xff] %v1717_v49  ;;  %v591_v50 = vpop.f32.mrb[5].mxu0  ;;  %v751_v51 = vpop.f32.mrb[5].mxu1  ;;  %v1314_v40 = vld [vmem:[%s2183_s25] sm:$0xff] (%p1935_p6) }
 0x124   : > { %1089 = vst [vmem:[%s2183_s25 + $0x20] sm:$0xff] %v591_v50  ;;  %1121 = vst [vmem:[%s2183_s25 + $0x120] sm:$0xff] %v751_v51 }
 0x125   : > { %1315 = vst [vmem:[%s2258_s28] sm:$0xff] (%p1935_p6), %v1314_v40  ;;  %1317 = vst [vmem:[%s2258_s28 + $0x18] sm:$0xff] (%p1935_p6), %v1316_v41 }
 0x126   : > { %v1672_v52 = vpop.f32.mrb[6].mxu0  ;;  %v1720_v53 = vpop.f32.mrb[6].mxu1  ;;  %v1320_v43 = vld [vmem:[%s2183_s25 + $0x18] sm:$0xff] (%p1935_p6) }
 0x127   : > { %1092 = vst [vmem:[%s2183_s25 + $0x38] sm:$0xff] %v1672_v52  ;;  %1124 = vst [vmem:[%s2183_s25 + $0x138] sm:$0xff] %v1720_v53  ;;  %v601_v54 = vpop.f32.mrb[7].mxu0  ;;  %v761_v55 = vpop.f32.mrb[7].mxu1  ;;  %v1318_v42 = vld [vmem:[%s2183_s25 + $0x10] sm:$0xff] (%p1935_p6) }
 0x128   : > { %1091 = vst [vmem:[%s2183_s25 + $0x30] sm:$0xff] %v601_v54  ;;  %1123 = vst [vmem:[%s2183_s25 + $0x130] sm:$0xff] %v761_v55 }
 0x129   : > { %1319 = vst [vmem:[%s2258_s28 + $0x30] sm:$0xff] (%p1935_p6), %v1318_v42  ;;  %1321 = vst [vmem:[%s2258_s28 + $0x48] sm:$0xff] (%p1935_p6), %v1320_v43 }
 0x12a   : > { %v1675_v56 = vpop.f32.mrb[8].mxu0  ;;  %v1723_v57 = vpop.f32.mrb[8].mxu1  ;;  %v1324_v45 = vld [vmem:[%s2183_s25 + $0x28] sm:$0xff] (%p1935_p6) }
 0x12b   : > { %1094 = vst [vmem:[%s2183_s25 + $0x48] sm:$0xff] %v1675_v56  ;;  %1126 = vst [vmem:[%s2183_s25 + $0x148] sm:$0xff] %v1723_v57  ;;  %v611_v58 = vpop.f32.mrb[9].mxu0  ;;  %v771_v59 = vpop.f32.mrb[9].mxu1  ;;  %v1322_v44 = vld [vmem:[%s2183_s25 + $0x20] sm:$0xff] (%p1935_p6) }
 0x12c   : > { %1093 = vst [vmem:[%s2183_s25 + $0x40] sm:$0xff] %v611_v58  ;;  %1125 = vst [vmem:[%s2183_s25 + $0x140] sm:$0xff] %v771_v59 }
 0x12d   : > { %1323 = vst [vmem:[%s2258_s28 + $0x60] sm:$0xff] (%p1935_p6), %v1322_v44  ;;  %1325 = vst [vmem:[%s2258_s28 + $0x78] sm:$0xff] (%p1935_p6), %v1324_v45 }
 0x12e   : > { %v1678_v60 = vpop.f32.mrb[10].mxu0  ;;  %v1726_v61 = vpop.f32.mrb[10].mxu1  ;;  %v1328_v47 = vld [vmem:[%s2183_s25 + $0x38] sm:$0xff] (%p1935_p6) }
 0x12f   : > { %1096 = vst [vmem:[%s2183_s25 + $0x58] sm:$0xff] %v1678_v60  ;;  %1128 = vst [vmem:[%s2183_s25 + $0x158] sm:$0xff] %v1726_v61  ;;  %v621_v62 = vpop.f32.mrb[11].mxu0  ;;  %v781_v63 = vpop.f32.mrb[11].mxu1  ;;  %v1326_v46 = vld [vmem:[%s2183_s25 + $0x30] sm:$0xff] (%p1935_p6) }
 0x130   : > { %1095 = vst [vmem:[%s2183_s25 + $0x50] sm:$0xff] %v621_v62  ;;  %1127 = vst [vmem:[%s2183_s25 + $0x150] sm:$0xff] %v781_v63 }
 0x131   : > { %1327 = vst [vmem:[%s2258_s28 + $0x90] sm:$0xff] (%p1935_p6), %v1326_v46  ;;  %1329 = vst [vmem:[%s2258_s28 + $0xa8] sm:$0xff] (%p1935_p6), %v1328_v47 }
 0x132   : > { %v1681_v0 = vpop.f32.mrb[12].mxu0  ;;  %v1729_v1 = vpop.f32.mrb[12].mxu1  ;;  %v1332_v49 = vld [vmem:[%s2183_s25 + $0x48] sm:$0xff] (%p1935_p6) }
 0x133   : > { %1098 = vst [vmem:[%s2183_s25 + $0x68] sm:$0xff] %v1681_v0  ;;  %1130 = vst [vmem:[%s2183_s25 + $0x168] sm:$0xff] %v1729_v1  ;;  %v631_v2 = vpop.f32.mrb[13].mxu0  ;;  %v791_v3 = vpop.f32.mrb[13].mxu1  ;;  %v1330_v48 = vld [vmem:[%s2183_s25 + $0x40] sm:$0xff] (%p1935_p6) }
 0x134   : > { %1097 = vst [vmem:[%s2183_s25 + $0x60] sm:$0xff] %v631_v2  ;;  %1129 = vst [vmem:[%s2183_s25 + $0x160] sm:$0xff] %v791_v3 }
 0x135   : > { %1331 = vst [vmem:[%s2258_s28 + $0xc0] sm:$0xff] (%p1935_p6), %v1330_v48  ;;  %1333 = vst [vmem:[%s2258_s28 + $0xd8] sm:$0xff] (%p1935_p6), %v1332_v49 }
 0x136   : > { %v1684_v4 = vpop.f32.mrb[14].mxu0  ;;  %v1732_v5 = vpop.f32.mrb[14].mxu1  ;;  %v1336_v51 = vld [vmem:[%s2183_s25 + $0x58] sm:$0xff] (%p1935_p6) }
 0x137   : > { %1100 = vst [vmem:[%s2183_s25 + $0x78] sm:$0xff] %v1684_v4  ;;  %1132 = vst [vmem:[%s2183_s25 + $0x178] sm:$0xff] %v1732_v5  ;;  %v641_v6 = vpop.f32.mrb[15].mxu0  ;;  %v801_v7 = vpop.f32.mrb[15].mxu1  ;;  %v1334_v50 = vld [vmem:[%s2183_s25 + $0x50] sm:$0xff] (%p1935_p6) }
 0x138   : > { %1099 = vst [vmem:[%s2183_s25 + $0x70] sm:$0xff] %v641_v6  ;;  %1131 = vst [vmem:[%s2183_s25 + $0x170] sm:$0xff] %v801_v7 }
 0x139   : > { %1335 = vst [vmem:[%s2258_s28 + $0xf0] sm:$0xff] (%p1935_p6), %v1334_v50  ;;  %1337 = vst [vmem:[%s2258_s28 + $0x108] sm:$0xff] (%p1935_p6), %v1336_v51 }
 0x13a   : > { %v1687_v8 = vpop.f32.mrb[16].mxu0  ;;  %v1735_v9 = vpop.f32.mrb[16].mxu1  ;;  %v1340_v53 = vld [vmem:[%s2183_s25 + $0x68] sm:$0xff] (%p1935_p6) }
 0x13b   : > { %1102 = vst [vmem:[%s2183_s25 + $0x88] sm:$0xff] %v1687_v8  ;;  %1134 = vst [vmem:[%s2183_s25 + $0x188] sm:$0xff] %v1735_v9  ;;  %v651_v10 = vpop.f32.mrb[17].mxu0  ;;  %v811_v11 = vpop.f32.mrb[17].mxu1  ;;  %v1338_v52 = vld [vmem:[%s2183_s25 + $0x60] sm:$0xff] (%p1935_p6)  ;;  %v1380_v9 = vld [vmem:[%s2183_s25 + $0x108] sm:$0xff] (%p1935_p6) }
 0x13c   : > { %1101 = vst [vmem:[%s2183_s25 + $0x80] sm:$0xff] %v651_v10  ;;  %1133 = vst [vmem:[%s2183_s25 + $0x180] sm:$0xff] %v811_v11  ;;  %v1378_v8 = vld [vmem:[%s2183_s25 + $0x100] sm:$0xff] (%p1935_p6)  ;;  %v1382_v10 = vld [vmem:[%s2183_s25 + $0x110] sm:$0xff] (%p1935_p6) }
 0x13d   : > { %1339 = vst [vmem:[%s2258_s28 + $0x120] sm:$0xff] (%p1935_p6), %v1338_v52  ;;  %1341 = vst [vmem:[%s2258_s28 + $0x138] sm:$0xff] (%p1935_p6), %v1340_v53  ;;  %v1384_v11 = vld [vmem:[%s2183_s25 + $0x118] sm:$0xff] (%p1935_p6) }
 0x13e   : > { %v1690_v12 = vpop.f32.mrb[18].mxu0  ;;  %v1738_v13 = vpop.f32.mrb[18].mxu1  ;;  %v1344_v55 = vld [vmem:[%s2183_s25 + $0x78] sm:$0xff] (%p1935_p6)  ;;  %1379 = vst [vmem:[%s2258_s28 + $0x300] sm:$0xff] (%p1935_p6), %v1378_v8  ;;  %1381 = vst [vmem:[%s2258_s28 + $0x318] sm:$0xff] (%p1935_p6), %v1380_v9 }
 0x13f   : > { %1104 = vst [vmem:[%s2183_s25 + $0x98] sm:$0xff] %v1690_v12  ;;  %1136 = vst [vmem:[%s2183_s25 + $0x198] sm:$0xff] %v1738_v13  ;;  %v661_v14 = vpop.f32.mrb[19].mxu0  ;;  %v821_v15 = vpop.f32.mrb[19].mxu1  ;;  %v1342_v54 = vld [vmem:[%s2183_s25 + $0x70] sm:$0xff] (%p1935_p6)  ;;  %v1386_v12 = vld [vmem:[%s2183_s25 + $0x120] sm:$0xff] (%p1935_p6) }
 0x140   : > { %1103 = vst [vmem:[%s2183_s25 + $0x90] sm:$0xff] %v661_v14  ;;  %1135 = vst [vmem:[%s2183_s25 + $0x190] sm:$0xff] %v821_v15  ;;  %v1388_v13 = vld [vmem:[%s2183_s25 + $0x128] sm:$0xff] (%p1935_p6)  ;;  %v1390_v14 = vld [vmem:[%s2183_s25 + $0x130] sm:$0xff] (%p1935_p6) }
 0x141   : > { %1343 = vst [vmem:[%s2258_s28 + $0x150] sm:$0xff] (%p1935_p6), %v1342_v54  ;;  %1345 = vst [vmem:[%s2258_s28 + $0x168] sm:$0xff] (%p1935_p6), %v1344_v55  ;;  %v1392_v15 = vld [vmem:[%s2183_s25 + $0x138] sm:$0xff] (%p1935_p6) }
 0x142   : > { %v1693_v16 = vpop.f32.mrb[20].mxu0  ;;  %v1741_v17 = vpop.f32.mrb[20].mxu1  ;;  %v1348_v57 = vld [vmem:[%s2183_s25 + $0x88] sm:$0xff] (%p1935_p6)  ;;  %1383 = vst [vmem:[%s2258_s28 + $0x330] sm:$0xff] (%p1935_p6), %v1382_v10  ;;  %1385 = vst [vmem:[%s2258_s28 + $0x348] sm:$0xff] (%p1935_p6), %v1384_v11 }
 0x143   : > { %1106 = vst [vmem:[%s2183_s25 + $0xa8] sm:$0xff] %v1693_v16  ;;  %1138 = vst [vmem:[%s2183_s25 + $0x1a8] sm:$0xff] %v1741_v17  ;;  %v671_v18 = vpop.f32.mrb[21].mxu0  ;;  %v831_v19 = vpop.f32.mrb[21].mxu1  ;;  %v1346_v56 = vld [vmem:[%s2183_s25 + $0x80] sm:$0xff] (%p1935_p6)  ;;  %v1396_v17 = vld [vmem:[%s2183_s25 + $0x148] sm:$0xff] (%p1935_p6) }
 0x144   : > { %1105 = vst [vmem:[%s2183_s25 + $0xa0] sm:$0xff] %v671_v18  ;;  %1137 = vst [vmem:[%s2183_s25 + $0x1a0] sm:$0xff] %v831_v19  ;;  %v1394_v16 = vld [vmem:[%s2183_s25 + $0x140] sm:$0xff] (%p1935_p6)  ;;  %v1398_v18 = vld [vmem:[%s2183_s25 + $0x150] sm:$0xff] (%p1935_p6) }
 0x145   : > { %1347 = vst [vmem:[%s2258_s28 + $0x180] sm:$0xff] (%p1935_p6), %v1346_v56  ;;  %1349 = vst [vmem:[%s2258_s28 + $0x198] sm:$0xff] (%p1935_p6), %v1348_v57  ;;  %v1400_v19 = vld [vmem:[%s2183_s25 + $0x158] sm:$0xff] (%p1935_p6) }
 0x146   : > { %v1696_v20 = vpop.f32.mrb[22].mxu0  ;;  %v1744_v21 = vpop.f32.mrb[22].mxu1  ;;  %v1352_v59 = vld [vmem:[%s2183_s25 + $0x98] sm:$0xff] (%p1935_p6)  ;;  %1387 = vst [vmem:[%s2258_s28 + $0x360] sm:$0xff] (%p1935_p6), %v1386_v12  ;;  %1389 = vst [vmem:[%s2258_s28 + $0x378] sm:$0xff] (%p1935_p6), %v1388_v13 }
 0x147   : > { %1108 = vst [vmem:[%s2183_s25 + $0xb8] sm:$0xff] %v1696_v20  ;;  %1140 = vst [vmem:[%s2183_s25 + $0x1b8] sm:$0xff] %v1744_v21  ;;  %v681_v22 = vpop.f32.mrb[23].mxu0  ;;  %v841_v23 = vpop.f32.mrb[23].mxu1  ;;  %v1350_v58 = vld [vmem:[%s2183_s25 + $0x90] sm:$0xff] (%p1935_p6)  ;;  %v1402_v20 = vld [vmem:[%s2183_s25 + $0x160] sm:$0xff] (%p1935_p6) }
 0x148   : > { %1107 = vst [vmem:[%s2183_s25 + $0xb0] sm:$0xff] %v681_v22  ;;  %1139 = vst [vmem:[%s2183_s25 + $0x1b0] sm:$0xff] %v841_v23  ;;  %v1404_v21 = vld [vmem:[%s2183_s25 + $0x168] sm:$0xff] (%p1935_p6)  ;;  %v1406_v22 = vld [vmem:[%s2183_s25 + $0x170] sm:$0xff] (%p1935_p6) }
 0x149   : > { %1351 = vst [vmem:[%s2258_s28 + $0x1b0] sm:$0xff] (%p1935_p6), %v1350_v58  ;;  %1353 = vst [vmem:[%s2258_s28 + $0x1c8] sm:$0xff] (%p1935_p6), %v1352_v59  ;;  %v1408_v23 = vld [vmem:[%s2183_s25 + $0x178] sm:$0xff] (%p1935_p6) }
 0x14a   : > { %v1699_v24 = vpop.f32.mrb[24].mxu0  ;;  %v1747_v25 = vpop.f32.mrb[24].mxu1  ;;  %v1356_v61 = vld [vmem:[%s2183_s25 + $0xa8] sm:$0xff] (%p1935_p6)  ;;  %1391 = vst [vmem:[%s2258_s28 + $0x390] sm:$0xff] (%p1935_p6), %v1390_v14  ;;  %1393 = vst [vmem:[%s2258_s28 + $0x3a8] sm:$0xff] (%p1935_p6), %v1392_v15 }
 0x14b   : > { %1110 = vst [vmem:[%s2183_s25 + $0xc8] sm:$0xff] %v1699_v24  ;;  %1142 = vst [vmem:[%s2183_s25 + $0x1c8] sm:$0xff] %v1747_v25  ;;  %v691_v26 = vpop.f32.mrb[25].mxu0  ;;  %v851_v27 = vpop.f32.mrb[25].mxu1  ;;  %v1354_v60 = vld [vmem:[%s2183_s25 + $0xa0] sm:$0xff] (%p1935_p6)  ;;  %v1412_v25 = vld [vmem:[%s2183_s25 + $0x188] sm:$0xff] (%p1935_p6) }
 0x14c   : > { %1109 = vst [vmem:[%s2183_s25 + $0xc0] sm:$0xff] %v691_v26  ;;  %1141 = vst [vmem:[%s2183_s25 + $0x1c0] sm:$0xff] %v851_v27  ;;  %v1410_v24 = vld [vmem:[%s2183_s25 + $0x180] sm:$0xff] (%p1935_p6)  ;;  %v1414_v26 = vld [vmem:[%s2183_s25 + $0x190] sm:$0xff] (%p1935_p6) }
 0x14d   : > { %1355 = vst [vmem:[%s2258_s28 + $0x1e0] sm:$0xff] (%p1935_p6), %v1354_v60  ;;  %1357 = vst [vmem:[%s2258_s28 + $0x1f8] sm:$0xff] (%p1935_p6), %v1356_v61  ;;  %v1416_v27 = vld [vmem:[%s2183_s25 + $0x198] sm:$0xff] (%p1935_p6) }
 0x14e   : > { %v1702_v28 = vpop.f32.mrb[26].mxu0  ;;  %v1750_v29 = vpop.f32.mrb[26].mxu1  ;;  %v1360_v63 = vld [vmem:[%s2183_s25 + $0xb8] sm:$0xff] (%p1935_p6)  ;;  %1395 = vst [vmem:[%s2258_s28 + $0x3c0] sm:$0xff] (%p1935_p6), %v1394_v16  ;;  %1397 = vst [vmem:[%s2258_s28 + $0x3d8] sm:$0xff] (%p1935_p6), %v1396_v17 }
 0x14f   : > { %1112 = vst [vmem:[%s2183_s25 + $0xd8] sm:$0xff] %v1702_v28  ;;  %1144 = vst [vmem:[%s2183_s25 + $0x1d8] sm:$0xff] %v1750_v29  ;;  %v701_v30 = vpop.f32.mrb[27].mxu0  ;;  %v861_v31 = vpop.f32.mrb[27].mxu1  ;;  %v1358_v62 = vld [vmem:[%s2183_s25 + $0xb0] sm:$0xff] (%p1935_p6)  ;;  %v1418_v28 = vld [vmem:[%s2183_s25 + $0x1a0] sm:$0xff] (%p1935_p6) }
 0x150   : > { %1111 = vst [vmem:[%s2183_s25 + $0xd0] sm:$0xff] %v701_v30  ;;  %1143 = vst [vmem:[%s2183_s25 + $0x1d0] sm:$0xff] %v861_v31  ;;  %v1420_v29 = vld [vmem:[%s2183_s25 + $0x1a8] sm:$0xff] (%p1935_p6)  ;;  %v1422_v30 = vld [vmem:[%s2183_s25 + $0x1b0] sm:$0xff] (%p1935_p6) }
 0x151   : > { %1359 = vst [vmem:[%s2258_s28 + $0x210] sm:$0xff] (%p1935_p6), %v1358_v62  ;;  %1361 = vst [vmem:[%s2258_s28 + $0x228] sm:$0xff] (%p1935_p6), %v1360_v63  ;;  %v1424_v31 = vld [vmem:[%s2183_s25 + $0x1b8] sm:$0xff] (%p1935_p6) }
 0x152   : > { %v1705_v32 = vpop.f32.mrb[28].mxu0  ;;  %v1753_v33 = vpop.f32.mrb[28].mxu1  ;;  %1155 = sbr.rel (!%p1935_p6) target bundleno = 357 (0x165), region = 78  ;;  %v1364_v1 = vld [vmem:[%s2183_s25 + $0xc8] sm:$0xff] (%p1935_p6)  ;;  %1399 = vst [vmem:[%s2258_s28 + $0x3f0] sm:$0xff] (%p1935_p6), %v1398_v18  ;;  %1401 = vst [vmem:[%s2258_s28 + $0x408] sm:$0xff] (%p1935_p6), %v1400_v19 }
 0x153   : > { %1114 = vst [vmem:[%s2183_s25 + $0xe8] sm:$0xff] %v1705_v32  ;;  %1146 = vst [vmem:[%s2183_s25 + $0x1e8] sm:$0xff] %v1753_v33  ;;  %v711_v34 = vpop.f32.mrb[29].mxu0  ;;  %v871_v35 = vpop.f32.mrb[29].mxu1  ;;  %v1362_v0 = vld [vmem:[%s2183_s25 + $0xc0] sm:$0xff] (%p1935_p6)  ;;  %v1428_v33 = vld [vmem:[%s2183_s25 + $0x1c8] sm:$0xff] (%p1935_p6) }
 0x154   : > { %1113 = vst [vmem:[%s2183_s25 + $0xe0] sm:$0xff] %v711_v34  ;;  %1145 = vst [vmem:[%s2183_s25 + $0x1e0] sm:$0xff] %v871_v35  ;;  %v1426_v32 = vld [vmem:[%s2183_s25 + $0x1c0] sm:$0xff] (%p1935_p6) }
 0x155   : > { %1363 = vst [vmem:[%s2258_s28 + $0x240] sm:$0xff] (%p1935_p6), %v1362_v0  ;;  %1365 = vst [vmem:[%s2258_s28 + $0x258] sm:$0xff] (%p1935_p6), %v1364_v1 }
 0x156   : > { %v1708_v36 = vpop.f32.mrb[30].mxu0  ;;  %v1756_v37 = vpop.f32.mrb[30].mxu1  ;;  %v1368_v3 = vld [vmem:[%s2183_s25 + $0xd8] sm:$0xff] (%p1935_p6)  ;;  %1403 = vst [vmem:[%s2258_s28 + $0x420] sm:$0xff] (%p1935_p6), %v1402_v20  ;;  %1405 = vst [vmem:[%s2258_s28 + $0x438] sm:$0xff] (%p1935_p6), %v1404_v21 }
 0x157   : > { %1116 = vst [vmem:[%s2183_s25 + $0xf8] sm:$0xff] %v1708_v36  ;;  %1148 = vst [vmem:[%s2183_s25 + $0x1f8] sm:$0xff] %v1756_v37  ;;  %v721_v38 = vpop.f32.mrb[31].mxu0  ;;  %v881_v39 = vpop.f32.mrb[31].mxu1  ;;  %v1366_v2 = vld [vmem:[%s2183_s25 + $0xd0] sm:$0xff] (%p1935_p6)  ;;  %v1432_v35 = vld [vmem:[%s2183_s25 + $0x1d8] sm:$0xff] (%p1935_p6) }
 0x158   : > { %1115 = vst [vmem:[%s2183_s25 + $0xf0] sm:$0xff] %v721_v38  ;;  %1147 = vst [vmem:[%s2183_s25 + $0x1f0] sm:$0xff] %v881_v39  ;;  %v1430_v34 = vld [vmem:[%s2183_s25 + $0x1d0] sm:$0xff] (%p1935_p6) }
 0x159   : > { %1367 = vst [vmem:[%s2258_s28 + $0x270] sm:$0xff] %v1366_v2  ;;  %1369 = vst [vmem:[%s2258_s28 + $0x288] sm:$0xff] %v1368_v3 }
 0x15a   : > { %v1372_v5 = vld [vmem:[%s2183_s25 + $0xe8] sm:$0xff]  ;;  %1407 = vst [vmem:[%s2258_s28 + $0x450] sm:$0xff] %v1406_v22  ;;  %1409 = vst [vmem:[%s2258_s28 + $0x468] sm:$0xff] %v1408_v23 }
 0x15b   : > { %v1370_v4 = vld [vmem:[%s2183_s25 + $0xe0] sm:$0xff]  ;;  %1373 = vst [vmem:[%s2258_s28 + $0x2b8] sm:$0xff] %v1372_v5  ;;  %1411 = vst [vmem:[%s2258_s28 + $0x480] sm:$0xff] %v1410_v24  ;;  %v1436_v37 = vld [vmem:[%s2183_s25 + $0x1e8] sm:$0xff] }
 0x15c   : > { %1371 = vst [vmem:[%s2258_s28 + $0x2a0] sm:$0xff] %v1370_v4  ;;  %1413 = vst [vmem:[%s2258_s28 + $0x498] sm:$0xff] %v1412_v25  ;;  %v1434_v36 = vld [vmem:[%s2183_s25 + $0x1e0] sm:$0xff] }
 0x15d   : > { %1415 = vst [vmem:[%s2258_s28 + $0x4b0] sm:$0xff] %v1414_v26  ;;  %1417 = vst [vmem:[%s2258_s28 + $0x4c8] sm:$0xff] %v1416_v27 }
 0x15e   : > { %v1376_v7 = vld [vmem:[%s2183_s25 + $0xf8] sm:$0xff]  ;;  %1419 = vst [vmem:[%s2258_s28 + $0x4e0] sm:$0xff] %v1418_v28  ;;  %1421 = vst [vmem:[%s2258_s28 + $0x4f8] sm:$0xff] %v1420_v29 }
 0x15f   : > { %v1374_v6 = vld [vmem:[%s2183_s25 + $0xf0] sm:$0xff]  ;;  %1377 = vst [vmem:[%s2258_s28 + $0x2e8] sm:$0xff] %v1376_v7  ;;  %1423 = vst [vmem:[%s2258_s28 + $0x510] sm:$0xff] %v1422_v30  ;;  %v1440_v39 = vld [vmem:[%s2183_s25 + $0x1f8] sm:$0xff] }
 0x160   : > { %1375 = vst [vmem:[%s2258_s28 + $0x2d0] sm:$0xff] %v1374_v6  ;;  %1425 = vst [vmem:[%s2258_s28 + $0x528] sm:$0xff] %v1424_v31  ;;  %v1438_v38 = vld [vmem:[%s2183_s25 + $0x1f0] sm:$0xff] }
 0x161   : > { %1427 = vst [vmem:[%s2258_s28 + $0x540] sm:$0xff] %v1426_v32  ;;  %1429 = vst [vmem:[%s2258_s28 + $0x558] sm:$0xff] %v1428_v33 }
 0x162   : > { %1431 = vst [vmem:[%s2258_s28 + $0x570] sm:$0xff] %v1430_v34  ;;  %1433 = vst [vmem:[%s2258_s28 + $0x588] sm:$0xff] %v1432_v35 }
 0x163   : > { %1435 = vst [vmem:[%s2258_s28 + $0x5a0] sm:$0xff] %v1434_v36  ;;  %1437 = vst [vmem:[%s2258_s28 + $0x5b8] sm:$0xff] %v1436_v37 }
 0x164   : > { %1439 = vst [vmem:[%s2258_s28 + $0x5d0] sm:$0xff] %v1438_v38  ;;  %1441 = vst [vmem:[%s2258_s28 + $0x5e8] sm:$0xff] %v1440_v39 }
 0x165 PF: > { %s12_s13 = sadd.s32 1, %s1883_s13   ;;  %s2404_s9 = smov %s1871_s10 }
 0x166   : > { %p9_p11 = scmp.ge.s32.totalorder %s12_s13, 5   ;;  %s2405_s10 = smov %s1940_s19 }
 0x167   : > { %s2406_s11 = smov %s1879_s12  ;;  %s2407_s12 = smov %s2409_s14 }
 0x168   :  { %11 = sbr.rel (!%p9_p11) target bundleno = 3 (0x3), region = 150 }

// kernel: self_attention_forward.5
= control target key start
LH: loop header
LB: loop body
LE: loop exit
PB: predicated region body
PF: predicated region fallthrough
CT: control target
= control target key end

     0   :  { %s1437_s0 = inlined_call_operand.vmem [shape: f32[512,128], index: 0, kind: input, shape index: {}]   ;;  %s1438_s1 = inlined_call_operand.vmem [shape: f32[128,128], index: 1, kind: input, shape index: {}]   ;;  %s1439_s2 = inlined_call_operand.hbm [shape: f32[512,128], index: 2, kind: output, shape index: {}]  }
   0x1   :  { %v208_v0 = vld [vmem:[%s1438_s1] sm:$0xff]  ;;  %v209_v1 = vld [vmem:[%s1438_s1 + $0x8] sm:$0xff]  ;;  %v210_v2 = vld [vmem:[%s1438_s1 + $0x10] sm:$0xff] }
   0x2   :  { %v1092_v3 = vpack.c.bf16 %v209_v1, %v208_v0  ;;  %v211_v4 = vld [vmem:[%s1438_s1 + $0x18] sm:$0xff]  ;;  %v212_v6 = vld [vmem:[%s1438_s1 + $0x20] sm:$0xff]  ;;  %v213_v7 = vld [vmem:[%s1438_s1 + $0x28] sm:$0xff] }
   0x3   :  { %v1096_v5 = vpack.c.bf16 %v211_v4, %v210_v2  ;;  %v1100_v8 = vpack.c.bf16 %v213_v7, %v212_v6  ;;  %v144_v9 = vld [vmem:[%s1437_s0] sm:$0xff]  ;;  %v214_v11 = vld [vmem:[%s1438_s1 + $0x30] sm:$0xff]  ;;  %v215_v12 = vld [vmem:[%s1438_s1 + $0x38] sm:$0xff] }
   0x4   :  { %1093 = vmatprep.subr.bf16.mxu0 %v1092_v3  ;;  %1124 = vmatprep.subr.bf16.mxu1 %v1092_v3  ;;  %v176_v10 = vld [vmem:[%s1437_s0 + $0x100] sm:$0xff]  ;;  %v1104_v13 = vpack.c.bf16 %v215_v12, %v214_v11  ;;  %v217_v15 = vld [vmem:[%s1438_s1 + $0x48] sm:$0xff]  ;;  %v218_v17 = vld [vmem:[%s1438_s1 + $0x50] sm:$0xff] }
   0x5   :  { %1095 = vmatpush3.bf16.msra.mxu0 %v1092_v3  ;;  %1132 = vmatpush3.bf16.msra.mxu1 %v1092_v3  ;;  %v216_v14 = vld [vmem:[%s1438_s1 + $0x40] sm:$0xff]  ;;  %v219_v18 = vld [vmem:[%s1438_s1 + $0x58] sm:$0xff]  ;;  %v221_v21 = vld [vmem:[%s1438_s1 + $0x68] sm:$0xff] }
   0x6   :  { %1097 = vmatprep.subr.bf16.mxu0 %v1096_v5  ;;  %1125 = vmatprep.subr.bf16.mxu1 %v1096_v5  ;;  %v1108_v16 = vpack.c.bf16 %v217_v15, %v216_v14  ;;  %v1112_v19 = vpack.c.bf16 %v219_v18, %v218_v17  ;;  %v220_v20 = vld [vmem:[%s1438_s1 + $0x60] sm:$0xff]  ;;  %v222_v23 = vld [vmem:[%s1438_s1 + $0x70] sm:$0xff]  ;;  %v223_v24 = vld [vmem:[%s1438_s1 + $0x78] sm:$0xff] }
   0x7   :  { %996 = vmatprep.mubr.f32.mxu0 %v144_v9  ;;  %1044 = vmatprep.mubr.f32.mxu1 %v176_v10  ;;  %v1116_v22 = vpack.c.bf16 %v221_v21, %v220_v20  ;;  %v1120_v25 = vpack.c.bf16 %v223_v24, %v222_v23 }
   0x9   :  { %1099 = vmatpush3.bf16.msra.mxu0 %v1096_v5  ;;  %1133 = vmatpush3.bf16.msra.mxu1 %v1096_v5 }
   0xa   :  { %1101 = vmatprep.subr.bf16.mxu0 %v1100_v8  ;;  %1126 = vmatprep.subr.bf16.mxu1 %v1100_v8 }
   0xd   :  { %1103 = vmatpush3.bf16.msra.mxu0 %v1100_v8  ;;  %1134 = vmatpush3.bf16.msra.mxu1 %v1100_v8 }
   0xe   :  { %1105 = vmatprep.subr.bf16.mxu0 %v1104_v13  ;;  %1127 = vmatprep.subr.bf16.mxu1 %v1104_v13 }
  0x11   :  { %1107 = vmatpush3.bf16.msra.mxu0 %v1104_v13  ;;  %1135 = vmatpush3.bf16.msra.mxu1 %v1104_v13 }
  0x12   :  { %1109 = vmatprep.subr.bf16.mxu0 %v1108_v16  ;;  %1128 = vmatprep.subr.bf16.mxu1 %v1108_v16 }
  0x15   :  { %1111 = vmatpush3.bf16.msra.mxu0 %v1108_v16  ;;  %1136 = vmatpush3.bf16.msra.mxu1 %v1108_v16 }
  0x16   :  { %1113 = vmatprep.subr.bf16.mxu0 %v1112_v19  ;;  %1129 = vmatprep.subr.bf16.mxu1 %v1112_v19 }
  0x19   :  { %1115 = vmatpush3.bf16.msra.mxu0 %v1112_v19  ;;  %1137 = vmatpush3.bf16.msra.mxu1 %v1112_v19 }
  0x1a   :  { %1117 = vmatprep.subr.bf16.mxu0 %v1116_v22  ;;  %1130 = vmatprep.subr.bf16.mxu1 %v1116_v22 }
  0x1b   :  { %7 = vsyncpa [#allocation4], 0  ;;  %v145_v26 = vld [vmem:[%s1437_s0 + $0x8] sm:$0xff]  ;;  %v146_v28 = vld [vmem:[%s1437_s0 + $0x10] sm:$0xff] }
  0x1c   :  { %v177_v27 = vld [vmem:[%s1437_s0 + $0x108] sm:$0xff]  ;;  %v178_v29 = vld [vmem:[%s1437_s0 + $0x110] sm:$0xff]  ;;  %v147_v30 = vld [vmem:[%s1437_s0 + $0x18] sm:$0xff] }
  0x1d   :  { %1119 = vmatpush3.bf16.msra.mxu0 %v1116_v22  ;;  %1138 = vmatpush3.bf16.msra.mxu1 %v1116_v22  ;;  %v179_v31 = vld [vmem:[%s1437_s0 + $0x118] sm:$0xff]  ;;  %v148_v32 = vld [vmem:[%s1437_s0 + $0x20] sm:$0xff]  ;;  %v149_v34 = vld [vmem:[%s1437_s0 + $0x28] sm:$0xff] }
  0x1e   :  { %1121 = vmatprep.subr.bf16.mxu0 %v1120_v25  ;;  %1131 = vmatprep.subr.bf16.mxu1 %v1120_v25  ;;  %v180_v33 = vld [vmem:[%s1437_s0 + $0x120] sm:$0xff]  ;;  %v181_v35 = vld [vmem:[%s1437_s0 + $0x128] sm:$0xff]  ;;  %v150_v36 = vld [vmem:[%s1437_s0 + $0x30] sm:$0xff] }
  0x1f   :  { %v182_v37 = vld [vmem:[%s1437_s0 + $0x130] sm:$0xff]  ;;  %v151_v38 = vld [vmem:[%s1437_s0 + $0x38] sm:$0xff]  ;;  %v152_v40 = vld [vmem:[%s1437_s0 + $0x40] sm:$0xff] }
  0x20   :  { %v183_v39 = vld [vmem:[%s1437_s0 + $0x138] sm:$0xff]  ;;  %v184_v41 = vld [vmem:[%s1437_s0 + $0x140] sm:$0xff]  ;;  %v153_v42 = vld [vmem:[%s1437_s0 + $0x48] sm:$0xff] }
  0x21   :  { %1123 = vmatpush3.bf16.msra.mxu0 %v1120_v25  ;;  %1139 = vmatpush3.bf16.msra.mxu1 %v1120_v25  ;;  %v185_v43 = vld [vmem:[%s1437_s0 + $0x148] sm:$0xff]  ;;  %v154_v44 = vld [vmem:[%s1437_s0 + $0x50] sm:$0xff]  ;;  %v155_v46 = vld [vmem:[%s1437_s0 + $0x58] sm:$0xff] }
  0x22   :  { %v186_v45 = vld [vmem:[%s1437_s0 + $0x150] sm:$0xff]  ;;  %v187_v47 = vld [vmem:[%s1437_s0 + $0x158] sm:$0xff]  ;;  %v156_v48 = vld [vmem:[%s1437_s0 + $0x60] sm:$0xff] }
  0x23   :  { %v188_v49 = vld [vmem:[%s1437_s0 + $0x160] sm:$0xff]  ;;  %v157_v50 = vld [vmem:[%s1437_s0 + $0x68] sm:$0xff]  ;;  %v158_v52 = vld [vmem:[%s1437_s0 + $0x70] sm:$0xff] }
  0x24   :  { %997 = vmatmul.mubr.f32.vlgmr.msra.gmra.mrb[0].mxu0 %v145_v26  ;;  %1045 = vmatmul.mubr.f32.vlgmr.msra.gmra.mrb[0].mxu1 %v177_v27  ;;  %v189_v51 = vld [vmem:[%s1437_s0 + $0x168] sm:$0xff]  ;;  %v190_v53 = vld [vmem:[%s1437_s0 + $0x170] sm:$0xff]  ;;  %v159_v54 = vld [vmem:[%s1437_s0 + $0x78] sm:$0xff] }
  0x25   :  { %999 = vmatprep.mubr.f32.mxu0 %v146_v28  ;;  %1047 = vmatprep.mubr.f32.mxu1 %v178_v29  ;;  %v191_v55 = vld [vmem:[%s1437_s0 + $0x178] sm:$0xff]  ;;  %v160_v56 = vld [vmem:[%s1437_s0 + $0x80] sm:$0xff]  ;;  %v161_v58 = vld [vmem:[%s1437_s0 + $0x88] sm:$0xff] }
  0x26   :  { %v192_v57 = vld [vmem:[%s1437_s0 + $0x180] sm:$0xff]  ;;  %v193_v59 = vld [vmem:[%s1437_s0 + $0x188] sm:$0xff]  ;;  %v162_v60 = vld [vmem:[%s1437_s0 + $0x90] sm:$0xff] }
  0x27   :  { %v194_v61 = vld [vmem:[%s1437_s0 + $0x190] sm:$0xff]  ;;  %v163_v62 = vld [vmem:[%s1437_s0 + $0x98] sm:$0xff]  ;;  %v164_v0 = vld [vmem:[%s1437_s0 + $0xa0] sm:$0xff] }
  0x28   :  { %1000 = vmatmul.mubr.f32.gmra.mrb[2].mxu0 %v147_v30  ;;  %1048 = vmatmul.mubr.f32.gmra.mrb[2].mxu1 %v179_v31  ;;  %v195_v63 = vld [vmem:[%s1437_s0 + $0x198] sm:$0xff]  ;;  %v196_v1 = vld [vmem:[%s1437_s0 + $0x1a0] sm:$0xff]  ;;  %v165_v2 = vld [vmem:[%s1437_s0 + $0xa8] sm:$0xff] }
  0x29   :  { %1002 = vmatprep.mubr.f32.mxu0 %v148_v32  ;;  %1050 = vmatprep.mubr.f32.mxu1 %v180_v33  ;;  %v197_v3 = vld [vmem:[%s1437_s0 + $0x1a8] sm:$0xff]  ;;  %v166_v4 = vld [vmem:[%s1437_s0 + $0xb0] sm:$0xff]  ;;  %v167_v6 = vld [vmem:[%s1437_s0 + $0xb8] sm:$0xff] }
  0x2a   :  { %v198_v5 = vld [vmem:[%s1437_s0 + $0x1b0] sm:$0xff]  ;;  %v199_v7 = vld [vmem:[%s1437_s0 + $0x1b8] sm:$0xff]  ;;  %v168_v8 = vld [vmem:[%s1437_s0 + $0xc0] sm:$0xff] }
  0x2b   :  { %v200_v9 = vld [vmem:[%s1437_s0 + $0x1c0] sm:$0xff]  ;;  %v169_v10 = vld [vmem:[%s1437_s0 + $0xc8] sm:$0xff]  ;;  %v170_v12 = vld [vmem:[%s1437_s0 + $0xd0] sm:$0xff] }
  0x2c   :  { %1003 = vmatmul.mubr.f32.gmra.mrb[4].mxu0 %v149_v34  ;;  %1051 = vmatmul.mubr.f32.gmra.mrb[4].mxu1 %v181_v35  ;;  %v201_v11 = vld [vmem:[%s1437_s0 + $0x1c8] sm:$0xff]  ;;  %v202_v13 = vld [vmem:[%s1437_s0 + $0x1d0] sm:$0xff]  ;;  %v171_v14 = vld [vmem:[%s1437_s0 + $0xd8] sm:$0xff] }
  0x2d   :  { %1005 = vmatprep.mubr.f32.mxu0 %v150_v36  ;;  %1053 = vmatprep.mubr.f32.mxu1 %v182_v37  ;;  %v203_v15 = vld [vmem:[%s1437_s0 + $0x1d8] sm:$0xff]  ;;  %v172_v16 = vld [vmem:[%s1437_s0 + $0xe0] sm:$0xff]  ;;  %v173_v18 = vld [vmem:[%s1437_s0 + $0xe8] sm:$0xff] }
  0x2e   :  { %v204_v17 = vld [vmem:[%s1437_s0 + $0x1e0] sm:$0xff]  ;;  %v205_v19 = vld [vmem:[%s1437_s0 + $0x1e8] sm:$0xff]  ;;  %v174_v20 = vld [vmem:[%s1437_s0 + $0xf0] sm:$0xff] }
  0x2f   :  { %v206_v21 = vld [vmem:[%s1437_s0 + $0x1f0] sm:$0xff]  ;;  %v175_v22 = vld [vmem:[%s1437_s0 + $0xf8] sm:$0xff] }
  0x30   :  { %1006 = vmatmul.mubr.f32.gmra.mrb[6].mxu0 %v151_v38  ;;  %1054 = vmatmul.mubr.f32.gmra.mrb[6].mxu1 %v183_v39  ;;  %v207_v23 = vld [vmem:[%s1437_s0 + $0x1f8] sm:$0xff]  ;;  %s1167_s0 = smov [#allocation3]  }
  0x31   :  { %1008 = vmatprep.mubr.f32.mxu0 %v152_v40  ;;  %1056 = vmatprep.mubr.f32.mxu1 %v184_v41  ;;  %s873_s24 = sshll.u32 %s1167_s0, 4  ;;  %s874_s24 = int_to_ptr.vmem [resolvable:$true] %s873_s24 }
  0x32   :  { %s1143_s25 = scalar_lea.vmem %s874_s24, 8192  ;;  %p1148_p1 = scmp.lt.s32.totalorder %s874_s24, %s874_s24 }
  0x33   :  { %p1144_p0 = scmp.ne.s32.totalorder %s874_s24, %s1143_s25  ;;  %p1149_p2 = scmp.lt.s32.totalorder %s1143_s25, %s1143_s25 }
  0x34   :  { %1009 = vmatmul.mubr.f32.gmra.mrb[8].mxu0 %v153_v42  ;;  %1057 = vmatmul.mubr.f32.gmra.mrb[8].mxu1 %v185_v43 }
  0x35   :  { %1011 = vmatprep.mubr.f32.mxu0 %v154_v44  ;;  %1059 = vmatprep.mubr.f32.mxu1 %v186_v45  ;;  %p1150_p3 = por %p1149_p2, %p1148_p1 }
  0x37   :  { %p1151_p4 = pnand %p1150_p3, %p1144_p0 }
  0x38   :  { %1012 = vmatmul.mubr.f32.gmra.mrb[10].mxu0 %v155_v46  ;;  %1060 = vmatmul.mubr.f32.gmra.mrb[10].mxu1 %v187_v47 }
  0x39   :  { %1014 = vmatprep.mubr.f32.mxu0 %v156_v48  ;;  %1062 = vmatprep.mubr.f32.mxu1 %v188_v49 }
  0x3c   :  { %1015 = vmatmul.mubr.f32.gmra.mrb[12].mxu0 %v157_v50  ;;  %1063 = vmatmul.mubr.f32.gmra.mrb[12].mxu1 %v189_v51 }
  0x3d   :  { %1017 = vmatprep.mubr.f32.mxu0 %v158_v52  ;;  %1065 = vmatprep.mubr.f32.mxu1 %v190_v53 }
  0x40   :  { %1018 = vmatmul.mubr.f32.gmra.mrb[14].mxu0 %v159_v54  ;;  %1066 = vmatmul.mubr.f32.gmra.mrb[14].mxu1 %v191_v55 }
  0x41   :  { %1020 = vmatprep.mubr.f32.mxu0 %v160_v56  ;;  %1068 = vmatprep.mubr.f32.mxu1 %v192_v57 }
  0x44   :  { %1021 = vmatmul.mubr.f32.gmra.mrb[16].mxu0 %v161_v58  ;;  %1069 = vmatmul.mubr.f32.gmra.mrb[16].mxu1 %v193_v59 }
  0x45   :  { %1023 = vmatprep.mubr.f32.mxu0 %v162_v60  ;;  %1071 = vmatprep.mubr.f32.mxu1 %v194_v61 }
  0x48   :  { %1024 = vmatmul.mubr.f32.gmra.mrb[18].mxu0 %v163_v62  ;;  %1072 = vmatmul.mubr.f32.gmra.mrb[18].mxu1 %v195_v63 }
  0x49   :  { %1026 = vmatprep.mubr.f32.mxu0 %v164_v0  ;;  %1074 = vmatprep.mubr.f32.mxu1 %v196_v1 }
  0x4c   :  { %1027 = vmatmul.mubr.f32.gmra.mrb[20].mxu0 %v165_v2  ;;  %1075 = vmatmul.mubr.f32.gmra.mrb[20].mxu1 %v197_v3 }
  0x4d   :  { %1029 = vmatprep.mubr.f32.mxu0 %v166_v4  ;;  %1077 = vmatprep.mubr.f32.mxu1 %v198_v5 }
  0x50   :  { %1030 = vmatmul.mubr.f32.gmra.mrb[22].mxu0 %v167_v6  ;;  %1078 = vmatmul.mubr.f32.gmra.mrb[22].mxu1 %v199_v7 }
  0x51   :  { %1032 = vmatprep.mubr.f32.mxu0 %v168_v8  ;;  %1080 = vmatprep.mubr.f32.mxu1 %v200_v9 }
  0x54   :  { %1033 = vmatmul.mubr.f32.gmra.mrb[24].mxu0 %v169_v10  ;;  %1081 = vmatmul.mubr.f32.gmra.mrb[24].mxu1 %v201_v11 }
  0x55   :  { %1035 = vmatprep.mubr.f32.mxu0 %v170_v12  ;;  %1083 = vmatprep.mubr.f32.mxu1 %v202_v13 }
  0x58   :  { %1036 = vmatmul.mubr.f32.gmra.mrb[26].mxu0 %v171_v14  ;;  %1084 = vmatmul.mubr.f32.gmra.mrb[26].mxu1 %v203_v15 }
  0x59   :  { %1038 = vmatprep.mubr.f32.mxu0 %v172_v16  ;;  %1086 = vmatprep.mubr.f32.mxu1 %v204_v17 }
  0x5c   :  { %1039 = vmatmul.mubr.f32.gmra.mrb[28].mxu0 %v173_v18  ;;  %1087 = vmatmul.mubr.f32.gmra.mrb[28].mxu1 %v205_v19 }
  0x5d   :  { %1041 = vmatprep.mubr.f32.mxu0 %v174_v20  ;;  %1089 = vmatprep.mubr.f32.mxu1 %v206_v21 }
  0x60   :  { %1042 = vmatmul.mubr.f32.gmra.mrb[30].mxu0 %v175_v22  ;;  %1090 = vmatmul.mubr.f32.gmra.mrb[30].mxu1 %v207_v23 }
  0xf7   :  { %v998_v24 = vpop.f32.mrb[0].mxu0  ;;  %v1046_v25 = vpop.f32.mrb[0].mxu1 }
  0xf8   :  { %805 = vst [vmem:[#allocation3 + $0x8] sm:$0xff] %v998_v24  ;;  %837 = vst [vmem:[#allocation3 + $0x108] sm:$0xff] %v1046_v25  ;;  %v290_v26 = vpop.f32.mrb[1].mxu0  ;;  %v450_v27 = vpop.f32.mrb[1].mxu1 }
  0xf9   :  { %804 = vst [vmem:[#allocation3] sm:$0xff] %v290_v26  ;;  %836 = vst [vmem:[#allocation3 + $0x100] sm:$0xff] %v450_v27 }
  0xfb   :  { %v1001_v28 = vpop.f32.mrb[2].mxu0  ;;  %v1049_v29 = vpop.f32.mrb[2].mxu1 }
  0xfc   :  { %807 = vst [vmem:[#allocation3 + $0x18] sm:$0xff] %v1001_v28  ;;  %839 = vst [vmem:[#allocation3 + $0x118] sm:$0xff] %v1049_v29  ;;  %v300_v30 = vpop.f32.mrb[3].mxu0  ;;  %v460_v31 = vpop.f32.mrb[3].mxu1 }
  0xfd   :  { %806 = vst [vmem:[#allocation3 + $0x10] sm:$0xff] %v300_v30  ;;  %838 = vst [vmem:[#allocation3 + $0x110] sm:$0xff] %v460_v31 }
  0xff   :  { %v1004_v32 = vpop.f32.mrb[4].mxu0  ;;  %v1052_v33 = vpop.f32.mrb[4].mxu1 }
 0x100   :  { %809 = vst [vmem:[#allocation3 + $0x28] sm:$0xff] %v1004_v32  ;;  %841 = vst [vmem:[#allocation3 + $0x128] sm:$0xff] %v1052_v33  ;;  %v310_v34 = vpop.f32.mrb[5].mxu0  ;;  %v470_v35 = vpop.f32.mrb[5].mxu1 }
 0x101   :  { %808 = vst [vmem:[#allocation3 + $0x20] sm:$0xff] %v310_v34  ;;  %840 = vst [vmem:[#allocation3 + $0x120] sm:$0xff] %v470_v35 }
 0x103   :  { %v1007_v36 = vpop.f32.mrb[6].mxu0  ;;  %v1055_v37 = vpop.f32.mrb[6].mxu1 }
 0x104   :  { %811 = vst [vmem:[#allocation3 + $0x38] sm:$0xff] %v1007_v36  ;;  %843 = vst [vmem:[#allocation3 + $0x138] sm:$0xff] %v1055_v37  ;;  %v320_v38 = vpop.f32.mrb[7].mxu0  ;;  %v480_v39 = vpop.f32.mrb[7].mxu1 }
 0x105   :  { %810 = vst [vmem:[#allocation3 + $0x30] sm:$0xff] %v320_v38  ;;  %842 = vst [vmem:[#allocation3 + $0x130] sm:$0xff] %v480_v39 }
 0x107   :  { %v1010_v40 = vpop.f32.mrb[8].mxu0  ;;  %v1058_v41 = vpop.f32.mrb[8].mxu1 }
 0x108   :  { %813 = vst [vmem:[#allocation3 + $0x48] sm:$0xff] %v1010_v40  ;;  %845 = vst [vmem:[#allocation3 + $0x148] sm:$0xff] %v1058_v41  ;;  %v330_v42 = vpop.f32.mrb[9].mxu0  ;;  %v490_v43 = vpop.f32.mrb[9].mxu1 }
 0x109   :  { %812 = vst [vmem:[#allocation3 + $0x40] sm:$0xff] %v330_v42  ;;  %844 = vst [vmem:[#allocation3 + $0x140] sm:$0xff] %v490_v43 }
 0x10b   :  { %v1013_v44 = vpop.f32.mrb[10].mxu0  ;;  %v1061_v45 = vpop.f32.mrb[10].mxu1 }
 0x10c   :  { %815 = vst [vmem:[#allocation3 + $0x58] sm:$0xff] %v1013_v44  ;;  %847 = vst [vmem:[#allocation3 + $0x158] sm:$0xff] %v1061_v45  ;;  %v340_v46 = vpop.f32.mrb[11].mxu0  ;;  %v500_v47 = vpop.f32.mrb[11].mxu1 }
 0x10d   :  { %814 = vst [vmem:[#allocation3 + $0x50] sm:$0xff] %v340_v46  ;;  %846 = vst [vmem:[#allocation3 + $0x150] sm:$0xff] %v500_v47 }
 0x10f   :  { %v1016_v48 = vpop.f32.mrb[12].mxu0  ;;  %v1064_v49 = vpop.f32.mrb[12].mxu1 }
 0x110   :  { %817 = vst [vmem:[#allocation3 + $0x68] sm:$0xff] %v1016_v48  ;;  %849 = vst [vmem:[#allocation3 + $0x168] sm:$0xff] %v1064_v49  ;;  %v350_v50 = vpop.f32.mrb[13].mxu0  ;;  %v510_v51 = vpop.f32.mrb[13].mxu1 }
 0x111   :  { %816 = vst [vmem:[#allocation3 + $0x60] sm:$0xff] %v350_v50  ;;  %848 = vst [vmem:[#allocation3 + $0x160] sm:$0xff] %v510_v51 }
 0x113   :  { %v1019_v52 = vpop.f32.mrb[14].mxu0  ;;  %v1067_v53 = vpop.f32.mrb[14].mxu1 }
 0x114   :  { %819 = vst [vmem:[#allocation3 + $0x78] sm:$0xff] %v1019_v52  ;;  %851 = vst [vmem:[#allocation3 + $0x178] sm:$0xff] %v1067_v53  ;;  %v360_v54 = vpop.f32.mrb[15].mxu0  ;;  %v520_v55 = vpop.f32.mrb[15].mxu1 }
 0x115   :  { %818 = vst [vmem:[#allocation3 + $0x70] sm:$0xff] %v360_v54  ;;  %850 = vst [vmem:[#allocation3 + $0x170] sm:$0xff] %v520_v55 }
 0x117   :  { %v1022_v56 = vpop.f32.mrb[16].mxu0  ;;  %v1070_v57 = vpop.f32.mrb[16].mxu1 }
 0x118   :  { %821 = vst [vmem:[#allocation3 + $0x88] sm:$0xff] %v1022_v56  ;;  %853 = vst [vmem:[#allocation3 + $0x188] sm:$0xff] %v1070_v57  ;;  %v370_v58 = vpop.f32.mrb[17].mxu0  ;;  %v530_v59 = vpop.f32.mrb[17].mxu1 }
 0x119   :  { %820 = vst [vmem:[#allocation3 + $0x80] sm:$0xff] %v370_v58  ;;  %852 = vst [vmem:[#allocation3 + $0x180] sm:$0xff] %v530_v59 }
 0x11b   :  { %v1025_v60 = vpop.f32.mrb[18].mxu0  ;;  %v1073_v61 = vpop.f32.mrb[18].mxu1 }
 0x11c   :  { %823 = vst [vmem:[#allocation3 + $0x98] sm:$0xff] %v1025_v60  ;;  %855 = vst [vmem:[#allocation3 + $0x198] sm:$0xff] %v1073_v61  ;;  %v380_v62 = vpop.f32.mrb[19].mxu0  ;;  %v540_v63 = vpop.f32.mrb[19].mxu1 }
 0x11d   :  { %822 = vst [vmem:[#allocation3 + $0x90] sm:$0xff] %v380_v62  ;;  %854 = vst [vmem:[#allocation3 + $0x190] sm:$0xff] %v540_v63 }
 0x11f   :  { %v1028_v0 = vpop.f32.mrb[20].mxu0  ;;  %v1076_v1 = vpop.f32.mrb[20].mxu1 }
 0x120   :  { %825 = vst [vmem:[#allocation3 + $0xa8] sm:$0xff] %v1028_v0  ;;  %857 = vst [vmem:[#allocation3 + $0x1a8] sm:$0xff] %v1076_v1  ;;  %v390_v2 = vpop.f32.mrb[21].mxu0  ;;  %v550_v3 = vpop.f32.mrb[21].mxu1 }
 0x121   :  { %824 = vst [vmem:[#allocation3 + $0xa0] sm:$0xff] %v390_v2  ;;  %856 = vst [vmem:[#allocation3 + $0x1a0] sm:$0xff] %v550_v3 }
 0x123   :  { %v1031_v4 = vpop.f32.mrb[22].mxu0  ;;  %v1079_v5 = vpop.f32.mrb[22].mxu1 }
 0x124   :  { %827 = vst [vmem:[#allocation3 + $0xb8] sm:$0xff] %v1031_v4  ;;  %859 = vst [vmem:[#allocation3 + $0x1b8] sm:$0xff] %v1079_v5  ;;  %v400_v6 = vpop.f32.mrb[23].mxu0  ;;  %v560_v7 = vpop.f32.mrb[23].mxu1 }
 0x125   :  { %826 = vst [vmem:[#allocation3 + $0xb0] sm:$0xff] %v400_v6  ;;  %858 = vst [vmem:[#allocation3 + $0x1b0] sm:$0xff] %v560_v7 }
 0x127   :  { %v1034_v8 = vpop.f32.mrb[24].mxu0  ;;  %v1082_v9 = vpop.f32.mrb[24].mxu1 }
 0x128   :  { %829 = vst [vmem:[#allocation3 + $0xc8] sm:$0xff] %v1034_v8  ;;  %861 = vst [vmem:[#allocation3 + $0x1c8] sm:$0xff] %v1082_v9  ;;  %v410_v10 = vpop.f32.mrb[25].mxu0  ;;  %v570_v11 = vpop.f32.mrb[25].mxu1 }
 0x129   :  { %828 = vst [vmem:[#allocation3 + $0xc0] sm:$0xff] %v410_v10  ;;  %860 = vst [vmem:[#allocation3 + $0x1c0] sm:$0xff] %v570_v11 }
 0x12b   :  { %v1037_v12 = vpop.f32.mrb[26].mxu0  ;;  %v1085_v13 = vpop.f32.mrb[26].mxu1 }
 0x12c   :  { %831 = vst [vmem:[#allocation3 + $0xd8] sm:$0xff] %v1037_v12  ;;  %863 = vst [vmem:[#allocation3 + $0x1d8] sm:$0xff] %v1085_v13  ;;  %v420_v14 = vpop.f32.mrb[27].mxu0  ;;  %v580_v15 = vpop.f32.mrb[27].mxu1 }
 0x12d   :  { %830 = vst [vmem:[#allocation3 + $0xd0] sm:$0xff] %v420_v14  ;;  %862 = vst [vmem:[#allocation3 + $0x1d0] sm:$0xff] %v580_v15 }
 0x12f   :  { %v1040_v16 = vpop.f32.mrb[28].mxu0  ;;  %v1088_v17 = vpop.f32.mrb[28].mxu1 }
 0x130   :  { %833 = vst [vmem:[#allocation3 + $0xe8] sm:$0xff] %v1040_v16  ;;  %865 = vst [vmem:[#allocation3 + $0x1e8] sm:$0xff] %v1088_v17  ;;  %v430_v18 = vpop.f32.mrb[29].mxu0  ;;  %v590_v19 = vpop.f32.mrb[29].mxu1 }
 0x131   :  { %832 = vst [vmem:[#allocation3 + $0xe0] sm:$0xff] %v430_v18  ;;  %864 = vst [vmem:[#allocation3 + $0x1e0] sm:$0xff] %v590_v19 }
 0x133   :  { %v1043_v20 = vpop.f32.mrb[30].mxu0  ;;  %v1091_v21 = vpop.f32.mrb[30].mxu1 }
 0x134   :  { %835 = vst [vmem:[#allocation3 + $0xf8] sm:$0xff] %v1043_v20  ;;  %867 = vst [vmem:[#allocation3 + $0x1f8] sm:$0xff] %v1091_v21  ;;  %v440_v22 = vpop.f32.mrb[31].mxu0  ;;  %v600_v23 = vpop.f32.mrb[31].mxu1 }
 0x135   :  { %834 = vst [vmem:[#allocation3 + $0xf0] sm:$0xff] %v440_v22  ;;  %866 = vst [vmem:[#allocation3 + $0x1f0] sm:$0xff] %v600_v23 }
 0x136   :  { %1154 = shalt.err (!%p1151_p4)
}
 0x137   :  { %s1155_s28 = scalar_lea.hbm %s1439_s2, 8192 }
 0x138   :  { %p1156_p5 = scmp.ne.s32.totalorder %s1439_s2, %s1155_s28  ;;  %p1159_p6 = scmp.lt.u32.totalorder %s1155_s28, %s1439_s2 }
 0x13a   :  { %p1161_p7 = pnand %p1159_p6, %p1156_p5 }
 0x13c   :  { %1164 = shalt.err (!%p1161_p7)
}
 0x13d   :  { %s1168_s5 = smov 128   ;;  %s1169_s6 = smov 8  }
 0x13e   :  { %879 = dma.vmem_to_hbm [thread:$0]  %s874_s24, 8192, %s1439_s2, [#allocation4], %s1168_s5, %s1168_s5, %s1169_s6  }
 0x13f   :  { %1165 = dma.done.wait [#allocation4], 8192  }
 0x140   :  { %1166 = vsyncadd [#allocation4], 4294959104 }
 0x141   :  { %883 = vsyncpa [#allocation4], 1 }

// kernel: self_attention_forward.4
= control target key start
LH: loop header
LB: loop body
LE: loop exit
PB: predicated region body
PF: predicated region fallthrough
CT: control target
= control target key end

     0   :  { %s9975_s0 = inlined_call_operand.vmem [shape: f32[2,256,384], index: 0, kind: input, shape index: {}, may-alias: {0,1,2}]   ;;  %s9976_s1 = inlined_call_operand.vmem [shape: f32[2,256,384], index: 1, kind: input, shape index: {}, may-alias: {0,1,2}]   ;;  %s9977_s2 = inlined_call_operand.vmem [shape: f32[2,256,384], index: 2, kind: input, shape index: {}, may-alias: {0,1,2}]   ;;  %s9978_s3 = inlined_call_operand.vmem [shape: f32[2,256,128], index: 3, kind: output, shape index: {}]  }
   0x1   :  { %10113 = sst [smem:[#allocation132_spill]] %s9975_s0 }
   0x2   :  { %s6557_s12 = smov 0   ;;  %s6559_s13 = smov 0  }
   0x3   :  { %s6561_s14 = smov 0   ;;  %s6563_s15 = smov 0  }
   0x4   :  { %s6565_s16 = smov 0   ;;  %s6567_s17 = smov 0  }
   0x5   :  { %s6569_s18 = smov 0   ;;  %s6571_s19 = smov 0  }
   0x6   :  { %s6573_s20 = smov 0   ;;  %s6575_s21 = smov 0  }
   0x7   :  { %s6577_s22 = smov 0  }
   0x8 LB: > { %s25_s23 = sadd.s32 1, %s6513_s19  ;;  %s28_s24 = sadd.s32 1, %s6517_s20  ;;  %s6525_s22 = sphi %s6577_s22, %s13_s22   ;;  %s6521_s21 = sphi %s6575_s21, %s10550_s21   ;;  %s6517_s20 = sphi %s6573_s20, %s10549_s20   ;;  %s6513_s19 = sphi %s6571_s19, %s10548_s19   ;;  %s6509_s18 = sphi %s6569_s18, %s10547_s18   ;;  %s6505_s17 = sphi %s6567_s17, %s10546_s17   ;;  %s6501_s16 = sphi %s6565_s16, %s10545_s16   ;;  %s6497_s15 = sphi %s6563_s15, %s10544_s15   ;;  %s6493_s14 = sphi %s6561_s14, %s10543_s14   ;;  %s6489_s13 = sphi %s6559_s13, %s10542_s13   ;;  %s6485_s12 = sphi %s6557_s12, %s10541_s12  }
   0x9   : > { %p26_p0 = scmp.ge.s32.totalorder %s25_s23, 2  ;;  %p48_p1 = scmp.ne.s32.totalorder %s6497_s15, %s6493_s14 }
   0xa   : > { %p49_p2 = scmp.eq.s32.totalorder %s6525_s22, 0  ;;  %s32_s25 = sadd.s32 1, %s6521_s21 }
   0xb   : > { %s10552_s23 = smov (%p26_p0, %s25_s23), 0  ;;  %s10554_s24 = smov (!%p26_p0, %s28_s24), %s6517_s20 }
   0xc   : > { %p30_p3 = scmp.ge.s32.totalorder %s10554_s24, 2  ;;  %p6621_p4 = por %p49_p2, %p48_p1 }
   0xd   : > { %p76_p5 = scmp.ne.s32.totalorder %s6489_s13, %s6485_s12  ;;  %s65_s29 = ssub.s32 %s6513_s19, %s10552_s23 }
   0xe   : > { %s10556_s24 = smov (%p30_p3, %s10554_s24), 0  ;;  %s10558_s25 = smov (!%p30_p3, %s32_s25), %s6521_s21 }
   0xf   : > { %p6630_p6 = por %p76_p5, %p49_p2  ;;  %p34_p7 = scmp.ge.s32.totalorder %s10558_s25, 2 }
  0x10   : > { %s37_s28 = ssub.s32 %s6517_s20, %s10556_s24  ;;  %s41_s30 = sadd.s32 1, %s6497_s15 }
  0x11   : > { %s10560_s25 = smov (%p34_p7, %s10558_s25), 0  ;;  %s69_s5 = sadd.s32 1, %s6489_s13 }
  0x12   : > { %10116 = sst [smem:[#allocation8_spill]] %s10560_s25  ;;  %s36_s4 = ssub.s32 %s6521_s21, %s10560_s25 }
  0x13   : > { %s38_s6 = sor.u32 %s37_s28, %s36_s4  ;;  %s66_s7 = sor.u32 %s65_s29, %s36_s4 }
  0x14   : > { %p39_p8 = scmp.eq.s32.totalorder %s38_s6, 0  ;;  %p67_p9 = scmp.eq.s32.totalorder %s66_s7, 0 }
  0x15   : > { %p5448_p10 = scmp.ge.s32.totalorder %s6525_s22, 8 }
  0x16   : > { %s6645_s8 = scalar_select %p39_p8, %s6497_s15, %s41_s30  }
  0x17   : > { %s6648_s9 = scalar_select %p67_p9, %s6489_s13, %s69_s5  }
  0x18   : > { %158 = sbr.rel (%p5448_p10) target bundleno = 81 (0x51), region = 16 }
  0x1f   : > { %161 = sbr.rel (!%p6621_p4) target bundleno = 49 (0x31), region = 20  ;;  %s163_s10 = sand.u32 (%p6621_p4), 1, %s6497_s15  }
  0x20   : > { %s5951_s11 = smul.u32 (%p6621_p4), 48, %s6517_s20  ;;  %s5449_s25 = sshll.u32 (%p6621_p4), %s163_s10, 7 }
  0x21   : > { %s5952_s28 = smul.u32 (%p6621_p4), 96, %s6521_s21  ;;  %s10117_s0 = sld [smem:[#allocation132_spill]] (%p6621_p4) }
  0x22   : > { %s165_s26 = scalar_lea.vmem (%p6621_p4), [#allocation5], %s5449_s25 }
  0x23   : > { %s169_s29 = sadd.s32 (%p6621_p4), %s5952_s28, %s5951_s11 }
  0x24   : > { %s5452_s4 = sshll.u32 (%p6621_p4), %s169_s29, 3 }
  0x27   : > { %s6659_s5 = scalar_lea.vmem %s10117_s0, %s5452_s4 }
  0x28   : > { %v229_v0 = vld [vmem:[%s6659_s5] sm:$0xff]  ;;  %v231_v1 = vld [vmem:[%s6659_s5 + $0x18] sm:$0xff]  ;;  %v233_v2 = vld [vmem:[%s6659_s5 + $0x30] sm:$0xff] }
  0x29   : > { %230 = vst [vmem:[%s165_s26] sm:$0xff] %v229_v0  ;;  %232 = vst [vmem:[%s165_s26 + $0x8] sm:$0xff] %v231_v1  ;;  %v235_v3 = vld [vmem:[%s6659_s5 + $0x48] sm:$0xff]  ;;  %v237_v4 = vld [vmem:[%s6659_s5 + $0x60] sm:$0xff] }
  0x2a   : > { %234 = vst [vmem:[%s165_s26 + $0x10] sm:$0xff] %v233_v2  ;;  %v239_v5 = vld [vmem:[%s6659_s5 + $0x78] sm:$0xff]  ;;  %236 = vst [vmem:[%s165_s26 + $0x18] sm:$0xff] %v235_v3  ;;  %v241_v6 = vld [vmem:[%s6659_s5 + $0x90] sm:$0xff] }
  0x2b   : > { %238 = vst [vmem:[%s165_s26 + $0x20] sm:$0xff] %v237_v4  ;;  %240 = vst [vmem:[%s165_s26 + $0x28] sm:$0xff] %v239_v5  ;;  %v243_v7 = vld [vmem:[%s6659_s5 + $0xa8] sm:$0xff]  ;;  %v245_v8 = vld [vmem:[%s6659_s5 + $0xc0] sm:$0xff] }
  0x2c   : > { %242 = vst [vmem:[%s165_s26 + $0x30] sm:$0xff] %v241_v6  ;;  %244 = vst [vmem:[%s165_s26 + $0x38] sm:$0xff] %v243_v7  ;;  %v247_v9 = vld [vmem:[%s6659_s5 + $0xd8] sm:$0xff]  ;;  %v249_v10 = vld [vmem:[%s6659_s5 + $0xf0] sm:$0xff] }
  0x2d   : > { %246 = vst [vmem:[%s165_s26 + $0x40] sm:$0xff] %v245_v8  ;;  %v251_v11 = vld [vmem:[%s6659_s5 + $0x108] sm:$0xff]  ;;  %248 = vst [vmem:[%s165_s26 + $0x48] sm:$0xff] %v247_v9  ;;  %v253_v12 = vld [vmem:[%s6659_s5 + $0x120] sm:$0xff] }
  0x2e   : > { %250 = vst [vmem:[%s165_s26 + $0x50] sm:$0xff] %v249_v10  ;;  %252 = vst [vmem:[%s165_s26 + $0x58] sm:$0xff] %v251_v11  ;;  %v255_v13 = vld [vmem:[%s6659_s5 + $0x138] sm:$0xff]  ;;  %v257_v14 = vld [vmem:[%s6659_s5 + $0x150] sm:$0xff] }
  0x2f   : > { %254 = vst [vmem:[%s165_s26 + $0x60] sm:$0xff] %v253_v12  ;;  %256 = vst [vmem:[%s165_s26 + $0x68] sm:$0xff] %v255_v13  ;;  %v259_v15 = vld [vmem:[%s6659_s5 + $0x168] sm:$0xff] }
  0x30   : > { %258 = vst [vmem:[%s165_s26 + $0x70] sm:$0xff] %v257_v14  ;;  %260 = vst [vmem:[%s165_s26 + $0x78] sm:$0xff] %v259_v15 }
  0x31 PF: > { %266 = sbr.rel (!%p6630_p6) target bundleno = 65 (0x41), region = 58  ;;  %s268_s25 = sand.u32 (%p6630_p6), 1, %s6489_s13  }
  0x32   : > { %s5341_s7 = smul.u32 (%p6630_p6), 48, %s6513_s19  ;;  %s5453_s10 = sshll.u32 (%p6630_p6), %s268_s25, 7 }
  0x33   : > { %s5342_s11 = smul.u32 (%p6630_p6), 96, %s6521_s21  ;;  %s270_s5 = scalar_lea.vmem (%p6630_p6), [#allocation6], %s5453_s10 }
  0x35   : > { %s5343_s28 = sadd.s32 (%p6630_p6), %s5342_s11, %s5341_s7 }
  0x36   : > { %s5454_s29 = sshll.u32 (%p6630_p6), %s5343_s28, 3 }
  0x37   : > { %s6685_s30 = scalar_lea.vmem (%p6630_p6), %s9976_s1, %s5454_s29 }
  0x38   : > { %v5455_v16 = vld [vmem:[%s6685_s30 + $0x8] sm:$0xff]  ;;  %v5456_v17 = vld [vmem:[%s6685_s30 + $0x20] sm:$0xff]  ;;  %v5457_v18 = vld [vmem:[%s6685_s30 + $0x38] sm:$0xff] }
  0x39   : > { %336 = vst [vmem:[%s270_s5] sm:$0xff] %v5455_v16  ;;  %338 = vst [vmem:[%s270_s5 + $0x8] sm:$0xff] %v5456_v17  ;;  %v5458_v19 = vld [vmem:[%s6685_s30 + $0x50] sm:$0xff]  ;;  %v5459_v20 = vld [vmem:[%s6685_s30 + $0x68] sm:$0xff] }
  0x3a   : > { %340 = vst [vmem:[%s270_s5 + $0x10] sm:$0xff] %v5457_v18  ;;  %v5460_v21 = vld [vmem:[%s6685_s30 + $0x80] sm:$0xff]  ;;  %342 = vst [vmem:[%s270_s5 + $0x18] sm:$0xff] %v5458_v19  ;;  %v5461_v22 = vld [vmem:[%s6685_s30 + $0x98] sm:$0xff] }
  0x3b   : > { %344 = vst [vmem:[%s270_s5 + $0x20] sm:$0xff] %v5459_v20  ;;  %346 = vst [vmem:[%s270_s5 + $0x28] sm:$0xff] %v5460_v21  ;;  %v5462_v23 = vld [vmem:[%s6685_s30 + $0xb0] sm:$0xff]  ;;  %v5463_v24 = vld [vmem:[%s6685_s30 + $0xc8] sm:$0xff] }
  0x3c   : > { %348 = vst [vmem:[%s270_s5 + $0x30] sm:$0xff] %v5461_v22  ;;  %350 = vst [vmem:[%s270_s5 + $0x38] sm:$0xff] %v5462_v23  ;;  %v5464_v25 = vld [vmem:[%s6685_s30 + $0xe0] sm:$0xff]  ;;  %v5465_v26 = vld [vmem:[%s6685_s30 + $0xf8] sm:$0xff] }
  0x3d   : > { %352 = vst [vmem:[%s270_s5 + $0x40] sm:$0xff] %v5463_v24  ;;  %v5466_v27 = vld [vmem:[%s6685_s30 + $0x110] sm:$0xff]  ;;  %354 = vst [vmem:[%s270_s5 + $0x48] sm:$0xff] %v5464_v25  ;;  %v5467_v28 = vld [vmem:[%s6685_s30 + $0x128] sm:$0xff] }
  0x3e   : > { %356 = vst [vmem:[%s270_s5 + $0x50] sm:$0xff] %v5465_v26  ;;  %358 = vst [vmem:[%s270_s5 + $0x58] sm:$0xff] %v5466_v27  ;;  %v5468_v29 = vld [vmem:[%s6685_s30 + $0x140] sm:$0xff]  ;;  %v5469_v30 = vld [vmem:[%s6685_s30 + $0x158] sm:$0xff] }
  0x3f   : > { %360 = vst [vmem:[%s270_s5 + $0x60] sm:$0xff] %v5467_v28  ;;  %362 = vst [vmem:[%s270_s5 + $0x68] sm:$0xff] %v5468_v29  ;;  %v5470_v31 = vld [vmem:[%s6685_s30 + $0x170] sm:$0xff] }
  0x40   : > { %364 = vst [vmem:[%s270_s5 + $0x70] sm:$0xff] %v5469_v30  ;;  %366 = vst [vmem:[%s270_s5 + $0x78] sm:$0xff] %v5470_v31 }
  0x41 PF: > { %372 = sbr.rel (!%p6630_p6) target bundleno = 81 (0x51), region = 96  ;;  %s374_s26 = sand.u32 (%p6630_p6), 1, %s6489_s13  }
  0x42   : > { %s5349_s25 = smul.u32 (%p6630_p6), 48, %s6513_s19  ;;  %s5471_s7 = sshll.u32 (%p6630_p6), %s374_s26, 7 }
  0x43   : > { %s5350_s10 = smul.u32 (%p6630_p6), 96, %s6521_s21  ;;  %s376_s27 = scalar_lea.vmem (%p6630_p6), [#allocation7], %s5471_s7 }
  0x45   : > { %s5351_s11 = sadd.s32 (%p6630_p6), %s5350_s10, %s5349_s25 }
  0x46   : > { %s5472_s28 = sshll.u32 (%p6630_p6), %s5351_s11, 3 }
  0x47   : > { %s6711_s6 = scalar_lea.vmem (%p6630_p6), %s9977_s2, %s5472_s28 }
  0x48   : > { %v5473_v32 = vld [vmem:[%s6711_s6 + $0x10] sm:$0xff]  ;;  %v5474_v33 = vld [vmem:[%s6711_s6 + $0x28] sm:$0xff]  ;;  %v5475_v34 = vld [vmem:[%s6711_s6 + $0x40] sm:$0xff] }
  0x49   : > { %442 = vst [vmem:[%s376_s27] sm:$0xff] %v5473_v32  ;;  %444 = vst [vmem:[%s376_s27 + $0x8] sm:$0xff] %v5474_v33  ;;  %v5476_v35 = vld [vmem:[%s6711_s6 + $0x58] sm:$0xff]  ;;  %v5477_v36 = vld [vmem:[%s6711_s6 + $0x70] sm:$0xff] }
  0x4a   : > { %446 = vst [vmem:[%s376_s27 + $0x10] sm:$0xff] %v5475_v34  ;;  %v5478_v37 = vld [vmem:[%s6711_s6 + $0x88] sm:$0xff]  ;;  %448 = vst [vmem:[%s376_s27 + $0x18] sm:$0xff] %v5476_v35  ;;  %v5479_v38 = vld [vmem:[%s6711_s6 + $0xa0] sm:$0xff] }
  0x4b   : > { %450 = vst [vmem:[%s376_s27 + $0x20] sm:$0xff] %v5477_v36  ;;  %452 = vst [vmem:[%s376_s27 + $0x28] sm:$0xff] %v5478_v37  ;;  %v5480_v39 = vld [vmem:[%s6711_s6 + $0xb8] sm:$0xff]  ;;  %v5481_v40 = vld [vmem:[%s6711_s6 + $0xd0] sm:$0xff] }
  0x4c   : > { %454 = vst [vmem:[%s376_s27 + $0x30] sm:$0xff] %v5479_v38  ;;  %456 = vst [vmem:[%s376_s27 + $0x38] sm:$0xff] %v5480_v39  ;;  %v5482_v41 = vld [vmem:[%s6711_s6 + $0xe8] sm:$0xff]  ;;  %v5483_v42 = vld [vmem:[%s6711_s6 + $0x100] sm:$0xff] }
  0x4d   : > { %458 = vst [vmem:[%s376_s27 + $0x40] sm:$0xff] %v5481_v40  ;;  %v5484_v43 = vld [vmem:[%s6711_s6 + $0x118] sm:$0xff]  ;;  %460 = vst [vmem:[%s376_s27 + $0x48] sm:$0xff] %v5482_v41  ;;  %v5485_v44 = vld [vmem:[%s6711_s6 + $0x130] sm:$0xff] }
  0x4e   : > { %462 = vst [vmem:[%s376_s27 + $0x50] sm:$0xff] %v5483_v42  ;;  %464 = vst [vmem:[%s376_s27 + $0x58] sm:$0xff] %v5484_v43  ;;  %v5486_v45 = vld [vmem:[%s6711_s6 + $0x148] sm:$0xff]  ;;  %v5487_v46 = vld [vmem:[%s6711_s6 + $0x160] sm:$0xff] }
  0x4f   : > { %466 = vst [vmem:[%s376_s27 + $0x60] sm:$0xff] %v5485_v44  ;;  %468 = vst [vmem:[%s376_s27 + $0x68] sm:$0xff] %v5486_v45  ;;  %v5488_v47 = vld [vmem:[%s6711_s6 + $0x178] sm:$0xff] }
  0x50   : > { %470 = vst [vmem:[%s376_s27 + $0x70] sm:$0xff] %v5487_v46  ;;  %472 = vst [vmem:[%s376_s27 + $0x78] sm:$0xff] %v5488_v47 }
  0x51 PF: > { %p5489_p11 = scmp.ge.s32.totalorder %s6525_s22, 1  ;;  %p477_p12 = scmp.lt.s32.totalorder %s6525_s22, 9 }
  0x53   : > { %p478_p13 = pnand %p5489_p11, %p477_p12 }
  0x54   : > { %s484_s30 = sand.u32 (!%p478_p13), 1, %s6493_s14   ;;  %s491_s5 = sand.u32 (!%p478_p13), 1, %s6485_s12  }
  0x55   : > { %481 = sbr.rel (%p478_p13) target bundleno = 3295 (0xcdf), region = 134  ;;  %s5490_s26 = sshll.u32 (!%p478_p13), %s484_s30, 7 }
  0x56   : > { %s5491_s25 = sshll.u32 (!%p478_p13), %s491_s5, 7  ;;  %s5493_s7 = sshll.u32 (!%p478_p13), %s6505_s17, 4 }
  0x57   : > { %p537_p0 = scmp.lt.s32.totalorder (!%p478_p13), %s6509_s18, 1  ;;  %p539_p1 = scmp.lt.s32.totalorder (!%p478_p13), %s5493_s7, 31 }
  0x58   : > { %s6741_s27 = scalar_lea.vmem (!%p478_p13), [#allocation5], %s5490_s26  ;;  %s6743_s0 = scalar_lea.vmem (!%p478_p13), [#allocation6], %s5491_s25 }
  0x59   : > { %s6745_s12 = scalar_lea.vmem (!%p478_p13), [#allocation7], %s5491_s25  ;;  %p5496_p2 = scmp.ne.s32.totalorder (!%p478_p13), %s6501_s16, 0 }
  0x5c   : > { %s10562_s18 = smov (!%p537_p0, %s6509_s18), 1  ;;  %s10564_s7 = smov (!%p539_p1, %s5493_s7), 31 }
  0x5d   : > { %s5494_s10 = sshll.u32 %s10562_s18, 5  ;;  %550 = sbr.rel (%p5496_p2) target bundleno = 190 (0xbe), region = 150  ;;  %vm551_vm0 = vcmask (!%p5496_p2), 7168   ;;  %vm680_vm1 = vcmask (!%p5496_p2), 261120   ;;  %v6527_v48 = vmov (!%p5496_p2), -inf   ;;  %v6528_v49 = vmov (!%p5496_p2), 0.0  }
  0x5e   : > { %s542_s11 = sadd.s32 %s5494_s10, %s10564_s7  ;;  %552 = vst.msk [vmem:[#allocation2] sm:$0xff] (!%p5496_p2), %vm551_vm0, %v6527_v48  ;;  %553 = vst.msk [vmem:[#allocation2 + $0x8] sm:$0xff] (!%p5496_p2), %vm551_vm0, %v6527_v48 }
  0x5f   : > { %s5495_s28 = sshll.u32 %s542_s11, 3  ;;  %554 = vst.msk [vmem:[#allocation2 + $0x10] sm:$0xff] (!%p5496_p2), %vm551_vm0, %v6527_v48  ;;  %555 = vst.msk [vmem:[#allocation2 + $0x18] sm:$0xff] (!%p5496_p2), %vm551_vm0, %v6527_v48 }
  0x60   : > { %s6739_s6 = scalar_lea.vmem %s9978_s3, %s5495_s28  ;;  %556 = vst.msk [vmem:[#allocation2 + $0x20] sm:$0xff] (!%p5496_p2), %vm551_vm0, %v6527_v48  ;;  %557 = vst.msk [vmem:[#allocation2 + $0x28] sm:$0xff] (!%p5496_p2), %vm551_vm0, %v6527_v48 }
  0x61   : > { %558 = vst.msk [vmem:[#allocation2 + $0x30] sm:$0xff] (!%p5496_p2), %vm551_vm0, %v6527_v48  ;;  %559 = vst.msk [vmem:[#allocation2 + $0x38] sm:$0xff] (!%p5496_p2), %vm551_vm0, %v6527_v48 }
  0x62   : > { %560 = vst.msk [vmem:[#allocation2 + $0x40] sm:$0xff] (!%p5496_p2), %vm551_vm0, %v6527_v48  ;;  %561 = vst.msk [vmem:[#allocation2 + $0x48] sm:$0xff] (!%p5496_p2), %vm551_vm0, %v6527_v48 }
  0x63   : > { %562 = vst.msk [vmem:[#allocation2 + $0x50] sm:$0xff] (!%p5496_p2), %vm551_vm0, %v6527_v48  ;;  %563 = vst.msk [vmem:[#allocation2 + $0x58] sm:$0xff] (!%p5496_p2), %vm551_vm0, %v6527_v48 }
  0x64   : > { %564 = vst.msk [vmem:[#allocation2 + $0x60] sm:$0xff] %vm551_vm0, %v6527_v48  ;;  %565 = vst.msk [vmem:[#allocation2 + $0x68] sm:$0xff] %vm551_vm0, %v6527_v48 }
  0x65   : > { %566 = vst.msk [vmem:[#allocation2 + $0x70] sm:$0xff] %vm551_vm0, %v6527_v48  ;;  %567 = vst.msk [vmem:[#allocation2 + $0x78] sm:$0xff] %vm551_vm0, %v6527_v48 }
  0x66   : > { %568 = vst.msk [vmem:[#allocation2 + $0x80] sm:$0xff] %vm551_vm0, %v6527_v48  ;;  %569 = vst.msk [vmem:[#allocation2 + $0x88] sm:$0xff] %vm551_vm0, %v6527_v48 }
  0x67   : > { %570 = vst.msk [vmem:[#allocation2 + $0x90] sm:$0xff] %vm551_vm0, %v6527_v48  ;;  %571 = vst.msk [vmem:[#allocation2 + $0x98] sm:$0xff] %vm551_vm0, %v6527_v48 }
  0x68   : > { %572 = vst.msk [vmem:[#allocation2 + $0xa0] sm:$0xff] %vm551_vm0, %v6527_v48  ;;  %573 = vst.msk [vmem:[#allocation2 + $0xa8] sm:$0xff] %vm551_vm0, %v6527_v48 }
  0x69   : > { %574 = vst.msk [vmem:[#allocation2 + $0xb0] sm:$0xff] %vm551_vm0, %v6527_v48  ;;  %575 = vst.msk [vmem:[#allocation2 + $0xb8] sm:$0xff] %vm551_vm0, %v6527_v48 }
  0x6a   : > { %576 = vst.msk [vmem:[#allocation2 + $0xc0] sm:$0xff] %vm551_vm0, %v6527_v48  ;;  %577 = vst.msk [vmem:[#allocation2 + $0xc8] sm:$0xff] %vm551_vm0, %v6527_v48 }
  0x6b   : > { %578 = vst.msk [vmem:[#allocation2 + $0xd0] sm:$0xff] %vm551_vm0, %v6527_v48  ;;  %579 = vst.msk [vmem:[#allocation2 + $0xd8] sm:$0xff] %vm551_vm0, %v6527_v48 }
  0x6c   : > { %580 = vst.msk [vmem:[#allocation2 + $0xe0] sm:$0xff] %vm551_vm0, %v6527_v48  ;;  %581 = vst.msk [vmem:[#allocation2 + $0xe8] sm:$0xff] %vm551_vm0, %v6527_v48 }
  0x6d   : > { %582 = vst.msk [vmem:[#allocation2 + $0xf0] sm:$0xff] %vm551_vm0, %v6527_v48  ;;  %583 = vst.msk [vmem:[#allocation2 + $0xf8] sm:$0xff] %vm551_vm0, %v6527_v48 }
  0x6e   : > { %584 = vst.msk [vmem:[#allocation2 + $0x100] sm:$0xff] %vm551_vm0, %v6527_v48  ;;  %585 = vst.msk [vmem:[#allocation2 + $0x108] sm:$0xff] %vm551_vm0, %v6527_v48 }
  0x6f   : > { %586 = vst.msk [vmem:[#allocation2 + $0x110] sm:$0xff] %vm551_vm0, %v6527_v48  ;;  %587 = vst.msk [vmem:[#allocation2 + $0x118] sm:$0xff] %vm551_vm0, %v6527_v48 }
  0x70   : > { %588 = vst.msk [vmem:[#allocation2 + $0x120] sm:$0xff] %vm551_vm0, %v6527_v48  ;;  %589 = vst.msk [vmem:[#allocation2 + $0x128] sm:$0xff] %vm551_vm0, %v6527_v48 }
  0x71   : > { %590 = vst.msk [vmem:[#allocation2 + $0x130] sm:$0xff] %vm551_vm0, %v6527_v48  ;;  %591 = vst.msk [vmem:[#allocation2 + $0x138] sm:$0xff] %vm551_vm0, %v6527_v48 }
  0x72   : > { %592 = vst.msk [vmem:[#allocation2 + $0x140] sm:$0xff] %vm551_vm0, %v6527_v48  ;;  %593 = vst.msk [vmem:[#allocation2 + $0x148] sm:$0xff] %vm551_vm0, %v6527_v48 }
  0x73   : > { %594 = vst.msk [vmem:[#allocation2 + $0x150] sm:$0xff] %vm551_vm0, %v6527_v48  ;;  %595 = vst.msk [vmem:[#allocation2 + $0x158] sm:$0xff] %vm551_vm0, %v6527_v48 }
  0x74   : > { %596 = vst.msk [vmem:[#allocation2 + $0x160] sm:$0xff] %vm551_vm0, %v6527_v48  ;;  %597 = vst.msk [vmem:[#allocation2 + $0x168] sm:$0xff] %vm551_vm0, %v6527_v48 }
  0x75   : > { %598 = vst.msk [vmem:[#allocation2 + $0x170] sm:$0xff] %vm551_vm0, %v6527_v48  ;;  %599 = vst.msk [vmem:[#allocation2 + $0x178] sm:$0xff] %vm551_vm0, %v6527_v48 }
  0x76   : > { %600 = vst.msk [vmem:[#allocation2 + $0x180] sm:$0xff] %vm551_vm0, %v6527_v48  ;;  %601 = vst.msk [vmem:[#allocation2 + $0x188] sm:$0xff] %vm551_vm0, %v6527_v48 }
  0x77   : > { %602 = vst.msk [vmem:[#allocation2 + $0x190] sm:$0xff] %vm551_vm0, %v6527_v48  ;;  %603 = vst.msk [vmem:[#allocation2 + $0x198] sm:$0xff] %vm551_vm0, %v6527_v48 }
  0x78   : > { %604 = vst.msk [vmem:[#allocation2 + $0x1a0] sm:$0xff] %vm551_vm0, %v6527_v48  ;;  %605 = vst.msk [vmem:[#allocation2 + $0x1a8] sm:$0xff] %vm551_vm0, %v6527_v48 }
  0x79   : > { %606 = vst.msk [vmem:[#allocation2 + $0x1b0] sm:$0xff] %vm551_vm0, %v6527_v48  ;;  %607 = vst.msk [vmem:[#allocation2 + $0x1b8] sm:$0xff] %vm551_vm0, %v6527_v48 }
  0x7a   : > { %608 = vst.msk [vmem:[#allocation2 + $0x1c0] sm:$0xff] %vm551_vm0, %v6527_v48  ;;  %609 = vst.msk [vmem:[#allocation2 + $0x1c8] sm:$0xff] %vm551_vm0, %v6527_v48 }
  0x7b   : > { %610 = vst.msk [vmem:[#allocation2 + $0x1d0] sm:$0xff] %vm551_vm0, %v6527_v48  ;;  %611 = vst.msk [vmem:[#allocation2 + $0x1d8] sm:$0xff] %vm551_vm0, %v6527_v48 }
  0x7c   : > { %612 = vst.msk [vmem:[#allocation2 + $0x1e0] sm:$0xff] %vm551_vm0, %v6527_v48  ;;  %613 = vst.msk [vmem:[#allocation2 + $0x1e8] sm:$0xff] %vm551_vm0, %v6527_v48 }
  0x7d   : > { %614 = vst.msk [vmem:[#allocation2 + $0x1f0] sm:$0xff] %vm551_vm0, %v6527_v48  ;;  %615 = vst.msk [vmem:[#allocation2 + $0x1f8] sm:$0xff] %vm551_vm0, %v6527_v48 }
  0x7e   : > { %616 = vst.msk [vmem:[#allocation3] sm:$0xff] %vm551_vm0, %v6528_v49  ;;  %617 = vst.msk [vmem:[#allocation3 + $0x8] sm:$0xff] %vm551_vm0, %v6528_v49 }
  0x7f   : > { %618 = vst.msk [vmem:[#allocation3 + $0x10] sm:$0xff] %vm551_vm0, %v6528_v49  ;;  %619 = vst.msk [vmem:[#allocation3 + $0x18] sm:$0xff] %vm551_vm0, %v6528_v49 }
  0x80   : > { %620 = vst.msk [vmem:[#allocation3 + $0x20] sm:$0xff] %vm551_vm0, %v6528_v49  ;;  %621 = vst.msk [vmem:[#allocation3 + $0x28] sm:$0xff] %vm551_vm0, %v6528_v49 }
  0x81   : > { %622 = vst.msk [vmem:[#allocation3 + $0x30] sm:$0xff] %vm551_vm0, %v6528_v49  ;;  %623 = vst.msk [vmem:[#allocation3 + $0x38] sm:$0xff] %vm551_vm0, %v6528_v49 }
  0x82   : > { %624 = vst.msk [vmem:[#allocation3 + $0x40] sm:$0xff] %vm551_vm0, %v6528_v49  ;;  %625 = vst.msk [vmem:[#allocation3 + $0x48] sm:$0xff] %vm551_vm0, %v6528_v49 }
  0x83   : > { %626 = vst.msk [vmem:[#allocation3 + $0x50] sm:$0xff] %vm551_vm0, %v6528_v49  ;;  %627 = vst.msk [vmem:[#allocation3 + $0x58] sm:$0xff] %vm551_vm0, %v6528_v49 }
  0x84   : > { %628 = vst.msk [vmem:[#allocation3 + $0x60] sm:$0xff] %vm551_vm0, %v6528_v49  ;;  %629 = vst.msk [vmem:[#allocation3 + $0x68] sm:$0xff] %vm551_vm0, %v6528_v49 }
  0x85   : > { %630 = vst.msk [vmem:[#allocation3 + $0x70] sm:$0xff] %vm551_vm0, %v6528_v49  ;;  %631 = vst.msk [vmem:[#allocation3 + $0x78] sm:$0xff] %vm551_vm0, %v6528_v49 }
  0x86   : > { %632 = vst.msk [vmem:[#allocation3 + $0x80] sm:$0xff] %vm551_vm0, %v6528_v49  ;;  %633 = vst.msk [vmem:[#allocation3 + $0x88] sm:$0xff] %vm551_vm0, %v6528_v49 }
  0x87   : > { %634 = vst.msk [vmem:[#allocation3 + $0x90] sm:$0xff] %vm551_vm0, %v6528_v49  ;;  %635 = vst.msk [vmem:[#allocation3 + $0x98] sm:$0xff] %vm551_vm0, %v6528_v49 }
  0x88   : > { %636 = vst.msk [vmem:[#allocation3 + $0xa0] sm:$0xff] %vm551_vm0, %v6528_v49  ;;  %637 = vst.msk [vmem:[#allocation3 + $0xa8] sm:$0xff] %vm551_vm0, %v6528_v49 }
  0x89   : > { %638 = vst.msk [vmem:[#allocation3 + $0xb0] sm:$0xff] %vm551_vm0, %v6528_v49  ;;  %639 = vst.msk [vmem:[#allocation3 + $0xb8] sm:$0xff] %vm551_vm0, %v6528_v49 }
  0x8a   : > { %640 = vst.msk [vmem:[#allocation3 + $0xc0] sm:$0xff] %vm551_vm0, %v6528_v49  ;;  %641 = vst.msk [vmem:[#allocation3 + $0xc8] sm:$0xff] %vm551_vm0, %v6528_v49 }
  0x8b   : > { %642 = vst.msk [vmem:[#allocation3 + $0xd0] sm:$0xff] %vm551_vm0, %v6528_v49  ;;  %643 = vst.msk [vmem:[#allocation3 + $0xd8] sm:$0xff] %vm551_vm0, %v6528_v49 }
  0x8c   : > { %644 = vst.msk [vmem:[#allocation3 + $0xe0] sm:$0xff] %vm551_vm0, %v6528_v49  ;;  %645 = vst.msk [vmem:[#allocation3 + $0xe8] sm:$0xff] %vm551_vm0, %v6528_v49 }
  0x8d   : > { %646 = vst.msk [vmem:[#allocation3 + $0xf0] sm:$0xff] %vm551_vm0, %v6528_v49  ;;  %647 = vst.msk [vmem:[#allocation3 + $0xf8] sm:$0xff] %vm551_vm0, %v6528_v49 }
  0x8e   : > { %648 = vst.msk [vmem:[#allocation3 + $0x100] sm:$0xff] %vm551_vm0, %v6528_v49  ;;  %649 = vst.msk [vmem:[#allocation3 + $0x108] sm:$0xff] %vm551_vm0, %v6528_v49 }
  0x8f   : > { %650 = vst.msk [vmem:[#allocation3 + $0x110] sm:$0xff] %vm551_vm0, %v6528_v49  ;;  %651 = vst.msk [vmem:[#allocation3 + $0x118] sm:$0xff] %vm551_vm0, %v6528_v49 }
  0x90   : > { %652 = vst.msk [vmem:[#allocation3 + $0x120] sm:$0xff] %vm551_vm0, %v6528_v49  ;;  %653 = vst.msk [vmem:[#allocation3 + $0x128] sm:$0xff] %vm551_vm0, %v6528_v49 }
  0x91   : > { %654 = vst.msk [vmem:[#allocation3 + $0x130] sm:$0xff] %vm551_vm0, %v6528_v49  ;;  %655 = vst.msk [vmem:[#allocation3 + $0x138] sm:$0xff] %vm551_vm0, %v6528_v49 }
  0x92   : > { %656 = vst.msk [vmem:[#allocation3 + $0x140] sm:$0xff] %vm551_vm0, %v6528_v49  ;;  %657 = vst.msk [vmem:[#allocation3 + $0x148] sm:$0xff] %vm551_vm0, %v6528_v49 }
  0x93   : > { %658 = vst.msk [vmem:[#allocation3 + $0x150] sm:$0xff] %vm551_vm0, %v6528_v49  ;;  %659 = vst.msk [vmem:[#allocation3 + $0x158] sm:$0xff] %vm551_vm0, %v6528_v49 }
  0x94   : > { %660 = vst.msk [vmem:[#allocation3 + $0x160] sm:$0xff] %vm551_vm0, %v6528_v49  ;;  %661 = vst.msk [vmem:[#allocation3 + $0x168] sm:$0xff] %vm551_vm0, %v6528_v49 }
  0x95   : > { %662 = vst.msk [vmem:[#allocation3 + $0x170] sm:$0xff] %vm551_vm0, %v6528_v49  ;;  %663 = vst.msk [vmem:[#allocation3 + $0x178] sm:$0xff] %vm551_vm0, %v6528_v49 }
  0x96   : > { %664 = vst.msk [vmem:[#allocation3 + $0x180] sm:$0xff] %vm551_vm0, %v6528_v49  ;;  %665 = vst.msk [vmem:[#allocation3 + $0x188] sm:$0xff] %vm551_vm0, %v6528_v49 }
  0x97   : > { %666 = vst.msk [vmem:[#allocation3 + $0x190] sm:$0xff] %vm551_vm0, %v6528_v49  ;;  %667 = vst.msk [vmem:[#allocation3 + $0x198] sm:$0xff] %vm551_vm0, %v6528_v49 }
  0x98   : > { %668 = vst.msk [vmem:[#allocation3 + $0x1a0] sm:$0xff] %vm551_vm0, %v6528_v49  ;;  %669 = vst.msk [vmem:[#allocation3 + $0x1a8] sm:$0xff] %vm551_vm0, %v6528_v49 }
  0x99   : > { %670 = vst.msk [vmem:[#allocation3 + $0x1b0] sm:$0xff] %vm551_vm0, %v6528_v49  ;;  %671 = vst.msk [vmem:[#allocation3 + $0x1b8] sm:$0xff] %vm551_vm0, %v6528_v49 }
  0x9a   : > { %672 = vst.msk [vmem:[#allocation3 + $0x1c0] sm:$0xff] %vm551_vm0, %v6528_v49  ;;  %673 = vst.msk [vmem:[#allocation3 + $0x1c8] sm:$0xff] %vm551_vm0, %v6528_v49 }
  0x9b   : > { %674 = vst.msk [vmem:[#allocation3 + $0x1d0] sm:$0xff] %vm551_vm0, %v6528_v49  ;;  %675 = vst.msk [vmem:[#allocation3 + $0x1d8] sm:$0xff] %vm551_vm0, %v6528_v49 }
  0x9c   : > { %676 = vst.msk [vmem:[#allocation3 + $0x1e0] sm:$0xff] %vm551_vm0, %v6528_v49  ;;  %677 = vst.msk [vmem:[#allocation3 + $0x1e8] sm:$0xff] %vm551_vm0, %v6528_v49 }
  0x9d   : > { %678 = vst.msk [vmem:[#allocation3 + $0x1f0] sm:$0xff] %vm551_vm0, %v6528_v49  ;;  %679 = vst.msk [vmem:[#allocation3 + $0x1f8] sm:$0xff] %vm551_vm0, %v6528_v49 }
  0x9e   : > { %681 = vst.msk [vmem:[#allocation4] sm:$0xff] %vm680_vm1, %v6528_v49  ;;  %682 = vst.msk [vmem:[#allocation4 + $0x8] sm:$0xff] %vm680_vm1, %v6528_v49 }
  0x9f   : > { %683 = vst.msk [vmem:[#allocation4 + $0x10] sm:$0xff] %vm680_vm1, %v6528_v49  ;;  %684 = vst.msk [vmem:[#allocation4 + $0x18] sm:$0xff] %vm680_vm1, %v6528_v49 }
  0xa0   : > { %685 = vst.msk [vmem:[#allocation4 + $0x20] sm:$0xff] %vm680_vm1, %v6528_v49  ;;  %686 = vst.msk [vmem:[#allocation4 + $0x28] sm:$0xff] %vm680_vm1, %v6528_v49 }
  0xa1   : > { %687 = vst.msk [vmem:[#allocation4 + $0x30] sm:$0xff] %vm680_vm1, %v6528_v49  ;;  %688 = vst.msk [vmem:[#allocation4 + $0x38] sm:$0xff] %vm680_vm1, %v6528_v49 }
  0xa2   : > { %689 = vst.msk [vmem:[#allocation4 + $0x40] sm:$0xff] %vm680_vm1, %v6528_v49  ;;  %690 = vst.msk [vmem:[#allocation4 + $0x48] sm:$0xff] %vm680_vm1, %v6528_v49 }
  0xa3   : > { %691 = vst.msk [vmem:[#allocation4 + $0x50] sm:$0xff] %vm680_vm1, %v6528_v49  ;;  %692 = vst.msk [vmem:[#allocation4 + $0x58] sm:$0xff] %vm680_vm1, %v6528_v49 }
  0xa4   : > { %693 = vst.msk [vmem:[#allocation4 + $0x60] sm:$0xff] %vm680_vm1, %v6528_v49  ;;  %694 = vst.msk [vmem:[#allocation4 + $0x68] sm:$0xff] %vm680_vm1, %v6528_v49 }
  0xa5   : > { %695 = vst.msk [vmem:[#allocation4 + $0x70] sm:$0xff] %vm680_vm1, %v6528_v49  ;;  %696 = vst.msk [vmem:[#allocation4 + $0x78] sm:$0xff] %vm680_vm1, %v6528_v49 }
  0xa6   : > { %697 = vst.msk [vmem:[#allocation4 + $0x80] sm:$0xff] %vm680_vm1, %v6528_v49  ;;  %698 = vst.msk [vmem:[#allocation4 + $0x88] sm:$0xff] %vm680_vm1, %v6528_v49 }
  0xa7   : > { %699 = vst.msk [vmem:[#allocation4 + $0x90] sm:$0xff] %vm680_vm1, %v6528_v49  ;;  %700 = vst.msk [vmem:[#allocation4 + $0x98] sm:$0xff] %vm680_vm1, %v6528_v49 }
  0xa8   : > { %701 = vst.msk [vmem:[#allocation4 + $0xa0] sm:$0xff] %vm680_vm1, %v6528_v49  ;;  %702 = vst.msk [vmem:[#allocation4 + $0xa8] sm:$0xff] %vm680_vm1, %v6528_v49 }
  0xa9   : > { %703 = vst.msk [vmem:[#allocation4 + $0xb0] sm:$0xff] %vm680_vm1, %v6528_v49  ;;  %704 = vst.msk [vmem:[#allocation4 + $0xb8] sm:$0xff] %vm680_vm1, %v6528_v49 }
  0xaa   : > { %705 = vst.msk [vmem:[#allocation4 + $0xc0] sm:$0xff] %vm680_vm1, %v6528_v49  ;;  %706 = vst.msk [vmem:[#allocation4 + $0xc8] sm:$0xff] %vm680_vm1, %v6528_v49 }
  0xab   : > { %707 = vst.msk [vmem:[#allocation4 + $0xd0] sm:$0xff] %vm680_vm1, %v6528_v49  ;;  %708 = vst.msk [vmem:[#allocation4 + $0xd8] sm:$0xff] %vm680_vm1, %v6528_v49 }
  0xac   : > { %709 = vst.msk [vmem:[#allocation4 + $0xe0] sm:$0xff] %vm680_vm1, %v6528_v49  ;;  %710 = vst.msk [vmem:[#allocation4 + $0xe8] sm:$0xff] %vm680_vm1, %v6528_v49 }
  0xad   : > { %711 = vst.msk [vmem:[#allocation4 + $0xf0] sm:$0xff] %vm680_vm1, %v6528_v49  ;;  %712 = vst.msk [vmem:[#allocation4 + $0xf8] sm:$0xff] %vm680_vm1, %v6528_v49 }
  0xae   : > { %713 = vst.msk [vmem:[#allocation4 + $0x100] sm:$0xff] %vm680_vm1, %v6528_v49  ;;  %714 = vst.msk [vmem:[#allocation4 + $0x108] sm:$0xff] %vm680_vm1, %v6528_v49 }
  0xaf   : > { %715 = vst.msk [vmem:[#allocation4 + $0x110] sm:$0xff] %vm680_vm1, %v6528_v49  ;;  %716 = vst.msk [vmem:[#allocation4 + $0x118] sm:$0xff] %vm680_vm1, %v6528_v49 }
  0xb0   : > { %717 = vst.msk [vmem:[#allocation4 + $0x120] sm:$0xff] %vm680_vm1, %v6528_v49  ;;  %718 = vst.msk [vmem:[#allocation4 + $0x128] sm:$0xff] %vm680_vm1, %v6528_v49 }
  0xb1   : > { %719 = vst.msk [vmem:[#allocation4 + $0x130] sm:$0xff] %vm680_vm1, %v6528_v49  ;;  %720 = vst.msk [vmem:[#allocation4 + $0x138] sm:$0xff] %vm680_vm1, %v6528_v49 }
  0xb2   : > { %721 = vst.msk [vmem:[#allocation4 + $0x140] sm:$0xff] %vm680_vm1, %v6528_v49  ;;  %722 = vst.msk [vmem:[#allocation4 + $0x148] sm:$0xff] %vm680_vm1, %v6528_v49 }
  0xb3   : > { %723 = vst.msk [vmem:[#allocation4 + $0x150] sm:$0xff] %vm680_vm1, %v6528_v49  ;;  %724 = vst.msk [vmem:[#allocation4 + $0x158] sm:$0xff] %vm680_vm1, %v6528_v49 }
  0xb4   : > { %725 = vst.msk [vmem:[#allocation4 + $0x160] sm:$0xff] %vm680_vm1, %v6528_v49  ;;  %726 = vst.msk [vmem:[#allocation4 + $0x168] sm:$0xff] %vm680_vm1, %v6528_v49 }
  0xb5   : > { %727 = vst.msk [vmem:[#allocation4 + $0x170] sm:$0xff] %vm680_vm1, %v6528_v49  ;;  %728 = vst.msk [vmem:[#allocation4 + $0x178] sm:$0xff] %vm680_vm1, %v6528_v49 }
  0xb6   : > { %729 = vst.msk [vmem:[#allocation4 + $0x180] sm:$0xff] %vm680_vm1, %v6528_v49  ;;  %730 = vst.msk [vmem:[#allocation4 + $0x188] sm:$0xff] %vm680_vm1, %v6528_v49 }
  0xb7   : > { %731 = vst.msk [vmem:[#allocation4 + $0x190] sm:$0xff] %vm680_vm1, %v6528_v49  ;;  %732 = vst.msk [vmem:[#allocation4 + $0x198] sm:$0xff] %vm680_vm1, %v6528_v49 }
  0xb8   : > { %733 = vst.msk [vmem:[#allocation4 + $0x1a0] sm:$0xff] %vm680_vm1, %v6528_v49  ;;  %734 = vst.msk [vmem:[#allocation4 + $0x1a8] sm:$0xff] %vm680_vm1, %v6528_v49 }
  0xb9   : > { %735 = vst.msk [vmem:[#allocation4 + $0x1b0] sm:$0xff] %vm680_vm1, %v6528_v49  ;;  %736 = vst.msk [vmem:[#allocation4 + $0x1b8] sm:$0xff] %vm680_vm1, %v6528_v49 }
  0xba   : > { %737 = vst.msk [vmem:[#allocation4 + $0x1c0] sm:$0xff] %vm680_vm1, %v6528_v49  ;;  %738 = vst.msk [vmem:[#allocation4 + $0x1c8] sm:$0xff] %vm680_vm1, %v6528_v49 }
  0xbb   : > { %739 = vst.msk [vmem:[#allocation4 + $0x1d0] sm:$0xff] %vm680_vm1, %v6528_v49  ;;  %740 = vst.msk [vmem:[#allocation4 + $0x1d8] sm:$0xff] %vm680_vm1, %v6528_v49 }
  0xbc   : > { %741 = vst.msk [vmem:[#allocation4 + $0x1e0] sm:$0xff] %vm680_vm1, %v6528_v49  ;;  %742 = vst.msk [vmem:[#allocation4 + $0x1e8] sm:$0xff] %vm680_vm1, %v6528_v49 }
  0xbd   : > { %743 = vst.msk [vmem:[#allocation4 + $0x1f0] sm:$0xff] %vm680_vm1, %v6528_v49  ;;  %744 = vst.msk [vmem:[#allocation4 + $0x1f8] sm:$0xff] %vm680_vm1, %v6528_v49 }
  0xbe PF: > { %p5497_p3 = scmp.gt.s32.totalorder %s6501_s16, %s6505_s17 }
  0xc0   : > { %748 = sbr.rel (%p5497_p3) target bundleno = 2821 (0xb05), region = 154 }
  0xc7   : > { %v829_v50 = vld [vmem:[%s6743_s0] sm:$0xff]  ;;  %v830_v51 = vld [vmem:[%s6743_s0 + $0x8] sm:$0xff]  ;;  %vm877_vm2 = vcmask 261120   ;;  %v831_v52 = vld [vmem:[%s6743_s0 + $0x10] sm:$0xff]  ;;  %v750_v42 = vlaneseq  ;;  %s5498_s14 = sshll.u32 %s6505_s17, 7  ;;  %s5499_s18 = sshll.u32 %s6501_s16, 7 }
  0xc8   : > { %v7137_v53 = vpack.c.bf16 %v830_v51, %v829_v50  ;;  %v832_v54 = vld [vmem:[%s6743_s0 + $0x18] sm:$0xff]  ;;  %v805_v57 = vld [vmem:[%s6741_s27] sm:$0xff]  ;;  %v806_v58 = vld [vmem:[%s6741_s27 + $0x8] sm:$0xff]  ;;  %v7251_v46 = vstv %s5498_s14  ;;  %s6530_s30 = smov 96   ;;  %s6531_s5 = smov 64  }
  0xc9   : > { %v7140_v55 = vpack.c.bf16 %v832_v54, %v831_v52  ;;  %v833_v59 = vld [vmem:[%s6743_s0 + $0x20] sm:$0xff]  ;;  %v834_v60 = vld [vmem:[%s6743_s0 + $0x28] sm:$0xff]  ;;  %v7152_v61 = vpack.c.bf16 %v806_v58, %v805_v57  ;;  %v835_v0 = vld [vmem:[%s6743_s0 + $0x30] sm:$0xff]  ;;  %v7246_v43 = vshrl.u32 %v750_v42, 7  ;;  %v786_v45 = vand.u32 127, %v750_v42  ;;  %s6532_s26 = smov 32  }
  0xca   : > { %5919 = vmatprep.subr.msk.bf16.mxu0 %vm877_vm2, %v7137_v53  ;;  %v903_v56 = vsel %vm877_vm2, %v7137_v53, 0  ;;  %v7158_v63 = vpack.c.bf16 %v834_v60, %v833_v59  ;;  %v836_v1 = vld [vmem:[%s6743_s0 + $0x38] sm:$0xff]  ;;  %v837_v4 = vld [vmem:[%s6743_s0 + $0x40] sm:$0xff]  ;;  %v838_v5 = vld [vmem:[%s6743_s0 + $0x48] sm:$0xff]  ;;  %v787_v47 = vstv %s5499_s18 }
  0xcb   : > { %5664 = vmatpush3.bf16.xpose.msra.mxu0 %v903_v56  ;;  %5679 = vmatprep.mubr.msk.bf16.mxu0 %vm877_vm2, %v7152_v61  ;;  %v906_v62 = vsel %vm877_vm2, %v7140_v55, 0  ;;  %v7166_v3 = vpack.c.bf16 %v836_v1, %v835_v0  ;;  %v7174_v7 = vpack.c.bf16 %v838_v5, %v837_v4  ;;  %v839_v8 = vld [vmem:[%s6743_s0 + $0x50] sm:$0xff]  ;;  %v840_v9 = vld [vmem:[%s6743_s0 + $0x58] sm:$0xff]  ;;  %v841_v12 = vld [vmem:[%s6743_s0 + $0x60] sm:$0xff]  ;;  %v753_v44 = vadd.s32 16, %v7246_v43 }
  0xcc   : > { %5920 = vmatprep.subr.msk.bf16.mxu0 %vm877_vm2, %v7140_v55  ;;  %v909_v2 = vsel %vm877_vm2, %v7158_v63, 0  ;;  %v7182_v11 = vpack.c.bf16 %v840_v9, %v839_v8  ;;  %v842_v13 = vld [vmem:[%s6743_s0 + $0x68] sm:$0xff]  ;;  %v843_v16 = vld [vmem:[%s6743_s0 + $0x70] sm:$0xff]  ;;  %v844_v17 = vld [vmem:[%s6743_s0 + $0x78] sm:$0xff]  ;;  %v754_v48 = vadd.s32 24, %v7246_v43  ;;  %v7257_v50 = vadd.s32 %v787_v47, %v786_v45 }
  0xcd   : > { %v912_v6 = vsel %vm877_vm2, %v7166_v3, 0  ;;  %v915_v10 = vsel %vm877_vm2, %v7174_v7, 0  ;;  %v7190_v15 = vpack.c.bf16 %v842_v13, %v841_v12  ;;  %v7198_v19 = vpack.c.bf16 %v844_v17, %v843_v16  ;;  %v807_v21 = vld [vmem:[%s6741_s27 + $0x10] sm:$0xff]  ;;  %v808_v22 = vld [vmem:[%s6741_s27 + $0x18] sm:$0xff]  ;;  %v809_v23 = vld [vmem:[%s6741_s27 + $0x20] sm:$0xff] }
  0xce   : > { %v918_v14 = vsel %vm877_vm2, %v7182_v11, 0  ;;  %v810_v24 = vld [vmem:[%s6741_s27 + $0x28] sm:$0xff]  ;;  %v7208_v25 = vpack.c.bf16 %v808_v22, %v807_v21  ;;  %v811_v27 = vld [vmem:[%s6741_s27 + $0x30] sm:$0xff]  ;;  %v812_v28 = vld [vmem:[%s6741_s27 + $0x38] sm:$0xff]  ;;  %v7255_v49 = vadd.s32 %v7251_v46, %v753_v44  ;;  %v7261_v51 = vadd.s32 %v7251_v46, %v7246_v43 }
  0xcf   : > { %v921_v18 = vsel %vm877_vm2, %v7190_v15, 0  ;;  %v924_v20 = vsel %vm877_vm2, %v7198_v19, 0  ;;  %v7210_v26 = vpack.c.bf16 %v810_v24, %v809_v23  ;;  %v813_v29 = vld [vmem:[%s6741_s27 + $0x40] sm:$0xff]  ;;  %v814_v30 = vld [vmem:[%s6741_s27 + $0x48] sm:$0xff]  ;;  %v7220_v31 = vpack.c.bf16 %v812_v28, %v811_v27  ;;  %v815_v33 = vld [vmem:[%s6741_s27 + $0x50] sm:$0xff] }
  0xd0   : > { %v7222_v32 = vpack.c.bf16 %v814_v30, %v813_v29  ;;  %v816_v34 = vld [vmem:[%s6741_s27 + $0x58] sm:$0xff]  ;;  %v817_v35 = vld [vmem:[%s6741_s27 + $0x60] sm:$0xff]  ;;  %v818_v36 = vld [vmem:[%s6741_s27 + $0x68] sm:$0xff]  ;;  %10118 = vst [vmem:[#allocation9_spill] sm:$0xff] %v7255_v49  ;;  %v752_v52 = vadd.s32 8, %v7246_v43  ;;  %v7265_v54 = vadd.s32 %v7251_v46, %v754_v48  ;;  %vm791_vm3 = vcmp.ge.s32.totalorder %v7255_v49, %v7257_v50 }
  0xd1   : > { %v7232_v37 = vpack.c.bf16 %v816_v34, %v815_v33  ;;  %v7234_v38 = vpack.c.bf16 %v818_v36, %v817_v35  ;;  %v819_v39 = vld [vmem:[%s6741_s27 + $0x70] sm:$0xff]  ;;  %v820_v40 = vld [vmem:[%s6741_s27 + $0x78] sm:$0xff]  ;;  %10119 = vst [vmem:[#allocation10_spill] sm:$0xff] %v7261_v51  ;;  %v757_v57 = vadd.s32 48, %v7246_v43  ;;  %vm789_vm4 = vcmp.ge.s32.totalorder %v7261_v51, %v7257_v50 }
  0xd2   : > { %v7242_v41 = vpack.c.bf16 %v820_v40, %v819_v39  ;;  %10120 = vst [vmem:[#allocation11_spill] sm:$0xff] %v7265_v54  ;;  %v7273_v60 = vadd.s32 %v7251_v46, %v752_v52  ;;  %v758_v1 = vadd.s32 56, %v7246_v43  ;;  %vm792_vm5 = vcmp.ge.s32.totalorder %v7265_v54, %v7257_v50 }
  0xd3   : > { %5666 = vmatpush3.bf16.xpose.msra.mxu0 %v906_v62  ;;  %v756_v12 = vadd.s32 40, %v7246_v43  ;;  %v761_v21 = vadd.s32 80, %v7246_v43  ;;  %v762_v28 = vadd.s32 88, %v7246_v43  ;;  %v759_v34 = vadd.s32 64, %v7246_v43 }
  0xd4   : > { %5921 = vmatprep.subr.msk.bf16.mxu0 %vm877_vm2, %v7158_v63  ;;  %10121 = vst [vmem:[#allocation12_spill] sm:$0xff] %v7273_v60  ;;  %vm790_vm6 = vcmp.ge.s32.totalorder %v7273_v60, %v7257_v50  ;;  %v7298_v13 = vadd.s32 %v7251_v46, %v758_v1  ;;  %v760_v39 = vadd.s32 72, %v7246_v43 }
  0xd5   : > { %v7335_v36 = vadd.s32 %v7251_v46, %v761_v21  ;;  %v7351_v44 = vadd.s32 %v7251_v46, %v762_v28  ;;  %v7359_v47 = vadd.s32 %v7251_v46, %v759_v34 }
  0xd6   : > { %vm796_vm8 = vcmp.ge.s32.totalorder %v7298_v13, %v7257_v50  ;;  %v7364_v52 = vadd.s32 %v7251_v46, %v760_v39 }
  0xd7   : > { %10124 = vst [vmem:[#allocation15_spill] sm:$0xff] %v7335_v36  ;;  %10125 = vst [vmem:[#allocation16_spill] sm:$0xff] %v7351_v44  ;;  %vm799_vm11 = vcmp.ge.s32.totalorder %v7335_v36, %v7257_v50  ;;  %vm800_vm12 = vcmp.ge.s32.totalorder %v7351_v44, %v7257_v50  ;;  %vm797_vm13 = vcmp.ge.s32.totalorder %v7359_v47, %v7257_v50  ;;  %v8592_v36 = vld [vmem:[#allocation2 + $0x148] sm:$0xff] }
  0xd8   : > { %10126 = vst [vmem:[#allocation17_spill] sm:$0xff] %v7359_v47  ;;  %10127 = vst [vmem:[#allocation18_spill] sm:$0xff] %v7364_v52  ;;  %vm9980_vm14 = vcmp.ge.s32.totalorder %v7364_v52, %v7257_v50 }
  0xdb   : > { %5668 = vmatpush3.bf16.xpose.msra.mxu0 %v909_v2 }
  0xdc   : > { %5922 = vmatprep.subr.msk.bf16.mxu0 %vm877_vm2, %v7166_v3 }
  0xe3   : > { %5670 = vmatpush3.bf16.xpose.msra.mxu0 %v912_v6  ;;  %v755_v6 = vadd.s32 32, %v7246_v43 }
  0xe4   : > { %5923 = vmatprep.subr.msk.bf16.mxu0 %vm877_vm2, %v7174_v7 }
  0xe5   : > { %v7306_v16 = vadd.s32 %v7251_v46, %v755_v6  ;;  %v763_v6 = vadd.s32 96, %v7246_v43 }
  0xe7   : > { %10122 = vst [vmem:[#allocation13_spill] sm:$0xff] %v7306_v16  ;;  %vm793_vm9 = vcmp.ge.s32.totalorder %v7306_v16, %v7257_v50 }
  0xeb   : > { %5672 = vmatpush3.bf16.xpose.msra.mxu0 %v915_v10  ;;  %v7291_v10 = vadd.s32 %v7251_v46, %v757_v57 }
  0xec   : > { %5924 = vmatprep.subr.msk.bf16.mxu0 %vm877_vm2, %v7182_v11 }
  0xed   : > { %vm795_vm7 = vcmp.ge.s32.totalorder %v7291_v10, %v7257_v50 }
  0xf3   : > { %5674 = vmatpush3.bf16.xpose.msra.mxu0 %v918_v14 }
  0xf4   : > { %5925 = vmatprep.subr.msk.bf16.mxu0 %vm877_vm2, %v7190_v15 }
  0xfb   : > { %5676 = vmatpush3.bf16.xpose.msra.mxu0 %v921_v18 }
  0xfc   : > { %5926 = vmatprep.subr.msk.bf16.mxu0 %vm877_vm2, %v7198_v19 }
 0x103   : > { %5678 = vmatpush3.bf16.xpose.msra.mxu0 %v924_v20  ;;  %v7317_v20 = vadd.s32 %v7251_v46, %v756_v12 }
 0x105   : > { %10123 = vst [vmem:[#allocation14_spill] sm:$0xff] %v7317_v20  ;;  %vm10013_vm10 = vcmp.ge.s32.totalorder %v7317_v20, %v7257_v50 }
 0x10a   : > { %5680 = vmatmul.mubr.msk.bf16.vlgmr.msra.gmra.mrb[0].mxu0 %vm877_vm2, %v7208_v25 }
 0x10b   : > { %5683 = vmatprep.mubr.msk.bf16.mxu0 %vm877_vm2, %v7210_v26 }
 0x112   : > { %5684 = vmatmul.mubr.msk.bf16.gmra.mrb[4].mxu0 %vm877_vm2, %v7220_v31 }
 0x113   : > { %5687 = vmatprep.mubr.msk.bf16.mxu0 %vm877_vm2, %v7222_v32 }
 0x11a   : > { %5688 = vmatmul.mubr.msk.bf16.gmra.mrb[8].mxu0 %vm877_vm2, %v7232_v37 }
 0x11b   : > { %5691 = vmatprep.mubr.msk.bf16.mxu0 %vm877_vm2, %v7234_v38 }
 0x122   : > { %5692 = vmatmul.mubr.msk.bf16.gmra.mrb[12].mxu0 %vm877_vm2, %v7242_v41 }
 0x1dd   : > { %v5681_v56 = vpop.f32.mrb[0].mxu0 }
 0x1de   : > { %v1025_v58 = vmul.f32 0.17677669, %v5681_v56  ;;  %v960_v59 = vpop.f32.mrb[1].mxu0  ;;  %v765_v56 = vadd.s32 112, %v7246_v43 }
 0x1df   : > { %v1023_v62 = vmul.f32 0.17677669, %v960_v59  ;;  %v5682_v0 = vpop.f32.mrb[2].mxu0 }
 0x1e0   : > { %v1026_v2 = vmul.f32 0.17677669, %v5682_v0  ;;  %v963_v4 = vpop.f32.mrb[3].mxu0  ;;  %v7279_v5 = vsel %vm791_vm3, %v1025_v58, -inf  ;;  %v766_v0 = vadd.s32 120, %v7246_v43  ;;  %v7384_v21 = vadd.s32 %v7251_v46, %v765_v56 }
 0x1e1   : > { %v1024_v8 = vmul.f32 0.17677669, %v963_v4  ;;  %1075 = vmax.xlane.f32.xlu1 %v7279_v5  ;;  %v7288_v9 = vsel %vm789_vm4, %v1023_v62, -inf }
 0x1e2   : > { %1071 = vmax.xlane.f32.xlu0 %v7288_v9  ;;  %v7303_v14 = vsel %vm792_vm5, %v1026_v2, -inf  ;;  %10128 = vst [vmem:[#allocation19_spill] sm:$0xff] %v7384_v21  ;;  %vm803_vm15 = vcmp.ge.s32.totalorder %v7384_v21, %v7257_v50  ;;  %v3550_v21 = vld [vmem:[%s6743_s0 + $0x18] sm:$0xff] }
 0x1e3   : > { %v7312_v18 = vsel %vm790_vm6, %v1024_v8, -inf  ;;  %v6529_v8 = vmov 0  }
 0x1e4   : > { %6052 = vset.pattern.permute.xlu1 %v6529_v8  ;;  %6051 = vset.pattern.permute.xlu0 %v6529_v8  ;;  %v856_v8 = vld [vmem:[%s6745_s12 + $0x18] sm:$0xff] }
 0x1e5   : > { %v5685_v17 = vpop.f32.mrb[4].mxu0  ;;  %1077 = vmax.xlane.f32.xlu1 %v7303_v14 }
 0x1e6   : > { %v1029_v22 = vmul.f32 0.17677669, %v5685_v17  ;;  %v976_v23 = vpop.f32.mrb[5].mxu0  ;;  %1073 = vmax.xlane.f32.xlu0 %v7312_v18  ;;  %v764_v17 = vadd.s32 104, %v7246_v43 }
 0x1e7   : > { %v1027_v24 = vmul.f32 0.17677669, %v976_v23  ;;  %v5686_v27 = vpop.f32.mrb[6].mxu0 }
 0x1e8   : > { %v1030_v29 = vmul.f32 0.17677669, %v5686_v27  ;;  %v7327_v30 = vsel %vm795_vm7, %v1029_v22, -inf  ;;  %v979_v33 = vpop.f32.mrb[7].mxu0  ;;  %v7407_v27 = vadd.s32 %v7251_v46, %v763_v6 }
 0x1e9   : > { %v1028_v35 = vmul.f32 0.17677669, %v979_v33  ;;  %v7348_v42 = vsel %vm793_vm9, %v1027_v24, -inf  ;;  %v7399_v24 = vadd.s32 %v7251_v46, %v766_v0  ;;  %v853_v0 = vld [vmem:[%s6745_s12] sm:$0xff] }
 0x1ea   : > { %1083 = vmax.xlane.f32.xlu0 %v7327_v30  ;;  %v7342_v40 = vsel %vm796_vm8, %v1030_v29, -inf  ;;  %10130 = vst [vmem:[#allocation21_spill] sm:$0xff] %v7407_v27  ;;  %v7410_v29 = vadd.s32 %v7251_v46, %v764_v17  ;;  %vm10064_vm1 = vcmp.ge.s32.totalorder %v7407_v27, %v7257_v50  ;;  %v857_v17 = vld [vmem:[%s6745_s12 + $0x20] sm:$0xff] }
 0x1eb   : > { %1085 = vmax.xlane.f32.xlu1 %v7342_v40  ;;  %v7356_v45 = vsel %vm10013_vm10, %v1028_v35, -inf  ;;  %10129 = vst [vmem:[#allocation20_spill] sm:$0xff] %v7399_v24  ;;  %vm804_vm0 = vcmp.ge.s32.totalorder %v7399_v24, %v7257_v50  ;;  %v2603_v24 = vld [vmem:[%s6741_s27 + $0x68] sm:$0xff] }
 0x1ec   : > { %10131 = vst [vmem:[#allocation22_spill] sm:$0xff] %v7410_v29 }
 0x1ed   : > { %v5689_v48 = vpop.f32.mrb[8].mxu0 }
 0x1ee   : > { %v1033_v57 = vmul.f32 0.17677669, %v5689_v48  ;;  %v992_v58 = vpop.f32.mrb[9].mxu0  ;;  %1079 = vmax.xlane.f32.xlu0 %v7348_v42 }
 0x1ef   : > { %v1031_v59 = vmul.f32 0.17677669, %v992_v58  ;;  %v5690_v62 = vpop.f32.mrb[10].mxu0  ;;  %1081 = vmax.xlane.f32.xlu1 %v7356_v45 }
 0x1f0   : > { %v1034_v1 = vmul.f32 0.17677669, %v5690_v62  ;;  %v7375_v2 = vsel %vm799_vm11, %v1033_v57, -inf  ;;  %v995_v4 = vpop.f32.mrb[11].mxu0 }
 0x1f1   : > { %v1032_v12 = vmul.f32 0.17677669, %v995_v4  ;;  %v7396_v23 = vsel %vm797_vm13, %v1031_v59, -inf  ;;  %v855_v4 = vld [vmem:[%s6745_s12 + $0x10] sm:$0xff] }
 0x1f2   : > { %1091 = vmax.xlane.f32.xlu0 %v7375_v2  ;;  %v7390_v22 = vsel %vm800_vm12, %v1034_v1, -inf  ;;  %v854_v1 = vld [vmem:[%s6745_s12 + $0x8] sm:$0xff] }
 0x1f3   : > { %1093 = vmax.xlane.f32.xlu1 %v7390_v22  ;;  %v7404_v43 = vsel %vm9980_vm14, %v1032_v12, -inf  ;;  %vm9981_vm14 = vcmp.ge.s32.totalorder %v7410_v29, %v7257_v50  ;;  %v7449_v6 = vpack.c.bf16 %v854_v1, %v853_v0  ;;  %v7452_v12 = vpack.c.bf16 %v856_v8, %v855_v4  ;;  %v7476_v0 = vld [vmem:[#allocation2 + $0x10] sm:$0xff]  ;;  %v7478_v1 = vld [vmem:[#allocation2] sm:$0xff] }
 0x1f4   : > { %10133 = vst [vmem:[#allocation24_spill] sm:$0xff] %v7476_v0  ;;  %10134 = vst [vmem:[#allocation25_spill] sm:$0xff] %v7478_v1 }
 0x1f5   : > { %v5693_v28 = vpop.f32.mrb[12].mxu0  ;;  %5695 = vmatprep.subr.bf16.mxu1 %v7449_v6 }
 0x1f6   : > { %v1037_v33 = vmul.f32 0.17677669, %v5693_v28  ;;  %v1008_v34 = vpop.f32.mrb[13].mxu0  ;;  %1087 = vmax.xlane.f32.xlu0 %v7396_v23  ;;  %v858_v28 = vld [vmem:[%s6745_s12 + $0x28] sm:$0xff]  ;;  %5696 = vmatpush3.bf16.msra.mxu1 %v7449_v6 }
 0x1f7   : > { %v1035_v35 = vmul.f32 0.17677669, %v1008_v34  ;;  %v5694_v39 = vpop.f32.mrb[14].mxu0  ;;  %1089 = vmax.xlane.f32.xlu1 %v7404_v43  ;;  %5697 = vmatprep.subr.bf16.mxu1 %v7452_v12  ;;  %v859_v34 = vld [vmem:[%s6745_s12 + $0x30] sm:$0xff] }
 0x1f8   : > { %v1038_v48 = vmul.f32 0.17677669, %v5694_v39  ;;  %v1011_v46 = vpop.f32.mrb[15].mxu0  ;;  %v7421_v56 = vsel %vm803_vm15, %v1037_v33, -inf  ;;  %v7459_v33 = vpack.c.bf16 %v858_v28, %v857_v17 }
 0x1f9   : > { %v1036_v57 = vmul.f32 0.17677669, %v1011_v46  ;;  %v7437_v59 = vsel %vm10064_vm1, %v1035_v35, -inf  ;;  %v860_v35 = vld [vmem:[%s6745_s12 + $0x38] sm:$0xff]  ;;  %v862_v46 = vld [vmem:[%s6745_s12 + $0x48] sm:$0xff] }
 0x1fa   : > { %v7430_v58 = vsel %vm804_vm0, %v1038_v48, -inf  ;;  %1099 = vmax.xlane.f32.xlu0 %v7421_v56  ;;  %5698 = vmatpush3.bf16.msra.mxu1 %v7452_v12  ;;  %v7465_v39 = vpack.c.bf16 %v860_v35, %v859_v34  ;;  %v861_v48 = vld [vmem:[%s6745_s12 + $0x40] sm:$0xff]  ;;  %v7486_v34 = vld [vmem:[#allocation2 + $0x18] sm:$0xff] }
 0x1fb   : > { %1101 = vmax.xlane.f32.xlu1 %v7430_v58  ;;  %v7442_v62 = vsel %vm9981_vm14, %v1036_v57, -inf  ;;  %5699 = vmatprep.subr.bf16.mxu1 %v7459_v33  ;;  %v7471_v57 = vpack.c.bf16 %v862_v46, %v861_v48  ;;  %vm1375_vm14 = vcmask 7168   ;;  %10137 = vst [vmem:[#allocation28_spill] sm:$0xff] %v7486_v34  ;;  %v7493_v48 = vld [vmem:[#allocation2 + $0x8] sm:$0xff]  ;;  %v863_v46 = vld [vmem:[%s6745_s12 + $0x50] sm:$0xff] }
 0x1fc   : > { %10138 = vst [vmem:[#allocation29_spill] sm:$0xff] %v7493_v48 }
 0x1fd   : > { %10132 = vst [vmem:[#allocation23_spill] sm:$0xff] %v7471_v57 }
 0x1fe   : > { %1095 = vmax.xlane.f32.xlu0 %v7437_v59  ;;  %5700 = vmatpush3.bf16.msra.mxu1 %v7459_v33 }
 0x1ff   : > { %1097 = vmax.xlane.f32.xlu1 %v7442_v62  ;;  %5701 = vmatprep.subr.bf16.mxu1 %v7465_v39 }
 0x202   : > { %5702 = vmatpush3.bf16.msra.mxu1 %v7465_v39 }
 0x203   : > { %5703 = vmatprep.subr.bf16.mxu1 %v7471_v57 }
 0x206   : > { %5704 = vmatpush3.bf16.msra.mxu1 %v7471_v57 }
 0x26e   : > { %v1076_v4 = vpop.xlane.xlu1 %1075 }
 0x26f   : > { %v7481_v8 = vmax.f32 %v7476_v0, %v1076_v4  ;;  %v1072_v17 = vpop.xlane.xlu0 %1071  ;;  %v864_v4 = vld [vmem:[%s6745_s12 + $0x58] sm:$0xff] }
 0x270   : > { %v7484_v28 = vmax.f32 %v7478_v1, %v1072_v17  ;;  %v7502_v35 = vpack.c.bf16 %v864_v4, %v863_v46  ;;  %v7515_v1 = vld [vmem:[#allocation2 + $0x30] sm:$0xff]  ;;  %v866_v46 = vld [vmem:[%s6745_s12 + $0x68] sm:$0xff]  ;;  %v7525_v4 = vld [vmem:[#allocation2 + $0x38] sm:$0xff] }
 0x271   : > { %10135 = vst [vmem:[#allocation26_spill] sm:$0xff] %v7481_v8  ;;  %1643 = vst.msk [vmem:[#allocation2 + $0x10] sm:$0xff] %vm1375_vm14, %v7481_v8  ;;  %1179 = vperm.xlu1 %6052, %v7481_v8  }
 0x272   : > { %10136 = vst [vmem:[#allocation27_spill] sm:$0xff] %v7484_v28  ;;  %1641 = vst.msk [vmem:[#allocation2] sm:$0xff] %vm1375_vm14, %v7484_v28  ;;  %v1078_v57 = vpop.xlane.xlu1 %1077  ;;  %1169 = vperm.xlu0 %6051, %v7484_v28   ;;  %5705 = vmatprep.subr.bf16.mxu1 %v7502_v35 }
 0x273   : > { %10139 = vst [vmem:[#allocation30_spill] sm:$0xff] %v7502_v35  ;;  %v7505_v0 = vmax.f32 %v7486_v34, %v1078_v57  ;;  %v1074_v8 = vpop.xlane.xlu0 %1073  ;;  %10142 = vst [vmem:[#allocation33_spill] sm:$0xff] %v7515_v1  ;;  %5706 = vmatpush3.bf16.msra.mxu1 %v7502_v35  ;;  %v865_v57 = vld [vmem:[%s6745_s12 + $0x60] sm:$0xff] }
 0x274   : > { %v7508_v29 = vmax.f32 %v7493_v48, %v1074_v8  ;;  %10143 = vst [vmem:[#allocation34_spill] sm:$0xff] %v7525_v4  ;;  %v7527_v17 = vpack.c.bf16 %v866_v46, %v865_v57  ;;  %v7536_v8 = vld [vmem:[#allocation2 + $0x20] sm:$0xff]  ;;  %v867_v48 = vld [vmem:[%s6745_s12 + $0x70] sm:$0xff] }
 0x275   : > { %10140 = vst [vmem:[#allocation31_spill] sm:$0xff] %v7505_v0  ;;  %1644 = vst.msk [vmem:[#allocation2 + $0x18] sm:$0xff] %vm1375_vm14, %v7505_v0 }
 0x276   : > { %10141 = vst [vmem:[#allocation32_spill] sm:$0xff] %v7508_v29  ;;  %1642 = vst.msk [vmem:[#allocation2 + $0x8] sm:$0xff] %vm1375_vm14, %v7508_v29  ;;  %1174 = vperm.xlu1 %6052, %v7508_v29   ;;  %5707 = vmatprep.subr.bf16.mxu1 %v7527_v17  ;;  %v868_v29 = vld [vmem:[%s6745_s12 + $0x78] sm:$0xff] }
 0x277   : > { %10144 = vst [vmem:[#allocation35_spill] sm:$0xff] %v7527_v17  ;;  %v1084_v34 = vpop.xlane.xlu0 %1083  ;;  %10146 = vst [vmem:[#allocation37_spill] sm:$0xff] %v7536_v8  ;;  %5708 = vmatpush3.bf16.msra.mxu1 %v7527_v17  ;;  %v7548_v46 = vpack.c.bf16 %v868_v29, %v867_v48  ;;  %v7562_v29 = vld [vmem:[#allocation2 + $0x50] sm:$0xff] }
 0x278   : > { %v7530_v28 = vmax.f32 %v7515_v1, %v1084_v34  ;;  %v1086_v35 = vpop.xlane.xlu1 %1085  ;;  %v7546_v34 = vld [vmem:[#allocation2 + $0x28] sm:$0xff]  ;;  %10149 = vst [vmem:[#allocation40_spill] sm:$0xff] %v7562_v29 }
 0x279   : > { %v7534_v27 = vmax.f32 %v7525_v4, %v1086_v35  ;;  %10147 = vst [vmem:[#allocation38_spill] sm:$0xff] %v7546_v34  ;;  %10148 = vst [vmem:[#allocation39_spill] sm:$0xff] %v7548_v46  ;;  %5709 = vmatprep.subr.bf16.mxu1 %v7548_v46 }
 0x27a   : > { %1647 = vst.msk [vmem:[#allocation2 + $0x30] sm:$0xff] %vm1375_vm14, %v7530_v28  ;;  %1184 = vperm.xlu1 %6052, %v7505_v0  }
 0x27b   : > { %10145 = vst [vmem:[#allocation36_spill] sm:$0xff] %v7534_v27  ;;  %1648 = vst.msk [vmem:[#allocation2 + $0x38] sm:$0xff] %vm1375_vm14, %v7534_v27  ;;  %1204 = vperm.xlu0 %6051, %v7534_v27   ;;  %v1080_v17 = vpop.xlane.xlu0 %1079  ;;  %5710 = vmatpush3.bf16.msra.mxu1 %v7548_v46  ;;  %v7604_v46 = vld [vmem:[#allocation2 + $0x70] sm:$0xff] }
 0x27c   : > { %v7556_v57 = vmax.f32 %v7536_v8, %v1080_v17  ;;  %v1082_v1 = vpop.xlane.xlu1 %1081  ;;  %v7571_v17 = vld [vmem:[#allocation2 + $0x58] sm:$0xff]  ;;  %v7583_v8 = vld [vmem:[#allocation2 + $0x40] sm:$0xff]  ;;  %10156 = vst [vmem:[#allocation47_spill] sm:$0xff] %v7604_v46 }
 0x27d   : > { %v7560_v0 = vmax.f32 %v7546_v34, %v1082_v1  ;;  %10150 = vst [vmem:[#allocation41_spill] sm:$0xff] %v7571_v17  ;;  %10153 = vst [vmem:[#allocation44_spill] sm:$0xff] %v7583_v8  ;;  %v7592_v1 = vld [vmem:[#allocation2 + $0x48] sm:$0xff] }
 0x27e   : > { %1645 = vst.msk [vmem:[#allocation2 + $0x20] sm:$0xff] %vm1375_vm14, %v7556_v57  ;;  %1761 = vrot.lane.b32.xlu1 %v7137_v53, %s6530_s30  ;;  %10154 = vst [vmem:[#allocation45_spill] sm:$0xff] %v7592_v1 }
 0x27f   : > { %1646 = vst.msk [vmem:[#allocation2 + $0x28] sm:$0xff] %vm1375_vm14, %v7560_v0  ;;  %v1092_v35 = vpop.xlane.xlu0 %1091 }
 0x280   : > { %v7578_v27 = vmax.f32 %v7562_v29, %v1092_v35  ;;  %v1094_v48 = vpop.xlane.xlu1 %1093  ;;  %v7613_v35 = vld [vmem:[#allocation2 + $0x78] sm:$0xff] }
 0x281   : > { %v7581_v4 = vmax.f32 %v7571_v17, %v1094_v48  ;;  %10157 = vst [vmem:[#allocation48_spill] sm:$0xff] %v7613_v35 }
 0x282   : > { %10151 = vst [vmem:[#allocation42_spill] sm:$0xff] %v7578_v27  ;;  %1651 = vst.msk [vmem:[#allocation2 + $0x50] sm:$0xff] %vm1375_vm14, %v7578_v27  ;;  %1763 = vrot.lane.b32.xlu1 %v7140_v55, %s6530_s30  ;;  %1219 = vperm.xlu0 %6051, %v7578_v27  }
 0x283   : > { %10152 = vst [vmem:[#allocation43_spill] sm:$0xff] %v7581_v4  ;;  %1652 = vst.msk [vmem:[#allocation2 + $0x58] sm:$0xff] %vm1375_vm14, %v7581_v4  ;;  %v1088_v48 = vpop.xlane.xlu0 %1087 }
 0x284   : > { %v7599_v34 = vmax.f32 %v7583_v8, %v1088_v48  ;;  %v1090_v53 = vpop.xlane.xlu1 %1089  ;;  %v7625_v8 = vld [vmem:[#allocation2 + $0x60] sm:$0xff] }
 0x285   : > { %v7602_v29 = vmax.f32 %v7592_v1, %v1090_v53  ;;  %10160 = vst [vmem:[#allocation51_spill] sm:$0xff] %v7625_v8 }
 0x286   : > { %10155 = vst [vmem:[#allocation46_spill] sm:$0xff] %v7599_v34  ;;  %1649 = vst.msk [vmem:[#allocation2 + $0x40] sm:$0xff] %vm1375_vm14, %v7599_v34  ;;  %1765 = vrot.lane.b32.xlu1 %v7158_v63, %s6530_s30  ;;  %1209 = vperm.xlu0 %6051, %v7599_v34   ;;  %v7630_v63 = vld [vmem:[#allocation2 + $0x68] sm:$0xff] }
 0x287   : > { %1650 = vst.msk [vmem:[#allocation2 + $0x48] sm:$0xff] %vm1375_vm14, %v7602_v29  ;;  %v1100_v53 = vpop.xlane.xlu0 %1099  ;;  %10161 = vst [vmem:[#allocation52_spill] sm:$0xff] %v7630_v63 }
 0x288   : > { %v1102_v17 = vpop.xlane.xlu1 %1101  ;;  %v7620_v55 = vmax.f32 %v7604_v46, %v1100_v53  ;;  %v7920_v46 = vld [vmem:[#allocation2 + $0x88] sm:$0xff] }
 0x289   : > { %v7623_v27 = vmax.f32 %v7613_v35, %v1102_v17  ;;  %10193 = vst [vmem:[#allocation80_spill] sm:$0xff] %v7920_v46 }
 0x28a   : > { %10158 = vst [vmem:[#allocation49_spill] sm:$0xff] %v7620_v55  ;;  %1199 = vperm.xlu1 %6052, %v7530_v28   ;;  %1767 = vrot.lane.b32.xlu0 %v7166_v3, %s6530_s30  ;;  %1655 = vst.msk [vmem:[#allocation2 + $0x70] sm:$0xff] %vm1375_vm14, %v7620_v55 }
 0x28b   : > { %10159 = vst [vmem:[#allocation50_spill] sm:$0xff] %v7623_v27  ;;  %1656 = vst.msk [vmem:[#allocation2 + $0x78] sm:$0xff] %vm1375_vm14, %v7623_v27  ;;  %v1096_v17 = vpop.xlane.xlu0 %1095 }
 0x28c   : > { %v1098_v1 = vpop.xlane.xlu1 %1097  ;;  %v7641_v34 = vmax.f32 %v7625_v8, %v1096_v17 }
 0x28d   : > { %v7644_v3 = vmax.f32 %v7630_v63, %v1098_v1 }
 0x28e   : > { %10162 = vst [vmem:[#allocation53_spill] sm:$0xff] %v7641_v34  ;;  %1189 = vperm.xlu1 %6052, %v7556_v57   ;;  %1653 = vst.msk [vmem:[#allocation2 + $0x60] sm:$0xff] %vm1375_vm14, %v7641_v34 }
 0x28f   : > { %10163 = vst [vmem:[#allocation54_spill] sm:$0xff] %v7644_v3  ;;  %1654 = vst.msk [vmem:[#allocation2 + $0x68] sm:$0xff] %vm1375_vm14, %v7644_v3  ;;  %1234 = vperm.xlu0 %6051, %v7644_v3  }
 0x292   : > { %1194 = vperm.xlu1 %6052, %v7560_v0  }
 0x293   : > { %1244 = vperm.xlu0 %6051, %v7623_v27  }
 0x296   : > { %1224 = vperm.xlu1 %6052, %v7581_v4   ;;  %v2619_v4 = vld [vmem:[%s6743_s0 + $0x28] sm:$0xff] }
 0x297   : > { %1771 = vrot.lane.b32.xlu0 %v7182_v11, %s6530_s30 }
 0x29a   : > { %1214 = vperm.xlu1 %6052, %v7602_v29  }
 0x29b   : > { %1775 = vrot.lane.b32.xlu0 %v7198_v19, %s6530_s30 }
 0x29e   : > { %1239 = vperm.xlu1 %6052, %v7620_v55  }
 0x29f   : > { %1739 = vrot.lane.b32.xlu0 %v7208_v25, %s6530_s30 }
 0x2a2   : > { %1229 = vperm.xlu1 %6052, %v7641_v34   ;;  %v7927_v34 = vld [vmem:[#allocation2 + $0x98] sm:$0xff] }
 0x2a3   : > { %1743 = vrot.lane.b32.xlu0 %v7220_v31, %s6530_s30  ;;  %10194 = vst [vmem:[#allocation81_spill] sm:$0xff] %v7927_v34 }
 0x2a6   : > { %1769 = vrot.lane.b32.xlu1 %v7174_v7, %s6530_s30 }
 0x2a7   : > { %1747 = vrot.lane.b32.xlu0 %v7232_v37, %s6530_s30 }
 0x2aa   : > { %1773 = vrot.lane.b32.xlu1 %v7190_v15, %s6530_s30 }
 0x2ab   : > { %1751 = vrot.lane.b32.xlu0 %v7242_v41, %s6530_s30 }
 0x2ae   : > { %1737 = vrot.lane.b32.xlu1 %v7152_v61, %s6530_s30 }
 0x2af   : > { %2421 = vrot.lane.b32.xlu0 %v7449_v6, %s6530_s30 }
 0x2b2   : > { %1741 = vrot.lane.b32.xlu1 %v7210_v26, %s6530_s30 }
 0x2b6   : > { %1745 = vrot.lane.b32.xlu1 %v7222_v32, %s6530_s30 }
 0x2ba   : > { %1749 = vrot.lane.b32.xlu1 %v7234_v38, %s6530_s30 }
 0x2be   : > { %2423 = vrot.lane.b32.xlu1 %v7452_v12, %s6530_s30 }
 0x2f0   : > { %v1180_v7 = vpop.permute.xlu1 %1179 }
 0x2f1   : > { %v1170_v11 = vpop.permute.xlu0 %1169  ;;  %v1249_v61 = vsub.f32 %v7279_v5, %v1180_v7 }
 0x2f2   : > { %v1247_v15 = vsub.f32 %v7288_v9, %v1170_v11 }
 0x2f3   : > { %v1267_v37 = vmul.f32 1.442695, %v1249_v61 }
 0x2f4   : > { %v1263_v19 = vmul.f32 1.442695, %v1247_v15 }
 0x2f5   : > { %v1175_v25 = vpop.permute.xlu1 %1174 }
 0x2f6   : > { %v1248_v31 = vsub.f32 %v7312_v18, %v1175_v25  ;;  %6053 = vpow2.f32 %v1263_v19 }
 0x2f8   : > { %v1265_v26 = vmul.f32 1.442695, %v1248_v31 }
 0x2f9   : > { %v1185_v32 = vpop.permute.xlu1 %1184 }
 0x2fa   : > { %6055 = vpow2.f32 %v1265_v26  ;;  %v1250_v38 = vsub.f32 %v7303_v14, %v1185_v32  ;;  %v1205_v9 = vpop.permute.xlu0 %1204 }
 0x2fb   : > { %6057 = vpow2.f32 %v1267_v37  ;;  %v1254_v32 = vsub.f32 %v7342_v40, %v1205_v9 }
 0x2fc   : > { %v1269_v41 = vmul.f32 1.442695, %v1250_v38 }
 0x2fd   : > { %v1762_v6 = vpop.permute.xlu1 %1761  ;;  %v1277_v27 = vmul.f32 1.442695, %v1254_v32 }
 0x2fe   : > { %6059 = vpow2.f32 %v1269_v41  ;;  %5927 = vmatprep.subr.msk.bf16.mxu1 %vm877_vm2, %v1762_v6  ;;  %v1802_v25 = vsel %vm877_vm2, %v1762_v6, 0 }
 0x300   : > { %v7695_v5 = vpop.eup %6053 }
 0x301   : > { %v1764_v12 = vpop.permute.xlu1 %1763  ;;  %v1220_v18 = vpop.permute.xlu0 %1219 }
 0x304   : > { %v7697_v1 = vpop.eup %6055 }
 0x305   : > { %v1766_v17 = vpop.permute.xlu1 %1765  ;;  %v1504_v7 = vpack.c.bf16 %v7697_v1, %v7695_v5  ;;  %v7701_v11 = vpop.eup %6057 }
 0x306   : > { %v1210_v19 = vpop.permute.xlu0 %1209 }
 0x307   : > { %5711 = vmatprep.mubr.bf16.mxu1 %v1504_v7  ;;  %v1255_v6 = vsub.f32 %v7396_v23, %v1210_v19  ;;  %v1808_v23 = vsel %vm877_vm2, %v1766_v17, 0 }
 0x308   : > { %v7703_v14 = vpop.eup %6059 }
 0x309   : > { %v1200_v15 = vpop.permute.xlu1 %1199  ;;  %v1505_v61 = vpack.c.bf16 %v7703_v14, %v7701_v11 }
 0x30a   : > { %v1253_v31 = vsub.f32 %v7327_v30, %v1200_v15  ;;  %v1768_v41 = vpop.permute.xlu0 %1767  ;;  %v1257_v15 = vsub.f32 %v7375_v2, %v1220_v18 }
 0x30b   : > { %5712 = vmatmul.mubr.bf16.vlgmr.msra.gmra.mrb[0].mxu1 %v1505_v61  ;;  %v1805_v61 = vsel %vm877_vm2, %v1764_v12, 0 }
 0x30c   : > { %5728 = vmatpush3.bf16.xpose.msra.mxu1 %v1802_v25  ;;  %v1275_v38 = vmul.f32 1.442695, %v1253_v31 }
 0x30d   : > { %5928 = vmatprep.subr.msk.bf16.mxu1 %vm877_vm2, %v1764_v12  ;;  %v1190_v26 = vpop.permute.xlu1 %1189 }
 0x30e   : > { %v1251_v37 = vsub.f32 %v7348_v42, %v1190_v26  ;;  %6061 = vpow2.f32 %v1275_v38  ;;  %v1235_v9 = vpop.permute.xlu0 %1234 }
 0x30f   : > { %v1260_v19 = vsub.f32 %v7442_v62, %v1235_v9 }
 0x310   : > { %v1271_v7 = vmul.f32 1.442695, %v1251_v37 }
 0x311   : > { %v1195_v53 = vpop.permute.xlu1 %1194 }
 0x312   : > { %v1252_v48 = vsub.f32 %v7356_v45, %v1195_v53  ;;  %6063 = vpow2.f32 %v1271_v7  ;;  %v1279_v45 = vmul.f32 1.442695, %v1255_v6  ;;  %v1245_v26 = vpop.permute.xlu0 %1244 }
 0x313   : > { %v1262_v62 = vsub.f32 %v7430_v58, %v1245_v26 }
 0x314   : > { %v1273_v30 = vmul.f32 1.442695, %v1252_v48  ;;  %5730 = vmatpush3.bf16.xpose.msra.mxu1 %v1805_v61  ;;  %v1283_v48 = vmul.f32 1.442695, %v1257_v15 }
 0x315   : > { %5929 = vmatprep.subr.msk.bf16.mxu1 %vm877_vm2, %v1766_v17  ;;  %v1225_v42 = vpop.permute.xlu1 %1224  ;;  %v1289_v17 = vmul.f32 1.442695, %v1260_v19 }
 0x316   : > { %6065 = vpow2.f32 %v1273_v30  ;;  %v1258_v40 = vsub.f32 %v7390_v22, %v1225_v42  ;;  %v1293_v30 = vmul.f32 1.442695, %v1262_v62 }
 0x317   : > { %6067 = vpow2.f32 %v1277_v27 }
 0x318   : > { %v1285_v53 = vmul.f32 1.442695, %v1258_v40  ;;  %6069 = vpow2.f32 %v1279_v45  ;;  %v7722_v27 = vpop.eup %6061 }
 0x319   : > { %v1215_v12 = vpop.permute.xlu1 %1214 }
 0x31a   : > { %v1256_v25 = vsub.f32 %v7404_v43, %v1215_v12  ;;  %6071 = vpow2.f32 %v1285_v53  ;;  %v1772_v53 = vpop.permute.xlu0 %1771 }
 0x31b   : > { %v1817_v26 = vsel %vm877_vm2, %v1772_v53, 0 }
 0x31c   : > { %v1281_v31 = vmul.f32 1.442695, %v1256_v25  ;;  %5732 = vmatpush3.bf16.xpose.msra.mxu1 %v1808_v23  ;;  %v7725_v18 = vpop.eup %6063 }
 0x31d   : > { %5930 = vmatprep.subr.msk.bf16.mxu1 %vm877_vm2, %v1768_v41  ;;  %v1240_v22 = vpop.permute.xlu1 %1239 }
 0x31e   : > { %6073 = vpow2.f32 %v1281_v31  ;;  %v1261_v2 = vsub.f32 %v7421_v56, %v1240_v22  ;;  %v1811_v56 = vsel %vm877_vm2, %v1768_v41, 0 }
 0x31f   : > { %6075 = vpow2.f32 %v1283_v48 }
 0x320   : > { %v7727_v43 = vpop.eup %6065  ;;  %v1291_v37 = vmul.f32 1.442695, %v1261_v2  ;;  %6077 = vpow2.f32 %v1289_v17 }
 0x321   : > { %v1230_v32 = vpop.permute.xlu1 %1229  ;;  %v1506_v38 = vpack.c.bf16 %v7727_v43, %v7725_v18  ;;  %v7732_v7 = vpop.eup %6067 }
 0x322   : > { %v1259_v61 = vsub.f32 %v7437_v59, %v1230_v32  ;;  %v1507_v6 = vpack.c.bf16 %v7732_v7, %v7722_v27  ;;  %6079 = vpow2.f32 %v1291_v37  ;;  %v7738_v40 = vpop.eup %6069  ;;  %v1776_v37 = vpop.permute.xlu0 %1775 }
 0x323   : > { %5715 = vmatprep.mubr.bf16.mxu1 %v1506_v38  ;;  %v1823_v32 = vsel %vm877_vm2, %v1776_v37, 0 }
 0x324   : > { %v1287_v42 = vmul.f32 1.442695, %v1259_v61  ;;  %5734 = vmatpush3.bf16.xpose.msra.mxu1 %v1811_v56  ;;  %v7741_v9 = vpop.eup %6071 }
 0x325   : > { %5716 = vmatmul.mubr.bf16.gmra.mrb[4].mxu1 %v1507_v6  ;;  %v1770_v58 = vpop.permute.xlu1 %1769  ;;  %10164 = vst [vmem:[#allocation55_spill] sm:$0xff] %v7741_v9 }
 0x326   : > { %6081 = vpow2.f32 %v1287_v42  ;;  %5931 = vmatprep.subr.msk.bf16.mxu1 %vm877_vm2, %v1770_v58  ;;  %v1814_v15 = vsel %vm877_vm2, %v1770_v58, 0  ;;  %v1740_v38 = vpop.permute.xlu0 %1739 }
 0x327   : > { %6083 = vpow2.f32 %v1293_v30 }
 0x328   : > { %v7743_v59 = vpop.eup %6073 }
 0x329   : > { %v1508_v41 = vpack.c.bf16 %v7743_v59, %v7738_v40  ;;  %v7748_v45 = vpop.eup %6075  ;;  %v1774_v48 = vpop.permute.xlu1 %1773 }
 0x32a   : > { %v1509_v12 = vpack.c.bf16 %v7741_v9, %v7748_v45  ;;  %v7753_v25 = vpop.eup %6077  ;;  %v1820_v62 = vsel %vm877_vm2, %v1774_v48, 0  ;;  %v1744_v56 = vpop.permute.xlu0 %1743  ;;  %v2600_v9 = vld [vmem:[%s6741_s27 + $0x50] sm:$0xff] }
 0x32b   : > { %5719 = vmatprep.mubr.bf16.mxu1 %v1508_v41  ;;  %10165 = vst [vmem:[#allocation56_spill] sm:$0xff] %v7753_v25 }
 0x32c   : > { %5736 = vmatpush3.bf16.xpose.msra.mxu1 %v1814_v15  ;;  %v7755_v23 = vpop.eup %6079 }
 0x32d   : > { %5720 = vmatmul.mubr.bf16.gmra.mrb[8].mxu1 %v1509_v12  ;;  %5932 = vmatprep.subr.msk.bf16.mxu1 %vm877_vm2, %v1772_v53  ;;  %10166 = vst [vmem:[#allocation57_spill] sm:$0xff] %v7755_v23  ;;  %v1738_v17 = vpop.permute.xlu1 %1737 }
 0x32e   : > { %v1748_v30 = vpop.permute.xlu0 %1747 }
 0x330   : > { %v7757_v19 = vpop.eup %6081 }
 0x331   : > { %10167 = vst [vmem:[#allocation58_spill] sm:$0xff] %v7757_v19  ;;  %v1510_v31 = vpack.c.bf16 %v7753_v25, %v7757_v19  ;;  %v7762_v22 = vpop.eup %6083  ;;  %v1742_v61 = vpop.permute.xlu1 %1741  ;;  %v8062_v19 = vld [vmem:[#allocation2 + $0xe0] sm:$0xff] }
 0x332   : > { %10168 = vst [vmem:[#allocation59_spill] sm:$0xff] %v7762_v22  ;;  %v1511_v2 = vpack.c.bf16 %v7762_v22, %v7755_v23  ;;  %v1752_v58 = vpop.permute.xlu0 %1751  ;;  %v8042_v23 = vld [vmem:[#allocation2 + $0xf0] sm:$0xff]  ;;  %10221 = vst [vmem:[#allocation100_spill] sm:$0xff] %v8062_v19 }
 0x333   : > { %5723 = vmatprep.mubr.bf16.mxu1 %v1510_v31  ;;  %10217 = vst [vmem:[#allocation96_spill] sm:$0xff] %v8042_v23 }
 0x334   : > { %5738 = vmatpush3.bf16.xpose.msra.mxu1 %v1817_v26 }
 0x335   : > { %5724 = vmatmul.mubr.bf16.gmra.mrb[12].mxu1 %v1511_v2  ;;  %5933 = vmatprep.subr.msk.bf16.mxu1 %vm877_vm2, %v1774_v48  ;;  %v1746_v6 = vpop.permute.xlu1 %1745 }
 0x336   : > { %5743 = vmatprep.mubr.msk.bf16.mxu1 %vm877_vm2, %v1738_v17  ;;  %v2422_v48 = vpop.permute.xlu0 %2421 }
 0x337   : > { %5759 = vmatprep.subr.bf16.mxu0 %v2422_v48 }
 0x338   : > { %5760 = vmatpush3.bf16.msra.mxu0 %v2422_v48 }
 0x339   : > { %v1750_v42 = vpop.permute.xlu1 %1749 }
 0x33c   : > { %5740 = vmatpush3.bf16.xpose.msra.mxu1 %v1820_v62 }
 0x33d   : > { %5934 = vmatprep.subr.msk.bf16.mxu1 %vm877_vm2, %v1776_v37  ;;  %v2424_v31 = vpop.permute.xlu1 %2423 }
 0x33e   : > { %5761 = vmatprep.subr.bf16.mxu0 %v2424_v31 }
 0x33f   : > { %5762 = vmatpush3.bf16.msra.mxu0 %v2424_v31 }
 0x344   : > { %5742 = vmatpush3.bf16.xpose.msra.mxu1 %v1823_v32 }
 0x34b   : > { %5744 = vmatmul.mubr.msk.bf16.vlgmr.msra.gmra.mrb[16].mxu1 %vm877_vm2, %v1740_v38 }
 0x34c   : > { %5747 = vmatprep.mubr.msk.bf16.mxu1 %vm877_vm2, %v1742_v61 }
 0x353   : > { %5748 = vmatmul.mubr.msk.bf16.gmra.mrb[20].mxu1 %vm877_vm2, %v1744_v56 }
 0x354   : > { %5751 = vmatprep.mubr.msk.bf16.mxu1 %vm877_vm2, %v1746_v6 }
 0x35b   : > { %5752 = vmatmul.mubr.msk.bf16.gmra.mrb[24].mxu1 %vm877_vm2, %v1748_v30 }
 0x35c   : > { %5755 = vmatprep.mubr.msk.bf16.mxu1 %vm877_vm2, %v1750_v42 }
 0x363   : > { %5756 = vmatmul.mubr.msk.bf16.gmra.mrb[28].mxu1 %vm877_vm2, %v1752_v58 }
 0x3de   : > { %v7778_v41 = vpop.f32.mrb[0].mxu1 }
 0x3df   : > { %10169 = vst [vmem:[#allocation60_spill] sm:$0xff] %v7778_v41  ;;  %v7780_v15 = vpop.f32.mrb[1].mxu1 }
 0x3e0   : > { %10170 = vst [vmem:[#allocation61_spill] sm:$0xff] %v7780_v15  ;;  %v7782_v53 = vpop.f32.mrb[2].mxu1 }
 0x3e1   : > { %10171 = vst [vmem:[#allocation62_spill] sm:$0xff] %v7782_v53  ;;  %v7784_v12 = vpop.f32.mrb[3].mxu1 }
 0x3e2   : > { %10172 = vst [vmem:[#allocation63_spill] sm:$0xff] %v7784_v12 }
 0x3f8   : > { %v7786_v26 = vpop.f32.mrb[4].mxu1 }
 0x3f9   : > { %10173 = vst [vmem:[#allocation64_spill] sm:$0xff] %v7786_v26  ;;  %v7788_v2 = vpop.f32.mrb[5].mxu1 }
 0x3fa   : > { %10174 = vst [vmem:[#allocation65_spill] sm:$0xff] %v7788_v2  ;;  %v7790_v17 = vpop.f32.mrb[6].mxu1 }
 0x3fb   : > { %10175 = vst [vmem:[#allocation66_spill] sm:$0xff] %v7790_v17  ;;  %v7792_v62 = vpop.f32.mrb[7].mxu1 }
 0x3fc   : > { %10176 = vst [vmem:[#allocation67_spill] sm:$0xff] %v7792_v62 }
 0x400   : > { %v7794_v37 = vpop.f32.mrb[8].mxu1 }
 0x401   : > { %10177 = vst [vmem:[#allocation68_spill] sm:$0xff] %v7794_v37  ;;  %v7796_v32 = vpop.f32.mrb[9].mxu1 }
 0x402   : > { %10178 = vst [vmem:[#allocation69_spill] sm:$0xff] %v7796_v32  ;;  %v7798_v38 = vpop.f32.mrb[10].mxu1 }
 0x403   : > { %10179 = vst [vmem:[#allocation70_spill] sm:$0xff] %v7798_v38  ;;  %v7800_v61 = vpop.f32.mrb[11].mxu1 }
 0x404   : > { %10180 = vst [vmem:[#allocation71_spill] sm:$0xff] %v7800_v61 }
 0x408   : > { %v7802_v56 = vpop.f32.mrb[12].mxu1 }
 0x409   : > { %10181 = vst [vmem:[#allocation72_spill] sm:$0xff] %v7802_v56  ;;  %v7804_v6 = vpop.f32.mrb[13].mxu1 }
 0x40a   : > { %10182 = vst [vmem:[#allocation73_spill] sm:$0xff] %v7804_v6  ;;  %v7806_v30 = vpop.f32.mrb[14].mxu1 }
 0x40b   : > { %10183 = vst [vmem:[#allocation74_spill] sm:$0xff] %v7806_v30  ;;  %v7808_v42 = vpop.f32.mrb[15].mxu1 }
 0x40c   : > { %10184 = vst [vmem:[#allocation75_spill] sm:$0xff] %v7808_v42 }
 0x41e   : > { %v5745_v58 = vpop.f32.mrb[16].mxu1 }
 0x41f   : > { %v1924_v48 = vmul.f32 0.17677669, %v5745_v58  ;;  %v1859_v31 = vpop.f32.mrb[17].mxu1 }
 0x420   : > { %v1922_v17 = vmul.f32 0.17677669, %v1859_v31  ;;  %v5746_v62 = vpop.f32.mrb[18].mxu1 }
 0x421   : > { %v1862_v53 = vpop.f32.mrb[19].mxu1  ;;  %v7813_v38 = vsel %vm791_vm3, %v1924_v48, -inf  ;;  %v1925_v61 = vmul.f32 0.17677669, %v5746_v62 }
 0x422   : > { %v1923_v41 = vmul.f32 0.17677669, %v1862_v53  ;;  %1975 = vmax.xlane.f32.xlu0 %v7813_v38  ;;  %v7819_v30 = vsel %vm789_vm4, %v1922_v17, -inf }
 0x423   : > { %1971 = vmax.xlane.f32.xlu1 %v7819_v30  ;;  %v7831_v53 = vsel %vm792_vm5, %v1925_v61, -inf }
 0x424   : > { %v7825_v58 = vsel %vm790_vm6, %v1923_v41, -inf }
 0x426   : > { %1973 = vmax.xlane.f32.xlu0 %v7825_v58  ;;  %v5749_v62 = vpop.f32.mrb[20].mxu1 }
 0x427   : > { %1977 = vmax.xlane.f32.xlu1 %v7831_v53  ;;  %v1875_v48 = vpop.f32.mrb[21].mxu1  ;;  %v1928_v61 = vmul.f32 0.17677669, %v5749_v62 }
 0x428   : > { %v5750_v17 = vpop.f32.mrb[22].mxu1  ;;  %v1926_v35 = vmul.f32 0.17677669, %v1875_v48 }
 0x429   : > { %v1878_v31 = vpop.f32.mrb[23].mxu1  ;;  %v1929_v2 = vmul.f32 0.17677669, %v5750_v17  ;;  %v7841_v12 = vsel %vm795_vm7, %v1928_v61, -inf }
 0x42a   : > { %v1927_v3 = vmul.f32 0.17677669, %v1878_v31 }
 0x42c   : > { %v7859_v48 = vsel %vm10013_vm10, %v1927_v3, -inf  ;;  %vm10185_vm10 = vcmp.ge.s32.totalorder %v7364_v52, %v7257_v50 }
 0x42e   : > { %v5753_v42 = vpop.f32.mrb[24].mxu1 }
 0x42f   : > { %v1891_v56 = vpop.f32.mrb[25].mxu1  ;;  %v1932_v63 = vmul.f32 0.17677669, %v5753_v42 }
 0x430   : > { %v5754_v6 = vpop.f32.mrb[26].mxu1  ;;  %v1930_v42 = vmul.f32 0.17677669, %v1891_v56 }
 0x431   : > { %v1894_v37 = vpop.f32.mrb[27].mxu1  ;;  %v1933_v62 = vmul.f32 0.17677669, %v5754_v6 }
 0x432   : > { %v1931_v17 = vmul.f32 0.17677669, %v1894_v37  ;;  %v7877_v31 = vsel %vm797_vm13, %v1930_v42, -inf  ;;  %v10187_v42 = vld [vmem:[#allocation22_spill] sm:$0xff] }
 0x436   : > { %v5757_v15 = vpop.f32.mrb[28].mxu1 }
 0x437   : > { %v1907_v41 = vpop.f32.mrb[29].mxu1  ;;  %v1936_v3 = vmul.f32 0.17677669, %v5757_v15 }
 0x438   : > { %2425 = vrot.lane.b32.xlu1 %v7459_v33, %s6530_s30  ;;  %v5758_v32 = vpop.f32.mrb[30].mxu1  ;;  %v7847_v33 = vsel %vm796_vm8, %v1929_v2, -inf  ;;  %v7865_v2 = vsel %vm799_vm11, %v1932_v63, -inf  ;;  %v7883_v63 = vsel %vm10185_vm10, %v1931_v17, -inf  ;;  %vm10188_vm10 = vcmp.ge.s32.totalorder %v10187_v42, %v7257_v50  ;;  %v2601_v42 = vld [vmem:[%s6741_s27 + $0x58] sm:$0xff] }
 0x439   : > { %v1910_v26 = vpop.f32.mrb[31].mxu1  ;;  %v1937_v6 = vmul.f32 0.17677669, %v5758_v32  ;;  %v7889_v37 = vsel %vm803_vm15, %v1936_v3, -inf  ;;  %v1934_v32 = vmul.f32 0.17677669, %v1907_v41 }
 0x43a   : > { %v1935_v56 = vmul.f32 0.17677669, %v1910_v26  ;;  %v7910_v41 = vld [vmem:[#allocation2 + $0x90] sm:$0xff]  ;;  %v7912_v26 = vld [vmem:[#allocation2 + $0x80] sm:$0xff] }
 0x43b   : > { %v7894_v15 = vsel %vm804_vm0, %v1937_v6, -inf  ;;  %10189 = vst [vmem:[#allocation76_spill] sm:$0xff] %v7910_v41  ;;  %10190 = vst [vmem:[#allocation77_spill] sm:$0xff] %v7912_v26 }
 0x43c   : > { %2427 = vrot.lane.b32.xlu0 %v7465_v39, %s6530_s30  ;;  %v7853_v39 = vsel %vm793_vm9, %v1926_v35, -inf  ;;  %v7871_v35 = vsel %vm800_vm12, %v1933_v62, -inf  ;;  %v7901_v62 = vsel %vm10064_vm1, %v1934_v32, -inf  ;;  %v7907_v17 = vsel %vm10188_vm10, %v1935_v56, -inf }
 0x43d   : > { %vm10272_vm10 = vcmp.ge.s32.totalorder %v7317_v20, %v7257_v50  ;;  %v3554_v20 = vld [vmem:[%s6743_s0 + $0x38] sm:$0xff] }
 0x45b   : > { %1983 = vmax.xlane.f32.xlu0 %v7841_v12 }
 0x45c   : > { %1985 = vmax.xlane.f32.xlu1 %v7847_v33 }
 0x45f   : > { %1979 = vmax.xlane.f32.xlu0 %v7853_v39 }
 0x460   : > { %1981 = vmax.xlane.f32.xlu1 %v7859_v48 }
 0x463   : > { %1991 = vmax.xlane.f32.xlu0 %v7865_v2 }
 0x464   : > { %1993 = vmax.xlane.f32.xlu1 %v7871_v35 }
 0x467   : > { %1987 = vmax.xlane.f32.xlu0 %v7877_v31 }
 0x468   : > { %1989 = vmax.xlane.f32.xlu1 %v7883_v63 }
 0x46b   : > { %1999 = vmax.xlane.f32.xlu0 %v7889_v37 }
 0x46c   : > { %2001 = vmax.xlane.f32.xlu1 %v7894_v15 }
 0x46f   : > { %1995 = vmax.xlane.f32.xlu0 %v7901_v62 }
 0x470   : > { %1997 = vmax.xlane.f32.xlu1 %v7907_v17 }
 0x4af   : > { %v1976_v3 = vpop.xlane.xlu0 %1975 }
 0x4b0   : > { %v7915_v6 = vmax.f32 %v7910_v41, %v1976_v3  ;;  %v1972_v55 = vpop.xlane.xlu1 %1971  ;;  %v2614_v41 = vld [vmem:[%s6743_s0] sm:$0xff] }
 0x4b1   : > { %v7918_v32 = vmax.f32 %v7912_v26, %v1972_v55 }
 0x4b2   : > { %10191 = vst [vmem:[#allocation78_spill] sm:$0xff] %v7915_v6  ;;  %2576 = vst.msk [vmem:[#allocation2 + $0x90] sm:$0xff] %vm1375_vm14, %v7915_v6  ;;  %2079 = vperm.xlu1 %6052, %v7915_v6   ;;  %v10197_v6 = vld [vmem:[#allocation23_spill] sm:$0xff] }
 0x4b3   : > { %10192 = vst [vmem:[#allocation79_spill] sm:$0xff] %v7918_v32  ;;  %2574 = vst.msk [vmem:[#allocation2 + $0x80] sm:$0xff] %vm1375_vm14, %v7918_v32  ;;  %v1974_v55 = vpop.xlane.xlu0 %1973 }
 0x4b4   : > { %v7934_v8 = vmax.f32 %v7920_v46, %v1974_v55  ;;  %v1978_v25 = vpop.xlane.xlu1 %1977  ;;  %v10198_v55 = vld [vmem:[#allocation30_spill] sm:$0xff]  ;;  %v2617_v46 = vld [vmem:[%s6743_s0 + $0x18] sm:$0xff] }
 0x4b5   : > { %v7937_v56 = vmax.f32 %v7927_v34, %v1978_v25  ;;  %v10199_v34 = vld [vmem:[#allocation35_spill] sm:$0xff] }
 0x4b6   : > { %10195 = vst [vmem:[#allocation82_spill] sm:$0xff] %v7934_v8  ;;  %2575 = vst.msk [vmem:[#allocation2 + $0x88] sm:$0xff] %vm1375_vm14, %v7934_v8  ;;  %2069 = vperm.xlu1 %6052, %v7918_v32   ;;  %2074 = vperm.xlu0 %6051, %v7934_v8   ;;  %v2615_v32 = vld [vmem:[%s6743_s0 + $0x8] sm:$0xff]  ;;  %v2616_v8 = vld [vmem:[%s6743_s0 + $0x10] sm:$0xff] }
 0x4b7   : > { %10196 = vst [vmem:[#allocation83_spill] sm:$0xff] %v7937_v56  ;;  %2577 = vst.msk [vmem:[#allocation2 + $0x98] sm:$0xff] %vm1375_vm14, %v7937_v56  ;;  %v2428_v3 = vpop.permute.xlu0 %2427  ;;  %v7958_v26 = vpack.c.bf16 %v2615_v32, %v2614_v41  ;;  %v2631_v22 = vpack.c.bf16 %v2617_v46, %v2616_v8  ;;  %v7972_v41 = vld [vmem:[#allocation2 + $0xb8] sm:$0xff]  ;;  %v7980_v46 = vld [vmem:[#allocation2 + $0xa0] sm:$0xff] }
 0x4b8   : > { %v2426_v25 = vpop.permute.xlu1 %2425  ;;  %10202 = vst [vmem:[#allocation30_spill] sm:$0xff] %v7972_v41  ;;  %10205 = vst [vmem:[#allocation84_spill] sm:$0xff] %v7980_v46 }
 0x4b9   : > { %5763 = vmatprep.subr.bf16.mxu0 %v2426_v25 }
 0x4ba   : > { %5764 = vmatpush3.bf16.msra.mxu0 %v2426_v25  ;;  %2084 = vperm.xlu0 %6051, %v7937_v56   ;;  %v2618_v25 = vld [vmem:[%s6743_s0 + $0x20] sm:$0xff]  ;;  %v10200_v56 = vld [vmem:[#allocation39_spill] sm:$0xff] }
 0x4bb   : > { %5765 = vmatprep.subr.bf16.mxu0 %v2428_v3  ;;  %2429 = vrot.lane.b32.xlu1 %v10197_v6, %s6530_s30  ;;  %v2632_v6 = vpack.c.bf16 %v2619_v4, %v2618_v25  ;;  %v8000_v4 = vld [vmem:[#allocation2 + $0xd0] sm:$0xff] }
 0x4bc   : > { %10209 = vst [vmem:[#allocation88_spill] sm:$0xff] %v8000_v4 }
 0x4be   : > { %5766 = vmatpush3.bf16.msra.mxu0 %v2428_v3  ;;  %2431 = vrot.lane.b32.xlu0 %v10198_v55, %s6530_s30 }
 0x4bf   : > { %2433 = vrot.lane.b32.xlu1 %v10199_v34, %s6530_s30  ;;  %v7970_v34 = vld [vmem:[#allocation2 + $0xb0] sm:$0xff] }
 0x4c0   : > { %10201 = vst [vmem:[#allocation23_spill] sm:$0xff] %v7970_v34 }
 0x4c2   : > { %2435 = vrot.lane.b32.xlu0 %v10200_v56, %s6530_s30  ;;  %v8007_v56 = vld [vmem:[#allocation2 + $0xd8] sm:$0xff] }
 0x4c3   : > { %2694 = vrot.lane.b32.xlu1 %v7958_v26, %s6531_s5  ;;  %10210 = vst [vmem:[#allocation89_spill] sm:$0xff] %v8007_v56 }
 0x4c6   : > { %2696 = vrot.lane.b32.xlu0 %v2631_v22, %s6531_s5  ;;  %v7987_v22 = vld [vmem:[#allocation2 + $0xa8] sm:$0xff] }
 0x4c7   : > { %2698 = vrot.lane.b32.xlu1 %v2632_v6, %s6531_s5  ;;  %10206 = vst [vmem:[#allocation85_spill] sm:$0xff] %v7987_v22 }
 0x4e8   : > { %v1984_v32 = vpop.xlane.xlu0 %1983 }
 0x4e9   : > { %v7975_v3 = vmax.f32 %v7970_v34, %v1984_v32  ;;  %v1986_v55 = vpop.xlane.xlu1 %1985  ;;  %v8020_v34 = vld [vmem:[#allocation2 + $0xc0] sm:$0xff] }
 0x4ea   : > { %v7978_v8 = vmax.f32 %v7972_v41, %v1986_v55  ;;  %10213 = vst [vmem:[#allocation92_spill] sm:$0xff] %v8020_v34 }
 0x4eb   : > { %10203 = vst [vmem:[#allocation35_spill] sm:$0xff] %v7975_v3  ;;  %2580 = vst.msk [vmem:[#allocation2 + $0xb0] sm:$0xff] %vm1375_vm14, %v7975_v3  ;;  %2099 = vperm.xlu1 %6052, %v7975_v3  }
 0x4ec   : > { %10204 = vst [vmem:[#allocation39_spill] sm:$0xff] %v7978_v8  ;;  %2581 = vst.msk [vmem:[#allocation2 + $0xb8] sm:$0xff] %vm1375_vm14, %v7978_v8  ;;  %2104 = vperm.xlu0 %6051, %v7978_v8   ;;  %v1980_v25 = vpop.xlane.xlu0 %1979 }
 0x4ed   : > { %v7995_v6 = vmax.f32 %v7980_v46, %v1980_v25  ;;  %v1982_v32 = vpop.xlane.xlu1 %1981 }
 0x4ee   : > { %v7998_v55 = vmax.f32 %v7987_v22, %v1982_v32  ;;  %v8026_v22 = vld [vmem:[#allocation2 + $0xc8] sm:$0xff] }
 0x4ef   : > { %10207 = vst [vmem:[#allocation86_spill] sm:$0xff] %v7995_v6  ;;  %2578 = vst.msk [vmem:[#allocation2 + $0xa0] sm:$0xff] %vm1375_vm14, %v7995_v6  ;;  %2089 = vperm.xlu1 %6052, %v7995_v6   ;;  %v2621_v6 = vld [vmem:[%s6743_s0 + $0x38] sm:$0xff] }
 0x4f0   : > { %10208 = vst [vmem:[#allocation87_spill] sm:$0xff] %v7998_v55  ;;  %2579 = vst.msk [vmem:[#allocation2 + $0xa8] sm:$0xff] %vm1375_vm14, %v7998_v55  ;;  %2094 = vperm.xlu0 %6051, %v7998_v55   ;;  %v1992_v32 = vpop.xlane.xlu0 %1991 }
 0x4f1   : > { %v8015_v3 = vmax.f32 %v8000_v4, %v1992_v32  ;;  %v1994_v8 = vpop.xlane.xlu1 %1993  ;;  %10214 = vst [vmem:[#allocation93_spill] sm:$0xff] %v8026_v22  ;;  %v2620_v4 = vld [vmem:[%s6743_s0 + $0x30] sm:$0xff] }
 0x4f2   : > { %v8018_v41 = vmax.f32 %v8007_v56, %v1994_v8  ;;  %v2633_v56 = vpack.c.bf16 %v2621_v6, %v2620_v4 }
 0x4f3   : > { %10211 = vst [vmem:[#allocation90_spill] sm:$0xff] %v8015_v3  ;;  %2584 = vst.msk [vmem:[#allocation2 + $0xd0] sm:$0xff] %vm1375_vm14, %v8015_v3 }
 0x4f4   : > { %10212 = vst [vmem:[#allocation91_spill] sm:$0xff] %v8018_v41  ;;  %2585 = vst.msk [vmem:[#allocation2 + $0xd8] sm:$0xff] %vm1375_vm14, %v8018_v41  ;;  %2124 = vperm.xlu1 %6052, %v8018_v41   ;;  %2119 = vperm.xlu0 %6051, %v8015_v3   ;;  %v1988_v8 = vpop.xlane.xlu0 %1987  ;;  %v8048_v41 = vld [vmem:[#allocation2 + $0xf8] sm:$0xff] }
 0x4f5   : > { %v8035_v32 = vmax.f32 %v8020_v34, %v1988_v8  ;;  %v1990_v25 = vpop.xlane.xlu1 %1989  ;;  %10218 = vst [vmem:[#allocation97_spill] sm:$0xff] %v8048_v41  ;;  %v2622_v8 = vld [vmem:[%s6743_s0 + $0x40] sm:$0xff] }
 0x4f6   : > { %v8040_v46 = vmax.f32 %v8026_v22, %v1990_v25  ;;  %v2627_v22 = vld [vmem:[%s6743_s0 + $0x68] sm:$0xff] }
 0x4f7   : > { %10215 = vst [vmem:[#allocation94_spill] sm:$0xff] %v8035_v32  ;;  %2582 = vst.msk [vmem:[#allocation2 + $0xc0] sm:$0xff] %vm1375_vm14, %v8035_v32 }
 0x4f8   : > { %10216 = vst [vmem:[#allocation95_spill] sm:$0xff] %v8040_v46  ;;  %2583 = vst.msk [vmem:[#allocation2 + $0xc8] sm:$0xff] %vm1375_vm14, %v8040_v46  ;;  %2114 = vperm.xlu1 %6052, %v8040_v46   ;;  %2109 = vperm.xlu0 %6051, %v8035_v32   ;;  %v2000_v25 = vpop.xlane.xlu0 %1999  ;;  %v8068_v46 = vld [vmem:[#allocation2 + $0xe8] sm:$0xff]  ;;  %v2592_v32 = vld [vmem:[%s6741_s27 + $0x10] sm:$0xff] }
 0x4f9   : > { %v8057_v55 = vmax.f32 %v8042_v23, %v2000_v25  ;;  %v2002_v3 = vpop.xlane.xlu1 %2001  ;;  %10222 = vst [vmem:[#allocation101_spill] sm:$0xff] %v8068_v46  ;;  %v2623_v23 = vld [vmem:[%s6743_s0 + $0x48] sm:$0xff] }
 0x4fa   : > { %v8060_v34 = vmax.f32 %v8048_v41, %v2002_v3  ;;  %v2625_v41 = vld [vmem:[%s6743_s0 + $0x58] sm:$0xff] }
 0x4fb   : > { %10219 = vst [vmem:[#allocation98_spill] sm:$0xff] %v8057_v55  ;;  %2588 = vst.msk [vmem:[#allocation2 + $0xf0] sm:$0xff] %vm1375_vm14, %v8057_v55 }
 0x4fc   : > { %10220 = vst [vmem:[#allocation99_spill] sm:$0xff] %v8060_v34  ;;  %2589 = vst.msk [vmem:[#allocation2 + $0xf8] sm:$0xff] %vm1375_vm14, %v8060_v34  ;;  %2700 = vrot.lane.b32.xlu0 %v2633_v56, %s6531_s5  ;;  %2139 = vperm.xlu1 %6052, %v8057_v55   ;;  %v1996_v3 = vpop.xlane.xlu0 %1995  ;;  %v2626_v55 = vld [vmem:[%s6743_s0 + $0x60] sm:$0xff] }
 0x4fd   : > { %v8077_v6 = vmax.f32 %v8062_v19, %v1996_v3  ;;  %v1998_v25 = vpop.xlane.xlu1 %1997  ;;  %v8094_v3 = vpack.c.bf16 %v2623_v23, %v2622_v8  ;;  %v2629_v23 = vld [vmem:[%s6743_s0 + $0x78] sm:$0xff]  ;;  %v2590_v8 = vld [vmem:[%s6741_s27] sm:$0xff] }
 0x4fe   : > { %v8082_v4 = vmax.f32 %v8068_v46, %v1998_v25  ;;  %v2624_v25 = vld [vmem:[%s6743_s0 + $0x50] sm:$0xff]  ;;  %v8103_v46 = vpack.c.bf16 %v2627_v22, %v2626_v55  ;;  %v2594_v22 = vld [vmem:[%s6741_s27 + $0x20] sm:$0xff]  ;;  %v2595_v55 = vld [vmem:[%s6741_s27 + $0x28] sm:$0xff] }
 0x4ff   : > { %10223 = vst [vmem:[#allocation102_spill] sm:$0xff] %v8077_v6  ;;  %2586 = vst.msk [vmem:[#allocation2 + $0xe0] sm:$0xff] %vm1375_vm14, %v8077_v6  ;;  %v2635_v56 = vpack.c.bf16 %v2625_v41, %v2624_v25  ;;  %v2593_v41 = vld [vmem:[%s6741_s27 + $0x18] sm:$0xff]  ;;  %v2608_v25 = vpack.c.bf16 %v2595_v55, %v2594_v22  ;;  %v2604_v22 = vld [vmem:[%s6741_s27 + $0x70] sm:$0xff] }
 0x500   : > { %10224 = vst [vmem:[#allocation103_spill] sm:$0xff] %v8082_v4  ;;  %2587 = vst.msk [vmem:[#allocation2 + $0xe8] sm:$0xff] %vm1375_vm14, %v8082_v4  ;;  %2134 = vperm.xlu0 %6051, %v8082_v4   ;;  %2129 = vperm.xlu1 %6052, %v8077_v6   ;;  %v2628_v4 = vld [vmem:[%s6743_s0 + $0x70] sm:$0xff]  ;;  %v2591_v6 = vld [vmem:[%s6741_s27 + $0x8] sm:$0xff] }
 0x501   : > { %10225 = vst [vmem:[#allocation104_spill] sm:$0xff] %v8094_v3  ;;  %10226 = vst [vmem:[#allocation105_spill] sm:$0xff] %v8103_v46  ;;  %v8112_v19 = vpack.c.bf16 %v2591_v6, %v2590_v8  ;;  %v2598_v6 = vld [vmem:[%s6741_s27 + $0x40] sm:$0xff]  ;;  %v2605_v55 = vld [vmem:[%s6741_s27 + $0x78] sm:$0xff] }
 0x504   : > { %2144 = vperm.xlu0 %6051, %v8060_v34   ;;  %2702 = vrot.lane.b32.xlu1 %v8094_v3, %s6531_s5  ;;  %v2637_v34 = vpack.c.bf16 %v2629_v23, %v2628_v4  ;;  %v2596_v3 = vld [vmem:[%s6741_s27 + $0x30] sm:$0xff]  ;;  %v2597_v4 = vld [vmem:[%s6741_s27 + $0x38] sm:$0xff]  ;;  %v2599_v23 = vld [vmem:[%s6741_s27 + $0x48] sm:$0xff] }
 0x505   : > { %v2609_v8 = vpack.c.bf16 %v2597_v4, %v2596_v3 }
 0x508   : > { %2704 = vrot.lane.b32.xlu0 %v2635_v56, %s6531_s5  ;;  %2706 = vrot.lane.b32.xlu1 %v8103_v46, %s6531_s5  ;;  %v2607_v56 = vpack.c.bf16 %v2593_v41, %v2592_v32  ;;  %v2610_v46 = vpack.c.bf16 %v2599_v23, %v2598_v6  ;;  %v2611_v32 = vpack.c.bf16 %v2601_v42, %v2600_v9 }
 0x50c   : > { %2708 = vrot.lane.b32.xlu0 %v2637_v34, %s6531_s5  ;;  %2670 = vrot.lane.b32.xlu1 %v8112_v19, %s6531_s5  ;;  %v2602_v34 = vld [vmem:[%s6741_s27 + $0x60] sm:$0xff] }
 0x50d   : > { %v2612_v41 = vpack.c.bf16 %v2603_v24, %v2602_v34 }
 0x510   : > { %2672 = vrot.lane.b32.xlu0 %v2607_v56, %s6531_s5  ;;  %2674 = vrot.lane.b32.xlu1 %v2608_v25, %s6531_s5  ;;  %v2613_v56 = vpack.c.bf16 %v2605_v55, %v2604_v22 }
 0x514   : > { %2676 = vrot.lane.b32.xlu0 %v2609_v8, %s6531_s5  ;;  %2678 = vrot.lane.b32.xlu1 %v2610_v46, %s6531_s5 }
 0x518   : > { %2680 = vrot.lane.b32.xlu0 %v2611_v32, %s6531_s5  ;;  %2682 = vrot.lane.b32.xlu1 %v2612_v41, %s6531_s5 }
 0x51c   : > { %2684 = vrot.lane.b32.xlu0 %v2613_v56, %s6531_s5 }
 0x531   : > { %v2080_v3 = vpop.permute.xlu1 %2079 }
 0x532   : > { %v2149_v25 = vsub.f32 %v7813_v38, %v2080_v3 }
 0x534   : > { %v2167_v42 = vmul.f32 1.442695, %v2149_v25 }
 0x535   : > { %v2070_v4 = vpop.permute.xlu1 %2069  ;;  %v2075_v6 = vpop.permute.xlu0 %2074 }
 0x536   : > { %v2147_v23 = vsub.f32 %v7819_v30, %v2070_v4  ;;  %v2148_v46 = vsub.f32 %v7825_v58, %v2075_v6 }
 0x538   : > { %v2163_v9 = vmul.f32 1.442695, %v2147_v23  ;;  %v2165_v24 = vmul.f32 1.442695, %v2148_v46 }
 0x539   : > { %v2430_v8 = vpop.permute.xlu1 %2429  ;;  %v2085_v34 = vpop.permute.xlu0 %2084 }
 0x53a   : > { %6085 = vpow2.f32 %v2163_v9  ;;  %v2150_v32 = vsub.f32 %v7831_v53, %v2085_v34  ;;  %5767 = vmatprep.subr.bf16.mxu0 %v2430_v8 }
 0x53b   : > { %6087 = vpow2.f32 %v2165_v24  ;;  %5768 = vmatpush3.bf16.msra.mxu0 %v2430_v8  ;;  %1331 = vadd.xlane.f32.xlu0 %v7701_v11 }
 0x53c   : > { %v2169_v38 = vmul.f32 1.442695, %v2150_v32  ;;  %1327 = vadd.xlane.f32.xlu1 %v7695_v5  ;;  %6089 = vpow2.f32 %v2167_v42 }
 0x53d   : > { %v2432_v30 = vpop.permute.xlu0 %2431  ;;  %v2434_v41 = vpop.permute.xlu1 %2433 }
 0x53e   : > { %6091 = vpow2.f32 %v2169_v38  ;;  %5769 = vmatprep.subr.bf16.mxu0 %v2432_v30 }
 0x53f   : > { %1335 = vadd.xlane.f32.xlu0 %v7725_v18  ;;  %5770 = vmatpush3.bf16.msra.mxu0 %v2432_v30 }
 0x540   : > { %1329 = vadd.xlane.f32.xlu1 %v7697_v1  ;;  %5771 = vmatprep.subr.bf16.mxu0 %v2434_v41 }
 0x541   : > { %v2436_v58 = vpop.permute.xlu0 %2435  ;;  %v2695_v22 = vpop.permute.xlu1 %2694 }
 0x543   : > { %1339 = vadd.xlane.f32.xlu0 %v7722_v27  ;;  %5772 = vmatpush3.bf16.msra.mxu0 %v2434_v41  ;;  %v2735_v27 = vsel %vm877_vm2, %v2695_v22, 0 }
 0x544   : > { %v8147_v53 = vpop.eup %6085  ;;  %1333 = vadd.xlane.f32.xlu1 %v7703_v14  ;;  %5773 = vmatprep.subr.bf16.mxu0 %v2436_v58 }
 0x545   : > { %v8150_v5 = vpop.eup %6087  ;;  %v2697_v55 = vpop.permute.xlu0 %2696 }
 0x546   : > { %v2405_v11 = vpack.c.bf16 %v8150_v5, %v8147_v53  ;;  %v8154_v18 = vpop.eup %6089 }
 0x547   : > { %1343 = vadd.xlane.f32.xlu0 %v7738_v40  ;;  %5774 = vmatpush3.bf16.msra.mxu0 %v2436_v58  ;;  %v2699_v40 = vpop.permute.xlu1 %2698 }
 0x548   : > { %v8157_v1 = vpop.eup %6091  ;;  %5775 = vmatprep.mubr.bf16.mxu0 %v2405_v11  ;;  %1337 = vadd.xlane.f32.xlu1 %v7727_v43  ;;  %v2738_v43 = vsel %vm877_vm2, %v2697_v55, 0  ;;  %v2741_v56 = vsel %vm877_vm2, %v2699_v40, 0 }
 0x549   : > { %v2406_v14 = vpack.c.bf16 %v8157_v1, %v8154_v18  ;;  %5935 = vmatprep.subr.msk.bf16.mxu0 %vm877_vm2, %v2695_v22 }
 0x54b   : > { %1347 = vadd.xlane.f32.xlu0 %v7748_v45  ;;  %5776 = vmatmul.mubr.bf16.vlgmr.msra.gmra.mrb[16].mxu0 %v2406_v14 }
 0x54c   : > { %1341 = vadd.xlane.f32.xlu1 %v7732_v7 }
 0x550   : > { %1345 = vadd.xlane.f32.xlu1 %v7743_v59  ;;  %5792 = vmatpush3.bf16.xpose.msra.mxu0 %v2735_v27 }
 0x551   : > { %5936 = vmatprep.subr.msk.bf16.mxu0 %vm877_vm2, %v2697_v55 }
 0x558   : > { %5794 = vmatpush3.bf16.xpose.msra.mxu0 %v2738_v43 }
 0x559   : > { %5937 = vmatprep.subr.msk.bf16.mxu0 %vm877_vm2, %v2699_v40 }
 0x560   : > { %5796 = vmatpush3.bf16.xpose.msra.mxu0 %v2741_v56 }
 0x56a   : > { %v2100_v45 = vpop.permute.xlu1 %2099 }
 0x56b   : > { %v2153_v7 = vsub.f32 %v7841_v12, %v2100_v45  ;;  %v2105_v3 = vpop.permute.xlu0 %2104 }
 0x56c   : > { %v2154_v25 = vsub.f32 %v7847_v33, %v2105_v3 }
 0x56d   : > { %v2175_v4 = vmul.f32 1.442695, %v2153_v7 }
 0x56e   : > { %v2177_v59 = vmul.f32 1.442695, %v2154_v25  ;;  %v2090_v6 = vpop.permute.xlu1 %2089 }
 0x56f   : > { %v2151_v23 = vsub.f32 %v7853_v39, %v2090_v6  ;;  %v2095_v46 = vpop.permute.xlu0 %2094  ;;  %6093 = vpow2.f32 %v2175_v4 }
 0x570   : > { %v2152_v9 = vsub.f32 %v7859_v48, %v2095_v46  ;;  %6095 = vpow2.f32 %v2177_v59 }
 0x571   : > { %v2171_v24 = vmul.f32 1.442695, %v2151_v23 }
 0x572   : > { %v2173_v42 = vmul.f32 1.442695, %v2152_v9 }
 0x573   : > { %6097 = vpow2.f32 %v2171_v24  ;;  %v2125_v8 = vpop.permute.xlu1 %2124  ;;  %v2120_v34 = vpop.permute.xlu0 %2119 }
 0x574   : > { %6099 = vpow2.f32 %v2173_v42  ;;  %v2158_v12 = vsub.f32 %v7871_v35, %v2125_v8  ;;  %v2157_v33 = vsub.f32 %v7865_v2, %v2120_v34 }
 0x576   : > { %v2185_v32 = vmul.f32 1.442695, %v2158_v12  ;;  %v2183_v38 = vmul.f32 1.442695, %v2157_v33 }
 0x577   : > { %v2115_v30 = vpop.permute.xlu1 %2114  ;;  %v2110_v41 = vpop.permute.xlu0 %2109 }
 0x578   : > { %v2156_v39 = vsub.f32 %v7883_v63, %v2115_v30  ;;  %v2155_v48 = vsub.f32 %v7877_v31, %v2110_v41  ;;  %6101 = vpow2.f32 %v2185_v32 }
 0x579   : > { %v8179_v22 = vpop.eup %6093  ;;  %6103 = vpow2.f32 %v2183_v38 }
 0x57a   : > { %v2181_v58 = vmul.f32 1.442695, %v2156_v39  ;;  %v2179_v11 = vmul.f32 1.442695, %v2155_v48  ;;  %v8181_v55 = vpop.eup %6095 }
 0x57b   : > { %v2140_v14 = vpop.permute.xlu1 %2139  ;;  %v2701_v27 = vpop.permute.xlu0 %2700  ;;  %v2408_v3 = vpack.c.bf16 %v8181_v55, %v8179_v22 }
 0x57c   : > { %6105 = vpow2.f32 %v2181_v58  ;;  %5938 = vmatprep.subr.msk.bf16.mxu0 %vm877_vm2, %v2701_v27  ;;  %v2744_v2 = vsel %vm877_vm2, %v2701_v27, 0  ;;  %v2161_v63 = vsub.f32 %v7889_v37, %v2140_v14 }
 0x57d   : > { %v8185_v35 = vpop.eup %6097  ;;  %6107 = vpow2.f32 %v2179_v11  ;;  %5798 = vmatpush3.bf16.xpose.msra.mxu0 %v2744_v2  ;;  %v2638_v2 = vld [vmem:[%s6745_s12] sm:$0xff] }
 0x57e   : > { %v8187_v31 = vpop.eup %6099  ;;  %v2191_v59 = vmul.f32 1.442695, %v2161_v63  ;;  %v2639_v63 = vld [vmem:[%s6745_s12 + $0x8] sm:$0xff] }
 0x57f   : > { %v2130_v43 = vpop.permute.xlu1 %2129  ;;  %v2135_v40 = vpop.permute.xlu0 %2134  ;;  %v2407_v56 = vpack.c.bf16 %v8187_v31, %v8185_v35 }
 0x580   : > { %v2159_v45 = vsub.f32 %v7901_v62, %v2130_v43  ;;  %v2160_v7 = vsub.f32 %v7907_v17, %v2135_v40  ;;  %v2640_v43 = vld [vmem:[%s6745_s12 + $0x10] sm:$0xff] }
 0x581   : > { %5779 = vmatprep.mubr.bf16.mxu0 %v2407_v56  ;;  %v8233_v56 = vpack.c.bf16 %v2639_v63, %v2638_v2 }
 0x582   : > { %v2187_v25 = vmul.f32 1.442695, %v2159_v45  ;;  %v2189_v4 = vmul.f32 1.442695, %v2160_v7  ;;  %5780 = vmatmul.mubr.bf16.gmra.mrb[20].mxu0 %v2408_v3  ;;  %v8196_v37 = vpop.eup %6101  ;;  %v2641_v45 = vld [vmem:[%s6745_s12 + $0x18] sm:$0xff]  ;;  %v2642_v7 = vld [vmem:[%s6745_s12 + $0x20] sm:$0xff] }
 0x583   : > { %v2703_v6 = vpop.permute.xlu1 %2702  ;;  %v2145_v23 = vpop.permute.xlu0 %2144  ;;  %v2643_v3 = vld [vmem:[%s6745_s12 + $0x28] sm:$0xff]  ;;  %3354 = vrot.lane.b32.xlu1 %v8233_v56, %s6531_s5 }
 0x584   : > { %6109 = vpow2.f32 %v2187_v25  ;;  %v2162_v46 = vsub.f32 %v7894_v15, %v2145_v23  ;;  %5939 = vmatprep.subr.msk.bf16.mxu0 %vm877_vm2, %v2703_v6  ;;  %v2747_v62 = vsel %vm877_vm2, %v2703_v6, 0  ;;  %v8201_v17 = vpop.eup %6103  ;;  %v2655_v25 = vpack.c.bf16 %v2641_v45, %v2640_v43  ;;  %v2647_v6 = vld [vmem:[%s6745_s12 + $0x48] sm:$0xff]  ;;  %v10233_v43 = vld [vmem:[#allocation37_spill] sm:$0xff] }
 0x585   : > { %6111 = vpow2.f32 %v2189_v4  ;;  %5800 = vmatpush3.bf16.xpose.msra.mxu0 %v2747_v62  ;;  %v2410_v15 = vpack.c.bf16 %v8196_v37, %v8201_v17  ;;  %v2646_v4 = vld [vmem:[%s6745_s12 + $0x40] sm:$0xff]  ;;  %v2645_v62 = vld [vmem:[%s6745_s12 + $0x38] sm:$0xff] }
 0x586   : > { %v8203_v9 = vpop.eup %6105  ;;  %v2193_v24 = vmul.f32 1.442695, %v2162_v46  ;;  %6113 = vpow2.f32 %v2191_v59  ;;  %v2656_v59 = vpack.c.bf16 %v2643_v3, %v2642_v7  ;;  %3356 = vrot.lane.b32.xlu0 %v2655_v25, %s6531_s5  ;;  %v2644_v46 = vld [vmem:[%s6745_s12 + $0x30] sm:$0xff]  ;;  %v10235_v7 = vld [vmem:[#allocation29_spill] sm:$0xff]  ;;  %v10236_v3 = vld [vmem:[#allocation32_spill] sm:$0xff] }
 0x587   : > { %v8205_v42 = vpop.eup %6107  ;;  %v2705_v8 = vpop.permute.xlu0 %2704  ;;  %v10237_v25 = vsub.f32 %v10235_v7, %v10236_v3  ;;  %v10252_v7 = vld [vmem:[#allocation36_spill] sm:$0xff] }
 0x588   : > { %6115 = vpow2.f32 %v2193_v24  ;;  %v2409_v34 = vpack.c.bf16 %v8203_v9, %v8205_v42  ;;  %5940 = vmatprep.subr.msk.bf16.mxu0 %vm877_vm2, %v2705_v8  ;;  %v2750_v12 = vsel %vm877_vm2, %v2705_v8, 0  ;;  %v2707_v33 = vpop.permute.xlu1 %2706  ;;  %v2658_v24 = vpack.c.bf16 %v2647_v6, %v2646_v4  ;;  %3358 = vrot.lane.b32.xlu1 %v2656_v59, %s6531_s5  ;;  %v10238_v6 = vld [vmem:[#allocation33_spill] sm:$0xff] }
 0x589   : > { %v2753_v58 = vsel %vm877_vm2, %v2707_v33, 0  ;;  %v2657_v8 = vpack.c.bf16 %v2645_v62, %v2644_v46  ;;  %v1137_v4 = vmul.f32 1.442695, %v10237_v25  ;;  %v10240_v62 = vld [vmem:[#allocation28_spill] sm:$0xff] }
 0x58a   : > { %5783 = vmatprep.mubr.bf16.mxu0 %v2409_v34  ;;  %3362 = vrot.lane.b32.xlu0 %v2658_v24, %s6531_s5  ;;  %v10241_v24 = vld [vmem:[#allocation31_spill] sm:$0xff] }
 0x58b   : > { %5784 = vmatmul.mubr.bf16.gmra.mrb[24].mxu0 %v2410_v15  ;;  %v2709_v14 = vpop.permute.xlu0 %2708 }
 0x58c   : > { %v2671_v11 = vpop.permute.xlu1 %2670  ;;  %v2756_v27 = vsel %vm877_vm2, %v2709_v14, 0  ;;  %3360 = vrot.lane.b32.xlu1 %v2657_v8, %s6531_s5  ;;  %v10242_v8 = vsub.f32 %v10240_v62, %v10241_v24 }
 0x58d   : > { %5802 = vmatpush3.bf16.xpose.msra.mxu0 %v2750_v12 }
 0x58e   : > { %v8213_v32 = vpop.eup %6109  ;;  %5941 = vmatprep.subr.msk.bf16.mxu0 %vm877_vm2, %v2707_v33 }
 0x58f   : > { %v8216_v38 = vpop.eup %6111  ;;  %v2673_v40 = vpop.permute.xlu0 %2672 }
 0x590   : > { %v2411_v30 = vpack.c.bf16 %v8216_v38, %v8213_v32  ;;  %v8220_v41 = vpop.eup %6113  ;;  %v2675_v23 = vpop.permute.xlu1 %2674 }
 0x592   : > { %v8222_v39 = vpop.eup %6115  ;;  %5787 = vmatprep.mubr.bf16.mxu0 %v2411_v30  ;;  %v10227_v30 = vld [vmem:[#allocation24_spill] sm:$0xff] }
 0x593   : > { %v2412_v48 = vpack.c.bf16 %v8222_v39, %v8220_v41  ;;  %v2677_v34 = vpop.permute.xlu0 %2676 }
 0x594   : > { %v2679_v15 = vpop.permute.xlu1 %2678 }
 0x595   : > { %5788 = vmatmul.mubr.bf16.gmra.mrb[28].mxu0 %v2412_v48  ;;  %v10228_v48 = vld [vmem:[#allocation26_spill] sm:$0xff] }
 0x596   : > { %5804 = vmatpush3.bf16.xpose.msra.mxu0 %v2753_v58  ;;  %5807 = vmatprep.mubr.msk.bf16.mxu0 %vm877_vm2, %v2671_v11  ;;  %v10229_v58 = vsub.f32 %v10227_v30, %v10228_v48  ;;  %v10246_v30 = vld [vmem:[#allocation38_spill] sm:$0xff] }
 0x597   : > { %5942 = vmatprep.subr.msk.bf16.mxu0 %vm877_vm2, %v2709_v14  ;;  %v2681_v12 = vpop.permute.xlu0 %2680  ;;  %v10230_v14 = vld [vmem:[#allocation25_spill] sm:$0xff]  ;;  %v10247_v48 = vsub.f32 %v10246_v30, %v7560_v0 }
 0x598   : > { %v2683_v33 = vpop.permute.xlu1 %2682  ;;  %v1139_v11 = vmul.f32 1.442695, %v10229_v58 }
 0x599   : > { %v1145_v58 = vmul.f32 1.442695, %v10247_v48 }
 0x59a   : > { %6117 = vpow2.f32 %v1139_v11 }
 0x59b   : > { %v2685_v59 = vpop.permute.xlu0 %2684 }
 0x59e   : > { %5806 = vmatpush3.bf16.xpose.msra.mxu0 %v2756_v27  ;;  %v10231_v27 = vld [vmem:[#allocation27_spill] sm:$0xff] }
 0x59f   : > { %v10232_v2 = vsub.f32 %v10230_v14, %v10231_v27  ;;  %v1295_v27 = vld [vmem:[#allocation3] sm:$0xff] }
 0x5a1   : > { %v1135_v63 = vmul.f32 1.442695, %v10232_v2  ;;  %v10248_v2 = vld [vmem:[#allocation40_spill] sm:$0xff] }
 0x5a3   : > { %6119 = vpow2.f32 %v1135_v63  ;;  %v10249_v63 = vld [vmem:[#allocation42_spill] sm:$0xff] }
 0x5a4   : > { %v8279_v11 = vpop.eup %6117 }
 0x5a5   : > { %5808 = vmatmul.mubr.msk.bf16.vlgmr.msra.gmra.mrb[32].mxu0 %vm877_vm2, %v2673_v40  ;;  %v10234_v40 = vsub.f32 %v10233_v43, %v7556_v57  ;;  %v10243_v57 = vld [vmem:[#allocation44_spill] sm:$0xff]  ;;  %v10250_v43 = vsub.f32 %v10248_v2, %v10249_v63 }
 0x5a6   : > { %5811 = vmatprep.mubr.msk.bf16.mxu0 %vm877_vm2, %v2675_v23  ;;  %v10239_v23 = vsub.f32 %v10238_v6, %v7530_v28  ;;  %v1297_v28 = vld [vmem:[#allocation3 + $0x10] sm:$0xff] }
 0x5a7   : > { %v1143_v45 = vmul.f32 1.442695, %v10234_v40  ;;  %v1155_v40 = vmul.f32 1.442695, %v10250_v43  ;;  %v1298_v43 = vld [vmem:[#allocation3 + $0x18] sm:$0xff] }
 0x5a8   : > { %v1147_v46 = vmul.f32 1.442695, %v10239_v23  ;;  %v1299_v23 = vld [vmem:[#allocation3 + $0x20] sm:$0xff] }
 0x5a9   : > { %6121 = vpow2.f32 %v1143_v45  ;;  %v10251_v45 = vld [vmem:[#allocation34_spill] sm:$0xff] }
 0x5aa   : > { %6123 = vpow2.f32 %v1137_v4  ;;  %v10253_v3 = vsub.f32 %v10251_v45, %v10252_v7  ;;  %v1313_v4 = vmul.f32 %v8279_v11, %v1297_v28  ;;  %v1301_v28 = vld [vmem:[#allocation3 + $0x30] sm:$0xff] }
 0x5ab   : > { %6125 = vpow2.f32 %v1147_v46 }
 0x5ac   : > { %v1149_v25 = vmul.f32 1.442695, %v10253_v3 }
 0x5ad   : > { %5812 = vmatmul.mubr.msk.bf16.gmra.mrb[36].mxu0 %vm877_vm2, %v2677_v34  ;;  %v1141_v34 = vmul.f32 1.442695, %v10242_v8  ;;  %v8281_v14 = vpop.eup %6119  ;;  %v1296_v8 = vld [vmem:[#allocation3 + $0x8] sm:$0xff] }
 0x5ae   : > { %5815 = vmatprep.mubr.msk.bf16.mxu0 %vm877_vm2, %v2679_v15  ;;  %v10244_v15 = vld [vmem:[#allocation46_spill] sm:$0xff]  ;;  %v1311_v6 = vmul.f32 %v8281_v14, %v1295_v27 }
 0x5af   : > { %6127 = vpow2.f32 %v1141_v34 }
 0x5b3   : > { %v8290_v0 = vpop.eup %6121 }
 0x5b4   : > { %v8293_v46 = vpop.eup %6123 }
 0x5b5   : > { %5816 = vmatmul.mubr.msk.bf16.gmra.mrb[40].mxu0 %vm877_vm2, %v2681_v12  ;;  %v10245_v12 = vsub.f32 %v10243_v57, %v10244_v15  ;;  %v10254_v57 = vld [vmem:[#allocation45_spill] sm:$0xff]  ;;  %v8300_v30 = vpop.eup %6125 }
 0x5b6   : > { %5819 = vmatprep.mubr.msk.bf16.mxu0 %vm877_vm2, %v2683_v33  ;;  %v10255_v15 = vsub.f32 %v10254_v57, %v7602_v29  ;;  %v1317_v29 = vmul.f32 %v8300_v30, %v1301_v28  ;;  %v2648_v28 = vld [vmem:[%s6745_s12 + $0x50] sm:$0xff] }
 0x5b7   : > { %v1151_v33 = vmul.f32 1.442695, %v10245_v12 }
 0x5b8   : > { %v1153_v12 = vmul.f32 1.442695, %v10255_v15  ;;  %v1305_v15 = vld [vmem:[#allocation3 + $0x50] sm:$0xff] }
 0x5b9   : > { %6129 = vpow2.f32 %v1151_v33  ;;  %v1315_v33 = vmul.f32 %v8290_v0, %v1299_v23  ;;  %v8304_v27 = vpop.eup %6127  ;;  %v1300_v23 = vld [vmem:[#allocation3 + $0x28] sm:$0xff] }
 0x5ba   : > { %6131 = vpow2.f32 %v1145_v58  ;;  %v1312_v58 = vmul.f32 %v8293_v46, %v1296_v8  ;;  %v1314_v3 = vmul.f32 %v8304_v27, %v1298_v43 }
 0x5bb   : > { %6133 = vpow2.f32 %v1155_v40 }
 0x5bc   : > { %6135 = vpow2.f32 %v1149_v25  ;;  %v1303_v25 = vld [vmem:[#allocation3 + $0x40] sm:$0xff] }
 0x5bd   : > { %5820 = vmatmul.mubr.msk.bf16.gmra.mrb[44].mxu0 %vm877_vm2, %v2685_v59  ;;  %6137 = vpow2.f32 %v1153_v12 }
 0x5c3   : > { %v8308_v45 = vpop.eup %6129 }
 0x5c8   : > { %v1332_v59 = vpop.xlane.xlu0 %1331 }
 0x5c9   : > { %v1361_v62 = vadd.f32 %v1332_v59, %v1313_v4  ;;  %v1328_v24 = vpop.xlane.xlu1 %1327  ;;  %v8312_v4 = vpop.eup %6131 }
 0x5ca   : > { %v1359_v34 = vadd.f32 %v1328_v24, %v1311_v6  ;;  %v1319_v24 = vmul.f32 %v8308_v45, %v1303_v25  ;;  %v8316_v8 = vpop.eup %6133  ;;  %v1316_v57 = vmul.f32 %v8312_v4, %v1300_v23  ;;  %v2651_v25 = vld [vmem:[%s6745_s12 + $0x68] sm:$0xff] }
 0x5cb   : > { %1378 = vst.msk [vmem:[#allocation3 + $0x10] sm:$0xff] %vm1375_vm14, %v1361_v62  ;;  %v8320_v12 = vpop.eup %6135 }
 0x5cc   : > { %1376 = vst.msk [vmem:[#allocation3] sm:$0xff] %vm1375_vm14, %v1359_v34  ;;  %v1336_v48 = vpop.xlane.xlu0 %1335 }
 0x5cd   : > { %v1363_v2 = vadd.f32 %v1336_v48, %v1315_v33  ;;  %v1330_v63 = vpop.xlane.xlu1 %1329 }
 0x5ce   : > { %v1360_v40 = vadd.f32 %v1330_v63, %v1312_v58  ;;  %v1302_v58 = vld [vmem:[#allocation3 + $0x38] sm:$0xff] }
 0x5cf   : > { %1380 = vst.msk [vmem:[#allocation3 + $0x20] sm:$0xff] %vm1375_vm14, %v1363_v2  ;;  %v2649_v2 = vld [vmem:[%s6745_s12 + $0x58] sm:$0xff] }
 0x5d0   : > { %1377 = vst.msk [vmem:[#allocation3 + $0x8] sm:$0xff] %vm1375_vm14, %v1360_v40  ;;  %v1340_v7 = vpop.xlane.xlu0 %1339  ;;  %v2659_v43 = vpack.c.bf16 %v2649_v2, %v2648_v28  ;;  %v1321_v40 = vmul.f32 %v8316_v8, %v1305_v15 }
 0x5d1   : > { %v1365_v59 = vadd.f32 %v1340_v7, %v1317_v29  ;;  %v1334_v6 = vpop.xlane.xlu1 %1333  ;;  %v1318_v7 = vmul.f32 %v8320_v12, %v1302_v58 }
 0x5d2   : > { %v1362_v62 = vadd.f32 %v1334_v6, %v1314_v3  ;;  %3364 = vrot.lane.b32.xlu1 %v2659_v43, %s6531_s5  ;;  %v2650_v3 = vld [vmem:[%s6745_s12 + $0x60] sm:$0xff] }
 0x5d3   : > { %1382 = vst.msk [vmem:[#allocation3 + $0x30] sm:$0xff] %vm1375_vm14, %v1365_v59  ;;  %v8331_v59 = vpop.eup %6137 }
 0x5d4   : > { %1379 = vst.msk [vmem:[#allocation3 + $0x18] sm:$0xff] %vm1375_vm14, %v1362_v62  ;;  %v1344_v34 = vpop.xlane.xlu0 %1343  ;;  %v1304_v62 = vld [vmem:[#allocation3 + $0x48] sm:$0xff] }
 0x5d5   : > { %v1367_v33 = vadd.f32 %v1344_v34, %v1319_v24  ;;  %v1338_v48 = vpop.xlane.xlu1 %1337  ;;  %v2660_v24 = vpack.c.bf16 %v2651_v25, %v2650_v3 }
 0x5d6   : > { %v1364_v63 = vadd.f32 %v1338_v48, %v1316_v57  ;;  %v1320_v57 = vmul.f32 %v8331_v59, %v1304_v62 }
 0x5d7   : > { %1384 = vst.msk [vmem:[#allocation3 + $0x40] sm:$0xff] %vm1375_vm14, %v1367_v33  ;;  %3366 = vrot.lane.b32.xlu0 %v2660_v24, %s6531_s5 }
 0x5d8   : > { %1381 = vst.msk [vmem:[#allocation3 + $0x28] sm:$0xff] %vm1375_vm14, %v1364_v63  ;;  %v1348_v29 = vpop.xlane.xlu0 %1347 }
 0x5d9   : > { %v1369_v6 = vadd.f32 %v1348_v29, %v1321_v40  ;;  %v1342_v23 = vpop.xlane.xlu1 %1341 }
 0x5da   : > { %v1366_v34 = vadd.f32 %v1342_v23, %v1318_v7 }
 0x5db   : > { %1386 = vst.msk [vmem:[#allocation3 + $0x50] sm:$0xff] %vm1375_vm14, %v1369_v6 }
 0x5dc   : > { %1383 = vst.msk [vmem:[#allocation3 + $0x38] sm:$0xff] %vm1375_vm14, %v1366_v34 }
 0x5dd   : > { %v1346_v15 = vpop.xlane.xlu1 %1345 }
 0x5de   : > { %v1368_v33 = vadd.f32 %v1346_v15, %v1320_v57 }
 0x5e0   : > { %1385 = vst.msk [vmem:[#allocation3 + $0x48] sm:$0xff] %vm1375_vm14, %v1368_v33 }
 0x5f5   : > { %v3355_v63 = vpop.permute.xlu1 %3354 }
 0x5f6   : > { %5823 = vmatprep.subr.bf16.mxu1 %v3355_v63 }
 0x5f7   : > { %5824 = vmatpush3.bf16.msra.mxu1 %v3355_v63 }
 0x5f8   : > { %v3357_v43 = vpop.permute.xlu0 %3356 }
 0x5f9   : > { %5825 = vmatprep.subr.bf16.mxu1 %v3357_v43 }
 0x5fa   : > { %v3359_v40 = vpop.permute.xlu1 %3358 }
 0x5fb   : > { %5826 = vmatpush3.bf16.msra.mxu1 %v3357_v43 }
 0x5fc   : > { %5827 = vmatprep.subr.bf16.mxu1 %v3359_v40  ;;  %v3363_v7 = vpop.permute.xlu0 %3362 }
 0x5fe   : > { %v3361_v29 = vpop.permute.xlu1 %3360 }
 0x5ff   : > { %5828 = vmatpush3.bf16.msra.mxu1 %v3359_v40 }
 0x600   : > { %5829 = vmatprep.subr.bf16.mxu1 %v3361_v29 }
 0x603   : > { %5830 = vmatpush3.bf16.msra.mxu1 %v3361_v29 }
 0x604   : > { %5831 = vmatprep.subr.bf16.mxu1 %v3363_v7 }
 0x607   : > { %5832 = vmatpush3.bf16.msra.mxu1 %v3363_v7 }
 0x61e   : > { %v8338_v48 = vpop.f32.mrb[16].mxu0 }
 0x61f   : > { %10256 = vst [vmem:[#allocation24_spill] sm:$0xff] %v8338_v48  ;;  %v8340_v58 = vpop.f32.mrb[17].mxu0 }
 0x620   : > { %10257 = vst [vmem:[#allocation26_spill] sm:$0xff] %v8340_v58  ;;  %v8342_v28 = vpop.f32.mrb[18].mxu0 }
 0x621   : > { %10258 = vst [vmem:[#allocation25_spill] sm:$0xff] %v8342_v28  ;;  %v8344_v2 = vpop.f32.mrb[19].mxu0 }
 0x622   : > { %10259 = vst [vmem:[#allocation27_spill] sm:$0xff] %v8344_v2 }
 0x644   : > { %v3365_v3 = vpop.permute.xlu1 %3364 }
 0x645   : > { %5833 = vmatprep.subr.bf16.mxu1 %v3365_v3 }
 0x646   : > { %5834 = vmatpush3.bf16.msra.mxu1 %v3365_v3 }
 0x649   : > { %v3367_v25 = vpop.permute.xlu0 %3366 }
 0x64a   : > { %5835 = vmatprep.subr.bf16.mxu1 %v3367_v25 }
 0x64b   : > { %5836 = vmatpush3.bf16.msra.mxu1 %v3367_v25 }
 0x655   : > { %v8346_v6 = vpop.f32.mrb[20].mxu0 }
 0x656   : > { %10260 = vst [vmem:[#allocation37_spill] sm:$0xff] %v8346_v6  ;;  %v8348_v23 = vpop.f32.mrb[21].mxu0 }
 0x657   : > { %10261 = vst [vmem:[#allocation29_spill] sm:$0xff] %v8348_v23  ;;  %v8350_v62 = vpop.f32.mrb[22].mxu0 }
 0x658   : > { %10262 = vst [vmem:[#allocation32_spill] sm:$0xff] %v8350_v62  ;;  %v8352_v24 = vpop.f32.mrb[23].mxu0 }
 0x659   : > { %10263 = vst [vmem:[#allocation33_spill] sm:$0xff] %v8352_v24 }
 0x65e   : > { %v8354_v34 = vpop.f32.mrb[24].mxu0 }
 0x65f   : > { %10264 = vst [vmem:[#allocation28_spill] sm:$0xff] %v8354_v34  ;;  %v8356_v57 = vpop.f32.mrb[25].mxu0 }
 0x660   : > { %10265 = vst [vmem:[#allocation31_spill] sm:$0xff] %v8356_v57  ;;  %v8358_v15 = vpop.f32.mrb[26].mxu0 }
 0x661   : > { %10266 = vst [vmem:[#allocation44_spill] sm:$0xff] %v8358_v15  ;;  %v8360_v33 = vpop.f32.mrb[27].mxu0 }
 0x662   : > { %10267 = vst [vmem:[#allocation46_spill] sm:$0xff] %v8360_v33 }
 0x668   : > { %v8362_v63 = vpop.f32.mrb[28].mxu0 }
 0x669   : > { %10268 = vst [vmem:[#allocation38_spill] sm:$0xff] %v8362_v63  ;;  %v8364_v43 = vpop.f32.mrb[29].mxu0 }
 0x66a   : > { %10269 = vst [vmem:[#allocation40_spill] sm:$0xff] %v8364_v43  ;;  %v8366_v40 = vpop.f32.mrb[30].mxu0 }
 0x66b   : > { %10270 = vst [vmem:[#allocation42_spill] sm:$0xff] %v8366_v40  ;;  %v8368_v29 = vpop.f32.mrb[31].mxu0 }
 0x66c   : > { %10271 = vst [vmem:[#allocation34_spill] sm:$0xff] %v8368_v29 }
 0x678   : > { %v5809_v7 = vpop.f32.mrb[32].mxu0 }
 0x679   : > { %v2857_v3 = vmul.f32 0.17677669, %v5809_v7  ;;  %v2792_v25 = vpop.f32.mrb[33].mxu0 }
 0x67a   : > { %v2855_v62 = vmul.f32 0.17677669, %v2792_v25  ;;  %v5810_v24 = vpop.f32.mrb[34].mxu0 }
 0x67b   : > { %v2795_v28 = vpop.f32.mrb[35].mxu0  ;;  %v8373_v15 = vsel %vm791_vm3, %v2857_v3, -inf  ;;  %v2858_v63 = vmul.f32 0.17677669, %v5810_v24 }
 0x67c   : > { %2908 = vmax.xlane.f32.xlu1 %v8373_v15  ;;  %v8379_v40 = vsel %vm789_vm4, %v2855_v62, -inf  ;;  %v2856_v7 = vmul.f32 0.17677669, %v2795_v28  ;;  %v2652_v62 = vld [vmem:[%s6745_s12 + $0x70] sm:$0xff]  ;;  %v2653_v28 = vld [vmem:[%s6745_s12 + $0x78] sm:$0xff] }
 0x67d   : > { %2904 = vmax.xlane.f32.xlu0 %v8379_v40  ;;  %v8385_v25 = vsel %vm792_vm5, %v2858_v63, -inf  ;;  %v2661_v29 = vpack.c.bf16 %v2653_v28, %v2652_v62 }
 0x67e   : > { %v8391_v51 = vsel %vm790_vm6, %v2856_v7, -inf }
 0x680   : > { %v5813_v49 = vpop.f32.mrb[36].mxu0 }
 0x681   : > { %2910 = vmax.xlane.f32.xlu0 %v8385_v25  ;;  %v2808_v3 = vpop.f32.mrb[37].mxu0  ;;  %v2861_v7 = vmul.f32 0.17677669, %v5813_v49 }
 0x682   : > { %v5814_v24 = vpop.f32.mrb[38].mxu0  ;;  %v2859_v62 = vmul.f32 0.17677669, %v2808_v3 }
 0x683   : > { %v2811_v33 = vpop.f32.mrb[39].mxu0  ;;  %v8402_v60 = vsel %vm795_vm7, %v2861_v7, -inf  ;;  %v2862_v23 = vmul.f32 0.17677669, %v5814_v24 }
 0x685   : > { %2906 = vmax.xlane.f32.xlu0 %v8391_v51  ;;  %v8419_v3 = vsel %vm796_vm8, %v2862_v23, -inf }
 0x688   : > { %v5817_v48 = vpop.f32.mrb[40].mxu0 }
 0x689   : > { %v2824_v54 = vpop.f32.mrb[41].mxu0  ;;  %v2865_v28 = vmul.f32 0.17677669, %v5817_v48 }
 0x68a   : > { %v5818_v63 = vpop.f32.mrb[42].mxu0  ;;  %v2863_v2 = vmul.f32 0.17677669, %v2824_v54 }
 0x68b   : > { %v2827_v58 = vpop.f32.mrb[43].mxu0  ;;  %v8414_v49 = vsel %vm799_vm11, %v2865_v28, -inf  ;;  %v2866_v24 = vmul.f32 0.17677669, %v5818_v63 }
 0x68c   : > { %v8426_v48 = vsel %vm797_vm13, %v2863_v2, -inf }
 0x68d   : > { %3368 = vrot.lane.b32.xlu1 %v2661_v29, %s6531_s5  ;;  %v8408_v29 = vsel %vm793_vm9, %v2859_v62, -inf  ;;  %v8443_v2 = vsel %vm800_vm12, %v2866_v24, -inf  ;;  %v8471_v24 = vld [vmem:[#allocation2 + $0x110] sm:$0xff] }
 0x68e   : > { %10277 = vst [vmem:[#allocation36_spill] sm:$0xff] %v8471_v24 }
 0x690   : > { %v5821_v43 = vpop.f32.mrb[44].mxu0 }
 0x691   : > { %v2840_v34 = vpop.f32.mrb[45].mxu0  ;;  %v2869_v54 = vmul.f32 0.17677669, %v5821_v43  ;;  %v2864_v43 = vmul.f32 0.17677669, %v2827_v58 }
 0x692   : > { %v5822_v57 = vpop.f32.mrb[46].mxu0  ;;  %v2867_v23 = vmul.f32 0.17677669, %v2840_v34 }
 0x693   : > { %v2843_v6 = vpop.f32.mrb[47].mxu0  ;;  %v8438_v7 = vsel %vm803_vm15, %v2869_v54, -inf  ;;  %v2870_v34 = vmul.f32 0.17677669, %v5822_v57  ;;  %v10275_v54 = vld [vmem:[#allocation22_spill] sm:$0xff] }
 0x694   : > { %v8450_v63 = vsel %vm10064_vm1, %v2867_v23, -inf  ;;  %vm10276_vm1 = vcmp.ge.s32.totalorder %v10275_v54, %v7257_v50  ;;  %v8473_v23 = vld [vmem:[#allocation2 + $0x100] sm:$0xff] }
 0x695   : > { %v8462_v28 = vsel %vm804_vm0, %v2870_v34, -inf  ;;  %10278 = vst [vmem:[#allocation45_spill] sm:$0xff] %v8473_v23 }
 0x69b   : > { %3627 = vrot.lane.b32.xlu0 %v7958_v26, %s6532_s26  ;;  %v2860_v26 = vmul.f32 0.17677669, %v2811_v33 }
 0x69d   : > { %v8431_v33 = vsel %vm10272_vm10, %v2860_v26, -inf  ;;  %vm10273_vm10 = vcmp.ge.s32.totalorder %v7364_v52, %v7257_v50  ;;  %v2868_v26 = vmul.f32 0.17677669, %v2843_v6  ;;  %v3552_v52 = vld [vmem:[%s6743_s0 + $0x28] sm:$0xff] }
 0x69e   : > { %v8455_v62 = vsel %vm10273_vm10, %v2864_v43, -inf }
 0x69f   : > { %v8468_v57 = vsel %vm10276_vm1, %v2868_v26, -inf  ;;  %v8486_v26 = vld [vmem:[#allocation2 + $0x118] sm:$0xff] }
 0x6a0   : > { %10281 = vst [vmem:[#allocation108_spill] sm:$0xff] %v8486_v26 }
 0x6b1   : > { %2916 = vmax.xlane.f32.xlu1 %v8402_v60 }
 0x6b5   : > { %2912 = vmax.xlane.f32.xlu1 %v8408_v29 }
 0x6b9   : > { %2924 = vmax.xlane.f32.xlu1 %v8414_v49 }
 0x6ba   : > { %2918 = vmax.xlane.f32.xlu0 %v8419_v3 }
 0x6bd   : > { %2920 = vmax.xlane.f32.xlu1 %v8426_v48 }
 0x6be   : > { %2914 = vmax.xlane.f32.xlu0 %v8431_v33 }
 0x6c1   : > { %2932 = vmax.xlane.f32.xlu1 %v8438_v7 }
 0x6c2   : > { %2926 = vmax.xlane.f32.xlu0 %v8443_v2 }
 0x6c5   : > { %2928 = vmax.xlane.f32.xlu1 %v8450_v63 }
 0x6c6   : > { %2922 = vmax.xlane.f32.xlu0 %v8455_v62 }
 0x6ca   : > { %2934 = vmax.xlane.f32.xlu0 %v8462_v28 }
 0x6ce   : > { %2930 = vmax.xlane.f32.xlu0 %v8468_v57 }
 0x709   : > { %v2909_v43 = vpop.xlane.xlu1 %2908 }
 0x70a   : > { %v8476_v61 = vmax.f32 %v8471_v24, %v2909_v43  ;;  %v2905_v34 = vpop.xlane.xlu0 %2904 }
 0x70b   : > { %v8479_v6 = vmax.f32 %v8473_v23, %v2905_v34  ;;  %v3549_v23 = vld [vmem:[%s6743_s0 + $0x10] sm:$0xff] }
 0x70c   : > { %10279 = vst [vmem:[#allocation106_spill] sm:$0xff] %v8476_v61  ;;  %3509 = vst.msk [vmem:[#allocation2 + $0x110] sm:$0xff] %vm1375_vm14, %v8476_v61  ;;  %3012 = vperm.xlu0 %6051, %v8476_v61   ;;  %v8496_v61 = vld [vmem:[#allocation2 + $0x108] sm:$0xff]  ;;  %v3564_v24 = vpack.c.bf16 %v3550_v21, %v3549_v23  ;;  %v8527_v21 = vld [vmem:[#allocation2 + $0x120] sm:$0xff] }
 0x70d   : > { %10280 = vst [vmem:[#allocation107_spill] sm:$0xff] %v8479_v6  ;;  %3507 = vst.msk [vmem:[#allocation2 + $0x100] sm:$0xff] %vm1375_vm14, %v8479_v6  ;;  %v3369_v34 = vpop.permute.xlu1 %3368 }
 0x70e   : > { %5837 = vmatprep.subr.bf16.mxu1 %v3369_v34  ;;  %v2911_v54 = vpop.xlane.xlu0 %2910  ;;  %10283 = vst [vmem:[#allocation110_spill] sm:$0xff] %v8496_v61  ;;  %10288 = vst [vmem:[#allocation113_spill] sm:$0xff] %v8527_v21 }
 0x70f   : > { %v8493_v58 = vmax.f32 %v8486_v26, %v2911_v54  ;;  %5838 = vmatpush3.bf16.msra.mxu1 %v3369_v34  ;;  %v8522_v34 = vld [vmem:[#allocation2 + $0x130] sm:$0xff] }
 0x710   : > { %3002 = vperm.xlu0 %6051, %v8479_v6   ;;  %v3551_v6 = vld [vmem:[%s6743_s0 + $0x20] sm:$0xff] }
 0x711   : > { %10282 = vst [vmem:[#allocation109_spill] sm:$0xff] %v8493_v58  ;;  %3510 = vst.msk [vmem:[#allocation2 + $0x118] sm:$0xff] %vm1375_vm14, %v8493_v58  ;;  %3017 = vperm.xlu1 %6052, %v8493_v58   ;;  %v10285_v58 = vld [vmem:[#allocation55_spill] sm:$0xff] }
 0x712   : > { %v2907_v43 = vpop.xlane.xlu0 %2906  ;;  %10286 = vst [vmem:[#allocation55_spill] sm:$0xff] %v8522_v34 }
 0x713   : > { %v8506_v54 = vmax.f32 %v8496_v61, %v2907_v43  ;;  %v3565_v43 = vpack.c.bf16 %v3552_v52, %v3551_v6  ;;  %v8544_v6 = vld [vmem:[#allocation2 + $0x138] sm:$0xff] }
 0x714   : > { %10291 = vst [vmem:[#allocation116_spill] sm:$0xff] %v8544_v6 }
 0x715   : > { %10284 = vst [vmem:[#allocation111_spill] sm:$0xff] %v8506_v54  ;;  %3508 = vst.msk [vmem:[#allocation2 + $0x108] sm:$0xff] %vm1375_vm14, %v8506_v54  ;;  %3007 = vperm.xlu1 %6052, %v8506_v54  }
 0x716   : > { %v8513_v26 = vpop.permute.xlu0 %3627 }
 0x717   : > { %5943 = vmatprep.subr.msk.bf16.mxu1 %vm877_vm2, %v8513_v26 }
 0x719   : > { %3629 = vrot.lane.b32.xlu1 %v3564_v24, %s6532_s26 }
 0x71d   : > { %3631 = vrot.lane.b32.xlu1 %v3565_v43, %s6532_s26 }
 0x72f   : > { %1349 = vadd.xlane.f32.xlu0 %v10285_v58  ;;  %v8537_v58 = vld [vmem:[#allocation2 + $0x150] sm:$0xff] }
 0x730   : > { %10290 = vst [vmem:[#allocation115_spill] sm:$0xff] %v8537_v58 }
 0x73e   : > { %v2917_v61 = vpop.xlane.xlu1 %2916 }
 0x73f   : > { %v8525_v54 = vmax.f32 %v8522_v34, %v2917_v61  ;;  %v8552_v34 = vld [vmem:[#allocation2 + $0x140] sm:$0xff] }
 0x740   : > { %10294 = vst [vmem:[#allocation119_spill] sm:$0xff] %v8552_v34 }
 0x741   : > { %10287 = vst [vmem:[#allocation112_spill] sm:$0xff] %v8525_v54  ;;  %3513 = vst.msk [vmem:[#allocation2 + $0x130] sm:$0xff] %vm1375_vm14, %v8525_v54  ;;  %3032 = vperm.xlu1 %6052, %v8525_v54  }
 0x742   : > { %v2913_v52 = vpop.xlane.xlu1 %2912 }
 0x743   : > { %v8535_v24 = vmax.f32 %v8527_v21, %v2913_v52  ;;  %v8558_v21 = vld [vmem:[#allocation2 + $0x128] sm:$0xff] }
 0x744   : > { %10295 = vst [vmem:[#allocation120_spill] sm:$0xff] %v8558_v21 }
 0x745   : > { %10289 = vst [vmem:[#allocation114_spill] sm:$0xff] %v8535_v24  ;;  %3511 = vst.msk [vmem:[#allocation2 + $0x120] sm:$0xff] %vm1375_vm14, %v8535_v24  ;;  %3022 = vperm.xlu1 %6052, %v8535_v24   ;;  %v8577_v24 = vld [vmem:[#allocation2 + $0x158] sm:$0xff] }
 0x746   : > { %v2925_v43 = vpop.xlane.xlu1 %2924  ;;  %10299 = vst [vmem:[#allocation124_spill] sm:$0xff] %v8577_v24 }
 0x747   : > { %v2919_v23 = vpop.xlane.xlu0 %2918  ;;  %v8547_v54 = vmax.f32 %v8537_v58, %v2925_v43  ;;  %v8571_v58 = vld [vmem:[#allocation2 + $0x170] sm:$0xff] }
 0x748   : > { %v8550_v52 = vmax.f32 %v8544_v6, %v2919_v23  ;;  %10298 = vst [vmem:[#allocation123_spill] sm:$0xff] %v8571_v58 }
 0x749   : > { %10292 = vst [vmem:[#allocation117_spill] sm:$0xff] %v8547_v54  ;;  %3517 = vst.msk [vmem:[#allocation2 + $0x150] sm:$0xff] %vm1375_vm14, %v8547_v54 }
 0x74a   : > { %10293 = vst [vmem:[#allocation118_spill] sm:$0xff] %v8550_v52  ;;  %3514 = vst.msk [vmem:[#allocation2 + $0x138] sm:$0xff] %vm1375_vm14, %v8550_v52  ;;  %3037 = vperm.xlu1 %6052, %v8550_v52   ;;  %v2921_v23 = vpop.xlane.xlu1 %2920 }
 0x74b   : > { %v2915_v43 = vpop.xlane.xlu0 %2914  ;;  %v8566_v47 = vmax.f32 %v8552_v34, %v2921_v23  ;;  %v8590_v34 = vld [vmem:[#allocation2 + $0x160] sm:$0xff] }
 0x74c   : > { %v8569_v61 = vmax.f32 %v8558_v21, %v2915_v43  ;;  %10302 = vst [vmem:[#allocation127_spill] sm:$0xff] %v8590_v34  ;;  %v3553_v21 = vld [vmem:[%s6743_s0 + $0x30] sm:$0xff] }
 0x74d   : > { %10296 = vst [vmem:[#allocation121_spill] sm:$0xff] %v8566_v47  ;;  %3515 = vst.msk [vmem:[#allocation2 + $0x140] sm:$0xff] %vm1375_vm14, %v8566_v47 }
 0x74e   : > { %10297 = vst [vmem:[#allocation122_spill] sm:$0xff] %v8569_v61  ;;  %3512 = vst.msk [vmem:[#allocation2 + $0x128] sm:$0xff] %vm1375_vm14, %v8569_v61  ;;  %3027 = vperm.xlu1 %6052, %v8569_v61   ;;  %v2933_v23 = vpop.xlane.xlu1 %2932 }
 0x74f   : > { %v2927_v43 = vpop.xlane.xlu0 %2926  ;;  %v8585_v6 = vmax.f32 %v8571_v58, %v2933_v23  ;;  %v8612_v58 = vld [vmem:[#allocation2 + $0x178] sm:$0xff] }
 0x750   : > { %v8588_v44 = vmax.f32 %v8577_v24, %v2927_v43  ;;  %10305 = vst [vmem:[#allocation130_spill] sm:$0xff] %v8612_v58  ;;  %v3531_v24 = vld [vmem:[%s6741_s27 + $0x40] sm:$0xff] }
 0x751   : > { %10300 = vst [vmem:[#allocation125_spill] sm:$0xff] %v8585_v6  ;;  %3521 = vst.msk [vmem:[#allocation2 + $0x170] sm:$0xff] %vm1375_vm14, %v8585_v6 }
 0x752   : > { %10301 = vst [vmem:[#allocation126_spill] sm:$0xff] %v8588_v44  ;;  %3518 = vst.msk [vmem:[#allocation2 + $0x158] sm:$0xff] %vm1375_vm14, %v8588_v44  ;;  %3052 = vperm.xlu1 %6052, %v8547_v54   ;;  %3057 = vperm.xlu0 %6051, %v8588_v44   ;;  %v2929_v23 = vpop.xlane.xlu1 %2928  ;;  %v10309_v54 = vld [vmem:[#allocation105_spill] sm:$0xff] }
 0x753   : > { %v2923_v43 = vpop.xlane.xlu0 %2922  ;;  %v8607_v16 = vmax.f32 %v8590_v34, %v2929_v23  ;;  %v10306_v23 = vld [vmem:[#allocation104_spill] sm:$0xff]  ;;  %v8628_v34 = vld [vmem:[#allocation2 + $0x168] sm:$0xff] }
 0x754   : > { %v8610_v52 = vmax.f32 %v8592_v36, %v2923_v43  ;;  %v3566_v43 = vpack.c.bf16 %v3554_v20, %v3553_v21  ;;  %10308 = vst [vmem:[#allocation131_spill] sm:$0xff] %v8628_v34  ;;  %v3527_v21 = vld [vmem:[%s6741_s27 + $0x20] sm:$0xff] }
 0x755   : > { %10303 = vst [vmem:[#allocation128_spill] sm:$0xff] %v8607_v16  ;;  %3519 = vst.msk [vmem:[#allocation2 + $0x160] sm:$0xff] %vm1375_vm14, %v8607_v16 }
 0x756   : > { %10304 = vst [vmem:[#allocation129_spill] sm:$0xff] %v8610_v52  ;;  %3516 = vst.msk [vmem:[#allocation2 + $0x148] sm:$0xff] %vm1375_vm14, %v8610_v52  ;;  %3042 = vperm.xlu1 %6052, %v8566_v47   ;;  %3635 = vrot.lane.b32.xlu0 %v10306_v23, %s6532_s26  ;;  %v3536_v47 = vld [vmem:[%s6741_s27 + $0x68] sm:$0xff] }
 0x757   : > { %v2935_v44 = vpop.xlane.xlu0 %2934 }
 0x758   : > { %v8626_v61 = vmax.f32 %v8612_v58, %v2935_v44  ;;  %v3528_v44 = vld [vmem:[%s6741_s27 + $0x28] sm:$0xff] }
 0x759   : > { %v3532_v58 = vld [vmem:[%s6741_s27 + $0x48] sm:$0xff] }
 0x75a   : > { %10307 = vst [vmem:[#allocation104_spill] sm:$0xff] %v8626_v61  ;;  %3633 = vrot.lane.b32.xlu1 %v3566_v43, %s6532_s26  ;;  %3639 = vrot.lane.b32.xlu0 %v10309_v54, %s6532_s26  ;;  %3522 = vst.msk [vmem:[#allocation2 + $0x178] sm:$0xff] %vm1375_vm14, %v8626_v61  ;;  %v3541_v43 = vpack.c.bf16 %v3528_v44, %v3527_v21  ;;  %v3557_v21 = vld [vmem:[%s6743_s0 + $0x50] sm:$0xff]  ;;  %v3558_v44 = vld [vmem:[%s6743_s0 + $0x58] sm:$0xff] }
 0x75b   : > { %v2931_v20 = vpop.xlane.xlu0 %2930 }
 0x75c   : > { %v8640_v23 = vmax.f32 %v8628_v34, %v2931_v20  ;;  %v3535_v20 = vld [vmem:[%s6741_s27 + $0x60] sm:$0xff]  ;;  %v3533_v34 = vld [vmem:[%s6741_s27 + $0x50] sm:$0xff] }
 0x75d   : > { %v3545_v54 = vpack.c.bf16 %v3536_v47, %v3535_v20  ;;  %v3525_v47 = vld [vmem:[%s6741_s27 + $0x10] sm:$0xff]  ;;  %v3526_v20 = vld [vmem:[%s6741_s27 + $0x18] sm:$0xff] }
 0x75e   : > { %10310 = vst [vmem:[#allocation105_spill] sm:$0xff] %v8640_v23  ;;  %3603 = vrot.lane.b32.xlu0 %v8112_v19, %s6532_s26  ;;  %3047 = vperm.xlu1 %6052, %v8610_v52   ;;  %3520 = vst.msk [vmem:[#allocation2 + $0x168] sm:$0xff] %vm1375_vm14, %v8640_v23  ;;  %v3543_v19 = vpack.c.bf16 %v3532_v58, %v3531_v24  ;;  %v3568_v24 = vpack.c.bf16 %v3558_v44, %v3557_v21  ;;  %v3561_v58 = vld [vmem:[%s6743_s0 + $0x70] sm:$0xff]  ;;  %v3538_v52 = vld [vmem:[%s6741_s27 + $0x78] sm:$0xff] }
 0x75f   : > { %v3537_v44 = vld [vmem:[%s6741_s27 + $0x70] sm:$0xff] }
 0x762   : > { %3607 = vrot.lane.b32.xlu0 %v3541_v43, %s6532_s26  ;;  %3072 = vperm.xlu1 %6052, %v8585_v6   ;;  %v3562_v43 = vld [vmem:[%s6743_s0 + $0x78] sm:$0xff]  ;;  %v3529_v6 = vld [vmem:[%s6741_s27 + $0x30] sm:$0xff] }
 0x766   : > { %3611 = vrot.lane.b32.xlu0 %v3543_v19, %s6532_s26  ;;  %3062 = vperm.xlu1 %6052, %v8607_v16   ;;  %v3570_v19 = vpack.c.bf16 %v3562_v43, %v3561_v58  ;;  %v3530_v16 = vld [vmem:[%s6741_s27 + $0x38] sm:$0xff]  ;;  %v10311_v58 = vld [vmem:[#allocation58_spill] sm:$0xff] }
 0x76a   : > { %3615 = vrot.lane.b32.xlu0 %v3545_v54, %s6532_s26  ;;  %3067 = vperm.xlu1 %6052, %v8640_v23   ;;  %v3540_v54 = vpack.c.bf16 %v3526_v20, %v3525_v47  ;;  %v3542_v23 = vpack.c.bf16 %v3530_v16, %v3529_v6 }
 0x76e   : > { %3077 = vperm.xlu1 %6052, %v8626_v61   ;;  %v3534_v61 = vld [vmem:[%s6741_s27 + $0x58] sm:$0xff] }
 0x76f   : > { %v3544_v21 = vpack.c.bf16 %v3534_v61, %v3533_v34 }
 0x772   : > { %3637 = vrot.lane.b32.xlu1 %v3568_v24, %s6532_s26  ;;  %v3546_v24 = vpack.c.bf16 %v3538_v52, %v3537_v44 }
 0x776   : > { %3641 = vrot.lane.b32.xlu1 %v3570_v19, %s6532_s26  ;;  %v10312_v19 = vld [vmem:[#allocation57_spill] sm:$0xff] }
 0x77a   : > { %3605 = vrot.lane.b32.xlu1 %v3540_v54, %s6532_s26 }
 0x77e   : > { %3609 = vrot.lane.b32.xlu1 %v3542_v23, %s6532_s26  ;;  %v10313_v23 = vld [vmem:[#allocation59_spill] sm:$0xff] }
 0x782   : > { %3613 = vrot.lane.b32.xlu1 %v3544_v21, %s6532_s26 }
 0x786   : > { %3617 = vrot.lane.b32.xlu1 %v3546_v24, %s6532_s26 }
 0x789   : > { %1351 = vadd.xlane.f32.xlu0 %v10311_v58  ;;  %v10314_v58 = vld [vmem:[#allocation41_spill] sm:$0xff] }
 0x78b   : > { %v3013_v43 = vpop.permute.xlu0 %3012 }
 0x78c   : > { %v3082_v34 = vsub.f32 %v8373_v15, %v3013_v43  ;;  %v10315_v43 = vld [vmem:[#allocation43_spill] sm:$0xff] }
 0x78d   : > { %1355 = vadd.xlane.f32.xlu0 %v10312_v19  ;;  %v10316_v19 = vsub.f32 %v10314_v58, %v10315_v43  ;;  %v10325_v58 = vld [vmem:[#allocation82_spill] sm:$0xff] }
 0x78e   : > { %v3100_v44 = vmul.f32 1.442695, %v3082_v34 }
 0x78f   : > { %v3003_v47 = vpop.permute.xlu0 %3002 }
 0x790   : > { %v3080_v16 = vsub.f32 %v8379_v40, %v3003_v47  ;;  %v3018_v6 = vpop.permute.xlu1 %3017  ;;  %v1157_v47 = vmul.f32 1.442695, %v10316_v19 }
 0x791   : > { %v3083_v20 = vsub.f32 %v8385_v25, %v3018_v6  ;;  %1357 = vadd.xlane.f32.xlu0 %v10313_v23 }
 0x792   : > { %v3096_v61 = vmul.f32 1.442695, %v3080_v16  ;;  %v10317_v16 = vld [vmem:[#allocation56_spill] sm:$0xff] }
 0x793   : > { %v3102_v54 = vmul.f32 1.442695, %v3083_v20 }
 0x794   : > { %v3008_v52 = vpop.permute.xlu1 %3007  ;;  %6139 = vpow2.f32 %v3096_v61 }
 0x795   : > { %v3081_v21 = vsub.f32 %v8391_v51, %v3008_v52  ;;  %2228 = vadd.xlane.f32.xlu0 %v8147_v53  ;;  %6141 = vpow2.f32 %v3102_v54 }
 0x797   : > { %v3098_v24 = vmul.f32 1.442695, %v3081_v21  ;;  %v10318_v21 = vld [vmem:[#allocation51_spill] sm:$0xff] }
 0x799   : > { %6143 = vpow2.f32 %v3098_v24  ;;  %2232 = vadd.xlane.f32.xlu0 %v8154_v18 }
 0x79a   : > { %6145 = vpow2.f32 %v3100_v44  ;;  %v10319_v44 = vld [vmem:[#allocation53_spill] sm:$0xff] }
 0x79b   : > { %6147 = vpow2.f32 %v1157_v47 }
 0x79d   : > { %2234 = vadd.xlane.f32.xlu0 %v8157_v1  ;;  %v3630_v1 = vpop.permute.xlu1 %3629 }
 0x79e   : > { %v8688_v40 = vpop.eup %6139 }
 0x79f   : > { %v8691_v15 = vpop.eup %6141 }
 0x7a1   : > { %2238 = vadd.xlane.f32.xlu0 %v8187_v31  ;;  %v3668_v31 = vsel %vm877_vm2, %v8513_v26, 0  ;;  %v3632_v6 = vpop.permute.xlu1 %3631  ;;  %v1306_v26 = vld [vmem:[#allocation3 + $0x58] sm:$0xff] }
 0x7a3   : > { %v8693_v25 = vpop.eup %6143 }
 0x7a4   : > { %v8695_v51 = vpop.eup %6145  ;;  %v3338_v53 = vpack.c.bf16 %v8693_v25, %v8688_v40 }
 0x7a5   : > { %2242 = vadd.xlane.f32.xlu0 %v8181_v55  ;;  %v3339_v18 = vpack.c.bf16 %v8691_v15, %v8695_v51  ;;  %v3671_v55 = vsel %vm877_vm2, %v3630_v1, 0 }
 0x7a6   : > { %5839 = vmatprep.mubr.bf16.mxu1 %v3338_v53 }
 0x7a7   : > { %5840 = vmatmul.mubr.bf16.vlgmr.msra.gmra.mrb[32].mxu1 %v3339_v18 }
 0x7a8   : > { %5856 = vmatpush3.bf16.xpose.msra.mxu1 %v3668_v31 }
 0x7a9   : > { %2246 = vadd.xlane.f32.xlu0 %v8203_v9  ;;  %5944 = vmatprep.subr.msk.bf16.mxu1 %vm877_vm2, %v3630_v1  ;;  %v3674_v9 = vsel %vm877_vm2, %v3632_v6, 0 }
 0x7aa   : > { %1353 = vadd.xlane.f32.xlu1 %v10317_v16 }
 0x7ad   : > { %2250 = vadd.xlane.f32.xlu0 %v8196_v37  ;;  %v8719_v37 = vpop.eup %6147 }
 0x7ae   : > { %2230 = vadd.xlane.f32.xlu1 %v8150_v5  ;;  %v1322_v5 = vmul.f32 %v8719_v37, %v1306_v26 }
 0x7b0   : > { %5858 = vmatpush3.bf16.xpose.msra.mxu1 %v3671_v55 }
 0x7b1   : > { %2254 = vadd.xlane.f32.xlu0 %v8216_v38  ;;  %5945 = vmatprep.subr.msk.bf16.mxu1 %vm877_vm2, %v3632_v6  ;;  %v10327_v6 = vld [vmem:[#allocation84_spill] sm:$0xff] }
 0x7b2   : > { %2236 = vadd.xlane.f32.xlu1 %v8185_v35 }
 0x7b5   : > { %2258 = vadd.xlane.f32.xlu0 %v8222_v39 }
 0x7b6   : > { %2240 = vadd.xlane.f32.xlu1 %v8179_v22 }
 0x7b8   : > { %5860 = vmatpush3.bf16.xpose.msra.mxu1 %v3674_v9  ;;  %v10328_v9 = vld [vmem:[#allocation86_spill] sm:$0xff] }
 0x7b9   : > { %v10329_v26 = vsub.f32 %v10327_v6, %v10328_v9 }
 0x7ba   : > { %2244 = vadd.xlane.f32.xlu1 %v8205_v42 }
 0x7bc   : > { %v1350_v20 = vpop.xlane.xlu0 %1349 }
 0x7bd   : > { %v1370_v38 = vadd.f32 %v1350_v20, %v1322_v5 }
 0x7be   : > { %2248 = vadd.xlane.f32.xlu1 %v8201_v17 }
 0x7bf   : > { %1387 = vst.msk [vmem:[#allocation3 + $0x58] sm:$0xff] %vm1375_vm14, %v1370_v38 }
 0x7c0   : > { %v3033_v35 = vpop.permute.xlu1 %3032 }
 0x7c1   : > { %v3086_v42 = vsub.f32 %v8402_v60, %v3033_v35  ;;  %v10321_v60 = vld [vmem:[#allocation47_spill] sm:$0xff] }
 0x7c2   : > { %2252 = vadd.xlane.f32.xlu1 %v8213_v32  ;;  %v10320_v32 = vsub.f32 %v10318_v21, %v10319_v44  ;;  %v10333_v44 = vld [vmem:[#allocation52_spill] sm:$0xff] }
 0x7c4   : > { %v3023_v22 = vpop.permute.xlu1 %3022  ;;  %v1159_v24 = vmul.f32 1.442695, %v10320_v32 }
 0x7c5   : > { %v3084_v39 = vsub.f32 %v8408_v29, %v3023_v22 }
 0x7c6   : > { %2256 = vadd.xlane.f32.xlu1 %v8220_v41  ;;  %v3108_v41 = vmul.f32 1.442695, %v3086_v42  ;;  %v10331_v42 = vld [vmem:[#allocation35_spill] sm:$0xff] }
 0x7c7   : > { %v3104_v61 = vmul.f32 1.442695, %v3084_v39 }
 0x7c9   : > { %v3038_v23 = vpop.permute.xlu1 %3037  ;;  %6149 = vpow2.f32 %v3104_v61 }
 0x7ca   : > { %v3087_v34 = vsub.f32 %v8419_v3, %v3038_v23 }
 0x7cb   : > { %1415 = vperm.xlu0 %6051, %v8293_v46   ;;  %v10322_v46 = vld [vmem:[#allocation49_spill] sm:$0xff] }
 0x7cc   : > { %v3110_v54 = vmul.f32 1.442695, %v3087_v34  ;;  %v10323_v53 = vsub.f32 %v10321_v60, %v10322_v46  ;;  %v10330_v34 = vld [vmem:[#allocation23_spill] sm:$0xff] }
 0x7cd   : > { %v3028_v17 = vpop.permute.xlu1 %3027  ;;  %v10332_v61 = vsub.f32 %v10330_v34, %v10331_v42 }
 0x7ce   : > { %v3085_v52 = vsub.f32 %v8431_v33, %v3028_v17  ;;  %6151 = vpow2.f32 %v3110_v54  ;;  %v1163_v18 = vmul.f32 1.442695, %v10323_v53 }
 0x7cf   : > { %1430 = vperm.xlu0 %6051, %v8290_v0   ;;  %v10324_v0 = vld [vmem:[#allocation80_spill] sm:$0xff]  ;;  %v2047_v54 = vmul.f32 1.442695, %v10332_v61 }
 0x7d0   : > { %v3106_v29 = vmul.f32 1.442695, %v3085_v52  ;;  %v10326_v43 = vsub.f32 %v10324_v0, %v10325_v58  ;;  %v10342_v58 = vld [vmem:[#allocation88_spill] sm:$0xff] }
 0x7d1   : > { %v3053_v3 = vpop.permute.xlu1 %3052  ;;  %v3058_v33 = vpop.permute.xlu0 %3057 }
 0x7d2   : > { %6153 = vpow2.f32 %v3106_v29  ;;  %v3090_v31 = vsub.f32 %v8414_v49, %v3053_v3  ;;  %v2037_v19 = vmul.f32 1.442695, %v10326_v43  ;;  %v2043_v49 = vmul.f32 1.442695, %v10329_v26  ;;  %v10337_v29 = vld [vmem:[#allocation94_spill] sm:$0xff] }
 0x7d3   : > { %6155 = vpow2.f32 %v1159_v24  ;;  %1440 = vperm.xlu0 %6051, %v8300_v30   ;;  %v3091_v30 = vsub.f32 %v8443_v2, %v3058_v33  ;;  %v8748_v55 = vpop.eup %6149  ;;  %v10339_v33 = vld [vmem:[#allocation48_spill] sm:$0xff]  ;;  %v10343_v43 = vld [vmem:[#allocation90_spill] sm:$0xff] }
 0x7d4   : > { %6157 = vpow2.f32 %v3108_v41  ;;  %v3116_v20 = vmul.f32 1.442695, %v3090_v31  ;;  %v10336_v41 = vld [vmem:[#allocation92_spill] sm:$0xff] }
 0x7d5   : > { %v3043_v1 = vpop.permute.xlu1 %3042  ;;  %6159 = vpow2.f32 %v1163_v18  ;;  %v3118_v2 = vmul.f32 1.442695, %v3091_v30  ;;  %v10338_v3 = vsub.f32 %v10336_v41, %v10337_v29 }
 0x7d6   : > { %v3088_v47 = vsub.f32 %v8426_v48, %v3043_v1  ;;  %6161 = vpow2.f32 %v2037_v19  ;;  %v10340_v1 = vld [vmem:[#allocation50_spill] sm:$0xff]  ;;  %v10344_v19 = vsub.f32 %v10342_v58, %v10343_v43 }
 0x7d7   : > { %1450 = vperm.xlu0 %6051, %v8308_v45   ;;  %1410 = vperm.xlu1 %6052, %v8281_v14   ;;  %v3636_v45 = vpop.permute.xlu0 %3635  ;;  %6163 = vpow2.f32 %v2043_v49  ;;  %v2051_v60 = vmul.f32 1.442695, %v10338_v3  ;;  %v10341_v31 = vsub.f32 %v10339_v33, %v10340_v1 }
 0x7d8   : > { %v8755_v5 = vpop.eup %6151  ;;  %v3112_v35 = vmul.f32 1.442695, %v3088_v47  ;;  %6165 = vpow2.f32 %v3116_v20  ;;  %v2055_v30 = vmul.f32 1.442695, %v10344_v19  ;;  %v10360_v19 = vld [vmem:[#allocation85_spill] sm:$0xff] }
 0x7d9   : > { %v3634_v16 = vpop.permute.xlu1 %3633  ;;  %6167 = vpow2.f32 %v3118_v2  ;;  %v1165_v0 = vmul.f32 1.442695, %v10341_v31 }
 0x7da   : > { %5946 = vmatprep.subr.msk.bf16.mxu1 %vm877_vm2, %v3634_v16  ;;  %v3677_v14 = vsel %vm877_vm2, %v3634_v16, 0  ;;  %6169 = vpow2.f32 %v3112_v35  ;;  %v10349_v35 = vld [vmem:[#allocation102_spill] sm:$0xff] }
 0x7db   : > { %1460 = vperm.xlu0 %6051, %v8316_v8   ;;  %1420 = vperm.xlu1 %6052, %v8279_v11  }
 0x7dc   : > { %v8759_v48 = vpop.eup %6153  ;;  %5862 = vmatpush3.bf16.xpose.msra.mxu1 %v3677_v14  ;;  %v10346_v14 = vld [vmem:[#allocation79_spill] sm:$0xff] }
 0x7dd   : > { %v8761_v38 = vpop.eup %6155  ;;  %v3048_v22 = vpop.permute.xlu1 %3047  ;;  %v3340_v39 = vpack.c.bf16 %v8759_v48, %v8748_v55  ;;  %5947 = vmatprep.subr.msk.bf16.mxu1 %vm877_vm2, %v3636_v45 }
 0x7de   : > { %v8766_v23 = vpop.eup %6157  ;;  %v3089_v8 = vsub.f32 %v8455_v62, %v3048_v22  ;;  %v3680_v62 = vsel %vm877_vm2, %v3636_v45, 0 }
 0x7df   : > { %1470 = vperm.xlu0 %6051, %v8761_v38   ;;  %1425 = vperm.xlu1 %6052, %v8304_v27   ;;  %v3341_v11 = vpack.c.bf16 %v8755_v5, %v8766_v23  ;;  %v8777_v21 = vpop.eup %6159  ;;  %v10334_v27 = vld [vmem:[#allocation54_spill] sm:$0xff] }
 0x7e0   : > { %v3114_v17 = vmul.f32 1.442695, %v3089_v8  ;;  %5843 = vmatprep.mubr.bf16.mxu1 %v3340_v39  ;;  %v10335_v32 = vsub.f32 %v10333_v44, %v10334_v27  ;;  %v8787_v53 = vpop.eup %6161  ;;  %v10354_v44 = vld [vmem:[#allocation101_spill] sm:$0xff]  ;;  %v10355_v27 = vld [vmem:[#allocation103_spill] sm:$0xff] }
 0x7e1   : > { %5844 = vmatmul.mubr.bf16.gmra.mrb[36].mxu1 %v3341_v11  ;;  %v3073_v52 = vpop.permute.xlu1 %3072 }
 0x7e2   : > { %6171 = vpow2.f32 %v3114_v17  ;;  %v1161_v24 = vmul.f32 1.442695, %v10335_v32  ;;  %v10356_v32 = vsub.f32 %v10354_v44, %v10355_v27  ;;  %v10369_v27 = vld [vmem:[#allocation89_spill] sm:$0xff] }
 0x7e3   : > { %1480 = vperm.xlu0 %6051, %v8777_v21   ;;  %1435 = vperm.xlu1 %6052, %v8312_v4   ;;  %6173 = vpow2.f32 %v2047_v54  ;;  %v8795_v4 = vpop.eup %6163  ;;  %v10352_v54 = vld [vmem:[#allocation78_spill] sm:$0xff] }
 0x7e4   : > { %5864 = vmatpush3.bf16.xpose.msra.mxu1 %v3680_v62  ;;  %6175 = vpow2.f32 %v1161_v24  ;;  %v8800_v47 = vpop.eup %6165  ;;  %v2061_v24 = vmul.f32 1.442695, %v10356_v32  ;;  %v10370_v32 = vld [vmem:[#allocation91_spill] sm:$0xff] }
 0x7e5   : > { %v3063_v46 = vpop.permute.xlu1 %3062  ;;  %6177 = vpow2.f32 %v2051_v60  ;;  %v8803_v9 = vpop.eup %6167 }
 0x7e6   : > { %v3092_v18 = vsub.f32 %v8450_v63, %v3063_v46  ;;  %v3094_v63 = vsub.f32 %v8438_v7, %v3073_v52  ;;  %v8806_v49 = vpop.eup %6169  ;;  %6179 = vpow2.f32 %v1165_v0  ;;  %v10348_v7 = vld [vmem:[#allocation100_spill] sm:$0xff]  ;;  %v3343_v62 = vpack.c.bf16 %v8803_v9, %v8800_v47  ;;  %v3640_v60 = vpop.permute.xlu0 %3639  ;;  %v10357_v46 = vld [vmem:[#allocation81_spill] sm:$0xff] }
 0x7e7   : > { %2316 = vperm.xlu0 %6051, %v8787_v53   ;;  %1445 = vperm.xlu1 %6052, %v8320_v12   ;;  %v10345_v12 = vld [vmem:[#allocation77_spill] sm:$0xff]  ;;  %6181 = vpow2.f32 %v2055_v30  ;;  %v10350_v22 = vsub.f32 %v10348_v7, %v10349_v35  ;;  %v10361_v30 = vld [vmem:[#allocation87_spill] sm:$0xff]  ;;  %v10363_v35 = vld [vmem:[#allocation30_spill] sm:$0xff] }
 0x7e8   : > { %v3120_v16 = vmul.f32 1.442695, %v3092_v18  ;;  %v10347_v45 = vsub.f32 %v10345_v12, %v10346_v14  ;;  %v10358_v18 = vld [vmem:[#allocation83_spill] sm:$0xff]  ;;  %v3686_v12 = vsel %vm877_vm2, %v3640_v60, 0 }
 0x7e9   : > { %v3068_v6 = vpop.permute.xlu1 %3067  ;;  %v2059_v39 = vmul.f32 1.442695, %v10350_v22  ;;  %v10359_v33 = vsub.f32 %v10357_v46, %v10358_v18  ;;  %v10364_v22 = vld [vmem:[#allocation39_spill] sm:$0xff] }
 0x7ea   : > { %v3093_v26 = vsub.f32 %v8468_v57, %v3068_v6  ;;  %v2035_v20 = vmul.f32 1.442695, %v10347_v45  ;;  %v3124_v57 = vmul.f32 1.442695, %v3094_v63  ;;  %6183 = vpow2.f32 %v3120_v16 }
 0x7eb   : > { %2331 = vperm.xlu0 %6051, %v8795_v4   ;;  %1455 = vperm.xlu1 %6052, %v8331_v59   ;;  %v10351_v59 = vld [vmem:[#allocation76_spill] sm:$0xff]  ;;  %v2041_v1 = vmul.f32 1.442695, %v10359_v33  ;;  %v10362_v63 = vsub.f32 %v10360_v19, %v10361_v30 }
 0x7ec   : > { %v8813_v2 = vpop.eup %6171  ;;  %v3122_v8 = vmul.f32 1.442695, %v3093_v26  ;;  %v10353_v17 = vsub.f32 %v10351_v59, %v10352_v54  ;;  %v10366_v59 = vld [vmem:[#allocation93_spill] sm:$0xff]  ;;  %v10367_v54 = vld [vmem:[#allocation95_spill] sm:$0xff]  ;;  %v10372_v33 = vld [vmem:[#allocation96_spill] sm:$0xff] }
 0x7ed   : > { %v3078_v11 = vpop.permute.xlu1 %3077  ;;  %v3342_v34 = vpack.c.bf16 %v8813_v2, %v8806_v49  ;;  %v8820_v42 = vpop.eup %6173  ;;  %v2045_v16 = vmul.f32 1.442695, %v10362_v63 }
 0x7ee   : > { %6185 = vpow2.f32 %v3122_v8  ;;  %v3095_v61 = vsub.f32 %v8462_v28, %v3078_v11  ;;  %v2039_v52 = vmul.f32 1.442695, %v10353_v17  ;;  %v8833_v28 = vpop.eup %6175  ;;  %v10368_v17 = vsub.f32 %v10366_v59, %v10367_v54 }
 0x7ef   : > { %6187 = vpow2.f32 %v2035_v20  ;;  %2341 = vperm.xlu0 %6051, %v8820_v42   ;;  %1465 = vperm.xlu1 %6052, %v8719_v37   ;;  %v8835_v3 = vpop.eup %6177 }
 0x7f0   : > { %6189 = vpow2.f32 %v2059_v39  ;;  %v3126_v41 = vmul.f32 1.442695, %v3095_v61  ;;  %5847 = vmatprep.mubr.bf16.mxu1 %v3342_v34  ;;  %v8844_v31 = vpop.eup %6179  ;;  %v10365_v39 = vsub.f32 %v10363_v35, %v10364_v22  ;;  %v3604_v61 = vpop.permute.xlu0 %3603 }
 0x7f1   : > { %6191 = vpow2.f32 %v3124_v57  ;;  %5848 = vmatmul.mubr.bf16.gmra.mrb[40].mxu1 %v3343_v62  ;;  %v3638_v29 = vpop.permute.xlu1 %3637  ;;  %v8847_v0 = vpop.eup %6181 }
 0x7f2   : > { %6193 = vpow2.f32 %v3126_v41  ;;  %5948 = vmatprep.subr.msk.bf16.mxu1 %vm877_vm2, %v3638_v29  ;;  %v3683_v37 = vsel %vm877_vm2, %v3638_v29, 0  ;;  %v2049_v8 = vmul.f32 1.442695, %v10365_v39  ;;  %v1309_v39 = vld [vmem:[#allocation3 + $0x70] sm:$0xff] }
 0x7f3   : > { %6195 = vpow2.f32 %v2039_v52  ;;  %2351 = vperm.xlu0 %6051, %v8835_v3   ;;  %1475 = vperm.xlu1 %6052, %v8833_v28   ;;  %v2053_v52 = vmul.f32 1.442695, %v10368_v17  ;;  %v1310_v17 = vld [vmem:[#allocation3 + $0x78] sm:$0xff] }
 0x7f4   : > { %6197 = vpow2.f32 %v2061_v24  ;;  %5866 = vmatpush3.bf16.xpose.msra.mxu1 %v3683_v37  ;;  %v8849_v58 = vpop.eup %6183  ;;  %v10371_v24 = vsub.f32 %v10369_v27, %v10370_v32  ;;  %v3608_v29 = vpop.permute.xlu0 %3607 }
 0x7f5   : > { %5949 = vmatprep.subr.msk.bf16.mxu1 %vm877_vm2, %v3640_v60  ;;  %6199 = vpow2.f32 %v2041_v1  ;;  %v3642_v45 = vpop.permute.xlu1 %3641  ;;  %v10373_v1 = vld [vmem:[#allocation98_spill] sm:$0xff] }
 0x7f6   : > { %6201 = vpow2.f32 %v2045_v16  ;;  %v3689_v62 = vsel %vm877_vm2, %v3642_v45, 0  ;;  %v2057_v41 = vmul.f32 1.442695, %v10371_v24  ;;  %v10374_v19 = vsub.f32 %v10372_v33, %v10373_v1  ;;  %v2199_v33 = vld [vmem:[#allocation3 + $0x98] sm:$0xff] }
 0x7f7   : > { %2361 = vperm.xlu0 %6051, %v8847_v0   ;;  %1485 = vperm.xlu1 %6052, %v8844_v31   ;;  %6203 = vpow2.f32 %v2049_v8 }
 0x7f8   : > { %v8853_v43 = vpop.eup %6185  ;;  %6205 = vpow2.f32 %v2053_v52  ;;  %v3612_v18 = vpop.permute.xlu0 %3611  ;;  %v2063_v30 = vmul.f32 1.442695, %v10374_v19 }
 0x7f9   : > { %v8858_v6 = vpop.eup %6187  ;;  %v3344_v26 = vpack.c.bf16 %v8853_v43, %v8849_v58  ;;  %6207 = vpow2.f32 %v2057_v41  ;;  %v3606_v60 = vpop.permute.xlu1 %3605  ;;  %v2198_v41 = vld [vmem:[#allocation3 + $0x90] sm:$0xff] }
 0x7fa   : > { %v8863_v14 = vpop.eup %6189  ;;  %6209 = vpow2.f32 %v2063_v30  ;;  %v2201_v30 = vld [vmem:[#allocation3 + $0xa8] sm:$0xff] }
 0x7fb   : > { %v8865_v20 = vpop.eup %6191  ;;  %2371 = vperm.xlu0 %6051, %v8863_v14   ;;  %2311 = vperm.xlu1 %6052, %v8858_v6  }
 0x7fc   : > { %v8869_v7 = vpop.eup %6193  ;;  %5851 = vmatprep.mubr.bf16.mxu1 %v3344_v26  ;;  %5868 = vmatpush3.bf16.xpose.msra.mxu1 %v3686_v12  ;;  %v3616_v26 = vpop.permute.xlu0 %3615 }
 0x7fd   : > { %v8874_v57 = vpop.eup %6195  ;;  %v3345_v11 = vpack.c.bf16 %v8869_v7, %v8865_v20  ;;  %5950 = vmatprep.subr.msk.bf16.mxu1 %vm877_vm2, %v3642_v45  ;;  %v3610_v16 = vpop.permute.xlu1 %3609  ;;  %v1307_v45 = vld [vmem:[#allocation3 + $0x60] sm:$0xff] }
 0x7fe   : > { %v8879_v34 = vpop.eup %6197  ;;  %v1323_v35 = vmul.f32 %v8761_v38, %v1307_v45  ;;  %v2203_v45 = vld [vmem:[#allocation3 + $0xb8] sm:$0xff] }
 0x7ff   : > { %2376 = vperm.xlu0 %6051, %v8879_v34   ;;  %2321 = vperm.xlu1 %6052, %v8874_v57   ;;  %v6200_v44 = vpop.eup %6199 }
 0x800   : > { %5852 = vmatmul.mubr.bf16.gmra.mrb[44].mxu1 %v3345_v11  ;;  %v6202_v37 = vpop.eup %6201  ;;  %v2215_v1 = vmul.f32 %v6200_v44, %v2199_v33 }
 0x801   : > { %5871 = vmatprep.mubr.msk.bf16.mxu1 %vm877_vm2, %v3604_v61  ;;  %v6204_v46 = vpop.eup %6203  ;;  %v3614_v11 = vpop.permute.xlu1 %3613  ;;  %v1325_v61 = vmul.f32 %v8777_v21, %v1309_v39  ;;  %v10376_v39 = vld [vmem:[#allocation99_spill] sm:$0xff] }
 0x802   : > { %v6206_v63 = vpop.eup %6205 }
 0x803   : > { %2326 = vperm.xlu1 %6052, %v6200_v44   ;;  %v8896_v12 = vpop.eup %6207  ;;  %v1308_v44 = vld [vmem:[#allocation3 + $0x68] sm:$0xff] }
 0x804   : > { %5870 = vmatpush3.bf16.xpose.msra.mxu1 %v3689_v62  ;;  %v8906_v59 = vpop.eup %6209  ;;  %v2196_v62 = vld [vmem:[#allocation3 + $0x80] sm:$0xff] }
 0x805   : > { %v3618_v32 = vpop.permute.xlu1 %3617  ;;  %v2212_v21 = vmul.f32 %v8858_v6, %v2196_v62  ;;  %v2217_v6 = vmul.f32 %v6202_v37, %v2201_v30 }
 0x807   : > { %2336 = vperm.xlu1 %6052, %v6202_v37   ;;  %v1324_v37 = vmul.f32 %v8833_v28, %v1308_v44 }
 0x80b   : > { %5872 = vmatmul.mubr.msk.bf16.vlgmr.msra.gmra.mrb[48].mxu1 %vm877_vm2, %v3606_v60  ;;  %2346 = vperm.xlu1 %6052, %v6204_v46   ;;  %v2214_v60 = vmul.f32 %v8874_v57, %v2198_v41  ;;  %v2219_v57 = vmul.f32 %v6204_v46, %v2203_v45 }
 0x80c   : > { %5875 = vmatprep.mubr.msk.bf16.mxu1 %vm877_vm2, %v3608_v29 }
 0x80f   : > { %2356 = vperm.xlu1 %6052, %v6206_v63  }
 0x813   : > { %5876 = vmatmul.mubr.msk.bf16.gmra.mrb[52].mxu1 %vm877_vm2, %v3610_v16  ;;  %2366 = vperm.xlu1 %6052, %v8896_v12  }
 0x814   : > { %5879 = vmatprep.mubr.msk.bf16.mxu1 %vm877_vm2, %v3612_v18 }
 0x816   : > { %v1352_v22 = vpop.xlane.xlu0 %1351 }
 0x817   : > { %v1371_v8 = vadd.f32 %v1352_v22, %v1323_v35  ;;  %4287 = vrot.lane.b32.xlu1 %v8233_v56, %s6532_s26  ;;  %v1326_v56 = vmul.f32 %v8844_v31, %v1310_v17  ;;  %v10375_v22 = vld [vmem:[#allocation97_spill] sm:$0xff] }
 0x819   : > { %1388 = vst.msk [vmem:[#allocation3 + $0x60] sm:$0xff] %vm1375_vm14, %v1371_v8  ;;  %v10377_v8 = vsub.f32 %v10375_v22, %v10376_v39  ;;  %v2204_v39 = vld [vmem:[#allocation3 + $0xc0] sm:$0xff] }
 0x81a   : > { %v1356_v54 = vpop.xlane.xlu0 %1355 }
 0x81b   : > { %5880 = vmatmul.mubr.msk.bf16.gmra.mrb[56].mxu1 %vm877_vm2, %v3614_v11  ;;  %v1373_v52 = vadd.f32 %v1356_v54, %v1325_v61  ;;  %2381 = vperm.xlu1 %6052, %v8906_v59   ;;  %v2065_v11 = vmul.f32 1.442695, %v10377_v8  ;;  %v2205_v54 = vld [vmem:[#allocation3 + $0xc8] sm:$0xff] }
 0x81c   : > { %5883 = vmatprep.mubr.msk.bf16.mxu1 %vm877_vm2, %v3616_v26 }
 0x81d   : > { %1390 = vst.msk [vmem:[#allocation3 + $0x70] sm:$0xff] %vm1375_vm14, %v1373_v52  ;;  %6211 = vpow2.f32 %v2065_v11  ;;  %v2221_v52 = vmul.f32 %v6206_v63, %v2205_v54  ;;  %v1393_v54 = vld [vmem:[#allocation4 + $0x8] sm:$0xff] }
 0x81e   : > { %v1358_v38 = vpop.xlane.xlu0 %1357 }
 0x81f   : > { %v1374_v27 = vadd.f32 %v1358_v38, %v1326_v56  ;;  %v2207_v38 = vld [vmem:[#allocation3 + $0xd8] sm:$0xff] }
 0x820   : > { %v2223_v46 = vmul.f32 %v8896_v12, %v2207_v38  ;;  %v1396_v38 = vld [vmem:[#allocation4 + $0x20] sm:$0xff] }
 0x821   : > { %1391 = vst.msk [vmem:[#allocation3 + $0x78] sm:$0xff] %vm1375_vm14, %v1374_v27 }
 0x822   : > { %v2229_v24 = vpop.xlane.xlu0 %2228 }
 0x823   : > { %5884 = vmatmul.mubr.msk.bf16.gmra.mrb[60].mxu1 %vm877_vm2, %v3618_v32  ;;  %v2260_v29 = vadd.f32 %v2229_v24, %v2212_v21  ;;  %v2197_v32 = vld [vmem:[#allocation3 + $0x88] sm:$0xff] }
 0x824   : > { %v2213_v41 = vmul.f32 %v8787_v53, %v2197_v32  ;;  %v2202_v53 = vld [vmem:[#allocation3 + $0xb0] sm:$0xff] }
 0x825   : > { %2276 = vst.msk [vmem:[#allocation3 + $0x80] sm:$0xff] %vm1375_vm14, %v2260_v29  ;;  %v2209_v29 = vld [vmem:[#allocation3 + $0xe8] sm:$0xff] }
 0x826   : > { %v2233_v18 = vpop.xlane.xlu0 %2232  ;;  %v2225_v28 = vmul.f32 %v8879_v34, %v2209_v29  ;;  %v2218_v34 = vmul.f32 %v8820_v42, %v2202_v53  ;;  %v1398_v29 = vld [vmem:[#allocation4 + $0x30] sm:$0xff] }
 0x827   : > { %v2262_v31 = vadd.f32 %v2233_v18, %v2214_v60  ;;  %v2200_v18 = vld [vmem:[#allocation3 + $0xa0] sm:$0xff] }
 0x828   : > { %v2216_v12 = vmul.f32 %v8795_v4, %v2200_v18  ;;  %v2220_v4 = vmul.f32 %v8835_v3, %v2204_v39 }
 0x829   : > { %2278 = vst.msk [vmem:[#allocation3 + $0x90] sm:$0xff] %vm1375_vm14, %v2262_v31  ;;  %v8932_v31 = vpop.eup %6211 }
 0x82a   : > { %v2235_v19 = vpop.xlane.xlu0 %2234 }
 0x82b   : > { %v2263_v16 = vadd.f32 %v2235_v19, %v2215_v1  ;;  %v2211_v19 = vld [vmem:[#allocation3 + $0xf8] sm:$0xff] }
 0x82d   : > { %2279 = vst.msk [vmem:[#allocation3 + $0x98] sm:$0xff] %vm1375_vm14, %v2263_v16 }
 0x82e   : > { %v2239_v26 = vpop.xlane.xlu0 %2238 }
 0x82f   : > { %v2265_v35 = vadd.f32 %v2239_v26, %v2217_v6  ;;  %v2227_v26 = vmul.f32 %v8932_v31, %v2211_v19 }
 0x831   : > { %2281 = vst.msk [vmem:[#allocation3 + $0xa8] sm:$0xff] %vm1375_vm14, %v2265_v35 }
 0x832   : > { %v2243_v61 = vpop.xlane.xlu0 %2242 }
 0x833   : > { %v2267_v17 = vadd.f32 %v2243_v61, %v2219_v57  ;;  %v2206_v57 = vld [vmem:[#allocation3 + $0xd0] sm:$0xff] }
 0x834   : > { %v2222_v44 = vmul.f32 %v8847_v0, %v2206_v57  ;;  %v10379_v0 = vld [vmem:[#allocation65_spill] sm:$0xff] }
 0x835   : > { %2283 = vst.msk [vmem:[#allocation3 + $0xb8] sm:$0xff] %vm1375_vm14, %v2267_v17 }
 0x836   : > { %v2247_v56 = vpop.xlane.xlu0 %2246 }
 0x837   : > { %v2269_v62 = vadd.f32 %v2247_v56, %v2221_v52  ;;  %v1354_v27 = vpop.xlane.xlu1 %1353  ;;  %v2208_v56 = vld [vmem:[#allocation3 + $0xe0] sm:$0xff] }
 0x838   : > { %v1372_v21 = vadd.f32 %v1354_v27, %v1324_v37  ;;  %v2224_v3 = vmul.f32 %v8863_v14, %v2208_v56  ;;  %v1400_v14 = vld [vmem:[#allocation4 + $0x40] sm:$0xff] }
 0x839   : > { %2285 = vst.msk [vmem:[#allocation3 + $0xc8] sm:$0xff] %vm1375_vm14, %v2269_v62  ;;  %v10378_v62 = vld [vmem:[#allocation63_spill] sm:$0xff] }
 0x83a   : > { %1389 = vst.msk [vmem:[#allocation3 + $0x68] sm:$0xff] %vm1375_vm14, %v1372_v21  ;;  %v2251_v24 = vpop.xlane.xlu0 %2250 }
 0x83b   : > { %v2271_v60 = vadd.f32 %v2251_v24, %v2223_v46  ;;  %v2231_v63 = vpop.xlane.xlu1 %2230  ;;  %v2210_v24 = vld [vmem:[#allocation3 + $0xf0] sm:$0xff] }
 0x83c   : > { %v2261_v33 = vadd.f32 %v2231_v63, %v2213_v41  ;;  %v2226_v18 = vmul.f32 %v8906_v59, %v2210_v24 }
 0x83d   : > { %2287 = vst.msk [vmem:[#allocation3 + $0xd8] sm:$0xff] %vm1375_vm14, %v2271_v60 }
 0x83e   : > { %2277 = vst.msk [vmem:[#allocation3 + $0x88] sm:$0xff] %vm1375_vm14, %v2261_v33  ;;  %v2255_v1 = vpop.xlane.xlu0 %2254 }
 0x83f   : > { %v2273_v30 = vadd.f32 %v2255_v1, %v2225_v28  ;;  %v2237_v16 = vpop.xlane.xlu1 %2236 }
 0x840   : > { %v2264_v6 = vadd.f32 %v2237_v16, %v2216_v12  ;;  %v10380_v12 = vld [vmem:[#allocation64_spill] sm:$0xff] }
 0x841   : > { %2289 = vst.msk [vmem:[#allocation3 + $0xe8] sm:$0xff] %vm1375_vm14, %v2273_v30  ;;  %v1392_v30 = vld [vmem:[#allocation4] sm:$0xff] }
 0x842   : > { %2280 = vst.msk [vmem:[#allocation3 + $0xa0] sm:$0xff] %vm1375_vm14, %v2264_v6  ;;  %v2259_v45 = vpop.xlane.xlu0 %2258 }
 0x843   : > { %v2275_v35 = vadd.f32 %v2259_v45, %v2227_v26  ;;  %v2241_v22 = vpop.xlane.xlu1 %2240  ;;  %v1402_v45 = vld [vmem:[#allocation4 + $0x50] sm:$0xff] }
 0x844   : > { %v2266_v8 = vadd.f32 %v2241_v22, %v2218_v34  ;;  %v10381_v34 = vld [vmem:[#allocation69_spill] sm:$0xff] }
 0x845   : > { %2291 = vst.msk [vmem:[#allocation3 + $0xf8] sm:$0xff] %vm1375_vm14, %v2275_v35  ;;  %v1394_v35 = vld [vmem:[#allocation4 + $0x10] sm:$0xff]  ;;  %v10382_v22 = vld [vmem:[#allocation61_spill] sm:$0xff] }
 0x846   : > { %2282 = vst.msk [vmem:[#allocation3 + $0xb0] sm:$0xff] %vm1375_vm14, %v2266_v8 }
 0x847   : > { %v2245_v11 = vpop.xlane.xlu1 %2244 }
 0x848   : > { %v2268_v61 = vadd.f32 %v2245_v11, %v2220_v4 }
 0x84a   : > { %2284 = vst.msk [vmem:[#allocation3 + $0xc0] sm:$0xff] %vm1375_vm14, %v2268_v61  ;;  %v1416_v17 = vpop.permute.xlu0 %1415  ;;  %v1404_v61 = vld [vmem:[#allocation4 + $0x60] sm:$0xff] }
 0x84b   : > { %v1489_v42 = vmul.f32 %v1416_v17, %v1393_v54  ;;  %v2249_v52 = vpop.xlane.xlu1 %2248  ;;  %v10383_v54 = vld [vmem:[#allocation68_spill] sm:$0xff] }
 0x84c   : > { %v2270_v37 = vadd.f32 %v2249_v52, %v2222_v44  ;;  %v1395_v44 = vld [vmem:[#allocation4 + $0x18] sm:$0xff] }
 0x84d   : > { %v1610_v27 = vadd.f32 %v10378_v62, %v1489_v42  ;;  %v10384_v42 = vld [vmem:[#allocation60_spill] sm:$0xff] }
 0x84e   : > { %2286 = vst.msk [vmem:[#allocation3 + $0xd0] sm:$0xff] %vm1375_vm14, %v2270_v37  ;;  %v1431_v32 = vpop.permute.xlu0 %1430 }
 0x84f   : > { %1626 = vst.msk [vmem:[#allocation4 + $0x8] sm:$0xff] %vm877_vm2, %v1610_v27  ;;  %v1492_v21 = vmul.f32 %v1431_v32, %v1396_v38  ;;  %v2253_v46 = vpop.xlane.xlu1 %2252  ;;  %v1406_v27 = vld [vmem:[#allocation4 + $0x70] sm:$0xff]  ;;  %v10385_v32 = vld [vmem:[#allocation73_spill] sm:$0xff] }
 0x850   : > { %v2272_v41 = vadd.f32 %v2253_v46, %v2224_v3  ;;  %v10386_v46 = vld [vmem:[#allocation62_spill] sm:$0xff] }
 0x851   : > { %v1613_v60 = vadd.f32 %v10379_v0, %v1492_v21  ;;  %v1397_v21 = vld [vmem:[#allocation4 + $0x28] sm:$0xff] }
 0x852   : > { %2288 = vst.msk [vmem:[#allocation3 + $0xe0] sm:$0xff] %vm1375_vm14, %v2272_v41  ;;  %v1441_v63 = vpop.permute.xlu0 %1440 }
 0x853   : > { %1629 = vst.msk [vmem:[#allocation4 + $0x20] sm:$0xff] %vm877_vm2, %v1613_v60  ;;  %v1494_v33 = vmul.f32 %v1441_v63, %v1398_v29  ;;  %v2257_v28 = vpop.xlane.xlu1 %2256  ;;  %v2294_v63 = vld [vmem:[#allocation4 + $0x88] sm:$0xff] }
 0x854   : > { %v2274_v1 = vadd.f32 %v2257_v28, %v2226_v18  ;;  %v10387_v18 = vld [vmem:[#allocation72_spill] sm:$0xff] }
 0x855   : > { %v1615_v19 = vadd.f32 %v10380_v12, %v1494_v33  ;;  %v1399_v28 = vld [vmem:[#allocation4 + $0x38] sm:$0xff] }
 0x856   : > { %2290 = vst.msk [vmem:[#allocation3 + $0xf0] sm:$0xff] %vm1375_vm14, %v2274_v1  ;;  %v1451_v16 = vpop.permute.xlu0 %1450  ;;  %v10388_v1 = vld [vmem:[#allocation67_spill] sm:$0xff] }
 0x857   : > { %1631 = vst.msk [vmem:[#allocation4 + $0x30] sm:$0xff] %vm877_vm2, %v1615_v19  ;;  %v1496_v53 = vmul.f32 %v1451_v16, %v1400_v14  ;;  %v1411_v6 = vpop.permute.xlu1 %1410 }
 0x858   : > { %v1488_v26 = vmul.f32 %v1411_v6, %v1392_v30  ;;  %v10389_v6 = vld [vmem:[#allocation27_spill] sm:$0xff] }
 0x859   : > { %v1617_v59 = vadd.f32 %v10381_v34, %v1496_v53  ;;  %v2297_v53 = vld [vmem:[#allocation4 + $0xa0] sm:$0xff]  ;;  %v10390_v34 = vld [vmem:[#allocation66_spill] sm:$0xff] }
 0x85a   : > { %v1609_v39 = vadd.f32 %v10382_v22, %v1488_v26  ;;  %v1461_v8 = vpop.permute.xlu0 %1460 }
 0x85b   : > { %1633 = vst.msk [vmem:[#allocation4 + $0x40] sm:$0xff] %vm877_vm2, %v1617_v59  ;;  %v1498_v4 = vmul.f32 %v1461_v8, %v1402_v45  ;;  %v1421_v11 = vpop.permute.xlu1 %1420  ;;  %v1401_v45 = vld [vmem:[#allocation4 + $0x48] sm:$0xff] }
 0x85c   : > { %1625 = vst.msk [vmem:[#allocation4] sm:$0xff] %vm877_vm2, %v1609_v39  ;;  %v1490_v57 = vmul.f32 %v1421_v11, %v1394_v35  ;;  %v10391_v11 = vld [vmem:[#allocation29_spill] sm:$0xff] }
 0x85d   : > { %v1619_v17 = vadd.f32 %v10383_v54, %v1498_v4  ;;  %v2299_v4 = vld [vmem:[#allocation4 + $0xb0] sm:$0xff] }
 0x85e   : > { %v1611_v52 = vadd.f32 %v10384_v42, %v1490_v57  ;;  %v1471_v56 = vpop.permute.xlu0 %1470  ;;  %v10392_v54 = vld [vmem:[#allocation71_spill] sm:$0xff] }
 0x85f   : > { %1635 = vst.msk [vmem:[#allocation4 + $0x50] sm:$0xff] %vm877_vm2, %v1619_v17  ;;  %v1500_v37 = vmul.f32 %v1471_v56, %v1404_v61  ;;  %v1426_v38 = vpop.permute.xlu1 %1425  ;;  %v1403_v61 = vld [vmem:[#allocation4 + $0x58] sm:$0xff] }
 0x860   : > { %1627 = vst.msk [vmem:[#allocation4 + $0x10] sm:$0xff] %vm877_vm2, %v1611_v52  ;;  %v1491_v62 = vmul.f32 %v1426_v38, %v1395_v44  ;;  %v10393_v38 = vld [vmem:[#allocation37_spill] sm:$0xff] }
 0x861   : > { %v1621_v3 = vadd.f32 %v10385_v32, %v1500_v37  ;;  %v2301_v37 = vld [vmem:[#allocation4 + $0xc0] sm:$0xff]  ;;  %v10394_v32 = vld [vmem:[#allocation70_spill] sm:$0xff] }
 0x862   : > { %v1612_v24 = vadd.f32 %v10386_v46, %v1491_v62  ;;  %v1481_v41 = vpop.permute.xlu0 %1480 }
 0x863   : > { %1637 = vst.msk [vmem:[#allocation4 + $0x60] sm:$0xff] %vm877_vm2, %v1621_v3  ;;  %v1502_v29 = vmul.f32 %v1481_v41, %v1406_v27  ;;  %v1436_v0 = vpop.permute.xlu1 %1435  ;;  %v1405_v27 = vld [vmem:[#allocation4 + $0x68] sm:$0xff] }
 0x864   : > { %1628 = vst.msk [vmem:[#allocation4 + $0x18] sm:$0xff] %vm877_vm2, %v1612_v24  ;;  %v1493_v60 = vmul.f32 %v1436_v0, %v1397_v21  ;;  %v10395_v0 = vld [vmem:[#allocation31_spill] sm:$0xff] }
 0x865   : > { %v1623_v33 = vadd.f32 %v10387_v18, %v1502_v29  ;;  %v2303_v29 = vld [vmem:[#allocation4 + $0xd0] sm:$0xff] }
 0x866   : > { %v1614_v14 = vadd.f32 %v10388_v1, %v1493_v60  ;;  %v2317_v12 = vpop.permute.xlu0 %2316  ;;  %v10396_v18 = vld [vmem:[#allocation75_spill] sm:$0xff] }
 0x867   : > { %1639 = vst.msk [vmem:[#allocation4 + $0x70] sm:$0xff] %vm877_vm2, %v1623_v33  ;;  %v2390_v19 = vmul.f32 %v2317_v12, %v2294_v63  ;;  %v1446_v30 = vpop.permute.xlu1 %1445  ;;  %v1407_v63 = vld [vmem:[#allocation4 + $0x78] sm:$0xff] }
 0x868   : > { %1630 = vst.msk [vmem:[#allocation4 + $0x28] sm:$0xff] %vm877_vm2, %v1614_v14  ;;  %v1495_v16 = vmul.f32 %v1446_v30, %v1399_v28  ;;  %v10397_v30 = vld [vmem:[#allocation28_spill] sm:$0xff] }
 0x869   : > { %v2543_v26 = vadd.f32 %v10389_v6, %v2390_v19  ;;  %v2305_v19 = vld [vmem:[#allocation4 + $0xe0] sm:$0xff]  ;;  %v10398_v6 = vld [vmem:[#allocation74_spill] sm:$0xff] }
 0x86a   : > { %v1616_v59 = vadd.f32 %v10390_v34, %v1495_v16  ;;  %v2332_v35 = vpop.permute.xlu0 %2331 }
 0x86b   : > { %2559 = vst.msk [vmem:[#allocation4 + $0x88] sm:$0xff] %vm877_vm2, %v2543_v26  ;;  %v2393_v22 = vmul.f32 %v2332_v35, %v2297_v53  ;;  %v1456_v39 = vpop.permute.xlu1 %1455  ;;  %v2293_v53 = vld [vmem:[#allocation4 + $0x80] sm:$0xff] }
 0x86c   : > { %1632 = vst.msk [vmem:[#allocation4 + $0x38] sm:$0xff] %vm877_vm2, %v1616_v59  ;;  %v1497_v8 = vmul.f32 %v1456_v39, %v1401_v45 }
 0x86d   : > { %v2546_v57 = vadd.f32 %v10391_v11, %v2393_v22  ;;  %v10402_v11 = vld [vmem:[#allocation40_spill] sm:$0xff] }
 0x86e   : > { %v1618_v17 = vadd.f32 %v10392_v54, %v1497_v8  ;;  %v2342_v44 = vpop.permute.xlu0 %2341  ;;  %v2295_v54 = vld [vmem:[#allocation4 + $0x90] sm:$0xff] }
 0x86f   : > { %2562 = vst.msk [vmem:[#allocation4 + $0xa0] sm:$0xff] %vm877_vm2, %v2546_v57  ;;  %v2395_v42 = vmul.f32 %v2342_v44, %v2299_v4  ;;  %v1466_v52 = vpop.permute.xlu1 %1465  ;;  %v2306_v4 = vld [vmem:[#allocation4 + $0xe8] sm:$0xff] }
 0x870   : > { %1634 = vst.msk [vmem:[#allocation4 + $0x48] sm:$0xff] %vm877_vm2, %v1618_v17  ;;  %v1499_v56 = vmul.f32 %v1466_v52, %v1403_v61  ;;  %v10404_v17 = vld [vmem:[#allocation26_spill] sm:$0xff] }
 0x871   : > { %v2548_v62 = vadd.f32 %v10393_v38, %v2395_v42  ;;  %v10405_v38 = vld [vmem:[#allocation34_spill] sm:$0xff] }
 0x872   : > { %v1620_v3 = vadd.f32 %v10394_v32, %v1499_v56  ;;  %v2352_v21 = vpop.permute.xlu0 %2351  ;;  %v10406_v32 = vld [vmem:[#allocation24_spill] sm:$0xff] }
 0x873   : > { %2564 = vst.msk [vmem:[#allocation4 + $0xb0] sm:$0xff] %vm877_vm2, %v2548_v62  ;;  %v2397_v46 = vmul.f32 %v2352_v21, %v2301_v37  ;;  %v1476_v24 = vpop.permute.xlu1 %1475 }
 0x874   : > { %1636 = vst.msk [vmem:[#allocation4 + $0x58] sm:$0xff] %vm877_vm2, %v1620_v3  ;;  %v1501_v41 = vmul.f32 %v1476_v24, %v1405_v27  ;;  %v2296_v27 = vld [vmem:[#allocation4 + $0x98] sm:$0xff]  ;;  %v2298_v24 = vld [vmem:[#allocation4 + $0xa8] sm:$0xff] }
 0x875   : > { %v2550_v60 = vadd.f32 %v10395_v0, %v2397_v46 }
 0x876   : > { %v1622_v33 = vadd.f32 %v10396_v18, %v1501_v41  ;;  %v2362_v28 = vpop.permute.xlu0 %2361  ;;  %v10407_v41 = vld [vmem:[#allocation25_spill] sm:$0xff] }
 0x877   : > { %2566 = vst.msk [vmem:[#allocation4 + $0xc0] sm:$0xff] %vm877_vm2, %v2550_v60  ;;  %v2399_v1 = vmul.f32 %v2362_v28, %v2303_v29  ;;  %v1486_v14 = vpop.permute.xlu1 %1485  ;;  %v10408_v18 = vld [vmem:[#allocation33_spill] sm:$0xff] }
 0x878   : > { %1638 = vst.msk [vmem:[#allocation4 + $0x68] sm:$0xff] %vm877_vm2, %v1622_v33  ;;  %v1503_v12 = vmul.f32 %v1486_v14, %v1407_v63  ;;  %v2300_v63 = vld [vmem:[#allocation4 + $0xb8] sm:$0xff]  ;;  %v2302_v14 = vld [vmem:[#allocation4 + $0xc8] sm:$0xff] }
 0x879   : > { %v2552_v16 = vadd.f32 %v10397_v30, %v2399_v1 }
 0x87a   : > { %v1624_v26 = vadd.f32 %v10398_v6, %v1503_v12  ;;  %v8990_v45 = vpop.f32.mrb[32].mxu1  ;;  %v2372_v34 = vpop.permute.xlu0 %2371  ;;  %v10409_v12 = vld [vmem:[#allocation32_spill] sm:$0xff]  ;;  %v10410_v6 = vld [vmem:[#allocation46_spill] sm:$0xff] }
 0x87b   : > { %10399 = vst [vmem:[#allocation58_spill] sm:$0xff] %v8990_v45  ;;  %2568 = vst.msk [vmem:[#allocation4 + $0xd0] sm:$0xff] %vm877_vm2, %v2552_v16  ;;  %v2401_v59 = vmul.f32 %v2372_v34, %v2305_v19  ;;  %v2312_v35 = vpop.permute.xlu1 %2311  ;;  %v8993_v22 = vpop.f32.mrb[33].mxu1  ;;  %v9263_v45 = vld [vmem:[#allocation2 + $0x1f0] sm:$0xff] }
 0x87c   : > { %10400 = vst [vmem:[#allocation57_spill] sm:$0xff] %v8993_v22  ;;  %1640 = vst.msk [vmem:[#allocation4 + $0x78] sm:$0xff] %vm877_vm2, %v1624_v26  ;;  %v2389_v39 = vmul.f32 %v2312_v35, %v2293_v53  ;;  %v8996_v8 = vpop.f32.mrb[34].mxu1  ;;  %v2304_v53 = vld [vmem:[#allocation4 + $0xd8] sm:$0xff] }
 0x87d   : > { %10401 = vst [vmem:[#allocation59_spill] sm:$0xff] %v8996_v8  ;;  %v2554_v57 = vadd.f32 %v10402_v11, %v2401_v59  ;;  %v8999_v61 = vpop.f32.mrb[35].mxu1  ;;  %v10411_v35 = vld [vmem:[#allocation44_spill] sm:$0xff]  ;;  %v2307_v11 = vld [vmem:[#allocation4 + $0xf0] sm:$0xff]  ;;  %10451 = vst [vmem:[#allocation77_spill] sm:$0xff] %v9263_v45 }
 0x87e   : > { %10403 = vst [vmem:[#allocation41_spill] sm:$0xff] %v8999_v61  ;;  %v2542_v44 = vadd.f32 %v10404_v17, %v2389_v39  ;;  %v2377_v42 = vpop.permute.xlu0 %2376  ;;  %v10412_v17 = vld [vmem:[#allocation38_spill] sm:$0xff] }
 0x87f   : > { %2570 = vst.msk [vmem:[#allocation4 + $0xe0] sm:$0xff] %vm877_vm2, %v2554_v57  ;;  %v2402_v52 = vmul.f32 %v2377_v42, %v2306_v4  ;;  %v2322_v56 = vpop.permute.xlu1 %2321  ;;  %v3584_v61 = vld [vmem:[%s6745_s12 + $0x68] sm:$0xff] }
 0x880   : > { %2558 = vst.msk [vmem:[#allocation4 + $0x80] sm:$0xff] %vm877_vm2, %v2542_v44  ;;  %v2391_v37 = vmul.f32 %v2322_v56, %v2295_v54 }
 0x881   : > { %v2555_v62 = vadd.f32 %v10405_v38, %v2402_v52 }
 0x882   : > { %v2544_v3 = vadd.f32 %v10406_v32, %v2391_v37 }
 0x883   : > { %2571 = vst.msk [vmem:[#allocation4 + $0xe8] sm:$0xff] %vm877_vm2, %v2555_v62  ;;  %v2327_v21 = vpop.permute.xlu1 %2326 }
 0x884   : > { %2560 = vst.msk [vmem:[#allocation4 + $0x90] sm:$0xff] %vm877_vm2, %v2544_v3  ;;  %v2392_v46 = vmul.f32 %v2327_v21, %v2296_v27 }
 0x886   : > { %v2545_v29 = vadd.f32 %v10407_v41, %v2392_v46 }
 0x887   : > { %v2337_v0 = vpop.permute.xlu1 %2336 }
 0x888   : > { %2561 = vst.msk [vmem:[#allocation4 + $0x98] sm:$0xff] %vm877_vm2, %v2545_v29  ;;  %v2394_v60 = vmul.f32 %v2337_v0, %v2298_v24 }
 0x88a   : > { %v2547_v33 = vadd.f32 %v10408_v18, %v2394_v60 }
 0x88b   : > { %v2347_v28 = vpop.permute.xlu1 %2346 }
 0x88c   : > { %2563 = vst.msk [vmem:[#allocation4 + $0xa8] sm:$0xff] %vm877_vm2, %v2547_v33  ;;  %v2396_v1 = vmul.f32 %v2347_v28, %v2300_v63 }
 0x88e   : > { %v2549_v19 = vadd.f32 %v10409_v12, %v2396_v1 }
 0x88f   : > { %v2357_v30 = vpop.permute.xlu1 %2356 }
 0x890   : > { %2565 = vst.msk [vmem:[#allocation4 + $0xb8] sm:$0xff] %vm877_vm2, %v2549_v19  ;;  %v2398_v16 = vmul.f32 %v2357_v30, %v2302_v14 }
 0x892   : > { %v2551_v26 = vadd.f32 %v10410_v6, %v2398_v16 }
 0x893   : > { %v2367_v34 = vpop.permute.xlu1 %2366 }
 0x894   : > { %2567 = vst.msk [vmem:[#allocation4 + $0xc8] sm:$0xff] %vm877_vm2, %v2551_v26  ;;  %v2400_v59 = vmul.f32 %v2367_v34, %v2304_v53 }
 0x896   : > { %v2553_v39 = vadd.f32 %v10411_v35, %v2400_v59 }
 0x897   : > { %v4288_v4 = vpop.permute.xlu1 %4287 }
 0x898   : > { %2569 = vst.msk [vmem:[#allocation4 + $0xd8] sm:$0xff] %vm877_vm2, %v2553_v39  ;;  %5887 = vmatprep.subr.bf16.mxu0 %v4288_v4 }
 0x899   : > { %5888 = vmatpush3.bf16.msra.mxu0 %v4288_v4 }
 0x89b   : > { %v2382_v57 = vpop.permute.xlu1 %2381 }
 0x89c   : > { %v2403_v54 = vmul.f32 %v2382_v57, %v2307_v11 }
 0x89e   : > { %v2556_v44 = vadd.f32 %v10412_v17, %v2403_v54 }
 0x8a0   : > { %2572 = vst.msk [vmem:[#allocation4 + $0xf0] sm:$0xff] %vm877_vm2, %v2556_v44 }
 0x8b4   : > { %v9020_v42 = vpop.f32.mrb[36].mxu1 }
 0x8b5   : > { %10413 = vst [vmem:[#allocation43_spill] sm:$0xff] %v9020_v42  ;;  %v9022_v52 = vpop.f32.mrb[37].mxu1  ;;  %v9241_v42 = vld [vmem:[#allocation2 + $0x1c0] sm:$0xff] }
 0x8b6   : > { %10414 = vst [vmem:[#allocation56_spill] sm:$0xff] %v9022_v52  ;;  %v9024_v56 = vpop.f32.mrb[38].mxu1 }
 0x8b7   : > { %10415 = vst [vmem:[#allocation51_spill] sm:$0xff] %v9024_v56  ;;  %v9026_v37 = vpop.f32.mrb[39].mxu1 }
 0x8b8   : > { %10416 = vst [vmem:[#allocation53_spill] sm:$0xff] %v9026_v37  ;;  %v9252_v37 = vld [vmem:[#allocation2 + $0x1c8] sm:$0xff] }
 0x8b9   : > { %10450 = vst [vmem:[#allocation90_spill] sm:$0xff] %v9252_v37 }
 0x8c4   : > { %v9028_v38 = vpop.f32.mrb[40].mxu1 }
 0x8c5   : > { %10417 = vst [vmem:[#allocation47_spill] sm:$0xff] %v9028_v38  ;;  %v9030_v62 = vpop.f32.mrb[41].mxu1 }
 0x8c6   : > { %10418 = vst [vmem:[#allocation49_spill] sm:$0xff] %v9030_v62  ;;  %v9032_v27 = vpop.f32.mrb[42].mxu1 }
 0x8c7   : > { %10419 = vst [vmem:[#allocation80_spill] sm:$0xff] %v9032_v27  ;;  %v9034_v32 = vpop.f32.mrb[43].mxu1  ;;  %v9221_v27 = vld [vmem:[#allocation2 + $0x1d0] sm:$0xff] }
 0x8c8   : > { %10420 = vst [vmem:[#allocation82_spill] sm:$0xff] %v9034_v32 }
 0x8d3   : > { %v9036_v3 = vpop.f32.mrb[44].mxu1 }
 0x8d4   : > { %10421 = vst [vmem:[#allocation84_spill] sm:$0xff] %v9036_v3  ;;  %v9038_v21 = vpop.f32.mrb[45].mxu1 }
 0x8d5   : > { %10422 = vst [vmem:[#allocation86_spill] sm:$0xff] %v9038_v21  ;;  %v9040_v46 = vpop.f32.mrb[46].mxu1 }
 0x8d6   : > { %10423 = vst [vmem:[#allocation23_spill] sm:$0xff] %v9040_v46  ;;  %v9042_v24 = vpop.f32.mrb[47].mxu1 }
 0x8d7   : > { %10424 = vst [vmem:[#allocation35_spill] sm:$0xff] %v9042_v24  ;;  %v9212_v24 = vld [vmem:[#allocation2 + $0x1a8] sm:$0xff] }
 0x8de   : > { %v5873_v41 = vpop.f32.mrb[48].mxu1 }
 0x8df   : > { %v3790_v29 = vmul.f32 0.17677669, %v5873_v41  ;;  %v3725_v0 = vpop.f32.mrb[49].mxu1 }
 0x8e0   : > { %v3788_v60 = vmul.f32 0.17677669, %v3725_v0  ;;  %v5874_v63 = vpop.f32.mrb[50].mxu1 }
 0x8e1   : > { %v3728_v18 = vpop.f32.mrb[51].mxu1  ;;  %v9047_v28 = vsel %vm791_vm3, %v3790_v29, -inf  ;;  %v3791_v1 = vmul.f32 0.17677669, %v5874_v63 }
 0x8e2   : > { %v3789_v14 = vmul.f32 0.17677669, %v3728_v18  ;;  %3841 = vmax.xlane.f32.xlu0 %v9047_v28  ;;  %v9053_v19 = vsel %vm789_vm4, %v3788_v60, -inf  ;;  %v10430_v60 = vld [vmem:[#allocation14_spill] sm:$0xff]  ;;  %vm10438_vm4 = vmmov %vm10273_vm10 }
 0x8e3   : > { %3837 = vmax.xlane.f32.xlu1 %v9053_v19  ;;  %v9065_v26 = vsel %vm792_vm5, %v3791_v1, -inf  ;;  %vm10431_vm3 = vcmp.ge.s32.totalorder %v10430_v60, %v7257_v50 }
 0x8e4   : > { %v9059_v16 = vsel %vm790_vm6, %v3789_v14, -inf  ;;  %v10443_v14 = vld [vmem:[#allocation21_spill] sm:$0xff]  ;;  %vm10447_vm6 = vmmov %vm10276_vm1 }
 0x8e5   : > { %vm10444_vm5 = vcmp.ge.s32.totalorder %v10443_v14, %v7257_v50  ;;  %v3578_v50 = vld [vmem:[%s6745_s12 + $0x38] sm:$0xff]  ;;  %v3581_v14 = vld [vmem:[%s6745_s12 + $0x50] sm:$0xff] }
 0x8e6   : > { %3839 = vmax.xlane.f32.xlu0 %v9059_v16  ;;  %v5877_v53 = vpop.f32.mrb[52].mxu1 }
 0x8e7   : > { %v3794_v34 = vmul.f32 0.17677669, %v5877_v53  ;;  %3843 = vmax.xlane.f32.xlu1 %v9065_v26  ;;  %v3741_v59 = vpop.f32.mrb[53].mxu1  ;;  %v3582_v53 = vld [vmem:[%s6745_s12 + $0x58] sm:$0xff] }
 0x8e8   : > { %v5878_v35 = vpop.f32.mrb[54].mxu1  ;;  %v3792_v39 = vmul.f32 0.17677669, %v3741_v59  ;;  %v3592_v3 = vpack.c.bf16 %v3582_v53, %v3581_v14  ;;  %v9184_v53 = vld [vmem:[#allocation2 + $0x1b0] sm:$0xff] }
 0x8e9   : > { %v3795_v4 = vmul.f32 0.17677669, %v5878_v35  ;;  %v3744_v11 = vpop.f32.mrb[55].mxu1  ;;  %v9071_v57 = vsel %vm795_vm7, %v3794_v34, -inf }
 0x8ea   : > { %3849 = vmax.xlane.f32.xlu0 %v9071_v57  ;;  %v3793_v54 = vmul.f32 0.17677669, %v3744_v11  ;;  %v9083_v41 = vsel %vm793_vm9, %v3792_v39, -inf }
 0x8eb   : > { %v9077_v17 = vsel %vm796_vm8, %v3795_v4, -inf  ;;  %v3573_v4 = vld [vmem:[%s6745_s12 + $0x10] sm:$0xff] }
 0x8ec   : > { %3851 = vmax.xlane.f32.xlu1 %v9077_v17  ;;  %v9089_v63 = vsel %vm10431_vm3, %v3793_v54, -inf }
 0x8ee   : > { %3845 = vmax.xlane.f32.xlu0 %v9083_v41  ;;  %v5881_v10 = vpop.f32.mrb[56].mxu1 }
 0x8ef   : > { %v3798_v29 = vmul.f32 0.17677669, %v5881_v10  ;;  %v3757_v0 = vpop.f32.mrb[57].mxu1 }
 0x8f0   : > { %3847 = vmax.xlane.f32.xlu1 %v9089_v63  ;;  %v5882_v13 = vpop.f32.mrb[58].mxu1  ;;  %v3796_v18 = vmul.f32 0.17677669, %v3757_v0 }
 0x8f1   : > { %v3799_v33 = vmul.f32 0.17677669, %v5882_v13  ;;  %v3760_v1 = vpop.f32.mrb[59].mxu1  ;;  %v9095_v12 = vsel %vm799_vm11, %v3798_v29, -inf }
 0x8f2   : > { %10433 = vst [vmem:[#allocation52_spill] sm:$0xff] %v9095_v12  ;;  %3857 = vmax.xlane.f32.xlu0 %v9095_v12  ;;  %v3797_v30 = vmul.f32 0.17677669, %v3760_v1  ;;  %v9107_v59 = vsel %vm797_vm13, %v3796_v18, -inf }
 0x8f3   : > { %v9101_v6 = vsel %vm800_vm12, %v3799_v33, -inf }
 0x8f4   : > { %10435 = vst [vmem:[#allocation54_spill] sm:$0xff] %v9101_v6  ;;  %3859 = vmax.xlane.f32.xlu1 %v9101_v6  ;;  %v9113_v11 = vsel %vm10438_vm4, %v3797_v30, -inf  ;;  %v9285_v6 = vld [vmem:[#allocation2 + $0x1e0] sm:$0xff] }
 0x8f6   : > { %3853 = vmax.xlane.f32.xlu0 %v9107_v59  ;;  %v5885_v35 = vpop.f32.mrb[60].mxu1 }
 0x8f7   : > { %v3802_v39 = vmul.f32 0.17677669, %v5885_v35  ;;  %v3773_v54 = vpop.f32.mrb[61].mxu1  ;;  %v3575_v35 = vld [vmem:[%s6745_s12 + $0x20] sm:$0xff] }
 0x8f8   : > { %3855 = vmax.xlane.f32.xlu1 %v9113_v11  ;;  %v3800_v44 = vmul.f32 0.17677669, %v3773_v54  ;;  %v5886_v10 = vpop.f32.mrb[62].mxu1  ;;  %v3574_v54 = vld [vmem:[%s6745_s12 + $0x18] sm:$0xff] }
 0x8f9   : > { %v3803_v29 = vmul.f32 0.17677669, %v5886_v10  ;;  %v9119_v60 = vsel %vm803_vm15, %v3802_v39, -inf  ;;  %v3776_v13 = vpop.f32.mrb[63].mxu1  ;;  %v3576_v39 = vld [vmem:[%s6745_s12 + $0x28] sm:$0xff]  ;;  %v3588_v0 = vpack.c.bf16 %v3574_v54, %v3573_v4 }
 0x8fa   : > { %10440 = vst [vmem:[#allocation92_spill] sm:$0xff] %v9119_v60  ;;  %3865 = vmax.xlane.f32.xlu0 %v9119_v60  ;;  %v3801_v18 = vmul.f32 0.17677669, %v3776_v13  ;;  %v9130_v30 = vsel %vm10444_vm5, %v3800_v44, -inf  ;;  %v3589_v10 = vpack.c.bf16 %v3576_v39, %v3575_v35  ;;  %v3579_v44 = vld [vmem:[%s6745_s12 + $0x40] sm:$0xff]  ;;  %v3577_v13 = vld [vmem:[%s6745_s12 + $0x30] sm:$0xff] }
 0x8fb   : > { %v9125_v1 = vsel %vm804_vm0, %v3803_v29, -inf  ;;  %10445 = vst [vmem:[#allocation48_spill] sm:$0xff] %v9130_v30  ;;  %v3580_v29 = vld [vmem:[%s6745_s12 + $0x48] sm:$0xff]  ;;  %v3590_v33 = vpack.c.bf16 %v3578_v50, %v3577_v13  ;;  %v9155_v35 = vld [vmem:[#allocation2 + $0x190] sm:$0xff]  ;;  %v9157_v39 = vld [vmem:[#allocation2 + $0x180] sm:$0xff] }
 0x8fc   : > { %10442 = vst [vmem:[#allocation94_spill] sm:$0xff] %v9125_v1  ;;  %3867 = vmax.xlane.f32.xlu1 %v9125_v1  ;;  %v9136_v34 = vsel %vm10447_vm6, %v3801_v18, -inf  ;;  %v3591_v18 = vpack.c.bf16 %v3580_v29, %v3579_v44  ;;  %v9165_v29 = vld [vmem:[#allocation2 + $0x188] sm:$0xff]  ;;  %v9201_v13 = vld [vmem:[#allocation2 + $0x1a0] sm:$0xff] }
 0x8fd   : > { %10448 = vst [vmem:[#allocation50_spill] sm:$0xff] %v9136_v34 }
 0x8fe   : > { %3861 = vmax.xlane.f32.xlu0 %v9130_v30  ;;  %v3585_v30 = vld [vmem:[%s6745_s12 + $0x70] sm:$0xff] }
 0x900   : > { %3863 = vmax.xlane.f32.xlu1 %v9136_v34  ;;  %v9296_v34 = vld [vmem:[#allocation2 + $0x1e8] sm:$0xff] }
 0x911   : > { %4291 = vrot.lane.b32.xlu1 %v3589_v10, %s6532_s26 }
 0x914   : > { %4289 = vrot.lane.b32.xlu0 %v3588_v0, %s6532_s26 }
 0x915   : > { %4295 = vrot.lane.b32.xlu1 %v3591_v18, %s6532_s26 }
 0x918   : > { %4293 = vrot.lane.b32.xlu0 %v3590_v33, %s6532_s26 }
 0x91c   : > { %4297 = vrot.lane.b32.xlu0 %v3592_v3, %s6532_s26  ;;  %v9172_v3 = vld [vmem:[#allocation2 + $0x198] sm:$0xff] }
 0x96f   : > { %v3842_v4 = vpop.xlane.xlu0 %3841 }
 0x970   : > { %v9160_v54 = vmax.f32 %v9155_v35, %v3842_v4  ;;  %v3838_v10 = vpop.xlane.xlu1 %3837 }
 0x971   : > { %v9163_v44 = vmax.f32 %v9157_v39, %v3838_v10 }
 0x972   : > { %4442 = vst.msk [vmem:[#allocation2 + $0x190] sm:$0xff] %vm1375_vm14, %v9160_v54  ;;  %3945 = vperm.xlu1 %6052, %v9160_v54  }
 0x973   : > { %4440 = vst.msk [vmem:[#allocation2 + $0x180] sm:$0xff] %vm1375_vm14, %v9163_v44  ;;  %v3840_v50 = vpop.xlane.xlu0 %3839 }
 0x974   : > { %v9179_v18 = vmax.f32 %v9165_v29, %v3840_v50  ;;  %v3844_v33 = vpop.xlane.xlu1 %3843 }
 0x975   : > { %v9182_v14 = vmax.f32 %v9172_v3, %v3844_v33  ;;  %v9196_v33 = vld [vmem:[#allocation2 + $0x1b8] sm:$0xff] }
 0x976   : > { %4441 = vst.msk [vmem:[#allocation2 + $0x188] sm:$0xff] %vm1375_vm14, %v9179_v18  ;;  %3935 = vperm.xlu1 %6052, %v9163_v44  }
 0x977   : > { %4443 = vst.msk [vmem:[#allocation2 + $0x198] sm:$0xff] %vm1375_vm14, %v9182_v14  ;;  %3950 = vperm.xlu0 %6051, %v9182_v14   ;;  %v3850_v50 = vpop.xlane.xlu0 %3849 }
 0x978   : > { %v9199_v0 = vmax.f32 %v9184_v53, %v3850_v50  ;;  %v9232_v50 = vld [vmem:[#allocation2 + $0x1d8] sm:$0xff] }
 0x979   : > { %v3852_v4 = vpop.xlane.xlu1 %3851 }
 0x97a   : > { %4446 = vst.msk [vmem:[#allocation2 + $0x1b0] sm:$0xff] %vm1375_vm14, %v9199_v0  ;;  %v9208_v10 = vmax.f32 %v9196_v33, %v3852_v4  ;;  %3965 = vperm.xlu1 %6052, %v9199_v0  }
 0x97b   : > { %3940 = vperm.xlu0 %6051, %v9179_v18   ;;  %v3846_v21 = vpop.xlane.xlu0 %3845 }
 0x97c   : > { %4447 = vst.msk [vmem:[#allocation2 + $0x1b8] sm:$0xff] %vm1375_vm14, %v9208_v10  ;;  %v9219_v46 = vmax.f32 %v9201_v13, %v3846_v21 }
 0x97d   : > { %v3848_v38 = vpop.xlane.xlu1 %3847 }
 0x97e   : > { %4444 = vst.msk [vmem:[#allocation2 + $0x1a0] sm:$0xff] %vm1375_vm14, %v9219_v46  ;;  %v9228_v62 = vmax.f32 %v9212_v24, %v3848_v38  ;;  %3955 = vperm.xlu1 %6052, %v9219_v46  }
 0x97f   : > { %3970 = vperm.xlu0 %6051, %v9208_v10   ;;  %v3858_v21 = vpop.xlane.xlu0 %3857 }
 0x980   : > { %4445 = vst.msk [vmem:[#allocation2 + $0x1a8] sm:$0xff] %vm1375_vm14, %v9228_v62  ;;  %v9239_v4 = vmax.f32 %v9221_v27, %v3858_v21  ;;  %v3583_v21 = vld [vmem:[%s6745_s12 + $0x60] sm:$0xff] }
 0x981   : > { %v3860_v38 = vpop.xlane.xlu1 %3859  ;;  %v3593_v8 = vpack.c.bf16 %v3584_v61, %v3583_v21 }
 0x982   : > { %4450 = vst.msk [vmem:[#allocation2 + $0x1d0] sm:$0xff] %vm1375_vm14, %v9239_v4  ;;  %v9248_v52 = vmax.f32 %v9232_v50, %v3860_v38  ;;  %3985 = vperm.xlu1 %6052, %v9239_v4  }
 0x983   : > { %3960 = vperm.xlu0 %6051, %v9228_v62   ;;  %v3854_v32 = vpop.xlane.xlu0 %3853 }
 0x984   : > { %10449 = vst [vmem:[#allocation88_spill] sm:$0xff] %v9248_v52  ;;  %4451 = vst.msk [vmem:[#allocation2 + $0x1d8] sm:$0xff] %vm1375_vm14, %v9248_v52  ;;  %v9261_v38 = vmax.f32 %v9241_v42, %v3854_v32  ;;  %v9274_v32 = vld [vmem:[#allocation2 + $0x1f8] sm:$0xff] }
 0x985   : > { %v3856_v56 = vpop.xlane.xlu1 %3855 }
 0x986   : > { %4448 = vst.msk [vmem:[#allocation2 + $0x1c0] sm:$0xff] %vm1375_vm14, %v9261_v38  ;;  %v9270_v1 = vmax.f32 %v9252_v37, %v3856_v56  ;;  %3975 = vperm.xlu1 %6052, %v9261_v38   ;;  %v3586_v56 = vld [vmem:[%s6745_s12 + $0x78] sm:$0xff] }
 0x987   : > { %3990 = vperm.xlu0 %6051, %v9248_v52   ;;  %v3866_v60 = vpop.xlane.xlu0 %3865  ;;  %v3594_v37 = vpack.c.bf16 %v3586_v56, %v3585_v30 }
 0x988   : > { %4449 = vst.msk [vmem:[#allocation2 + $0x1c8] sm:$0xff] %vm1375_vm14, %v9270_v1  ;;  %v9281_v22 = vmax.f32 %v9263_v45, %v3866_v60 }
 0x989   : > { %v3868_v12 = vpop.xlane.xlu1 %3867 }
 0x98a   : > { %4454 = vst.msk [vmem:[#allocation2 + $0x1f0] sm:$0xff] %vm1375_vm14, %v9281_v22  ;;  %v9292_v21 = vmax.f32 %v9274_v32, %v3868_v12  ;;  %4299 = vrot.lane.b32.xlu1 %v3593_v8, %s6532_s26 }
 0x98b   : > { %3980 = vperm.xlu0 %6051, %v9270_v1   ;;  %v3862_v60 = vpop.xlane.xlu0 %3861 }
 0x98c   : > { %4455 = vst.msk [vmem:[#allocation2 + $0x1f8] sm:$0xff] %vm1375_vm14, %v9292_v21  ;;  %v9303_v61 = vmax.f32 %v9285_v6, %v3862_v60 }
 0x98d   : > { %v3864_v45 = vpop.xlane.xlu1 %3863 }
 0x98e   : > { %v3897_v12 = vsub.f32 %v9285_v6, %v9303_v61  ;;  %4452 = vst.msk [vmem:[#allocation2 + $0x1e0] sm:$0xff] %vm1375_vm14, %v9303_v61  ;;  %v9310_v8 = vmax.f32 %v9296_v34, %v3864_v45  ;;  %3995 = vperm.xlu1 %6052, %v9303_v61  }
 0x98f   : > { %4301 = vrot.lane.b32.xlu0 %v3594_v37, %s6532_s26  ;;  %v4290_v30 = vpop.permute.xlu0 %4289 }
 0x990   : > { %4453 = vst.msk [vmem:[#allocation2 + $0x1e8] sm:$0xff] %vm1375_vm14, %v9310_v8  ;;  %5889 = vmatprep.subr.bf16.mxu0 %v4290_v30 }
 0x991   : > { %5890 = vmatpush3.bf16.msra.mxu0 %v4290_v30  ;;  %v4292_v60 = vpop.permute.xlu1 %4291  ;;  %v10464_v30 = vld [vmem:[#allocation120_spill] sm:$0xff] }
 0x992   : > { %4005 = vperm.xlu1 %6052, %v9281_v22   ;;  %5891 = vmatprep.subr.bf16.mxu0 %v4292_v60 }
 0x993   : > { %4000 = vperm.xlu0 %6051, %v9310_v8   ;;  %v4294_v45 = vpop.permute.xlu0 %4293 }
 0x995   : > { %5892 = vmatpush3.bf16.msra.mxu0 %v4292_v60  ;;  %v4296_v37 = vpop.permute.xlu1 %4295  ;;  %v10465_v60 = vld [vmem:[#allocation122_spill] sm:$0xff] }
 0x996   : > { %5893 = vmatprep.subr.bf16.mxu0 %v4294_v45 }
 0x997   : > { %4010 = vperm.xlu0 %6051, %v9292_v21   ;;  %v4298_v52 = vpop.permute.xlu0 %4297 }
 0x999   : > { %5894 = vmatpush3.bf16.msra.mxu0 %v4294_v45 }
 0x99a   : > { %5895 = vmatprep.subr.bf16.mxu0 %v4296_v37 }
 0x99d   : > { %5896 = vmatpush3.bf16.msra.mxu0 %v4296_v37  ;;  %v10467_v37 = vld [vmem:[#allocation113_spill] sm:$0xff] }
 0x99e   : > { %5897 = vmatprep.subr.bf16.mxu0 %v4298_v52 }
 0x9a1   : > { %5898 = vmatpush3.bf16.msra.mxu0 %v4298_v52 }
 0x9b6   : > { %3161 = vadd.xlane.f32.xlu0 %v8688_v40  ;;  %3163 = vadd.xlane.f32.xlu1 %v8693_v25  ;;  %v10452_v40 = vld [vmem:[#allocation45_spill] sm:$0xff] }
 0x9ba   : > { %3165 = vadd.xlane.f32.xlu0 %v8695_v51  ;;  %3169 = vadd.xlane.f32.xlu1 %v8748_v55  ;;  %v10455_v55 = vld [vmem:[#allocation36_spill] sm:$0xff] }
 0x9be   : > { %3167 = vadd.xlane.f32.xlu0 %v8691_v15  ;;  %3173 = vadd.xlane.f32.xlu1 %v8766_v23  ;;  %v10453_v15 = vld [vmem:[#allocation107_spill] sm:$0xff] }
 0x9bf   : > { %v10454_v25 = vsub.f32 %v10452_v40, %v10453_v15  ;;  %v10468_v40 = vld [vmem:[#allocation114_spill] sm:$0xff] }
 0x9c0   : > { %v10469_v15 = vsub.f32 %v10467_v37, %v10468_v40  ;;  %v10481_v40 = vld [vmem:[#allocation124_spill] sm:$0xff] }
 0x9c1   : > { %v2968_v51 = vmul.f32 1.442695, %v10454_v25 }
 0x9c2   : > { %3171 = vadd.xlane.f32.xlu0 %v8759_v48  ;;  %3177 = vadd.xlane.f32.xlu1 %v8806_v49  ;;  %v10459_v49 = vld [vmem:[#allocation109_spill] sm:$0xff]  ;;  %v2976_v25 = vmul.f32 1.442695, %v10469_v15  ;;  %v10482_v15 = vld [vmem:[#allocation126_spill] sm:$0xff] }
 0x9c3   : > { %6213 = vpow2.f32 %v2968_v51 }
 0x9c6   : > { %3175 = vadd.xlane.f32.xlu0 %v8755_v5  ;;  %3181 = vadd.xlane.f32.xlu1 %v8800_v47  ;;  %v10456_v5 = vld [vmem:[#allocation106_spill] sm:$0xff]  ;;  %v10458_v47 = vld [vmem:[#allocation108_spill] sm:$0xff] }
 0x9c7   : > { %v10457_v48 = vsub.f32 %v10455_v55, %v10456_v5  ;;  %v10470_v55 = vld [vmem:[#allocation116_spill] sm:$0xff]  ;;  %v10471_v5 = vld [vmem:[#allocation118_spill] sm:$0xff] }
 0x9c9   : > { %v2972_v23 = vmul.f32 1.442695, %v10457_v48  ;;  %v10472_v48 = vsub.f32 %v10470_v55, %v10471_v5  ;;  %v10485_v5 = vld [vmem:[#allocation117_spill] sm:$0xff] }
 0x9ca   : > { %3179 = vadd.xlane.f32.xlu0 %v8813_v2  ;;  %3185 = vadd.xlane.f32.xlu1 %v8849_v58  ;;  %v10460_v2 = vsub.f32 %v10458_v47, %v10459_v49  ;;  %v10461_v58 = vld [vmem:[#allocation110_spill] sm:$0xff]  ;;  %v10474_v47 = vld [vmem:[#allocation112_spill] sm:$0xff] }
 0x9cb   : > { %6215 = vpow2.f32 %v2972_v23  ;;  %v2982_v23 = vmul.f32 1.442695, %v10472_v48 }
 0x9cd   : > { %v9356_v51 = vpop.eup %6213 }
 0x9ce   : > { %3183 = vadd.xlane.f32.xlu0 %v8803_v9  ;;  %3189 = vadd.xlane.f32.xlu1 %v8865_v20  ;;  %v2974_v9 = vmul.f32 1.442695, %v10460_v2  ;;  %v10462_v20 = vld [vmem:[#allocation111_spill] sm:$0xff] }
 0x9cf   : > { %v10463_v52 = vsub.f32 %v10461_v58, %v10462_v20  ;;  %v10476_v58 = vld [vmem:[#allocation129_spill] sm:$0xff] }
 0x9d0   : > { %6217 = vpow2.f32 %v2974_v9  ;;  %v10477_v20 = vsub.f32 %v8592_v36, %v10476_v58  ;;  %v10484_v36 = vld [vmem:[#allocation115_spill] sm:$0xff] }
 0x9d1   : > { %v10486_v48 = vsub.f32 %v10484_v36, %v10485_v5 }
 0x9d2   : > { %3187 = vadd.xlane.f32.xlu0 %v8853_v43  ;;  %v2970_v43 = vmul.f32 1.442695, %v10463_v52  ;;  %v2986_v52 = vmul.f32 1.442695, %v10477_v20 }
 0x9d4   : > { %6219 = vpow2.f32 %v2970_v43  ;;  %v10478_v43 = vld [vmem:[#allocation119_spill] sm:$0xff] }
 0x9d5   : > { %v9365_v9 = vpop.eup %6215 }
 0x9d6   : > { %3191 = vadd.xlane.f32.xlu0 %v8869_v7  ;;  %v10466_v7 = vsub.f32 %v10464_v30, %v10465_v60  ;;  %v10479_v30 = vld [vmem:[#allocation121_spill] sm:$0xff] }
 0x9d7   : > { %v10480_v60 = vsub.f32 %v10478_v43, %v10479_v30  ;;  %v10491_v43 = vld [vmem:[#allocation128_spill] sm:$0xff] }
 0x9d8   : > { %v2978_v45 = vmul.f32 1.442695, %v10466_v7 }
 0x9d9   : > { %v2984_v7 = vmul.f32 1.442695, %v10480_v60 }
 0x9da   : > { %6221 = vpow2.f32 %v2978_v45  ;;  %v9374_v45 = vpop.eup %6217 }
 0x9db   : > { %6223 = vpow2.f32 %v2976_v25  ;;  %v10483_v25 = vsub.f32 %v10481_v40, %v10482_v15 }
 0x9dc   : > { %6225 = vpow2.f32 %v2982_v23  ;;  %v2988_v23 = vmul.f32 1.442695, %v10486_v48  ;;  %v10496_v48 = vld [vmem:[#allocation123_spill] sm:$0xff] }
 0x9dd   : > { %v2990_v55 = vmul.f32 1.442695, %v10483_v25  ;;  %v10493_v25 = vld [vmem:[#allocation130_spill] sm:$0xff] }
 0x9de   : > { %v9376_v37 = vpop.eup %6219 }
 0x9df   : > { %2386 = vperm.xlu1 %6052, %v8932_v31   ;;  %v10473_v31 = vld [vmem:[#allocation55_spill] sm:$0xff] }
 0x9e0   : > { %v10475_v49 = vsub.f32 %v10473_v31, %v10474_v47 }
 0x9e2   : > { %v2980_v2 = vmul.f32 1.442695, %v10475_v49  ;;  %v10487_v49 = vld [vmem:[#allocation131_spill] sm:$0xff] }
 0x9e3   : > { %3244 = vperm.xlu1 %6052, %v9356_v51  }
 0x9e4   : > { %6227 = vpow2.f32 %v2980_v2  ;;  %v9386_v31 = vpop.eup %6221  ;;  %v10488_v2 = vld [vmem:[#allocation105_spill] sm:$0xff] }
 0x9e5   : > { %6229 = vpow2.f32 %v2986_v52  ;;  %v9388_v47 = vpop.eup %6223  ;;  %v10489_v58 = vsub.f32 %v10487_v49, %v10488_v2  ;;  %v10490_v52 = vld [vmem:[#allocation127_spill] sm:$0xff] }
 0x9e6   : > { %6231 = vpow2.f32 %v2984_v7  ;;  %v10492_v30 = vsub.f32 %v10490_v52, %v10491_v43  ;;  %v9398_v7 = vpop.eup %6225 }
 0x9e7   : > { %3254 = vperm.xlu1 %6052, %v9365_v9   ;;  %6233 = vpow2.f32 %v2990_v55  ;;  %v2994_v20 = vmul.f32 1.442695, %v10489_v58  ;;  %v10494_v55 = vld [vmem:[#allocation104_spill] sm:$0xff] }
 0x9e8   : > { %6235 = vpow2.f32 %v2988_v23  ;;  %v2992_v60 = vmul.f32 1.442695, %v10492_v30  ;;  %v10495_v36 = vsub.f32 %v10493_v25, %v10494_v55  ;;  %v10497_v23 = vld [vmem:[#allocation125_spill] sm:$0xff] }
 0x9e9   : > { %6237 = vpow2.f32 %v2994_v20  ;;  %v10498_v49 = vsub.f32 %v10496_v48, %v10497_v23  ;;  %v10499_v20 = vsub.f32 %v9157_v39, %v9163_v44  ;;  %v10501_v39 = vsub.f32 %v9155_v35, %v9160_v54 }
 0x9ea   : > { %v2998_v5 = vmul.f32 1.442695, %v10495_v36  ;;  %6239 = vpow2.f32 %v2992_v60  ;;  %v10500_v60 = vsub.f32 %v9165_v29, %v9179_v18  ;;  %v10502_v18 = vsub.f32 %v9201_v13, %v9219_v46 }
 0x9eb   : > { %3259 = vperm.xlu1 %6052, %v9374_v45   ;;  %v2996_v2 = vmul.f32 1.442695, %v10498_v49  ;;  %v3901_v25 = vmul.f32 1.442695, %v10499_v20  ;;  %v3905_v44 = vmul.f32 1.442695, %v10501_v39  ;;  %v10503_v35 = vsub.f32 %v9172_v3, %v9182_v14 }
 0x9ec   : > { %3249 = vperm.xlu0 %6051, %v9376_v37   ;;  %6241 = vpow2.f32 %v2998_v5  ;;  %v3903_v55 = vmul.f32 1.442695, %v10500_v60  ;;  %v10504_v46 = vsub.f32 %v9184_v53, %v9199_v0  ;;  %v10505_v53 = vsub.f32 %v9212_v24, %v9228_v62 }
 0x9ed   : > { %6243 = vpow2.f32 %v2996_v2  ;;  %v3909_v2 = vmul.f32 1.442695, %v10502_v18  ;;  %v3907_v54 = vmul.f32 1.442695, %v10503_v35  ;;  %v10507_v62 = vsub.f32 %v9196_v33, %v9208_v10 }
 0x9ee   : > { %v9400_v15 = vpop.eup %6227  ;;  %6245 = vpow2.f32 %v3901_v25  ;;  %v3913_v13 = vmul.f32 1.442695, %v10504_v46 }
 0x9ef   : > { %3269 = vperm.xlu1 %6052, %v9386_v31   ;;  %v9410_v52 = vpop.eup %6229  ;;  %6247 = vpow2.f32 %v3903_v55  ;;  %v3915_v24 = vmul.f32 1.442695, %v10507_v62 }
 0x9f0   : > { %3264 = vperm.xlu0 %6051, %v9388_v47   ;;  %v9413_v56 = vpop.eup %6231 }
 0x9f1   : > { %v3946_v40 = vpop.permute.xlu1 %3945 }
 0x9f3   : > { %3279 = vperm.xlu1 %6052, %v9398_v7  }
 0x9f4   : > { %3274 = vperm.xlu0 %6051, %v9400_v15  }
 0x9f5   : > { %v3936_v58 = vpop.permute.xlu1 %3935 }
 0x9f6   : > { %v4013_v43 = vsub.f32 %v9053_v19, %v3936_v58  ;;  %v3951_v30 = vpop.permute.xlu0 %3950  ;;  %v9425_v19 = vpop.eup %6233  ;;  %v4015_v58 = vsub.f32 %v9047_v28, %v3946_v40 }
 0x9f7   : > { %3289 = vperm.xlu1 %6052, %v9410_v52   ;;  %v9427_v49 = vpop.eup %6235  ;;  %v4016_v29 = vsub.f32 %v9065_v26, %v3951_v30 }
 0x9f8   : > { %3284 = vperm.xlu0 %6051, %v9413_v56   ;;  %v4029_v48 = vmul.f32 1.442695, %v4013_v43  ;;  %v9440_v20 = vpop.eup %6237  ;;  %v4033_v3 = vmul.f32 1.442695, %v4015_v58 }
 0x9f9   : > { %v9423_v36 = vpop.permute.xlu1 %3965  ;;  %v9446_v25 = vpop.eup %6239  ;;  %v4035_v28 = vmul.f32 1.442695, %v4016_v29 }
 0x9fa   : > { %v3941_v23 = vpop.permute.xlu0 %3940  ;;  %6249 = vpow2.f32 %v4029_v48  ;;  %v9455_v40 = vpop.eup %6241  ;;  %v3911_v48 = vmul.f32 1.442695, %v10505_v53 }
 0x9fb   : > { %v4014_v5 = vsub.f32 %v9059_v16, %v3941_v23  ;;  %3299 = vperm.xlu1 %6052, %v9425_v19   ;;  %v9457_v55 = vpop.eup %6243 }
 0x9fc   : > { %3294 = vperm.xlu0 %6051, %v9427_v49   ;;  %v9471_v18 = vpop.eup %6245 }
 0x9fd   : > { %v4031_v43 = vmul.f32 1.442695, %v4014_v5  ;;  %v3956_v16 = vpop.permute.xlu1 %3955  ;;  %v10506_v5 = vsub.f32 %v9221_v27, %v9239_v4  ;;  %v9477_v58 = vpop.eup %6247  ;;  %v10508_v27 = vsub.f32 %v9241_v42, %v9261_v38 }
 0x9fe   : > { %v4017_v26 = vsub.f32 %v9083_v41, %v3956_v16  ;;  %v3971_v30 = vpop.permute.xlu0 %3970 }
 0x9ff   : > { %6251 = vpow2.f32 %v4031_v43  ;;  %3309 = vperm.xlu1 %6052, %v9440_v20   ;;  %v4020_v23 = vsub.f32 %v9077_v17, %v3971_v30  ;;  %v3921_v39 = vmul.f32 1.442695, %v10506_v5  ;;  %v3917_v4 = vmul.f32 1.442695, %v10508_v27  ;;  %v10509_v30 = vld [vmem:[#allocation88_spill] sm:$0xff] }
 0xa00   : > { %6253 = vpow2.f32 %v3905_v44  ;;  %3304 = vperm.xlu0 %6051, %v9446_v25   ;;  %v4037_v41 = vmul.f32 1.442695, %v4017_v26  ;;  %v4019_v44 = vsub.f32 %v9071_v57, %v9423_v36  ;;  %v10510_v46 = vsub.f32 %v9232_v50, %v10509_v30 }
 0xa01   : > { %6255 = vpow2.f32 %v3909_v2  ;;  %v9453_v14 = vpop.permute.xlu1 %3985  ;;  %v4043_v36 = vmul.f32 1.442695, %v4020_v23  ;;  %v10513_v23 = vld [vmem:[#allocation48_spill] sm:$0xff] }
 0xa02   : > { %6257 = vpow2.f32 %v3907_v54  ;;  %v3961_v60 = vpop.permute.xlu0 %3960 }
 0xa03   : > { %6259 = vpow2.f32 %v3913_v13  ;;  %v4018_v0 = vsub.f32 %v9089_v63, %v3961_v60  ;;  %3319 = vperm.xlu1 %6052, %v9455_v40   ;;  %v3923_v13 = vmul.f32 1.442695, %v10510_v46  ;;  %v10512_v60 = vld [vmem:[#allocation52_spill] sm:$0xff] }
 0xa04   : > { %6261 = vpow2.f32 %v4035_v28  ;;  %3314 = vperm.xlu0 %6051, %v9457_v55   ;;  %v9483_v57 = vpop.eup %6249  ;;  %v10511_v28 = vld [vmem:[#allocation54_spill] sm:$0xff] }
 0xa05   : > { %6263 = vpow2.f32 %v4033_v3  ;;  %v4039_v63 = vmul.f32 1.442695, %v4018_v0  ;;  %v3976_v29 = vpop.permute.xlu1 %3975  ;;  %v4023_v0 = vsub.f32 %v10512_v60, %v9453_v14  ;;  %v10519_v60 = vld [vmem:[#allocation94_spill] sm:$0xff] }
 0xa06   : > { %6265 = vpow2.f32 %v4037_v41  ;;  %v4021_v17 = vsub.f32 %v9107_v59, %v3976_v29  ;;  %v3991_v2 = vpop.permute.xlu0 %3990  ;;  %v4041_v59 = vmul.f32 1.442695, %v4019_v44 }
 0xa07   : > { %6267 = vpow2.f32 %v4039_v63  ;;  %4177 = vperm.xlu1 %6052, %v9471_v18   ;;  %v4024_v3 = vsub.f32 %v10511_v28, %v3991_v2  ;;  %v10514_v63 = vld [vmem:[#allocation90_spill] sm:$0xff]  ;;  %v4049_v14 = vmul.f32 1.442695, %v4023_v0 }
 0xa08   : > { %6269 = vpow2.f32 %v3911_v48  ;;  %4182 = vperm.xlu0 %6051, %v9477_v58   ;;  %v4045_v16 = vmul.f32 1.442695, %v4021_v17  ;;  %v10515_v29 = vsub.f32 %v10514_v63, %v9270_v1 }
 0xa09   : > { %v9486_v10 = vpop.eup %6251  ;;  %6271 = vpow2.f32 %v3921_v39  ;;  %v4300_v33 = vpop.permute.xlu1 %4299  ;;  %v4051_v61 = vmul.f32 1.442695, %v4024_v3 }
 0xa0a   : > { %v9488_v43 = vpop.eup %6253  ;;  %6273 = vpow2.f32 %v3915_v24  ;;  %5899 = vmatprep.subr.bf16.mxu0 %v4300_v33  ;;  %v3981_v42 = vpop.permute.xlu0 %3980  ;;  %v4271_v38 = vpack.c.bf16 %v9486_v10, %v9483_v57  ;;  %v3919_v62 = vmul.f32 1.442695, %v10515_v29 }
 0xa0b   : > { %v9492_v35 = vpop.eup %6255  ;;  %6275 = vpow2.f32 %v3917_v4  ;;  %v4022_v54 = vsub.f32 %v9113_v11, %v3981_v42  ;;  %4187 = vperm.xlu1 %6052, %v9488_v43   ;;  %5900 = vmatpush3.bf16.msra.mxu0 %v4300_v33  ;;  %v3925_v11 = vmul.f32 1.442695, %v3897_v12  ;;  %v10517_v42 = vsub.f32 %v9296_v34, %v9310_v8 }
 0xa0c   : > { %v9496_v26 = vpop.eup %6257  ;;  %6277 = vpow2.f32 %v4043_v36  ;;  %4197 = vperm.xlu0 %6051, %v9492_v35   ;;  %5903 = vmatprep.mubr.bf16.mxu0 %v4271_v38 }
 0xa0d   : > { %v9503_v41 = vpop.eup %6259  ;;  %6279 = vpow2.f32 %v4041_v59  ;;  %v4047_v53 = vmul.f32 1.442695, %v4022_v54  ;;  %v3996_v48 = vpop.permute.xlu1 %3995  ;;  %v10516_v59 = vld [vmem:[#allocation50_spill] sm:$0xff]  ;;  %v3927_v38 = vmul.f32 1.442695, %v10517_v42 }
 0xa0e   : > { %v9510_v50 = vpop.eup %6261  ;;  %6281 = vpow2.f32 %v4045_v16  ;;  %v4025_v5 = vsub.f32 %v10513_v23, %v3996_v48  ;;  %v4302_v39 = vpop.permute.xlu0 %4301  ;;  %v3130_v42 = vld [vmem:[#allocation3 + $0x108] sm:$0xff] }
 0xa0f   : > { %v9513_v44 = vpop.eup %6263  ;;  %6283 = vpow2.f32 %v4047_v53  ;;  %4192 = vperm.xlu1 %6052, %v9496_v26   ;;  %5901 = vmatprep.subr.bf16.mxu0 %v4302_v39 }
 0xa10   : > { %v9519_v6 = vpop.eup %6265  ;;  %6285 = vpow2.f32 %v3923_v13  ;;  %4207 = vperm.xlu0 %6051, %v9503_v41   ;;  %5902 = vmatpush3.bf16.msra.mxu0 %v4302_v39  ;;  %v4272_v24 = vpack.c.bf16 %v9510_v50, %v9513_v44  ;;  %v4053_v17 = vmul.f32 1.442695, %v4025_v5  ;;  %v10518_v13 = vld [vmem:[#allocation92_spill] sm:$0xff] }
 0xa11   : > { %v9522_v12 = vpop.eup %6267  ;;  %6287 = vpow2.f32 %v3925_v11  ;;  %v4006_v36 = vpop.permute.xlu1 %4005 }
 0xa12   : > { %v9526_v1 = vpop.eup %6269  ;;  %v4001_v2 = vpop.permute.xlu0 %4000  ;;  %v4273_v27 = vpack.c.bf16 %v9522_v12, %v9519_v6  ;;  %6289 = vpow2.f32 %v3919_v62  ;;  %v4027_v28 = vsub.f32 %v10518_v13, %v4006_v36 }
 0xa13   : > { %v9530_v4 = vpop.eup %6271  ;;  %v4026_v33 = vsub.f32 %v10516_v59, %v4001_v2  ;;  %4202 = vperm.xlu1 %6052, %v9526_v1   ;;  %5904 = vmatmul.mubr.bf16.vlgmr.msra.gmra.mrb[48].mxu0 %v4272_v24  ;;  %6291 = vpow2.f32 %v4051_v61 }
 0xa14   : > { %v9534_v16 = vpop.eup %6273  ;;  %4227 = vperm.xlu0 %6051, %v9530_v4   ;;  %5907 = vmatprep.mubr.bf16.mxu0 %v4273_v27  ;;  %6293 = vpow2.f32 %v4049_v14  ;;  %v4057_v5 = vmul.f32 1.442695, %v4027_v28 }
 0xa15   : > { %v9540_v54 = vpop.eup %6275  ;;  %v4055_v30 = vmul.f32 1.442695, %v4026_v33  ;;  %6295 = vpow2.f32 %v4053_v17 }
 0xa16   : > { %v6278_v46 = vpop.eup %6277  ;;  %v4011_v3 = vpop.permute.xlu0 %4010 }
 0xa17   : > { %v9543_v11 = vpop.eup %6279  ;;  %6297 = vpow2.f32 %v4055_v30  ;;  %v4028_v0 = vsub.f32 %v10519_v60, %v4011_v3  ;;  %4212 = vperm.xlu1 %6052, %v9534_v16   ;;  %v3146_v30 = vmul.f32 %v9376_v37, %v3130_v42  ;;  %v3133_v60 = vld [vmem:[#allocation3 + $0x120] sm:$0xff]  ;;  %v3135_v37 = vld [vmem:[#allocation3 + $0x130] sm:$0xff] }
 0xa18   : > { %v9547_v34 = vpop.eup %6281  ;;  %6299 = vpow2.f32 %v3927_v38  ;;  %4217 = vperm.xlu0 %6051, %v9540_v54   ;;  %v4274_v48 = vpack.c.bf16 %v6278_v46, %v9543_v11  ;;  %v3129_v38 = vld [vmem:[#allocation3 + $0x100] sm:$0xff] }
 0xa19   : > { %v9550_v8 = vpop.eup %6283  ;;  %v4059_v53 = vmul.f32 1.442695, %v4028_v0  ;;  %v3145_v13 = vmul.f32 %v9356_v51, %v3129_v38  ;;  %v3131_v0 = vld [vmem:[#allocation3 + $0x110] sm:$0xff] }
 0xa1a   : > { %v9553_v23 = vpop.eup %6285  ;;  %v4275_v39 = vpack.c.bf16 %v9550_v8, %v9547_v34 }
 0xa1b   : > { %v9557_v63 = vpop.eup %6287  ;;  %4232 = vperm.xlu1 %6052, %v9553_v23   ;;  %5908 = vmatmul.mubr.bf16.gmra.mrb[52].mxu0 %v4274_v48  ;;  %6301 = vpow2.f32 %v4059_v53 }
 0xa1c   : > { %4237 = vperm.xlu0 %6051, %v9557_v63   ;;  %5911 = vmatprep.mubr.bf16.mxu0 %v4275_v39  ;;  %v9561_v29 = vpop.eup %6289  ;;  %6303 = vpow2.f32 %v4057_v5 }
 0xa1d   : > { %v6292_v62 = vpop.eup %6291 }
 0xa1e   : > { %v9563_v61 = vpop.eup %6293 }
 0xa1f   : > { %4222 = vperm.xlu1 %6052, %v9561_v29   ;;  %v9566_v14 = vpop.eup %6295  ;;  %v4276_v17 = vpack.c.bf16 %v6292_v62, %v9563_v61 }
 0xa21   : > { %v9568_v24 = vpop.eup %6297 }
 0xa22   : > { %v9571_v2 = vpop.eup %6299  ;;  %v4277_v27 = vpack.c.bf16 %v9568_v24, %v9566_v14 }
 0xa23   : > { %4242 = vperm.xlu1 %6052, %v9571_v2   ;;  %5912 = vmatmul.mubr.bf16.gmra.mrb[56].mxu0 %v4276_v17 }
 0xa24   : > { %5915 = vmatprep.mubr.bf16.mxu0 %v4277_v27  ;;  %v3151_v27 = vmul.f32 %v9400_v15, %v3135_v37 }
 0xa25   : > { %v9576_v36 = vpop.eup %6301 }
 0xa26   : > { %v9578_v59 = vpop.eup %6303 }
 0xa27   : > { %v4278_v33 = vpack.c.bf16 %v9576_v36, %v9578_v59 }
 0xa2b   : > { %5916 = vmatmul.mubr.bf16.gmra.mrb[60].mxu0 %v4278_v33 }
 0xa3b   : > { %4098 = vadd.xlane.f32.xlu0 %v9513_v44  ;;  %v3147_v44 = vmul.f32 %v9365_v9, %v3131_v0 }
 0xa3f   : > { %4094 = vadd.xlane.f32.xlu0 %v9483_v57  ;;  %v3149_v57 = vmul.f32 %v9388_v47, %v3133_v60 }
 0xa43   : > { %v3164_v28 = vpop.xlane.xlu1 %3163  ;;  %4100 = vadd.xlane.f32.xlu0 %v9510_v50  ;;  %v3162_v3 = vpop.xlane.xlu0 %3161  ;;  %v3132_v50 = vld [vmem:[#allocation3 + $0x118] sm:$0xff] }
 0xa44   : > { %v3194_v53 = vadd.f32 %v3164_v28, %v3146_v30  ;;  %v3193_v48 = vadd.f32 %v3162_v3, %v3145_v13  ;;  %v3148_v33 = vmul.f32 %v9374_v45, %v3132_v50 }
 0xa46   : > { %3210 = vst.msk [vmem:[#allocation3 + $0x108] sm:$0xff] %vm1375_vm14, %v3194_v53  ;;  %3209 = vst.msk [vmem:[#allocation3 + $0x100] sm:$0xff] %vm1375_vm14, %v3193_v48 }
 0xa47   : > { %v3170_v5 = vpop.xlane.xlu1 %3169  ;;  %4096 = vadd.xlane.f32.xlu1 %v9486_v10  ;;  %4108 = vadd.xlane.f32.xlu0 %v6278_v46  ;;  %v3166_v51 = vpop.xlane.xlu0 %3165  ;;  %v3137_v10 = vld [vmem:[#allocation3 + $0x140] sm:$0xff]  ;;  %v3134_v46 = vld [vmem:[#allocation3 + $0x128] sm:$0xff] }
 0xa48   : > { %v3197_v39 = vadd.f32 %v3170_v5, %v3149_v57  ;;  %v3195_v17 = vadd.f32 %v3166_v51, %v3147_v44  ;;  %v3153_v30 = vmul.f32 %v9413_v56, %v3137_v10  ;;  %v3150_v15 = vmul.f32 %v9386_v31, %v3134_v46  ;;  %v3226_v10 = vld [vmem:[#allocation4 + $0x100] sm:$0xff] }
 0xa49   : > { %v10521_v46 = vld [vmem:[#allocation77_spill] sm:$0xff] }
 0xa4a   : > { %3213 = vst.msk [vmem:[#allocation3 + $0x120] sm:$0xff] %vm1375_vm14, %v3197_v39  ;;  %3211 = vst.msk [vmem:[#allocation3 + $0x110] sm:$0xff] %vm1375_vm14, %v3195_v17  ;;  %v2308_v17 = vld [vmem:[#allocation4 + $0xf8] sm:$0xff] }
 0xa4b   : > { %v3174_v47 = vpop.xlane.xlu1 %3173  ;;  %4106 = vadd.xlane.f32.xlu1 %v9543_v11  ;;  %4104 = vadd.xlane.f32.xlu0 %v9522_v12  ;;  %v3168_v9 = vpop.xlane.xlu0 %3167  ;;  %v3139_v11 = vld [vmem:[#allocation3 + $0x150] sm:$0xff]  ;;  %v3136_v12 = vld [vmem:[#allocation3 + $0x138] sm:$0xff] }
 0xa4c   : > { %v3199_v42 = vadd.f32 %v3174_v47, %v3151_v27  ;;  %v3196_v38 = vadd.f32 %v3168_v9, %v3148_v33  ;;  %v3155_v60 = vmul.f32 %v9427_v49, %v3139_v11  ;;  %v3152_v0 = vmul.f32 %v9398_v7, %v3136_v12 }
 0xa4e   : > { %3215 = vst.msk [vmem:[#allocation3 + $0x130] sm:$0xff] %vm1375_vm14, %v3199_v42  ;;  %3212 = vst.msk [vmem:[#allocation3 + $0x118] sm:$0xff] %vm1375_vm14, %v3196_v38  ;;  %v10522_v42 = vsub.f32 %v10521_v46, %v9281_v22 }
 0xa4f   : > { %v3178_v13 = vpop.xlane.xlu1 %3177  ;;  %4102 = vadd.xlane.f32.xlu1 %v9519_v6  ;;  %4116 = vadd.xlane.f32.xlu0 %v6292_v62  ;;  %v3172_v45 = vpop.xlane.xlu0 %3171  ;;  %v3141_v6 = vld [vmem:[#allocation3 + $0x160] sm:$0xff]  ;;  %v3138_v62 = vld [vmem:[#allocation3 + $0x148] sm:$0xff] }
 0xa50   : > { %v3201_v28 = vadd.f32 %v3178_v13, %v3153_v30  ;;  %v3198_v3 = vadd.f32 %v3172_v45, %v3150_v15  ;;  %v3157_v57 = vmul.f32 %v9446_v25, %v3141_v6  ;;  %v3154_v49 = vmul.f32 %v9410_v52, %v3138_v62  ;;  %v10523_v30 = vld [vmem:[#allocation42_spill] sm:$0xff] }
 0xa51   : > { %v3929_v38 = vmul.f32 1.442695, %v10522_v42 }
 0xa52   : > { %3217 = vst.msk [vmem:[#allocation3 + $0x140] sm:$0xff] %vm1375_vm14, %v3201_v28  ;;  %3214 = vst.msk [vmem:[#allocation3 + $0x128] sm:$0xff] %vm1375_vm14, %v3198_v3  ;;  %v3229_v3 = vld [vmem:[#allocation4 + $0x118] sm:$0xff] }
 0xa53   : > { %v3182_v56 = vpop.xlane.xlu1 %3181  ;;  %4114 = vadd.xlane.f32.xlu1 %v9563_v61  ;;  %4112 = vadd.xlane.f32.xlu0 %v9550_v8  ;;  %v3176_v31 = vpop.xlane.xlu0 %3175  ;;  %v3143_v8 = vld [vmem:[#allocation3 + $0x170] sm:$0xff]  ;;  %v3140_v61 = vld [vmem:[#allocation3 + $0x158] sm:$0xff] }
 0xa54   : > { %v3203_v53 = vadd.f32 %v3182_v56, %v3155_v60  ;;  %v3200_v48 = vadd.f32 %v3176_v31, %v3152_v0  ;;  %v3159_v37 = vmul.f32 %v9457_v55, %v3143_v8  ;;  %v3156_v25 = vmul.f32 %v9425_v19, %v3140_v61  ;;  %v3144_v55 = vld [vmem:[#allocation3 + $0x178] sm:$0xff]  ;;  %v3227_v60 = vld [vmem:[#allocation4 + $0x108] sm:$0xff] }
 0xa56   : > { %3219 = vst.msk [vmem:[#allocation3 + $0x150] sm:$0xff] %vm1375_vm14, %v3203_v53  ;;  %3216 = vst.msk [vmem:[#allocation3 + $0x138] sm:$0xff] %vm1375_vm14, %v3200_v48  ;;  %v3231_v53 = vld [vmem:[#allocation4 + $0x128] sm:$0xff]  ;;  %v3230_v48 = vld [vmem:[#allocation4 + $0x120] sm:$0xff] }
 0xa57   : > { %v3186_v44 = vpop.xlane.xlu1 %3185  ;;  %4110 = vadd.xlane.f32.xlu1 %v9547_v34  ;;  %4124 = vadd.xlane.f32.xlu0 %v9576_v36  ;;  %v3180_v7 = vpop.xlane.xlu0 %3179  ;;  %v3142_v34 = vld [vmem:[#allocation3 + $0x168] sm:$0xff] }
 0xa58   : > { %v3205_v5 = vadd.f32 %v3186_v44, %v3157_v57  ;;  %v3202_v51 = vadd.f32 %v3180_v7, %v3154_v49  ;;  %v3158_v27 = vmul.f32 %v9440_v20, %v3142_v34  ;;  %v3160_v20 = vmul.f32 %v9455_v40, %v3144_v55  ;;  %v10525_v40 = vld [vmem:[#allocation58_spill] sm:$0xff]  ;;  %v10526_v57 = vld [vmem:[#allocation59_spill] sm:$0xff]  ;;  %v10527_v44 = vld [vmem:[#allocation41_spill] sm:$0xff] }
 0xa59   : > { %v10528_v34 = vld [vmem:[#allocation53_spill] sm:$0xff] }
 0xa5a   : > { %3221 = vst.msk [vmem:[#allocation3 + $0x160] sm:$0xff] %vm1375_vm14, %v3205_v5  ;;  %3218 = vst.msk [vmem:[#allocation3 + $0x148] sm:$0xff] %vm1375_vm14, %v3202_v51 }
 0xa5b   : > { %v3190_v50 = vpop.xlane.xlu1 %3189  ;;  %4122 = vadd.xlane.f32.xlu1 %v9578_v59  ;;  %4120 = vadd.xlane.f32.xlu0 %v9568_v24  ;;  %v3184_v52 = vpop.xlane.xlu0 %3183  ;;  %v10520_v24 = vsub.f32 %v9274_v32, %v9292_v21  ;;  %v3228_v32 = vld [vmem:[#allocation4 + $0x110] sm:$0xff]  ;;  %v10524_v21 = vld [vmem:[#allocation57_spill] sm:$0xff] }
 0xa5c   : > { %v3207_v36 = vadd.f32 %v3190_v50, %v3159_v37  ;;  %v3204_v39 = vadd.f32 %v3184_v52, %v3156_v25  ;;  %v3233_v50 = vld [vmem:[#allocation4 + $0x138] sm:$0xff]  ;;  %v3232_v52 = vld [vmem:[#allocation4 + $0x130] sm:$0xff] }
 0xa5d   : > { %v3931_v9 = vmul.f32 1.442695, %v10520_v24  ;;  %v10530_v24 = vld [vmem:[#allocation51_spill] sm:$0xff] }
 0xa5e   : > { %3223 = vst.msk [vmem:[#allocation3 + $0x170] sm:$0xff] %vm1375_vm14, %v3207_v36  ;;  %3220 = vst.msk [vmem:[#allocation3 + $0x158] sm:$0xff] %vm1375_vm14, %v3204_v39  ;;  %v10529_v39 = vld [vmem:[#allocation56_spill] sm:$0xff] }
 0xa5f   : > { %v2387_v33 = vpop.permute.xlu1 %2386  ;;  %4118 = vadd.xlane.f32.xlu1 %v9566_v14  ;;  %v3188_v19 = vpop.xlane.xlu0 %3187  ;;  %6305 = vpow2.f32 %v3931_v9 }
 0xa60   : > { %v2404_v47 = vmul.f32 %v2387_v33, %v2308_v17  ;;  %v3206_v59 = vadd.f32 %v3188_v19, %v3158_v27  ;;  %6307 = vpow2.f32 %v3929_v38 }
 0xa62   : > { %v2557_v15 = vadd.f32 %v10523_v30, %v2404_v47  ;;  %3222 = vst.msk [vmem:[#allocation3 + $0x168] sm:$0xff] %vm1375_vm14, %v3206_v59  ;;  %v3235_v47 = vld [vmem:[#allocation4 + $0x148] sm:$0xff]  ;;  %v3234_v59 = vld [vmem:[#allocation4 + $0x140] sm:$0xff] }
 0xa63   : > { %v3245_v14 = vpop.permute.xlu1 %3244  ;;  %v3192_v13 = vpop.xlane.xlu0 %3191 }
 0xa64   : > { %2573 = vst.msk [vmem:[#allocation4 + $0xf8] sm:$0xff] %vm877_vm2, %v2557_v15  ;;  %v3322_v45 = vmul.f32 %v3245_v14, %v3226_v10  ;;  %v3208_v11 = vadd.f32 %v3192_v13, %v3160_v20  ;;  %v10531_v10 = vld [vmem:[#allocation43_spill] sm:$0xff]  ;;  %v3237_v20 = vld [vmem:[#allocation4 + $0x158] sm:$0xff]  ;;  %v10532_v13 = vld [vmem:[#allocation82_spill] sm:$0xff] }
 0xa65   : > { %v3236_v14 = vld [vmem:[#allocation4 + $0x150] sm:$0xff] }
 0xa66   : > { %v3475_v12 = vadd.f32 %v10524_v21, %v3322_v45  ;;  %3224 = vst.msk [vmem:[#allocation3 + $0x178] sm:$0xff] %vm1375_vm14, %v3208_v11  ;;  %v10533_v11 = vld [vmem:[#allocation49_spill] sm:$0xff] }
 0xa67   : > { %v3255_v22 = vpop.permute.xlu1 %3254 }
 0xa68   : > { %3491 = vst.msk [vmem:[#allocation4 + $0x100] sm:$0xff] %vm877_vm2, %v3475_v12  ;;  %v3324_v28 = vmul.f32 %v3255_v22, %v3228_v32 }
 0xa69   : > { %v9642_v8 = vpop.eup %6305 }
 0xa6a   : > { %v3477_v0 = vadd.f32 %v10525_v40, %v3324_v28  ;;  %v9644_v51 = vpop.eup %6307  ;;  %v10534_v40 = vld [vmem:[#allocation80_spill] sm:$0xff] }
 0xa6b   : > { %v3260_v56 = vpop.permute.xlu1 %3259  ;;  %v3250_v31 = vpop.permute.xlu0 %3249 }
 0xa6c   : > { %3493 = vst.msk [vmem:[#allocation4 + $0x110] sm:$0xff] %vm877_vm2, %v3477_v0  ;;  %v3325_v6 = vmul.f32 %v3260_v56, %v3229_v3  ;;  %v3323_v62 = vmul.f32 %v3250_v31, %v3227_v60  ;;  %v3239_v3 = vld [vmem:[#allocation4 + $0x168] sm:$0xff]  ;;  %v3238_v60 = vld [vmem:[#allocation4 + $0x160] sm:$0xff]  ;;  %v10535_v56 = vld [vmem:[#allocation47_spill] sm:$0xff] }
 0xa6e   : > { %v3478_v49 = vadd.f32 %v10526_v57, %v3325_v6  ;;  %v3476_v7 = vadd.f32 %v10527_v44, %v3323_v62  ;;  %v3241_v57 = vld [vmem:[#allocation4 + $0x178] sm:$0xff]  ;;  %v10536_v44 = vld [vmem:[#allocation35_spill] sm:$0xff] }
 0xa6f   : > { %v3270_v61 = vpop.permute.xlu1 %3269  ;;  %v3265_v5 = vpop.permute.xlu0 %3264 }
 0xa70   : > { %3494 = vst.msk [vmem:[#allocation4 + $0x118] sm:$0xff] %vm877_vm2, %v3478_v49  ;;  %3492 = vst.msk [vmem:[#allocation4 + $0x108] sm:$0xff] %vm877_vm2, %v3476_v7  ;;  %v3327_v37 = vmul.f32 %v3270_v61, %v3231_v53  ;;  %v3326_v25 = vmul.f32 %v3265_v5, %v3230_v48  ;;  %4252 = vperm.xlu1 %6052, %v9642_v8   ;;  %v3240_v49 = vld [vmem:[#allocation4 + $0x170] sm:$0xff]  ;;  %v10537_v61 = vld [vmem:[#allocation86_spill] sm:$0xff] }
 0xa71   : > { %4247 = vperm.xlu0 %6051, %v9644_v51  }
 0xa72   : > { %v3480_v36 = vadd.f32 %v10528_v34, %v3327_v37  ;;  %v3479_v17 = vadd.f32 %v10529_v39, %v3326_v25  ;;  %v10538_v34 = vld [vmem:[#allocation23_spill] sm:$0xff]  ;;  %v10539_v39 = vld [vmem:[#allocation84_spill] sm:$0xff] }
 0xa73   : > { %v3280_v27 = vpop.permute.xlu1 %3279  ;;  %v3275_v33 = vpop.permute.xlu0 %3274 }
 0xa74   : > { %3496 = vst.msk [vmem:[#allocation4 + $0x128] sm:$0xff] %vm877_vm2, %v3480_v36  ;;  %3495 = vst.msk [vmem:[#allocation4 + $0x120] sm:$0xff] %vm877_vm2, %v3479_v17  ;;  %v3329_v19 = vmul.f32 %v3280_v27, %v3233_v50  ;;  %v3328_v55 = vmul.f32 %v3275_v33, %v3232_v52 }
 0xa76   : > { %v3482_v9 = vadd.f32 %v10530_v24, %v3329_v19  ;;  %v3481_v46 = vadd.f32 %v10531_v10, %v3328_v55 }
 0xa77   : > { %v3290_v42 = vpop.permute.xlu1 %3289  ;;  %v3285_v38 = vpop.permute.xlu0 %3284 }
 0xa78   : > { %3498 = vst.msk [vmem:[#allocation4 + $0x138] sm:$0xff] %vm877_vm2, %v3482_v9  ;;  %3497 = vst.msk [vmem:[#allocation4 + $0x130] sm:$0xff] %vm877_vm2, %v3481_v46  ;;  %v3331_v30 = vmul.f32 %v3290_v42, %v3235_v47  ;;  %v3330_v15 = vmul.f32 %v3285_v38, %v3234_v59 }
 0xa7a   : > { %v3484_v45 = vadd.f32 %v10532_v13, %v3331_v30  ;;  %v3483_v32 = vadd.f32 %v10533_v11, %v3330_v15  ;;  %v4064_v30 = vld [vmem:[#allocation3 + $0x190] sm:$0xff] }
 0xa7b   : > { %v3300_v21 = vpop.permute.xlu1 %3299  ;;  %v3295_v12 = vpop.permute.xlu0 %3294  ;;  %v4080_v15 = vmul.f32 %v9488_v43, %v4064_v30  ;;  %v4063_v43 = vld [vmem:[#allocation3 + $0x188] sm:$0xff] }
 0xa7c   : > { %3500 = vst.msk [vmem:[#allocation4 + $0x148] sm:$0xff] %vm877_vm2, %v3484_v45  ;;  %3499 = vst.msk [vmem:[#allocation4 + $0x140] sm:$0xff] %vm877_vm2, %v3483_v32  ;;  %v3333_v22 = vmul.f32 %v3300_v21, %v3237_v20  ;;  %v3332_v28 = vmul.f32 %v3295_v12, %v3236_v14  ;;  %v4062_v14 = vld [vmem:[#allocation3 + $0x180] sm:$0xff]  ;;  %v4065_v21 = vld [vmem:[#allocation3 + $0x198] sm:$0xff] }
 0xa7d   : > { %v4078_v11 = vmul.f32 %v9471_v18, %v4062_v14  ;;  %v4161_v14 = vld [vmem:[#allocation4 + $0x190] sm:$0xff] }
 0xa7e   : > { %v3486_v0 = vadd.f32 %v10534_v40, %v3333_v22  ;;  %v3485_v31 = vadd.f32 %v10535_v56, %v3332_v28  ;;  %v4081_v22 = vmul.f32 %v9496_v26, %v4065_v21  ;;  %v4162_v21 = vld [vmem:[#allocation4 + $0x198] sm:$0xff] }
 0xa7f   : > { %v3310_v6 = vpop.permute.xlu1 %3309  ;;  %v3305_v62 = vpop.permute.xlu0 %3304 }
 0xa80   : > { %3502 = vst.msk [vmem:[#allocation4 + $0x158] sm:$0xff] %vm877_vm2, %v3486_v0  ;;  %3501 = vst.msk [vmem:[#allocation4 + $0x150] sm:$0xff] %vm877_vm2, %v3485_v31  ;;  %v3335_v53 = vmul.f32 %v3310_v6, %v3239_v3  ;;  %v3334_v48 = vmul.f32 %v3305_v62, %v3238_v60  ;;  %v4069_v60 = vld [vmem:[#allocation3 + $0x1b8] sm:$0xff]  ;;  %v4079_v0 = vmul.f32 %v9477_v58, %v4063_v43  ;;  %v4068_v6 = vld [vmem:[#allocation3 + $0x1b0] sm:$0xff] }
 0xa81   : > { %v4085_v56 = vmul.f32 %v9534_v16, %v4069_v60  ;;  %v4067_v62 = vld [vmem:[#allocation3 + $0x1a8] sm:$0xff]  ;;  %v4084_v26 = vmul.f32 %v9503_v41, %v4068_v6  ;;  %v4073_v58 = vld [vmem:[#allocation3 + $0x1d8] sm:$0xff] }
 0xa82   : > { %v3488_v7 = vadd.f32 %v10536_v44, %v3335_v53  ;;  %v3487_v5 = vadd.f32 %v10537_v61, %v3334_v48  ;;  %v4071_v41 = vld [vmem:[#allocation3 + $0x1c8] sm:$0xff] }
 0xa83   : > { %v3320_v37 = vpop.permute.xlu1 %3319  ;;  %v3315_v25 = vpop.permute.xlu0 %3314 }
 0xa84   : > { %3504 = vst.msk [vmem:[#allocation4 + $0x168] sm:$0xff] %vm877_vm2, %v3488_v7  ;;  %3503 = vst.msk [vmem:[#allocation4 + $0x160] sm:$0xff] %vm877_vm2, %v3487_v5  ;;  %v3337_v50 = vmul.f32 %v3320_v37, %v3241_v57  ;;  %v3336_v52 = vmul.f32 %v3315_v25, %v3240_v49  ;;  %v4083_v57 = vmul.f32 %v9526_v1, %v4067_v62  ;;  %v4066_v7 = vld [vmem:[#allocation3 + $0x1a0] sm:$0xff] }
 0xa85   : > { %v4082_v5 = vmul.f32 %v9492_v35, %v4066_v7  ;;  %v4089_v37 = vmul.f32 %v9553_v23, %v4073_v58  ;;  %v4077_v35 = vld [vmem:[#allocation3 + $0x1f8] sm:$0xff] }
 0xa86   : > { %v3490_v36 = vadd.f32 %v10538_v34, %v3337_v50  ;;  %v3489_v17 = vadd.f32 %v10539_v39, %v3336_v52  ;;  %v4072_v52 = vld [vmem:[#allocation3 + $0x1d0] sm:$0xff]  ;;  %v4087_v39 = vmul.f32 %v9561_v29, %v4071_v41 }
 0xa87   : > { %v9674_v27 = vpop.permute.xlu1 %4177  ;;  %v9676_v33 = vpop.permute.xlu0 %4182  ;;  %v4076_v29 = vld [vmem:[#allocation3 + $0x1f0] sm:$0xff] }
 0xa88   : > { %3506 = vst.msk [vmem:[#allocation4 + $0x178] sm:$0xff] %vm877_vm2, %v3490_v36  ;;  %3505 = vst.msk [vmem:[#allocation4 + $0x170] sm:$0xff] %vm877_vm2, %v3489_v17  ;;  %v4088_v36 = vmul.f32 %v9530_v4, %v4072_v52 }
 0xa8b   : > { %v9678_v19 = vpop.permute.xlu1 %4187  ;;  %v9680_v55 = vpop.permute.xlu0 %4197 }
 0xa8f   : > { %v9682_v47 = vpop.permute.xlu1 %4192  ;;  %v9684_v59 = vpop.permute.xlu0 %4207 }
 0xa93   : > { %v9686_v24 = vpop.permute.xlu1 %4202  ;;  %v9688_v9 = vpop.permute.xlu0 %4227 }
 0xa97   : > { %v9690_v10 = vpop.permute.xlu1 %4212  ;;  %v9692_v46 = vpop.permute.xlu0 %4217 }
 0xa9b   : > { %v9694_v42 = vpop.permute.xlu1 %4232  ;;  %v9696_v38 = vpop.permute.xlu0 %4237 }
 0xa9f   : > { %v9699_v45 = vpop.permute.xlu1 %4222 }
 0xaa3   : > { %v9705_v28 = vpop.permute.xlu1 %4242 }
 0xac8   : > { %v4099_v20 = vpop.xlane.xlu0 %4098 }
 0xac9   : > { %v4128_v13 = vadd.f32 %v4099_v20, %v4080_v15  ;;  %v4070_v15 = vld [vmem:[#allocation3 + $0x1c0] sm:$0xff] }
 0xacb   : > { %4144 = vst.msk [vmem:[#allocation3 + $0x190] sm:$0xff] %vm1375_vm14, %v4128_v13  ;;  %v4159_v13 = vld [vmem:[#allocation4 + $0x180] sm:$0xff] }
 0xacc   : > { %v4095_v32 = vpop.xlane.xlu0 %4094 }
 0xacd   : > { %v4126_v12 = vadd.f32 %v4095_v32, %v4078_v11  ;;  %v4086_v11 = vmul.f32 %v9540_v54, %v4070_v15  ;;  %v4093_v32 = vmul.f32 %v9642_v8, %v4077_v35  ;;  %v4168_v35 = vld [vmem:[#allocation4 + $0x1c8] sm:$0xff] }
 0xacf   : > { %4142 = vst.msk [vmem:[#allocation3 + $0x180] sm:$0xff] %vm1375_vm14, %v4126_v12 }
 0xad0   : > { %v4101_v3 = vpop.xlane.xlu0 %4100 }
 0xad1   : > { %v4129_v40 = vadd.f32 %v4101_v3, %v4081_v22  ;;  %v4160_v22 = vld [vmem:[#allocation4 + $0x188] sm:$0xff]  ;;  %v4257_v3 = vmul.f32 %v9678_v19, %v4161_v14 }
 0xad2   : > { %v4256_v6 = vmul.f32 %v9676_v33, %v4160_v22 }
 0xad3   : > { %4145 = vst.msk [vmem:[#allocation3 + $0x198] sm:$0xff] %vm1375_vm14, %v4129_v40  ;;  %v4075_v40 = vld [vmem:[#allocation3 + $0x1e8] sm:$0xff] }
 0xad4   : > { %v4097_v18 = vpop.xlane.xlu1 %4096  ;;  %v4109_v31 = vpop.xlane.xlu0 %4108 }
 0xad5   : > { %v4127_v53 = vadd.f32 %v4097_v18, %v4079_v0  ;;  %v4133_v48 = vadd.f32 %v4109_v31, %v4085_v56  ;;  %v4255_v0 = vmul.f32 %v9674_v27, %v4159_v13  ;;  %v4258_v18 = vmul.f32 %v9682_v47, %v4162_v21 }
 0xad6   : > { %v4092_v31 = vmul.f32 %v9644_v51, %v4076_v29  ;;  %v4163_v51 = vld [vmem:[#allocation4 + $0x1a0] sm:$0xff]  ;;  %v4173_v29 = vld [vmem:[#allocation4 + $0x1f0] sm:$0xff] }
 0xad7   : > { %4143 = vst.msk [vmem:[#allocation3 + $0x188] sm:$0xff] %vm1375_vm14, %v4127_v53  ;;  %4149 = vst.msk [vmem:[#allocation3 + $0x1b8] sm:$0xff] %vm1375_vm14, %v4133_v48  ;;  %v4091_v48 = vmul.f32 %v9571_v2, %v4075_v40  ;;  %v4166_v2 = vld [vmem:[#allocation4 + $0x1b8] sm:$0xff] }
 0xad8   : > { %v4107_v49 = vpop.xlane.xlu1 %4106  ;;  %v4105_v44 = vpop.xlane.xlu0 %4104  ;;  %v4262_v52 = vmul.f32 %v9690_v10, %v4166_v2  ;;  %v4170_v10 = vld [vmem:[#allocation4 + $0x1d8] sm:$0xff] }
 0xad9   : > { %v4132_v61 = vadd.f32 %v4107_v49, %v4084_v26  ;;  %v4131_v16 = vadd.f32 %v4105_v44, %v4083_v57  ;;  %v4074_v26 = vld [vmem:[#allocation3 + $0x1e0] sm:$0xff]  ;;  %v4165_v44 = vld [vmem:[#allocation4 + $0x1b0] sm:$0xff] }
 0xada   : > { %v4090_v33 = vmul.f32 %v9557_v63, %v4074_v26 }
 0xadb   : > { %4148 = vst.msk [vmem:[#allocation3 + $0x1b0] sm:$0xff] %vm1375_vm14, %v4132_v61  ;;  %4147 = vst.msk [vmem:[#allocation3 + $0x1a8] sm:$0xff] %vm1375_vm14, %v4131_v16  ;;  %v4261_v16 = vmul.f32 %v9684_v59, %v4165_v44  ;;  %v4169_v59 = vld [vmem:[#allocation4 + $0x1d0] sm:$0xff] }
 0xadc   : > { %v4103_v25 = vpop.xlane.xlu1 %4102  ;;  %v4117_v50 = vpop.xlane.xlu0 %4116  ;;  %v4265_v15 = vmul.f32 %v9688_v9, %v4169_v59 }
 0xadd   : > { %v4130_v34 = vadd.f32 %v4103_v25, %v4082_v5  ;;  %v4137_v1 = vadd.f32 %v4117_v50, %v4089_v37  ;;  %v4164_v5 = vld [vmem:[#allocation4 + $0x1a8] sm:$0xff]  ;;  %v4259_v25 = vmul.f32 %v9680_v55, %v4163_v51  ;;  %v4167_v55 = vld [vmem:[#allocation4 + $0x1c0] sm:$0xff] }
 0xade   : > { %v4260_v63 = vmul.f32 %v9686_v24, %v4164_v5  ;;  %v4263_v24 = vmul.f32 %v9692_v46, %v4167_v55  ;;  %v4174_v46 = vld [vmem:[#allocation4 + $0x1f8] sm:$0xff] }
 0xadf   : > { %4146 = vst.msk [vmem:[#allocation3 + $0x1a0] sm:$0xff] %vm1375_vm14, %v4130_v34  ;;  %4153 = vst.msk [vmem:[#allocation3 + $0x1d8] sm:$0xff] %vm1375_vm14, %v4137_v1 }
 0xae0   : > { %v4115_v17 = vpop.xlane.xlu1 %4114  ;;  %v4113_v30 = vpop.xlane.xlu0 %4112 }
 0xae1   : > { %v4136_v20 = vadd.f32 %v4115_v17, %v4088_v36  ;;  %v4135_v23 = vadd.f32 %v4113_v30, %v4087_v39 }
 0xae3   : > { %4152 = vst.msk [vmem:[#allocation3 + $0x1d0] sm:$0xff] %vm1375_vm14, %v4136_v20  ;;  %4151 = vst.msk [vmem:[#allocation3 + $0x1c8] sm:$0xff] %vm1375_vm14, %v4135_v23  ;;  %v4266_v23 = vmul.f32 %v9694_v42, %v4170_v10 }
 0xae4   : > { %v4111_v4 = vpop.xlane.xlu1 %4110  ;;  %v4125_v12 = vpop.xlane.xlu0 %4124 }
 0xae5   : > { %v4134_v43 = vadd.f32 %v4111_v4, %v4086_v11  ;;  %v4141_v60 = vadd.f32 %v4125_v12, %v4093_v32  ;;  %v4264_v11 = vmul.f32 %v9699_v45, %v4168_v35 }
 0xae6   : > { %v5905_v56 = vpop.f32.mrb[48].mxu0 }
 0xae7   : > { %4150 = vst.msk [vmem:[#allocation3 + $0x1c0] sm:$0xff] %vm1375_vm14, %v4134_v43  ;;  %4157 = vst.msk [vmem:[#allocation3 + $0x1f8] sm:$0xff] %vm1375_vm14, %v4141_v60  ;;  %v4410_v54 = vadd.f32 %v5905_v56, %v4257_v3  ;;  %v4345_v8 = vpop.f32.mrb[49].mxu0  ;;  %v4171_v3 = vld [vmem:[#allocation4 + $0x1e0] sm:$0xff]  ;;  %v4172_v43 = vld [vmem:[#allocation4 + $0x1e8] sm:$0xff] }
 0xae8   : > { %v4408_v62 = vadd.f32 %v4345_v8, %v4255_v0  ;;  %v4123_v19 = vpop.xlane.xlu1 %4122  ;;  %v5906_v53 = vpop.f32.mrb[50].mxu0  ;;  %v4267_v60 = vmul.f32 %v9696_v38, %v4171_v3 }
 0xae9   : > { %4426 = vst.msk [vmem:[#allocation4 + $0x190] sm:$0xff] %vm877_vm2, %v4410_v54  ;;  %v4140_v27 = vadd.f32 %v4123_v19, %v4092_v31  ;;  %v4411_v47 = vadd.f32 %v5906_v53, %v4258_v18  ;;  %v4121_v57 = vpop.xlane.xlu0 %4120  ;;  %v4348_v49 = vpop.f32.mrb[51].mxu0  ;;  %v4268_v54 = vmul.f32 %v9705_v28, %v4172_v43 }
 0xaea   : > { %4424 = vst.msk [vmem:[#allocation4 + $0x180] sm:$0xff] %vm877_vm2, %v4408_v62  ;;  %v4139_v7 = vadd.f32 %v4121_v57, %v4091_v48  ;;  %v4409_v58 = vadd.f32 %v4348_v49, %v4256_v6 }
 0xaeb   : > { %4156 = vst.msk [vmem:[#allocation3 + $0x1f0] sm:$0xff] %vm1375_vm14, %v4140_v27 }
 0xaec   : > { %4427 = vst.msk [vmem:[#allocation4 + $0x198] sm:$0xff] %vm877_vm2, %v4411_v47  ;;  %4425 = vst.msk [vmem:[#allocation4 + $0x188] sm:$0xff] %vm877_vm2, %v4409_v58  ;;  %v4119_v61 = vpop.xlane.xlu1 %4118 }
 0xaed   : > { %4155 = vst.msk [vmem:[#allocation3 + $0x1e8] sm:$0xff] %vm1375_vm14, %v4139_v7  ;;  %v4138_v37 = vadd.f32 %v4119_v61, %v4090_v33 }
 0xaee   : > { %v5909_v50 = vpop.f32.mrb[52].mxu0 }
 0xaef   : > { %4154 = vst.msk [vmem:[#allocation3 + $0x1e0] sm:$0xff] %vm1375_vm14, %v4138_v37  ;;  %v4414_v41 = vadd.f32 %v5909_v50, %v4261_v16  ;;  %v4361_v34 = vpop.f32.mrb[53].mxu0 }
 0xaf0   : > { %v4412_v1 = vadd.f32 %v4361_v34, %v4259_v25  ;;  %v5910_v36 = vpop.f32.mrb[54].mxu0  ;;  %v4248_v22 = vpop.permute.xlu0 %4247 }
 0xaf1   : > { %4430 = vst.msk [vmem:[#allocation4 + $0x1b0] sm:$0xff] %vm877_vm2, %v4414_v41  ;;  %v4415_v39 = vadd.f32 %v5910_v36, %v4262_v52  ;;  %v4364_v17 = vpop.f32.mrb[55].mxu0  ;;  %v4253_v42 = vpop.permute.xlu1 %4252  ;;  %v4269_v45 = vmul.f32 %v4248_v22, %v4173_v29 }
 0xaf2   : > { %4428 = vst.msk [vmem:[#allocation4 + $0x1a0] sm:$0xff] %vm877_vm2, %v4412_v1  ;;  %v4413_v30 = vadd.f32 %v4364_v17, %v4260_v63  ;;  %v4270_v0 = vmul.f32 %v4253_v42, %v4174_v46 }
 0xaf3   : > { %4431 = vst.msk [vmem:[#allocation4 + $0x1b8] sm:$0xff] %vm877_vm2, %v4415_v39 }
 0xaf4   : > { %4429 = vst.msk [vmem:[#allocation4 + $0x1a8] sm:$0xff] %vm877_vm2, %v4413_v30 }
 0xaf6   : > { %v5913_v20 = vpop.f32.mrb[56].mxu0 }
 0xaf7   : > { %v4418_v14 = vadd.f32 %v5913_v20, %v4265_v15  ;;  %v4377_v13 = vpop.f32.mrb[57].mxu0 }
 0xaf8   : > { %v4416_v32 = vadd.f32 %v4377_v13, %v4263_v24  ;;  %v5914_v21 = vpop.f32.mrb[58].mxu0 }
 0xaf9   : > { %4434 = vst.msk [vmem:[#allocation4 + $0x1d0] sm:$0xff] %vm877_vm2, %v4418_v14  ;;  %v4419_v4 = vadd.f32 %v5914_v21, %v4266_v23  ;;  %v4380_v12 = vpop.f32.mrb[59].mxu0 }
 0xafa   : > { %4432 = vst.msk [vmem:[#allocation4 + $0x1c0] sm:$0xff] %vm877_vm2, %v4416_v32  ;;  %v4417_v9 = vadd.f32 %v4380_v12, %v4264_v11 }
 0xafb   : > { %4435 = vst.msk [vmem:[#allocation4 + $0x1d8] sm:$0xff] %vm877_vm2, %v4419_v4 }
 0xafc   : > { %4433 = vst.msk [vmem:[#allocation4 + $0x1c8] sm:$0xff] %vm877_vm2, %v4417_v9 }
 0xafe   : > { %v5917_v40 = vpop.f32.mrb[60].mxu0 }
 0xaff   : > { %v4422_v56 = vadd.f32 %v5917_v40, %v4269_v45  ;;  %v4393_v18 = vpop.f32.mrb[61].mxu0 }
 0xb00   : > { %v4420_v8 = vadd.f32 %v4393_v18, %v4267_v60  ;;  %v5918_v31 = vpop.f32.mrb[62].mxu0 }
 0xb01   : > { %4438 = vst.msk [vmem:[#allocation4 + $0x1f0] sm:$0xff] %vm877_vm2, %v4422_v56  ;;  %v4423_v6 = vadd.f32 %v5918_v31, %v4270_v0  ;;  %v4396_v62 = vpop.f32.mrb[63].mxu0 }
 0xb02   : > { %4436 = vst.msk [vmem:[#allocation4 + $0x1e0] sm:$0xff] %vm877_vm2, %v4420_v8  ;;  %v4421_v19 = vadd.f32 %v4396_v62, %v4268_v54 }
 0xb03   : > { %4439 = vst.msk [vmem:[#allocation4 + $0x1f8] sm:$0xff] %vm877_vm2, %v4423_v6 }
 0xb04   : > { %4437 = vst.msk [vmem:[#allocation4 + $0x1e8] sm:$0xff] %vm877_vm2, %v4421_v19 }
 0xb05 PF: > { %p5532_p4 = scmp.ne.s32.totalorder %s6501_s16, %s6505_s17 }
 0xb06   : > { %v4462_v38 = vld [vmem:[#allocation3 + $0x10] sm:$0xff] (!%p5532_p4)  ;;  %v4460_v28 = vld [vmem:[#allocation3] sm:$0xff] (!%p5532_p4)  ;;  %v4463_v53 = vld [vmem:[#allocation3 + $0x18] sm:$0xff] (!%p5532_p4)  ;;  %v6533_v48 = vmov (!%p5532_p4), 0   ;;  %vm4604_vm2 = vcmask (!%p5532_p4), 261120   ;;  %s6534_s0 = smov (!%p5532_p4), 32  }
 0xb07   : > { %4459 = sbr.rel (%p5532_p4) target bundleno = 3295 (0xcdf), region = 158  ;;  %6310 = vset.pattern.permute.xlu1 (!%p5532_p4), %v6533_v48  ;;  %6309 = vset.pattern.permute.xlu0 (!%p5532_p4), %v6533_v48  ;;  %6311 = vrcp.f32 (!%p5532_p4), %v4462_v38  ;;  %v4461_v26 = vld [vmem:[#allocation3 + $0x8] sm:$0xff] (!%p5532_p4)  ;;  %v4464_v47 = vld [vmem:[#allocation3 + $0x20] sm:$0xff] (!%p5532_p4)  ;;  %v4467_v57 = vld [vmem:[#allocation3 + $0x38] sm:$0xff] (!%p5532_p4)  ;;  %s6535_s16 = smov (!%p5532_p4), 64   ;;  %vm4831_vm7 = vcmask (!%p5532_p4), 523520  }
 0xb08   : > { %6313 = vrcp.f32 (!%p5532_p4), %v4460_v28  ;;  %v4465_v27 = vld [vmem:[#allocation3 + $0x28] sm:$0xff] (!%p5532_p4)  ;;  %v4466_v49 = vld [vmem:[#allocation3 + $0x30] sm:$0xff] (!%p5532_p4)  ;;  %v4468_v33 = vld [vmem:[#allocation3 + $0x40] sm:$0xff] (!%p5532_p4)  ;;  %s6536_s17 = smov (!%p5532_p4), 96   ;;  %vm5058_vm8 = vcmask (!%p5532_p4), 785920   ;;  %vm5285_vm9 = vcmask (!%p5532_p4), 1048320  }
 0xb09   : > { %6315 = vrcp.f32 (!%p5532_p4), %v4463_v53  ;;  %v4469_v58 = vld [vmem:[#allocation3 + $0x48] sm:$0xff] (!%p5532_p4)  ;;  %v4471_v61 = vld [vmem:[#allocation3 + $0x58] sm:$0xff] (!%p5532_p4)  ;;  %v4470_v5 = vld [vmem:[#allocation3 + $0x50] sm:$0xff] (!%p5532_p4) }
 0xb0a   : > { %6317 = vrcp.f32 (!%p5532_p4), %v4461_v26  ;;  %v4473_v25 = vld [vmem:[#allocation3 + $0x68] sm:$0xff] (!%p5532_p4)  ;;  %v4472_v52 = vld [vmem:[#allocation3 + $0x60] sm:$0xff] (!%p5532_p4)  ;;  %v4475_v34 = vld [vmem:[#allocation3 + $0x78] sm:$0xff] (!%p5532_p4) }
 0xb0b   : > { %6319 = vrcp.f32 (!%p5532_p4), %v4465_v27  ;;  %v4474_v1 = vld [vmem:[#allocation3 + $0x70] sm:$0xff] (!%p5532_p4)  ;;  %v4623_v39 = vld [vmem:[#allocation3 + $0x88] sm:$0xff] (!%p5532_p4)  ;;  %v4622_v59 = vld [vmem:[#allocation3 + $0x80] sm:$0xff] (!%p5532_p4) }
 0xb0c   : > { %6321 = vrcp.f32 (!%p5532_p4), %v4464_v47  ;;  %v4625_v55 = vld [vmem:[#allocation3 + $0x98] sm:$0xff] (!%p5532_p4)  ;;  %v4624_v15 = vld [vmem:[#allocation3 + $0x90] sm:$0xff] (!%p5532_p4)  ;;  %v4627_v24 = vld [vmem:[#allocation3 + $0xa8] sm:$0xff] (!%p5532_p4) }
 0xb0d   : > { %6323 = vrcp.f32 (!%p5532_p4), %v4467_v57  ;;  %v4626_v23 = vld [vmem:[#allocation3 + $0xa0] sm:$0xff] (!%p5532_p4)  ;;  %v4629_v13 = vld [vmem:[#allocation3 + $0xb8] sm:$0xff] (!%p5532_p4)  ;;  %v4628_v32 = vld [vmem:[#allocation3 + $0xb0] sm:$0xff] (!%p5532_p4) }
 0xb0e   : > { %6325 = vrcp.f32 %v4466_v49  ;;  %v4631_v4 = vld [vmem:[#allocation3 + $0xc8] sm:$0xff]  ;;  %v4630_v29 = vld [vmem:[#allocation3 + $0xc0] sm:$0xff]  ;;  %v4633_v9 = vld [vmem:[#allocation3 + $0xd8] sm:$0xff] }
 0xb0f   : > { %6327 = vrcp.f32 %v4469_v58  ;;  %v4632_v46 = vld [vmem:[#allocation3 + $0xd0] sm:$0xff]  ;;  %v4635_v43 = vld [vmem:[#allocation3 + $0xe8] sm:$0xff]  ;;  %v4634_v60 = vld [vmem:[#allocation3 + $0xe0] sm:$0xff] }
 0xb10   : > { %6329 = vrcp.f32 %v4468_v33  ;;  %v4637_v0 = vld [vmem:[#allocation3 + $0xf8] sm:$0xff]  ;;  %v4636_v18 = vld [vmem:[#allocation3 + $0xf0] sm:$0xff]  ;;  %v4850_v8 = vld [vmem:[#allocation3 + $0x108] sm:$0xff] }
 0xb11   : > { %v6312_v44 = vpop.eup %6311  ;;  %6331 = vrcp.f32 %v4471_v61  ;;  %v4849_v6 = vld [vmem:[#allocation3 + $0x100] sm:$0xff]  ;;  %v4852_v19 = vld [vmem:[#allocation3 + $0x118] sm:$0xff]  ;;  %v4851_v28 = vld [vmem:[#allocation3 + $0x110] sm:$0xff] }
 0xb12   : > { %v6314_v7 = vpop.eup %6313  ;;  %4520 = vperm.xlu1 %6310, %v6312_v44   ;;  %6333 = vrcp.f32 %v4470_v5  ;;  %v4854_v48 = vld [vmem:[#allocation3 + $0x128] sm:$0xff]  ;;  %v4853_v27 = vld [vmem:[#allocation3 + $0x120] sm:$0xff]  ;;  %v4856_v57 = vld [vmem:[#allocation3 + $0x138] sm:$0xff] }
 0xb13   : > { %v6316_v51 = vpop.eup %6315  ;;  %4510 = vperm.xlu0 %6309, %v6314_v7   ;;  %6335 = vrcp.f32 %v4473_v25  ;;  %v4855_v44 = vld [vmem:[#allocation3 + $0x130] sm:$0xff]  ;;  %v4858_v58 = vld [vmem:[#allocation3 + $0x148] sm:$0xff]  ;;  %v4857_v33 = vld [vmem:[#allocation3 + $0x140] sm:$0xff] }
 0xb14   : > { %v6318_v2 = vpop.eup %6317  ;;  %6337 = vrcp.f32 %v4472_v52  ;;  %v4860_v61 = vld [vmem:[#allocation3 + $0x158] sm:$0xff]  ;;  %v4859_v5 = vld [vmem:[#allocation3 + $0x150] sm:$0xff]  ;;  %v4862_v25 = vld [vmem:[#allocation3 + $0x168] sm:$0xff] }
 0xb15   : > { %v6320_v16 = vpop.eup %6319  ;;  %6339 = vrcp.f32 %v4475_v34  ;;  %v4861_v52 = vld [vmem:[#allocation3 + $0x160] sm:$0xff]  ;;  %v4864_v34 = vld [vmem:[#allocation3 + $0x178] sm:$0xff] }
 0xb16   : > { %4525 = vperm.xlu1 %6310, %v6316_v51   ;;  %v6322_v37 = vpop.eup %6321  ;;  %6341 = vrcp.f32 %v4474_v1  ;;  %v4863_v1 = vld [vmem:[#allocation3 + $0x170] sm:$0xff] }
 0xb17   : > { %4515 = vperm.xlu0 %6309, %v6318_v2   ;;  %v6324_v50 = vpop.eup %6323  ;;  %6343 = vrcp.f32 %v4623_v39  ;;  %v5077_v39 = vld [vmem:[#allocation3 + $0x188] sm:$0xff] }
 0xb18   : > { %v6326_v41 = vpop.eup %6325  ;;  %6345 = vrcp.f32 %v4622_v59  ;;  %v5076_v59 = vld [vmem:[#allocation3 + $0x180] sm:$0xff] }
 0xb19   : > { %v6328_v63 = vpop.eup %6327  ;;  %6347 = vrcp.f32 %v4625_v55  ;;  %v5079_v55 = vld [vmem:[#allocation3 + $0x198] sm:$0xff] }
 0xb1a   : > { %4535 = vperm.xlu1 %6310, %v6320_v16   ;;  %v6330_v36 = vpop.eup %6329  ;;  %6349 = vrcp.f32 %v4624_v15  ;;  %v5078_v15 = vld [vmem:[#allocation3 + $0x190] sm:$0xff] }
 0xb1b   : > { %4530 = vperm.xlu0 %6309, %v6322_v37   ;;  %v6332_v17 = vpop.eup %6331  ;;  %6351 = vrcp.f32 %v4627_v24  ;;  %v5081_v24 = vld [vmem:[#allocation3 + $0x1a8] sm:$0xff] }
 0xb1c   : > { %v6334_v30 = vpop.eup %6333  ;;  %6353 = vrcp.f32 %v4626_v23  ;;  %v5080_v23 = vld [vmem:[#allocation3 + $0x1a0] sm:$0xff] }
 0xb1d   : > { %v6336_v10 = vpop.eup %6335  ;;  %6355 = vrcp.f32 %v4629_v13 }
 0xb1e   : > { %4545 = vperm.xlu1 %6310, %v6324_v50   ;;  %v6338_v35 = vpop.eup %6337  ;;  %6357 = vrcp.f32 %v4628_v32 }
 0xb1f   : > { %4540 = vperm.xlu0 %6309, %v6326_v41   ;;  %v6340_v20 = vpop.eup %6339  ;;  %6359 = vrcp.f32 %v4631_v4 }
 0xb20   : > { %v6342_v14 = vpop.eup %6341  ;;  %6361 = vrcp.f32 %v4630_v29  ;;  %v4494_v29 = vld [vmem:[#allocation4 + $0x10] sm:$0xff] }
 0xb21   : > { %v6344_v11 = vpop.eup %6343  ;;  %6363 = vrcp.f32 %v4633_v9 }
 0xb22   : > { %4555 = vperm.xlu1 %6310, %v6328_v63   ;;  %v6346_v21 = vpop.eup %6345  ;;  %6365 = vrcp.f32 %v4632_v46 }
 0xb23   : > { %4550 = vperm.xlu0 %6309, %v6330_v36   ;;  %v6348_v12 = vpop.eup %6347  ;;  %6367 = vrcp.f32 %v4635_v43  ;;  %v4495_v43 = vld [vmem:[#allocation4 + $0x18] sm:$0xff] }
 0xb24   : > { %v6350_v22 = vpop.eup %6349  ;;  %6369 = vrcp.f32 %v4634_v60 }
 0xb25   : > { %v6352_v3 = vpop.eup %6351  ;;  %6371 = vrcp.f32 %v4637_v0 }
 0xb26   : > { %4565 = vperm.xlu1 %6310, %v6332_v17   ;;  %v6354_v42 = vpop.eup %6353  ;;  %6373 = vrcp.f32 %v4636_v18  ;;  %v4497_v18 = vld [vmem:[#allocation4 + $0x28] sm:$0xff] }
 0xb27   : > { %4560 = vperm.xlu0 %6309, %v6334_v30   ;;  %v6356_v45 = vpop.eup %6355  ;;  %6375 = vrcp.f32 %v4850_v8 }
 0xb28   : > { %v6358_v40 = vpop.eup %6357  ;;  %6377 = vrcp.f32 %v4849_v6 }
 0xb29   : > { %v6360_v56 = vpop.eup %6359  ;;  %6379 = vrcp.f32 %v4852_v19  ;;  %v4499_v19 = vld [vmem:[#allocation4 + $0x38] sm:$0xff] }
 0xb2a   : > { %4575 = vperm.xlu1 %6310, %v6336_v10   ;;  %v6362_v54 = vpop.eup %6361  ;;  %6381 = vrcp.f32 %v4851_v28 }
 0xb2b   : > { %4570 = vperm.xlu0 %6309, %v6338_v35   ;;  %v6364_v31 = vpop.eup %6363  ;;  %6383 = vrcp.f32 %v4854_v48 }
 0xb2c   : > { %v6366_v62 = vpop.eup %6365  ;;  %6385 = vrcp.f32 %v4853_v27  ;;  %v4501_v27 = vld [vmem:[#allocation4 + $0x48] sm:$0xff] }
 0xb2d   : > { %v6368_v38 = vpop.eup %6367  ;;  %6387 = vrcp.f32 %v4856_v57 }
 0xb2e   : > { %4585 = vperm.xlu1 %6310, %v6340_v20   ;;  %v6370_v53 = vpop.eup %6369  ;;  %6389 = vrcp.f32 %v4855_v44 }
 0xb2f   : > { %4580 = vperm.xlu0 %6309, %v6342_v14   ;;  %v6372_v26 = vpop.eup %6371  ;;  %6391 = vrcp.f32 %v4858_v58  ;;  %v4503_v58 = vld [vmem:[#allocation4 + $0x58] sm:$0xff] }
 0xb30   : > { %v6374_v47 = vpop.eup %6373  ;;  %6393 = vrcp.f32 %v4857_v33 }
 0xb31   : > { %v6376_v49 = vpop.eup %6375  ;;  %6395 = vrcp.f32 %v4860_v61 }
 0xb32   : > { %4678 = vperm.xlu1 %6310, %v6344_v11   ;;  %v6378_v7 = vpop.eup %6377  ;;  %6397 = vrcp.f32 %v4859_v5  ;;  %v4505_v5 = vld [vmem:[#allocation4 + $0x68] sm:$0xff] }
 0xb33   : > { %4673 = vperm.xlu0 %6309, %v6346_v21   ;;  %v6380_v51 = vpop.eup %6379  ;;  %6399 = vrcp.f32 %v4862_v25 }
 0xb34   : > { %v6382_v2 = vpop.eup %6381  ;;  %6401 = vrcp.f32 %v4861_v52 }
 0xb35   : > { %v6384_v16 = vpop.eup %6383  ;;  %6403 = vrcp.f32 %v4864_v34  ;;  %v4507_v34 = vld [vmem:[#allocation4 + $0x78] sm:$0xff] }
 0xb36   : > { %4688 = vperm.xlu1 %6310, %v6348_v12   ;;  %v6386_v37 = vpop.eup %6385  ;;  %6405 = vrcp.f32 %v4863_v1 }
 0xb37   : > { %4683 = vperm.xlu0 %6309, %v6350_v22   ;;  %v6388_v50 = vpop.eup %6387  ;;  %6407 = vrcp.f32 %v5077_v39  ;;  %v4492_v22 = vld [vmem:[#allocation4] sm:$0xff] }
 0xb38   : > { %v6390_v41 = vpop.eup %6389  ;;  %6409 = vrcp.f32 %v5076_v59  ;;  %v4656_v59 = vld [vmem:[#allocation4 + $0x88] sm:$0xff] }
 0xb39   : > { %v6392_v63 = vpop.eup %6391  ;;  %6411 = vrcp.f32 %v5079_v55 }
 0xb3a   : > { %4698 = vperm.xlu1 %6310, %v6352_v3   ;;  %v6394_v36 = vpop.eup %6393  ;;  %6413 = vrcp.f32 %v5078_v15 }
 0xb3b   : > { %4693 = vperm.xlu0 %6309, %v6354_v42   ;;  %v6396_v17 = vpop.eup %6395  ;;  %6415 = vrcp.f32 %v5081_v24  ;;  %v4658_v24 = vld [vmem:[#allocation4 + $0x98] sm:$0xff] }
 0xb3c   : > { %v6398_v30 = vpop.eup %6397  ;;  %6417 = vrcp.f32 %v5080_v23 }
 0xb3d   : > { %v6400_v10 = vpop.eup %6399 }
 0xb3e   : > { %4708 = vperm.xlu1 %6310, %v6356_v45   ;;  %v6402_v35 = vpop.eup %6401  ;;  %v4493_v45 = vld [vmem:[#allocation4 + $0x8] sm:$0xff] }
 0xb3f   : > { %4703 = vperm.xlu0 %6309, %v6358_v40   ;;  %v6404_v20 = vpop.eup %6403 }
 0xb40   : > { %v6406_v14 = vpop.eup %6405 }
 0xb41   : > { %v6408_v13 = vpop.eup %6407 }
 0xb42   : > { %4718 = vperm.xlu1 %6310, %v6360_v56   ;;  %v6410_v11 = vpop.eup %6409 }
 0xb43   : > { %4713 = vperm.xlu0 %6309, %v6362_v54   ;;  %v6412_v32 = vpop.eup %6411  ;;  %v4496_v54 = vld [vmem:[#allocation4 + $0x20] sm:$0xff] }
 0xb44   : > { %v6414_v21 = vpop.eup %6413 }
 0xb45   : > { %v6416_v4 = vpop.eup %6415 }
 0xb46   : > { %4728 = vperm.xlu1 %6310, %v6364_v31   ;;  %v6418_v12 = vpop.eup %6417 }
 0xb47   : > { %4723 = vperm.xlu0 %6309, %v6366_v62  }
 0xb4a   : > { %4738 = vperm.xlu1 %6310, %v6368_v38   ;;  %v4498_v38 = vld [vmem:[#allocation4 + $0x30] sm:$0xff] }
 0xb4b   : > { %4733 = vperm.xlu0 %6309, %v6370_v53  }
 0xb4e   : > { %4748 = vperm.xlu1 %6310, %v6372_v26  }
 0xb4f   : > { %4743 = vperm.xlu0 %6309, %v6374_v47   ;;  %v4500_v47 = vld [vmem:[#allocation4 + $0x40] sm:$0xff] }
 0xb52   : > { %4905 = vperm.xlu1 %6310, %v6376_v49  }
 0xb53   : > { %4900 = vperm.xlu0 %6309, %v6378_v7  }
 0xb56   : > { %4915 = vperm.xlu1 %6310, %v6380_v51   ;;  %v4502_v51 = vld [vmem:[#allocation4 + $0x50] sm:$0xff] }
 0xb57   : > { %4910 = vperm.xlu0 %6309, %v6382_v2  }
 0xb5a   : > { %4925 = vperm.xlu1 %6310, %v6384_v16  }
 0xb5b   : > { %4920 = vperm.xlu0 %6309, %v6386_v37   ;;  %v4504_v37 = vld [vmem:[#allocation4 + $0x60] sm:$0xff] }
 0xb5e   : > { %4935 = vperm.xlu1 %6310, %v6388_v50  }
 0xb5f   : > { %4930 = vperm.xlu0 %6309, %v6390_v41  }
 0xb62   : > { %4945 = vperm.xlu1 %6310, %v6392_v63   ;;  %v4506_v63 = vld [vmem:[#allocation4 + $0x70] sm:$0xff] }
 0xb63   : > { %4940 = vperm.xlu0 %6309, %v6394_v36  }
 0xb66   : > { %4955 = vperm.xlu1 %6310, %v6396_v17  }
 0xb67   : > { %4950 = vperm.xlu0 %6309, %v6398_v30   ;;  %v4655_v30 = vld [vmem:[#allocation4 + $0x80] sm:$0xff] }
 0xb6a   : > { %4965 = vperm.xlu1 %6310, %v6400_v10  }
 0xb6b   : > { %4960 = vperm.xlu0 %6309, %v6402_v35  }
 0xb6e   : > { %4975 = vperm.xlu1 %6310, %v6404_v20   ;;  %v4657_v20 = vld [vmem:[#allocation4 + $0x90] sm:$0xff] }
 0xb6f   : > { %4970 = vperm.xlu0 %6309, %v6406_v14  }
 0xb72   : > { %5132 = vperm.xlu1 %6310, %v6408_v13  }
 0xb73   : > { %5127 = vperm.xlu0 %6309, %v6410_v11  }
 0xb76   : > { %5142 = vperm.xlu1 %6310, %v6412_v32   ;;  %v4660_v32 = vld [vmem:[#allocation4 + $0xa8] sm:$0xff] }
 0xb77   : > { %5137 = vperm.xlu0 %6309, %v6414_v21   ;;  %v4659_v21 = vld [vmem:[#allocation4 + $0xa0] sm:$0xff] }
 0xb7a   : > { %5152 = vperm.xlu1 %6310, %v6416_v4  }
 0xb7b   : > { %5147 = vperm.xlu0 %6309, %v6418_v12  }
 0xb91   : > { %v4521_v9 = vpop.permute.xlu1 %4520 }
 0xb92   : > { %v4590_v3 = vmul.f32 %v4521_v9, %v4494_v29  ;;  %v4511_v46 = vpop.permute.xlu0 %4510  ;;  %v4662_v9 = vld [vmem:[#allocation4 + $0xb8] sm:$0xff] }
 0xb93   : > { %v4588_v42 = vmul.f32 %v4511_v46, %v4492_v22 }
 0xb94   : > { %4607 = vst.msk [vmem:[%s6739_s6 + $0x10] sm:$0xff] %vm4604_vm2, %v4590_v3  ;;  %v4661_v3 = vld [vmem:[#allocation4 + $0xb0] sm:$0xff] }
 0xb95   : > { %4605 = vst.msk [vmem:[%s6739_s6] sm:$0xff] %vm4604_vm2, %v4588_v42  ;;  %v4526_v60 = vpop.permute.xlu1 %4525 }
 0xb96   : > { %v4591_v40 = vmul.f32 %v4526_v60, %v4495_v43  ;;  %v4516_v0 = vpop.permute.xlu0 %4515  ;;  %v4664_v60 = vld [vmem:[#allocation4 + $0xc8] sm:$0xff] }
 0xb97   : > { %v4589_v56 = vmul.f32 %v4516_v0, %v4493_v45 }
 0xb98   : > { %4608 = vst.msk [vmem:[%s6739_s6 + $0x18] sm:$0xff] %vm4604_vm2, %v4591_v40  ;;  %v4663_v40 = vld [vmem:[#allocation4 + $0xc0] sm:$0xff] }
 0xb99   : > { %4606 = vst.msk [vmem:[%s6739_s6 + $0x8] sm:$0xff] %vm4604_vm2, %v4589_v56  ;;  %v4536_v8 = vpop.permute.xlu1 %4535 }
 0xb9a   : > { %v4593_v31 = vmul.f32 %v4536_v8, %v4497_v18  ;;  %v4531_v6 = vpop.permute.xlu0 %4530  ;;  %v4666_v8 = vld [vmem:[#allocation4 + $0xd8] sm:$0xff] }
 0xb9b   : > { %v4592_v62 = vmul.f32 %v4531_v6, %v4496_v54 }
 0xb9c   : > { %4610 = vst.msk [vmem:[%s6739_s6 + $0x28] sm:$0xff] %vm4604_vm2, %v4593_v31  ;;  %v4665_v31 = vld [vmem:[#allocation4 + $0xd0] sm:$0xff] }
 0xb9d   : > { %4609 = vst.msk [vmem:[%s6739_s6 + $0x20] sm:$0xff] %vm4604_vm2, %v4592_v62  ;;  %v4546_v28 = vpop.permute.xlu1 %4545 }
 0xb9e   : > { %v4595_v53 = vmul.f32 %v4546_v28, %v4499_v19  ;;  %v4541_v48 = vpop.permute.xlu0 %4540  ;;  %v4668_v28 = vld [vmem:[#allocation4 + $0xe8] sm:$0xff] }
 0xb9f   : > { %v4594_v26 = vmul.f32 %v4541_v48, %v4498_v38  ;;  %v5083_v48 = vld [vmem:[#allocation3 + $0x1b8] sm:$0xff] }
 0xba0   : > { %4612 = vst.msk [vmem:[%s6739_s6 + $0x38] sm:$0xff] %vm4604_vm2, %v4595_v53  ;;  %v4667_v53 = vld [vmem:[#allocation4 + $0xe0] sm:$0xff]  ;;  %6419 = vrcp.f32 %v5083_v48  ;;  %v4893_v48 = vld [vmem:[#allocation4 + $0x158] sm:$0xff] }
 0xba1   : > { %4611 = vst.msk [vmem:[%s6739_s6 + $0x30] sm:$0xff] %vm4604_vm2, %v4594_v26  ;;  %v4556_v57 = vpop.permute.xlu1 %4555 }
 0xba2   : > { %v4597_v49 = vmul.f32 %v4556_v57, %v4501_v27  ;;  %v4551_v44 = vpop.permute.xlu0 %4550  ;;  %v5082_v27 = vld [vmem:[#allocation3 + $0x1b0] sm:$0xff] }
 0xba3   : > { %v4596_v7 = vmul.f32 %v4551_v44, %v4500_v47  ;;  %v4670_v44 = vld [vmem:[#allocation4 + $0xf8] sm:$0xff]  ;;  %6421 = vrcp.f32 %v5082_v27 }
 0xba4   : > { %4614 = vst.msk [vmem:[%s6739_s6 + $0x48] sm:$0xff] %vm4604_vm2, %v4597_v49 }
 0xba5   : > { %4613 = vst.msk [vmem:[%s6739_s6 + $0x40] sm:$0xff] %vm4604_vm2, %v4596_v7  ;;  %v4566_v33 = vpop.permute.xlu1 %4565  ;;  %v4669_v7 = vld [vmem:[#allocation4 + $0xf0] sm:$0xff] }
 0xba6   : > { %v4599_v2 = vmul.f32 %v4566_v33, %v4503_v58  ;;  %v4561_v61 = vpop.permute.xlu0 %4560  ;;  %v5085_v58 = vld [vmem:[#allocation3 + $0x1c8] sm:$0xff]  ;;  %v5084_v33 = vld [vmem:[#allocation3 + $0x1c0] sm:$0xff] }
 0xba7   : > { %v4598_v16 = vmul.f32 %v4561_v61, %v4502_v51  ;;  %6423 = vrcp.f32 %v5085_v58 }
 0xba8   : > { %4616 = vst.msk [vmem:[%s6739_s6 + $0x58] sm:$0xff] %vm4604_vm2, %v4599_v2  ;;  %6425 = vrcp.f32 %v5084_v33  ;;  %v4897_v33 = vld [vmem:[#allocation4 + $0x178] sm:$0xff] }
 0xba9   : > { %4615 = vst.msk [vmem:[%s6739_s6 + $0x50] sm:$0xff] %vm4604_vm2, %v4598_v16  ;;  %v4576_v25 = vpop.permute.xlu1 %4575 }
 0xbaa   : > { %v4601_v50 = vmul.f32 %v4576_v25, %v4505_v5  ;;  %v4571_v52 = vpop.permute.xlu0 %4570  ;;  %v4883_v5 = vld [vmem:[#allocation4 + $0x108] sm:$0xff]  ;;  %v5087_v25 = vld [vmem:[#allocation3 + $0x1d8] sm:$0xff] }
 0xbab   : > { %v4600_v41 = vmul.f32 %v4571_v52, %v4504_v37  ;;  %v4882_v37 = vld [vmem:[#allocation4 + $0x100] sm:$0xff]  ;;  %v5086_v52 = vld [vmem:[#allocation3 + $0x1d0] sm:$0xff]  ;;  %6427 = vrcp.f32 %v5087_v25  ;;  %v5110_v25 = vld [vmem:[#allocation4 + $0x188] sm:$0xff] }
 0xbac   : > { %4618 = vst.msk [vmem:[%s6739_s6 + $0x68] sm:$0xff] %vm4604_vm2, %v4601_v50  ;;  %6429 = vrcp.f32 %v5086_v52 }
 0xbad   : > { %4617 = vst.msk [vmem:[%s6739_s6 + $0x60] sm:$0xff] %vm4604_vm2, %v4600_v41  ;;  %v4586_v1 = vpop.permute.xlu1 %4585 }
 0xbae   : > { %v4603_v36 = vmul.f32 %v4586_v1, %v4507_v34  ;;  %v4581_v39 = vpop.permute.xlu0 %4580  ;;  %v5089_v1 = vld [vmem:[#allocation3 + $0x1e8] sm:$0xff] }
 0xbaf   : > { %v4602_v17 = vmul.f32 %v4581_v39, %v4506_v63  ;;  %6431 = vrcp.f32 %v5089_v1  ;;  %v5112_v1 = vld [vmem:[#allocation4 + $0x198] sm:$0xff] }
 0xbb0   : > { %4620 = vst.msk [vmem:[%s6739_s6 + $0x78] sm:$0xff] %vm4604_vm2, %v4603_v36  ;;  %v6420_v36 = vpop.eup %6419 }
 0xbb1   : > { %4619 = vst.msk [vmem:[%s6739_s6 + $0x70] sm:$0xff] %vm4604_vm2, %v4602_v17  ;;  %v4679_v55 = vpop.permute.xlu1 %4678  ;;  %v5088_v17 = vld [vmem:[#allocation3 + $0x1e0] sm:$0xff] }
 0xbb2   : > { %v4752_v10 = vmul.f32 %v4679_v55, %v4656_v59  ;;  %v4674_v15 = vpop.permute.xlu0 %4673  ;;  %v6422_v59 = vpop.eup %6421  ;;  %6433 = vrcp.f32 %v5088_v17  ;;  %v5091_v55 = vld [vmem:[#allocation3 + $0x1f8] sm:$0xff] }
 0xbb3   : > { %v4751_v35 = vmul.f32 %v4674_v15, %v4655_v30  ;;  %v5090_v15 = vld [vmem:[#allocation3 + $0x1f0] sm:$0xff]  ;;  %6435 = vrcp.f32 %v5091_v55  ;;  %v5113_v55 = vld [vmem:[#allocation4 + $0x1a0] sm:$0xff] }
 0xbb4   : > { %4785 = vrot.lane.b32.xlu1 %v4752_v10, %s6534_s0  ;;  %v6424_v10 = vpop.eup %6423  ;;  %6437 = vrcp.f32 %v5090_v15 }
 0xbb5   : > { %4783 = vrot.lane.b32.xlu0 %v4751_v35, %s6534_s0  ;;  %v4689_v23 = vpop.permute.xlu1 %4688  ;;  %v6426_v35 = vpop.eup %6425 }
 0xbb6   : > { %v4754_v14 = vmul.f32 %v4689_v23, %v4658_v24  ;;  %v4684_v13 = vpop.permute.xlu0 %4683  ;;  %v6428_v23 = vpop.eup %6427 }
 0xbb7   : > { %v4753_v11 = vmul.f32 %v4684_v13, %v4657_v20 }
 0xbb8   : > { %4789 = vrot.lane.b32.xlu1 %v4754_v14, %s6534_s0  ;;  %v6430_v14 = vpop.eup %6429 }
 0xbb9   : > { %4787 = vrot.lane.b32.xlu0 %v4753_v11, %s6534_s0  ;;  %v4699_v4 = vpop.permute.xlu1 %4698  ;;  %v6432_v13 = vpop.eup %6431 }
 0xbba   : > { %v4756_v12 = vmul.f32 %v4699_v4, %v4660_v32  ;;  %v4694_v29 = vpop.permute.xlu0 %4693 }
 0xbbb   : > { %v4755_v22 = vmul.f32 %v4694_v29, %v4659_v21  ;;  %v4885_v29 = vld [vmem:[#allocation4 + $0x118] sm:$0xff] }
 0xbbc   : > { %4793 = vrot.lane.b32.xlu1 %v4756_v12, %s6534_s0  ;;  %v6434_v32 = vpop.eup %6433 }
 0xbbd   : > { %4791 = vrot.lane.b32.xlu0 %v4755_v22, %s6534_s0  ;;  %v4709_v46 = vpop.permute.xlu1 %4708  ;;  %v6436_v4 = vpop.eup %6435 }
 0xbbe   : > { %v4758_v42 = vmul.f32 %v4709_v46, %v4662_v9  ;;  %v4704_v43 = vpop.permute.xlu0 %4703  ;;  %v6438_v12 = vpop.eup %6437  ;;  %v4884_v9 = vld [vmem:[#allocation4 + $0x110] sm:$0xff] }
 0xbbf   : > { %v4757_v45 = vmul.f32 %v4704_v43, %v4661_v3  ;;  %v4887_v43 = vld [vmem:[#allocation4 + $0x128] sm:$0xff] }
 0xbc0   : > { %4797 = vrot.lane.b32.xlu1 %v4758_v42, %s6534_s0 }
 0xbc1   : > { %4795 = vrot.lane.b32.xlu0 %v4757_v45, %s6534_s0  ;;  %v4719_v0 = vpop.permute.xlu1 %4718  ;;  %v4886_v45 = vld [vmem:[#allocation4 + $0x120] sm:$0xff] }
 0xbc2   : > { %v4760_v56 = vmul.f32 %v4719_v0, %v4664_v60  ;;  %v4714_v18 = vpop.permute.xlu0 %4713 }
 0xbc3   : > { %v4759_v54 = vmul.f32 %v4714_v18, %v4663_v40  ;;  %v4889_v18 = vld [vmem:[#allocation4 + $0x138] sm:$0xff] }
 0xbc4   : > { %4801 = vrot.lane.b32.xlu1 %v4760_v56, %s6534_s0 }
 0xbc5   : > { %4799 = vrot.lane.b32.xlu0 %v4759_v54, %s6534_s0  ;;  %v4729_v6 = vpop.permute.xlu1 %4728  ;;  %v4888_v54 = vld [vmem:[#allocation4 + $0x130] sm:$0xff] }
 0xbc6   : > { %v4762_v62 = vmul.f32 %v4729_v6, %v4666_v8  ;;  %v4724_v19 = vpop.permute.xlu0 %4723  ;;  %v4891_v6 = vld [vmem:[#allocation4 + $0x148] sm:$0xff] }
 0xbc7   : > { %v4761_v38 = vmul.f32 %v4724_v19, %v4665_v31  ;;  %v4890_v19 = vld [vmem:[#allocation4 + $0x140] sm:$0xff] }
 0xbc8   : > { %4805 = vrot.lane.b32.xlu1 %v4762_v62, %s6534_s0 }
 0xbc9   : > { %4803 = vrot.lane.b32.xlu0 %v4761_v38, %s6534_s0  ;;  %v4739_v26 = vpop.permute.xlu1 %4738 }
 0xbca   : > { %v4764_v47 = vmul.f32 %v4739_v26, %v4668_v28  ;;  %v4734_v57 = vpop.permute.xlu0 %4733  ;;  %v4892_v26 = vld [vmem:[#allocation4 + $0x150] sm:$0xff] }
 0xbcb   : > { %v4763_v49 = vmul.f32 %v4734_v57, %v4667_v53 }
 0xbcc   : > { %4809 = vrot.lane.b32.xlu1 %v4764_v47, %s6534_s0 }
 0xbcd   : > { %4807 = vrot.lane.b32.xlu0 %v4763_v49, %s6534_s0  ;;  %v4749_v51 = vpop.permute.xlu1 %4748 }
 0xbce   : > { %v4766_v2 = vmul.f32 %v4749_v51, %v4670_v44  ;;  %v4744_v61 = vpop.permute.xlu0 %4743  ;;  %v4895_v44 = vld [vmem:[#allocation4 + $0x168] sm:$0xff] }
 0xbcf   : > { %v4765_v16 = vmul.f32 %v4744_v61, %v4669_v7  ;;  %v4894_v7 = vld [vmem:[#allocation4 + $0x160] sm:$0xff]  ;;  %v4896_v61 = vld [vmem:[#allocation4 + $0x170] sm:$0xff] }
 0xbd0   : > { %4813 = vrot.lane.b32.xlu1 %v4766_v2, %s6534_s0 }
 0xbd1   : > { %4811 = vrot.lane.b32.xlu0 %v4765_v16, %s6534_s0  ;;  %v4906_v50 = vpop.permute.xlu1 %4905 }
 0xbd2   : > { %v4979_v41 = vmul.f32 %v4906_v50, %v4883_v5  ;;  %v4901_v34 = vpop.permute.xlu0 %4900  ;;  %v5109_v50 = vld [vmem:[#allocation4 + $0x180] sm:$0xff] }
 0xbd3   : > { %v4978_v63 = vmul.f32 %v4901_v34, %v4882_v37 }
 0xbd4   : > { %5012 = vrot.lane.b32.xlu1 %v4979_v41, %s6535_s16 }
 0xbd5   : > { %5010 = vrot.lane.b32.xlu0 %v4978_v63, %s6535_s16  ;;  %v4916_v39 = vpop.permute.xlu1 %4915 }
 0xbd6   : > { %v4911_v30 = vpop.permute.xlu0 %4910  ;;  %v4981_v46 = vmul.f32 %v4916_v39, %v4885_v29 }
 0xbd7   : > { %v4980_v42 = vmul.f32 %v4911_v30, %v4884_v9 }
 0xbd8   : > { %5162 = vperm.xlu1 %6310, %v6420_v36   ;;  %v5111_v36 = vld [vmem:[#allocation4 + $0x190] sm:$0xff] }
 0xbd9   : > { %5157 = vperm.xlu0 %6309, %v6422_v59   ;;  %v4926_v24 = vpop.permute.xlu1 %4925  ;;  %v5114_v59 = vld [vmem:[#allocation4 + $0x1a8] sm:$0xff] }
 0xbda   : > { %v4921_v20 = vpop.permute.xlu0 %4920  ;;  %v4983_v40 = vmul.f32 %v4926_v24, %v4887_v43 }
 0xbdb   : > { %v4982_v56 = vmul.f32 %v4921_v20, %v4886_v45 }
 0xbdc   : > { %5172 = vperm.xlu1 %6310, %v6424_v10  }
 0xbdd   : > { %5167 = vperm.xlu0 %6309, %v6426_v35   ;;  %v4936_v11 = vpop.permute.xlu1 %4935 }
 0xbde   : > { %v4931_v21 = vpop.permute.xlu0 %4930  ;;  %v4985_v8 = vmul.f32 %v4936_v11, %v4889_v18 }
 0xbdf   : > { %v4984_v31 = vmul.f32 %v4931_v21, %v4888_v54 }
 0xbe0   : > { %5182 = vperm.xlu1 %6310, %v6428_v23  }
 0xbe1   : > { %5177 = vperm.xlu0 %6309, %v6430_v14   ;;  %v4946_v22 = vpop.permute.xlu1 %4945 }
 0xbe2   : > { %v4941_v3 = vpop.permute.xlu0 %4940  ;;  %v4987_v28 = vmul.f32 %v4946_v22, %v4891_v6 }
 0xbe3   : > { %v4986_v53 = vmul.f32 %v4941_v3, %v4890_v19 }
 0xbe4   : > { %5192 = vperm.xlu1 %6310, %v6432_v13  }
 0xbe5   : > { %5187 = vperm.xlu0 %6309, %v6434_v32   ;;  %v4956_v60 = vpop.permute.xlu1 %4955 }
 0xbe6   : > { %v4951_v0 = vpop.permute.xlu0 %4950  ;;  %v4989_v47 = vmul.f32 %v4956_v60, %v4893_v48  ;;  %v5116_v60 = vld [vmem:[#allocation4 + $0x1b8] sm:$0xff] }
 0xbe7   : > { %v4988_v49 = vmul.f32 %v4951_v0, %v4892_v26 }
 0xbe8   : > { %5202 = vperm.xlu1 %6310, %v6436_v4  }
 0xbe9   : > { %5197 = vperm.xlu0 %6309, %v6438_v12   ;;  %v4966_v62 = vpop.permute.xlu1 %4965 }
 0xbea   : > { %v4961_v38 = vpop.permute.xlu0 %4960  ;;  %v4991_v58 = vmul.f32 %v4966_v62, %v4895_v44 }
 0xbeb   : > { %v4990_v51 = vmul.f32 %v4961_v38, %v4894_v7 }
 0xbec   : > { %5016 = vrot.lane.b32.xlu1 %v4981_v46, %s6535_s16 }
 0xbed   : > { %5014 = vrot.lane.b32.xlu0 %v4980_v42, %s6535_s16  ;;  %v4976_v27 = vpop.permute.xlu1 %4975 }
 0xbee   : > { %v4971_v57 = vpop.permute.xlu0 %4970  ;;  %v4993_v5 = vmul.f32 %v4976_v27, %v4897_v33  ;;  %v5124_v33 = vld [vmem:[#allocation4 + $0x1f8] sm:$0xff] }
 0xbef   : > { %v4992_v37 = vmul.f32 %v4971_v57, %v4896_v61  ;;  %v5122_v57 = vld [vmem:[#allocation4 + $0x1e8] sm:$0xff] }
 0xbf0   : > { %5020 = vrot.lane.b32.xlu1 %v4983_v40, %s6535_s16  ;;  %v5115_v40 = vld [vmem:[#allocation4 + $0x1b0] sm:$0xff] }
 0xbf1   : > { %5018 = vrot.lane.b32.xlu0 %v4982_v56, %s6535_s16  ;;  %v5133_v2 = vpop.permute.xlu1 %5132 }
 0xbf2   : > { %v5128_v16 = vpop.permute.xlu0 %5127  ;;  %v5206_v41 = vmul.f32 %v5133_v2, %v5110_v25  ;;  %v5123_v2 = vld [vmem:[#allocation4 + $0x1f0] sm:$0xff] }
 0xbf3   : > { %v5205_v63 = vmul.f32 %v5128_v16, %v5109_v50 }
 0xbf4   : > { %5024 = vrot.lane.b32.xlu1 %v4985_v8, %s6535_s16  ;;  %v5118_v8 = vld [vmem:[#allocation4 + $0x1c8] sm:$0xff] }
 0xbf5   : > { %5022 = vrot.lane.b32.xlu0 %v4984_v31, %s6535_s16  ;;  %v5143_v52 = vpop.permute.xlu1 %5142  ;;  %v5117_v31 = vld [vmem:[#allocation4 + $0x1c0] sm:$0xff] }
 0xbf6   : > { %v5138_v34 = vpop.permute.xlu0 %5137  ;;  %v5208_v39 = vmul.f32 %v5143_v52, %v5112_v1 }
 0xbf7   : > { %v5207_v17 = vmul.f32 %v5138_v34, %v5111_v36 }
 0xbf8   : > { %5028 = vrot.lane.b32.xlu1 %v4987_v28, %s6535_s16  ;;  %v5120_v28 = vld [vmem:[#allocation4 + $0x1d8] sm:$0xff] }
 0xbf9   : > { %5026 = vrot.lane.b32.xlu0 %v4986_v53, %s6535_s16  ;;  %v5153_v30 = vpop.permute.xlu1 %5152  ;;  %v5119_v53 = vld [vmem:[#allocation4 + $0x1d0] sm:$0xff] }
 0xbfa   : > { %v5148_v10 = vpop.permute.xlu0 %5147  ;;  %v5210_v15 = vmul.f32 %v5153_v30, %v5114_v59 }
 0xbfb   : > { %v5209_v35 = vmul.f32 %v5148_v10, %v5113_v55 }
 0xbfc   : > { %5032 = vrot.lane.b32.xlu1 %v4989_v47, %s6535_s16 }
 0xbfd   : > { %5030 = vrot.lane.b32.xlu0 %v4988_v49, %s6535_s16  ;;  %v5121_v49 = vld [vmem:[#allocation4 + $0x1e0] sm:$0xff] }
 0xc00   : > { %5036 = vrot.lane.b32.xlu1 %v4991_v58, %s6535_s16 }
 0xc01   : > { %5034 = vrot.lane.b32.xlu0 %v4990_v51, %s6535_s16 }
 0xc04   : > { %5040 = vrot.lane.b32.xlu1 %v4993_v5, %s6535_s16 }
 0xc05   : > { %5038 = vrot.lane.b32.xlu0 %v4992_v37, %s6535_s16 }
 0xc08   : > { %5239 = vrot.lane.b32.xlu1 %v5206_v41, %s6536_s17 }
 0xc09   : > { %5237 = vrot.lane.b32.xlu0 %v5205_v63, %s6536_s17 }
 0xc0c   : > { %5243 = vrot.lane.b32.xlu1 %v5208_v39, %s6536_s17 }
 0xc0d   : > { %5241 = vrot.lane.b32.xlu0 %v5207_v17, %s6536_s17 }
 0xc10   : > { %5247 = vrot.lane.b32.xlu1 %v5210_v15, %s6536_s17 }
 0xc11   : > { %5245 = vrot.lane.b32.xlu0 %v5209_v35, %s6536_s17 }
 0xc26   : > { %v4786_v24 = vpop.permute.xlu1 %4785 }
 0xc27   : > { %4833 = vst.msk [vmem:[%s6739_s6 + $0x8] sm:$0xff] %vm4831_vm7, %v4786_v24  ;;  %v4784_v20 = vpop.permute.xlu0 %4783 }
 0xc28   : > { %4832 = vst.msk [vmem:[%s6739_s6] sm:$0xff] %vm4831_vm7, %v4784_v20 }
 0xc2a   : > { %v4790_v23 = vpop.permute.xlu1 %4789 }
 0xc2b   : > { %4835 = vst.msk [vmem:[%s6739_s6 + $0x18] sm:$0xff] %vm4831_vm7, %v4790_v23  ;;  %v4788_v14 = vpop.permute.xlu0 %4787 }
 0xc2c   : > { %4834 = vst.msk [vmem:[%s6739_s6 + $0x10] sm:$0xff] %vm4831_vm7, %v4788_v14 }
 0xc2e   : > { %v4794_v13 = vpop.permute.xlu1 %4793 }
 0xc2f   : > { %4837 = vst.msk [vmem:[%s6739_s6 + $0x28] sm:$0xff] %vm4831_vm7, %v4794_v13  ;;  %v4792_v11 = vpop.permute.xlu0 %4791 }
 0xc30   : > { %4836 = vst.msk [vmem:[%s6739_s6 + $0x20] sm:$0xff] %vm4831_vm7, %v4792_v11 }
 0xc32   : > { %v4798_v32 = vpop.permute.xlu1 %4797 }
 0xc33   : > { %4839 = vst.msk [vmem:[%s6739_s6 + $0x38] sm:$0xff] %vm4831_vm7, %v4798_v32  ;;  %v4796_v21 = vpop.permute.xlu0 %4795 }
 0xc34   : > { %4838 = vst.msk [vmem:[%s6739_s6 + $0x30] sm:$0xff] %vm4831_vm7, %v4796_v21 }
 0xc36   : > { %v4802_v4 = vpop.permute.xlu1 %4801 }
 0xc37   : > { %4841 = vst.msk [vmem:[%s6739_s6 + $0x48] sm:$0xff] %vm4831_vm7, %v4802_v4  ;;  %v4800_v12 = vpop.permute.xlu0 %4799 }
 0xc38   : > { %4840 = vst.msk [vmem:[%s6739_s6 + $0x40] sm:$0xff] %vm4831_vm7, %v4800_v12 }
 0xc3a   : > { %v4806_v29 = vpop.permute.xlu1 %4805 }
 0xc3b   : > { %4843 = vst.msk [vmem:[%s6739_s6 + $0x58] sm:$0xff] %vm4831_vm7, %v4806_v29  ;;  %v4804_v22 = vpop.permute.xlu0 %4803 }
 0xc3c   : > { %4842 = vst.msk [vmem:[%s6739_s6 + $0x50] sm:$0xff] %vm4831_vm7, %v4804_v22 }
 0xc3e   : > { %v4810_v9 = vpop.permute.xlu1 %4809 }
 0xc3f   : > { %4845 = vst.msk [vmem:[%s6739_s6 + $0x68] sm:$0xff] %vm4831_vm7, %v4810_v9  ;;  %v4808_v3 = vpop.permute.xlu0 %4807 }
 0xc40   : > { %4844 = vst.msk [vmem:[%s6739_s6 + $0x60] sm:$0xff] %vm4831_vm7, %v4808_v3 }
 0xc42   : > { %v4814_v46 = vpop.permute.xlu1 %4813 }
 0xc43   : > { %4847 = vst.msk [vmem:[%s6739_s6 + $0x78] sm:$0xff] %vm4831_vm7, %v4814_v46  ;;  %v4812_v42 = vpop.permute.xlu0 %4811 }
 0xc44   : > { %4846 = vst.msk [vmem:[%s6739_s6 + $0x70] sm:$0xff] %vm4831_vm7, %v4812_v42 }
 0xc46   : > { %v5013_v43 = vpop.permute.xlu1 %5012 }
 0xc47   : > { %5060 = vst.msk [vmem:[%s6739_s6 + $0x8] sm:$0xff] %vm5058_vm8, %v5013_v43  ;;  %v5011_v45 = vpop.permute.xlu0 %5010 }
 0xc48   : > { %5059 = vst.msk [vmem:[%s6739_s6] sm:$0xff] %vm5058_vm8, %v5011_v45 }
 0xc57   : > { %v5163_v0 = vpop.permute.xlu1 %5162 }
 0xc58   : > { %v5212_v56 = vmul.f32 %v5163_v0, %v5116_v60  ;;  %v5158_v18 = vpop.permute.xlu0 %5157 }
 0xc59   : > { %v5211_v54 = vmul.f32 %v5158_v18, %v5115_v40 }
 0xc5a   : > { %5251 = vrot.lane.b32.xlu1 %v5212_v56, %s6536_s17 }
 0xc5b   : > { %5249 = vrot.lane.b32.xlu0 %v5211_v54, %s6536_s17  ;;  %v5173_v6 = vpop.permute.xlu1 %5172 }
 0xc5c   : > { %v5214_v62 = vmul.f32 %v5173_v6, %v5118_v8  ;;  %v5168_v19 = vpop.permute.xlu0 %5167 }
 0xc5d   : > { %v5213_v38 = vmul.f32 %v5168_v19, %v5117_v31 }
 0xc5e   : > { %5255 = vrot.lane.b32.xlu1 %v5214_v62, %s6536_s17 }
 0xc5f   : > { %5253 = vrot.lane.b32.xlu0 %v5213_v38, %s6536_s17  ;;  %v5183_v48 = vpop.permute.xlu1 %5182 }
 0xc60   : > { %v5216_v26 = vmul.f32 %v5183_v48, %v5120_v28  ;;  %v5178_v27 = vpop.permute.xlu0 %5177 }
 0xc61   : > { %v5215_v47 = vmul.f32 %v5178_v27, %v5119_v53 }
 0xc62   : > { %5259 = vrot.lane.b32.xlu1 %v5216_v26, %s6536_s17 }
 0xc63   : > { %5257 = vrot.lane.b32.xlu0 %v5215_v47, %s6536_s17  ;;  %v5193_v44 = vpop.permute.xlu1 %5192 }
 0xc64   : > { %v5218_v7 = vmul.f32 %v5193_v44, %v5122_v57  ;;  %v5188_v58 = vpop.permute.xlu0 %5187 }
 0xc65   : > { %v5217_v51 = vmul.f32 %v5188_v58, %v5121_v49 }
 0xc66   : > { %5263 = vrot.lane.b32.xlu1 %v5218_v7, %s6536_s17 }
 0xc67   : > { %5261 = vrot.lane.b32.xlu0 %v5217_v51, %s6536_s17  ;;  %v5203_v61 = vpop.permute.xlu1 %5202 }
 0xc68   : > { %v5220_v16 = vmul.f32 %v5203_v61, %v5124_v33  ;;  %v5198_v5 = vpop.permute.xlu0 %5197 }
 0xc69   : > { %v5219_v37 = vmul.f32 %v5198_v5, %v5123_v2 }
 0xc6a   : > { %5267 = vrot.lane.b32.xlu1 %v5220_v16, %s6536_s17 }
 0xc6b   : > { %5265 = vrot.lane.b32.xlu0 %v5219_v37, %s6536_s17  ;;  %v5017_v25 = vpop.permute.xlu1 %5016 }
 0xc6c   : > { %5062 = vst.msk [vmem:[%s6739_s6 + $0x18] sm:$0xff] %vm5058_vm8, %v5017_v25  ;;  %v5015_v50 = vpop.permute.xlu0 %5014 }
 0xc6d   : > { %5061 = vst.msk [vmem:[%s6739_s6 + $0x10] sm:$0xff] %vm5058_vm8, %v5015_v50 }
 0xc6f   : > { %v5021_v52 = vpop.permute.xlu1 %5020 }
 0xc70   : > { %5064 = vst.msk [vmem:[%s6739_s6 + $0x28] sm:$0xff] %vm5058_vm8, %v5021_v52  ;;  %v5019_v41 = vpop.permute.xlu0 %5018 }
 0xc71   : > { %5063 = vst.msk [vmem:[%s6739_s6 + $0x20] sm:$0xff] %vm5058_vm8, %v5019_v41 }
 0xc73   : > { %v5025_v34 = vpop.permute.xlu1 %5024 }
 0xc74   : > { %5066 = vst.msk [vmem:[%s6739_s6 + $0x38] sm:$0xff] %vm5058_vm8, %v5025_v34  ;;  %v5023_v63 = vpop.permute.xlu0 %5022 }
 0xc75   : > { %5065 = vst.msk [vmem:[%s6739_s6 + $0x30] sm:$0xff] %vm5058_vm8, %v5023_v63 }
 0xc77   : > { %v5029_v1 = vpop.permute.xlu1 %5028 }
 0xc78   : > { %5068 = vst.msk [vmem:[%s6739_s6 + $0x48] sm:$0xff] %vm5058_vm8, %v5029_v1  ;;  %v5027_v36 = vpop.permute.xlu0 %5026 }
 0xc79   : > { %5067 = vst.msk [vmem:[%s6739_s6 + $0x40] sm:$0xff] %vm5058_vm8, %v5027_v36 }
 0xc7b   : > { %v5033_v39 = vpop.permute.xlu1 %5032 }
 0xc7c   : > { %5070 = vst.msk [vmem:[%s6739_s6 + $0x58] sm:$0xff] %vm5058_vm8, %v5033_v39  ;;  %v5031_v17 = vpop.permute.xlu0 %5030 }
 0xc7d   : > { %5069 = vst.msk [vmem:[%s6739_s6 + $0x50] sm:$0xff] %vm5058_vm8, %v5031_v17 }
 0xc7f   : > { %v5037_v59 = vpop.permute.xlu1 %5036 }
 0xc80   : > { %5072 = vst.msk [vmem:[%s6739_s6 + $0x68] sm:$0xff] %vm5058_vm8, %v5037_v59  ;;  %v5035_v30 = vpop.permute.xlu0 %5034 }
 0xc81   : > { %5071 = vst.msk [vmem:[%s6739_s6 + $0x60] sm:$0xff] %vm5058_vm8, %v5035_v30 }
 0xc83   : > { %v5041_v55 = vpop.permute.xlu1 %5040 }
 0xc84   : > { %5074 = vst.msk [vmem:[%s6739_s6 + $0x78] sm:$0xff] %vm5058_vm8, %v5041_v55  ;;  %v5039_v10 = vpop.permute.xlu0 %5038 }
 0xc85   : > { %5073 = vst.msk [vmem:[%s6739_s6 + $0x70] sm:$0xff] %vm5058_vm8, %v5039_v10 }
 0xc87   : > { %v5240_v15 = vpop.permute.xlu1 %5239 }
 0xc88   : > { %5287 = vst.msk [vmem:[%s6739_s6 + $0x8] sm:$0xff] %vm5285_vm9, %v5240_v15  ;;  %v5238_v35 = vpop.permute.xlu0 %5237 }
 0xc89   : > { %5286 = vst.msk [vmem:[%s6739_s6] sm:$0xff] %vm5285_vm9, %v5238_v35 }
 0xc8b   : > { %v5244_v24 = vpop.permute.xlu1 %5243 }
 0xc8c   : > { %5289 = vst.msk [vmem:[%s6739_s6 + $0x18] sm:$0xff] %vm5285_vm9, %v5244_v24  ;;  %v5242_v20 = vpop.permute.xlu0 %5241 }
 0xc8d   : > { %5288 = vst.msk [vmem:[%s6739_s6 + $0x10] sm:$0xff] %vm5285_vm9, %v5242_v20 }
 0xc8f   : > { %v5248_v23 = vpop.permute.xlu1 %5247 }
 0xc90   : > { %5291 = vst.msk [vmem:[%s6739_s6 + $0x28] sm:$0xff] %vm5285_vm9, %v5248_v23  ;;  %v5246_v14 = vpop.permute.xlu0 %5245 }
 0xc91   : > { %5290 = vst.msk [vmem:[%s6739_s6 + $0x20] sm:$0xff] %vm5285_vm9, %v5246_v14 }
 0xccc   : > { %v5252_v13 = vpop.permute.xlu1 %5251 }
 0xccd   : > { %5293 = vst.msk [vmem:[%s6739_s6 + $0x38] sm:$0xff] %vm5285_vm9, %v5252_v13  ;;  %v5250_v11 = vpop.permute.xlu0 %5249 }
 0xcce   : > { %5292 = vst.msk [vmem:[%s6739_s6 + $0x30] sm:$0xff] %vm5285_vm9, %v5250_v11 }
 0xcd0   : > { %v5256_v32 = vpop.permute.xlu1 %5255 }
 0xcd1   : > { %5295 = vst.msk [vmem:[%s6739_s6 + $0x48] sm:$0xff] %vm5285_vm9, %v5256_v32  ;;  %v5254_v21 = vpop.permute.xlu0 %5253 }
 0xcd2   : > { %5294 = vst.msk [vmem:[%s6739_s6 + $0x40] sm:$0xff] %vm5285_vm9, %v5254_v21 }
 0xcd4   : > { %v5260_v4 = vpop.permute.xlu1 %5259 }
 0xcd5   : > { %5297 = vst.msk [vmem:[%s6739_s6 + $0x58] sm:$0xff] %vm5285_vm9, %v5260_v4  ;;  %v5258_v12 = vpop.permute.xlu0 %5257 }
 0xcd6   : > { %5296 = vst.msk [vmem:[%s6739_s6 + $0x50] sm:$0xff] %vm5285_vm9, %v5258_v12 }
 0xcd8   : > { %v5264_v29 = vpop.permute.xlu1 %5263 }
 0xcd9   : > { %5299 = vst.msk [vmem:[%s6739_s6 + $0x68] sm:$0xff] %vm5285_vm9, %v5264_v29  ;;  %v5262_v22 = vpop.permute.xlu0 %5261 }
 0xcda   : > { %5298 = vst.msk [vmem:[%s6739_s6 + $0x60] sm:$0xff] %vm5285_vm9, %v5262_v22 }
 0xcdc   : > { %v5268_v9 = vpop.permute.xlu1 %5267 }
 0xcdd   : > { %5301 = vst.msk [vmem:[%s6739_s6 + $0x78] sm:$0xff] %vm5285_vm9, %v5268_v9  ;;  %v5266_v3 = vpop.permute.xlu0 %5265 }
 0xcde   : > { %5300 = vst.msk [vmem:[%s6739_s6 + $0x70] sm:$0xff] %vm5285_vm9, %v5266_v3 }
 0xcdf PF: > { %s13_s22 = sadd.s32 1, %s6525_s22   ;;  %s10540_s25 = sld [smem:[#allocation8_spill]] }
 0xce0   : > { %p10_p5 = scmp.ge.s32.totalorder %s13_s22, 10   ;;  %s10541_s12 = smov %s6489_s13 }
 0xce1   : > { %s10542_s13 = smov %s6648_s9  ;;  %s10543_s14 = smov %s6497_s15 }
 0xce2   : > { %s10544_s15 = smov %s6645_s8  ;;  %s10545_s16 = smov %s6513_s19 }
 0xce3   : > { %s10546_s17 = smov %s6517_s20  ;;  %s10547_s18 = smov %s6521_s21 }
 0xce4   : > { %s10548_s19 = smov %s10552_s23  ;;  %s10549_s20 = smov %s10556_s24 }
 0xce5   : > { %s10550_s21 = smov %s10540_s25  ;;  %12 = sbr.rel (!%p10_p5) target bundleno = 8 (0x8), region = 224 }

</bundles_post_ra>
